<compile_context>
chip_gen: v7x
topology: tpu7x:2x2x1
jax: 0.10.0
libtpu: 0.0.40
codegen_flags: <defaults>
</compile_context>

<pallas_src>
import jax
import jax.numpy as jnp
from jax import lax
from jax.experimental import pallas as pl
from jax.experimental.pallas import tpu as pltpu

EPS = 1e-5
LANE = 128


def _resblock_kernel(x_ref, w1_ref, w2_ref, sb_ref, out_ref,
                     xpad_ref, h1pad_ref, slab_ref):
    """One (batch, row-tile) grid step.

    x_ref    : (H, W, Cp)          f32  full NHWC image of this batch element
    w1_ref   : (9*Cp, Cp)          bf16 im2col conv1 weight (row block k = tap k)
    w2_ref   : (9*Cp, Cp)          bf16 im2col conv2 weight
    sb_ref   : (8, Cp)             f32  rows: [scale1, bias1, scale2, bias2, 0...]
    out_ref  : (TH, W, Cp)         f32  output row tile
    xpad_ref : (H+4, W+2, Cp)      bf16 scratch: zero-bordered input copy
    h1pad_ref: (TH+2, W+2, Cp)     bf16 scratch: col-padded conv1 activation tile
    slab_ref : ((TH+2)*W, 9*Cp)    bf16 scratch: im2col slab (reused by conv2)
    """
    r = pl.program_id(1)
    nr = pl.num_programs(1)
    H, W, Cp = x_ref.shape
    TH = out_ref.shape[0]
    row0 = r * TH
    if TH % 8 == 0:
        row0 = pl.multiple_of(row0, 8)

    # ---- per-image init: zero ONLY the halo border; copy the image once (bf16) ----
    @pl.when(r == 0)
    def _init():
        zr = jnp.zeros((2, W + 2, Cp), xpad_ref.dtype)
        xpad_ref[0:2, :, :] = zr                       # top 2 halo rows
        xpad_ref[H + 2:H + 4, :, :] = zr               # bottom 2 halo rows
        zc = jnp.zeros((H + 4, 1, Cp), xpad_ref.dtype)
        xpad_ref[:, 0:1, :] = zc                       # left halo column
        xpad_ref[:, W + 1:W + 2, :] = zc               # right halo column
        xpad_ref[2:H + 2, 1:W + 1, :] = x_ref[...].astype(xpad_ref.dtype)
        zh = jnp.zeros((TH + 2, 1, Cp), h1pad_ref.dtype)
        h1pad_ref[:, 0:1, :] = zh                      # border cols stay 0 forever
        h1pad_ref[:, W + 1:W + 2, :] = zh

    def fill_slab(src_ref, base, rows):
        # im2col: one lane-aligned 128-wide column store per (ky, kx) tap into
        # the preallocated bf16 slab (single materialization, no concat).
        for k in range(9):
            ky, kx = divmod(k, 3)
            tap = src_ref[pl.ds(base + ky, rows), pl.ds(kx, W), :]
            slab_ref[0:rows * W, k * Cp:(k + 1) * Cp] = tap.reshape(rows * W, Cp)

    # ---- conv1 over TH+2 rows (1-row halo recomputed per tile) + BN1 + ReLU ----
    fill_slab(xpad_ref, row0, TH + 2)
    acc1 = jnp.dot(slab_ref[...], w1_ref[...], preferred_element_type=jnp.float32)
    h1 = jnp.maximum(acc1 * sb_ref[0:1, :] + sb_ref[1:2, :], 0.0)
    h1pad_ref[:, 1:W + 1, :] = h1.reshape(TH + 2, W, Cp).astype(h1pad_ref.dtype)

    # Halo rows outside the image must be conv2's zero padding, not BN(ReLU(.)).
    @pl.when(r == 0)
    def _zero_top():
        h1pad_ref[0:1, :, :] = jnp.zeros((1, W + 2, Cp), h1pad_ref.dtype)

    @pl.when(r == nr - 1)
    def _zero_bot():
        h1pad_ref[TH + 1:TH + 2, :, :] = jnp.zeros((1, W + 2, Cp),
                                                   h1pad_ref.dtype)

    # ---- conv2 over the TH output rows + BN2 + residual (f32) + ReLU ----
    fill_slab(h1pad_ref, 0, TH)
    acc2 = jnp.dot(slab_ref[0:TH * W, :], w2_ref[...],
                   preferred_element_type=jnp.float32)
    residual = x_ref[pl.ds(row0, TH), :, :].reshape(TH * W, Cp)
    y = jnp.maximum(acc2 * sb_ref[2:3, :] + sb_ref[3:4, :] + residual, 0.0)
    out_ref[...] = y.reshape(TH, W, Cp).astype(out_ref.dtype)


def _fold_bn(gamma, beta, mean, var, conv_bias):
    scale = gamma * lax.rsqrt(var + EPS)
    bias = beta + (conv_bias - mean) * scale
    return scale, bias


def _pad_lane(v, cp):
    return jnp.pad(v, (0, cp - v.shape[0]))


def _prep_w(w_oihw, cp):
    c = w_oihw.shape[0]
    w = jnp.transpose(w_oihw, (2, 3, 1, 0))                     # (3,3,Cin,Cout)
    w = jnp.pad(w, ((0, 0), (0, 0), (0, cp - c), (0, cp - c)))
    return w.reshape(9 * cp, cp).astype(jnp.bfloat16)           # (9*Cp, Cp)


def _pick_row_tile(H, W):
    """Smallest divisor of H with M = TH*W >= 256 (capped at 64 rows)."""
    divs = [d for d in range(1, H + 1) if H % d == 0]
    good = [d for d in divs if d * W >= 256 and d <= 64]
    if good:
        return min(good)
    small = [d for d in divs if d <= 64]
    return max(small) if small else H


def _pick_vmem_limit():
    """~100 MiB on 128-MiB VMEM parts (v5e/v6e), 48 MiB on 64-MiB parts (v7x)."""
    try:
        cap = int(pltpu.get_tpu_info().vmem_capacity_bytes)
    except Exception:
        cap = 64 * 1024 * 1024
    return (100 * 1024 * 1024) if cap >= 128 * 1024 * 1024 else (48 * 1024 * 1024)


@jax.jit
def resblock_forward(x_nchw, w1_oihw, cb1, g1, be1, m1, v1,
                     w2_oihw, cb2, g2, be2, m2, v2):
    """x_nchw: (N, C, H, W) float32 — PyTorch layout in, PyTorch layout out."""
    N, C, H, W = x_nchw.shape
    Cp = ((C + LANE - 1) // LANE) * LANE          # lane-dense channel padding
    TH = _pick_row_tile(H, W)                     # row tile (halo recompute)
    R = H // TH

    s1, b1 = _fold_bn(g1, be1, m1, v1, cb1)
    s2, b2 = _fold_bn(g2, be2, m2, v2, cb2)
    sb = jnp.zeros((8, Cp), jnp.float32)
    sb = sb.at[0, :].set(_pad_lane(s1, Cp)).at[1, :].set(_pad_lane(b1, Cp))
    sb = sb.at[2, :].set(_pad_lane(s2, Cp)).at[3, :].set(_pad_lane(b2, Cp))

    w1 = _prep_w(w1_oihw, Cp)
    w2 = _prep_w(w2_oihw, Cp)

    # NCHW -> NHWC with channels padded to a multiple of 128 (no spatial pad).
    x_nhwc = jnp.transpose(x_nchw, (0, 2, 3, 1))
    x_nhwc = jnp.pad(x_nhwc, ((0, 0), (0, 0), (0, 0), (0, Cp - C)))

    out_nhwc = pl.pallas_call(
        _resblock_kernel,
        out_shape=jax.ShapeDtypeStruct((N, H, W, Cp), x_nchw.dtype),
        grid=(N, R),
        in_specs=[
            pl.BlockSpec((None, H, W, Cp), lambda n, r: (n, 0, 0, 0)),
            pl.BlockSpec((9 * Cp, Cp), lambda n, r: (0, 0)),
            pl.BlockSpec((9 * Cp, Cp), lambda n, r: (0, 0)),
            pl.BlockSpec((8, Cp), lambda n, r: (0, 0)),
        ],
        out_specs=pl.BlockSpec((None, TH, W, Cp), lambda n, r: (n, r, 0, 0)),
        scratch_shapes=[
            pltpu.VMEM((H + 4, W + 2, Cp), jnp.bfloat16),
            pltpu.VMEM((TH + 2, W + 2, Cp), jnp.bfloat16),
            pltpu.VMEM(((TH + 2) * W, 9 * Cp), jnp.bfloat16),
        ],
        compiler_params=pltpu.CompilerParams(
            dimension_semantics=("parallel", "arbitrary"),
            vmem_limit_bytes=_pick_vmem_limit()),
    )(x_nhwc, w1, w2, sb)

    return jnp.transpose(out_nhwc[..., :C], (0, 3, 1, 2))       # NHWC -> NCHW


# ----------------------- pure-JAX reference (for sanity) -----------------------
def _bn_eval(h, gamma, beta, mean, var):
    return (gamma[None, :, None, None] * (h - mean[None, :, None, None])
            / jnp.sqrt(var[None, :, None, None] + EPS)
            + beta[None, :, None, None])


def ref_forward(x, w1, cb1, g1, be1, m1, v1, w2, cb2, g2, be2, m2, v2):
    dn = ('NCHW', 'OIHW', 'NCHW')
    h = lax.conv_general_dilated(x, w1, (1, 1), 'SAME', dimension_numbers=dn)
    h = h + cb1[None, :, None, None]
    h = jax.nn.relu(_bn_eval(h, g1, be1, m1, v1))
    h = lax.conv_general_dilated(h, w2, (1, 1), 'SAME', dimension_numbers=dn)
    h = h + cb2[None, :, None, None]
    h = _bn_eval(h, g2, be2, m2, v2) + x
    return jax.nn.relu(h)


if __name__ == "__main__":
    N, C, H, W = 2, 4, 16, 16
    key = jax.random.PRNGKey(0)
    keys = jax.random.split(key, 13)

    x = jax.random.normal(keys[0], (N, C, H, W), jnp.float32)

    # conv weights in PyTorch OIHW layout, conv biases
    w1_oihw = 0.1 * jax.random.normal(keys[1], (C, C, 3, 3), jnp.float32)
    cb1 = 0.1 * jax.random.normal(keys[2], (C,), jnp.float32)
    w2_oihw = 0.1 * jax.random.normal(keys[3], (C, C, 3, 3), jnp.float32)
    cb2 = 0.1 * jax.random.normal(keys[4], (C,), jnp.float32)

    # BatchNorm params (eval-mode / running statistics)
    g1 = 1.0 + 0.1 * jax.random.normal(keys[5], (C,), jnp.float32)
    be1 = 0.1 * jax.random.normal(keys[6], (C,), jnp.float32)
    m1 = 0.1 * jax.random.normal(keys[7], (C,), jnp.float32)
    v1 = 0.5 + 0.5 * jnp.abs(jax.random.normal(keys[8], (C,), jnp.float32))
    g2 = 1.0 + 0.1 * jax.random.normal(keys[9], (C,), jnp.float32)
    be2 = 0.1 * jax.random.normal(keys[10], (C,), jnp.float32)
    m2 = 0.1 * jax.random.normal(keys[11], (C,), jnp.float32)
    v2 = 0.5 + 0.5 * jnp.abs(jax.random.normal(keys[12], (C,), jnp.float32))

    out = resblock_forward(x, w1_oihw, cb1, g1, be1, m1, v1,
                           w2_oihw, cb2, g2, be2, m2, v2)
    out = jax.block_until_ready(out)

    ref = ref_forward(x, w1_oihw, cb1, g1, be1, m1, v1,
                      w2_oihw, cb2, g2, be2, m2, v2)
    ref = jax.block_until_ready(ref)

    assert out.shape == (N, C, H, W)
    # bf16 MXU inputs (f32 accumulation) -> slightly looser tolerance vs f32 ref.
    max_err = float(jnp.max(jnp.abs(out - ref)))
    assert jnp.allclose(out, ref, atol=5e-2, rtol=5e-2), max_err
    print("KERNEL_OK")
</pallas_src>

<mosaic_0001>
module attributes {stable_mosaic.version = 11 : i64} {
  func.func @_resblock_kernel(%arg0: i32, %arg1: i32, %arg2: memref<1x16x16x128xf32, #tpu.memory_space<vmem>>, %arg3: memref<1152x128xbf16, #tpu.memory_space<vmem>>, %arg4: memref<1152x128xbf16, #tpu.memory_space<vmem>>, %arg5: memref<8x128xf32, #tpu.memory_space<vmem>>, %arg6: memref<1x16x16x128xf32, #tpu.memory_space<vmem>>, %arg7: memref<20x18x128xbf16, #tpu.memory_space<vmem>>, %arg8: memref<18x18x128xbf16, #tpu.memory_space<vmem>>, %arg9: memref<288x1152xbf16, #tpu.memory_space<vmem>>) attributes {dimension_semantics = [#tpu.dimension_semantics<parallel>, #tpu.dimension_semantics<arbitrary>], iteration_bounds = array<i64: 2, 1>, scalar_prefetch = 0 : i64, scratch_operands = 3 : i64, tpu.core_type = #tpu.core_type<tc>, window_params = [{transform_indices = @transform_0, window_bounds = array<i64: 1, 16, 16, 128>}, {pipeline_mode = #tpu.pipeline_mode<synchronous>, transform_indices = @transform_1, window_bounds = array<i64: 1152, 128>}, {pipeline_mode = #tpu.pipeline_mode<synchronous>, transform_indices = @transform_2, window_bounds = array<i64: 1152, 128>}, {pipeline_mode = #tpu.pipeline_mode<synchronous>, transform_indices = @transform_3, window_bounds = array<i64: 8, 128>}, {transform_indices = @transform_4, window_bounds = array<i64: 1, 16, 16, 128>}]} {
    %c16_i32 = arith.constant 16 : i32
    %0 = arith.muli %arg1, %c16_i32 : i32
    %1 = tpu.assume_multiple %0, 8 : i32
    %c0_i32 = arith.constant 0 : i32
    %2 = arith.cmpi eq, %arg1, %c0_i32 : i32
    %3 = arith.extui %2 : i1 to i32
    %c0_i32_0 = arith.constant 0 : i32
    %4 = arith.cmpi ne, %3, %c0_i32_0 : i32
    scf.if %4 {
      %cst_110 = arith.constant 0.000000e+00 : bf16
      %117 = vector.broadcast %cst_110 : bf16 to vector<2x18x128xbf16>
      %c0_111 = arith.constant 0 : index
      %c0_112 = arith.constant 0 : index
      %c0_113 = arith.constant 0 : index
      %118 = vector.load %arg7[%c0_111, %c0_112, %c0_113] : memref<20x18x128xbf16, #tpu.memory_space<vmem>>, vector<2x18x128xbf16>
      tpu.vector_store %arg7[%c0_111, %c0_112, %c0_113], %117 {strides = array<i32>} : memref<20x18x128xbf16, #tpu.memory_space<vmem>>, vector<2x18x128xbf16>,
      %c18 = arith.constant 18 : index
      %c0_114 = arith.constant 0 : index
      %c0_115 = arith.constant 0 : index
      %119 = vector.load %arg7[%c18, %c0_114, %c0_115] : memref<20x18x128xbf16, #tpu.memory_space<vmem>>, vector<2x18x128xbf16>
      tpu.vector_store %arg7[%c18, %c0_114, %c0_115], %117 {strides = array<i32>} : memref<20x18x128xbf16, #tpu.memory_space<vmem>>, vector<2x18x128xbf16>,
      %cst_116 = arith.constant 0.000000e+00 : bf16
      %120 = vector.broadcast %cst_116 : bf16 to vector<20x1x128xbf16>
      %c0_117 = arith.constant 0 : index
      %c0_118 = arith.constant 0 : index
      %c0_119 = arith.constant 0 : index
      %121 = vector.load %arg7[%c0_117, %c0_118, %c0_119] : memref<20x18x128xbf16, #tpu.memory_space<vmem>>, vector<20x1x128xbf16>
      tpu.vector_store %arg7[%c0_117, %c0_118, %c0_119], %120 {strides = array<i32>} : memref<20x18x128xbf16, #tpu.memory_space<vmem>>, vector<20x1x128xbf16>,
      %c0_120 = arith.constant 0 : index
      %c17 = arith.constant 17 : index
      %c0_121 = arith.constant 0 : index
      %122 = vector.load %arg7[%c0_120, %c17, %c0_121] : memref<20x18x128xbf16, #tpu.memory_space<vmem>>, vector<20x1x128xbf16>
      tpu.vector_store %arg7[%c0_120, %c17, %c0_121], %120 {strides = array<i32>} : memref<20x18x128xbf16, #tpu.memory_space<vmem>>, vector<20x1x128xbf16>,
      %c0_122 = arith.constant 0 : index
      %c0_123 = arith.constant 0 : index
      %c0_124 = arith.constant 0 : index
      %c0_125 = arith.constant 0 : index
      %123 = vector.load %arg2[%c0_122, %c0_123, %c0_124, %c0_125] : memref<1x16x16x128xf32, #tpu.memory_space<vmem>>, vector<1x16x16x128xf32>
      %124 = vector.shape_cast %123 : vector<1x16x16x128xf32> to vector<16x16x128xf32>
      %125 = arith.truncf %124 : vector<16x16x128xf32> to vector<16x16x128xbf16>
      %c2_126 = arith.constant 2 : index
      %c1_127 = arith.constant 1 : index
      %c0_128 = arith.constant 0 : index
      %126 = vector.load %arg7[%c2_126, %c1_127, %c0_128] : memref<20x18x128xbf16, #tpu.memory_space<vmem>>, vector<16x16x128xbf16>
      tpu.vector_store %arg7[%c2_126, %c1_127, %c0_128], %125 {strides = array<i32>} : memref<20x18x128xbf16, #tpu.memory_space<vmem>>, vector<16x16x128xbf16>,
      %cst_129 = arith.constant 0.000000e+00 : bf16
      %127 = vector.broadcast %cst_129 : bf16 to vector<18x1x128xbf16>
      %c0_130 = arith.constant 0 : index
      %c0_131 = arith.constant 0 : index
      %c0_132 = arith.constant 0 : index
      %128 = vector.load %arg8[%c0_130, %c0_131, %c0_132] : memref<18x18x128xbf16, #tpu.memory_space<vmem>>, vector<18x1x128xbf16>
      tpu.vector_store %arg8[%c0_130, %c0_131, %c0_132], %127 {strides = array<i32>} : memref<18x18x128xbf16, #tpu.memory_space<vmem>>, vector<18x1x128xbf16>,
      %c0_133 = arith.constant 0 : index
      %c17_134 = arith.constant 17 : index
      %c0_135 = arith.constant 0 : index
      %129 = vector.load %arg8[%c0_133, %c17_134, %c0_135] : memref<18x18x128xbf16, #tpu.memory_space<vmem>>, vector<18x1x128xbf16>
      tpu.vector_store %arg8[%c0_133, %c17_134, %c0_135], %127 {strides = array<i32>} : memref<18x18x128xbf16, #tpu.memory_space<vmem>>, vector<18x1x128xbf16>,
    } else {
    }
    %c0_i32_1 = arith.constant 0 : i32
    %5 = arith.addi %1, %c0_i32_1 : i32
    %6 = arith.index_cast %5 : i32 to index
    %c0 = arith.constant 0 : index
    %c0_2 = arith.constant 0 : index
    %7 = vector.load %arg7[%6, %c0, %c0_2] : memref<20x18x128xbf16, #tpu.memory_space<vmem>>, vector<18x16x128xbf16>
    %8 = vector.shape_cast %7 : vector<18x16x128xbf16> to vector<288x128xbf16>
    %c0_3 = arith.constant 0 : index
    %c0_4 = arith.constant 0 : index
    %9 = vector.load %arg9[%c0_3, %c0_4] : memref<288x1152xbf16, #tpu.memory_space<vmem>>, vector<288x128xbf16>
    tpu.vector_store %arg9[%c0_3, %c0_4], %8 {strides = array<i32>} : memref<288x1152xbf16, #tpu.memory_space<vmem>>, vector<288x128xbf16>,
    %c0_i32_5 = arith.constant 0 : i32
    %10 = arith.addi %1, %c0_i32_5 : i32
    %11 = arith.index_cast %10 : i32 to index
    %c1 = arith.constant 1 : index
    %c0_6 = arith.constant 0 : index
    %12 = vector.load %arg7[%11, %c1, %c0_6] : memref<20x18x128xbf16, #tpu.memory_space<vmem>>, vector<18x16x128xbf16>
    %13 = vector.shape_cast %12 : vector<18x16x128xbf16> to vector<288x128xbf16>
    %c0_7 = arith.constant 0 : index
    %c128 = arith.constant 128 : index
    %14 = vector.load %arg9[%c0_7, %c128] : memref<288x1152xbf16, #tpu.memory_space<vmem>>, vector<288x128xbf16>
    tpu.vector_store %arg9[%c0_7, %c128], %13 {strides = array<i32>} : memref<288x1152xbf16, #tpu.memory_space<vmem>>, vector<288x128xbf16>,
    %c0_i32_8 = arith.constant 0 : i32
    %15 = arith.addi %1, %c0_i32_8 : i32
    %16 = arith.index_cast %15 : i32 to index
    %c2 = arith.constant 2 : index
    %c0_9 = arith.constant 0 : index
    %17 = vector.load %arg7[%16, %c2, %c0_9] : memref<20x18x128xbf16, #tpu.memory_space<vmem>>, vector<18x16x128xbf16>
    %18 = vector.shape_cast %17 : vector<18x16x128xbf16> to vector<288x128xbf16>
    %c0_10 = arith.constant 0 : index
    %c256 = arith.constant 256 : index
    %19 = vector.load %arg9[%c0_10, %c256] : memref<288x1152xbf16, #tpu.memory_space<vmem>>, vector<288x128xbf16>
    tpu.vector_store %arg9[%c0_10, %c256], %18 {strides = array<i32>} : memref<288x1152xbf16, #tpu.memory_space<vmem>>, vector<288x128xbf16>,
    %c1_i32 = arith.constant 1 : i32
    %20 = arith.addi %1, %c1_i32 : i32
    %21 = arith.index_cast %20 : i32 to index
    %c0_11 = arith.constant 0 : index
    %c0_12 = arith.constant 0 : index
    %22 = vector.load %arg7[%21, %c0_11, %c0_12] : memref<20x18x128xbf16, #tpu.memory_space<vmem>>, vector<18x16x128xbf16>
    %23 = vector.shape_cast %22 : vector<18x16x128xbf16> to vector<288x128xbf16>
    %c0_13 = arith.constant 0 : index
    %c384 = arith.constant 384 : index
    %24 = vector.load %arg9[%c0_13, %c384] : memref<288x1152xbf16, #tpu.memory_space<vmem>>, vector<288x128xbf16>
    tpu.vector_store %arg9[%c0_13, %c384], %23 {strides = array<i32>} : memref<288x1152xbf16, #tpu.memory_space<vmem>>, vector<288x128xbf16>,
    %c1_i32_14 = arith.constant 1 : i32
    %25 = arith.addi %1, %c1_i32_14 : i32
    %26 = arith.index_cast %25 : i32 to index
    %c1_15 = arith.constant 1 : index
    %c0_16 = arith.constant 0 : index
    %27 = vector.load %arg7[%26, %c1_15, %c0_16] : memref<20x18x128xbf16, #tpu.memory_space<vmem>>, vector<18x16x128xbf16>
    %28 = vector.shape_cast %27 : vector<18x16x128xbf16> to vector<288x128xbf16>
    %c0_17 = arith.constant 0 : index
    %c512 = arith.constant 512 : index
    %29 = vector.load %arg9[%c0_17, %c512] : memref<288x1152xbf16, #tpu.memory_space<vmem>>, vector<288x128xbf16>
    tpu.vector_store %arg9[%c0_17, %c512], %28 {strides = array<i32>} : memref<288x1152xbf16, #tpu.memory_space<vmem>>, vector<288x128xbf16>,
    %c1_i32_18 = arith.constant 1 : i32
    %30 = arith.addi %1, %c1_i32_18 : i32
    %31 = arith.index_cast %30 : i32 to index
    %c2_19 = arith.constant 2 : index
    %c0_20 = arith.constant 0 : index
    %32 = vector.load %arg7[%31, %c2_19, %c0_20] : memref<20x18x128xbf16, #tpu.memory_space<vmem>>, vector<18x16x128xbf16>
    %33 = vector.shape_cast %32 : vector<18x16x128xbf16> to vector<288x128xbf16>
    %c0_21 = arith.constant 0 : index
    %c640 = arith.constant 640 : index
    %34 = vector.load %arg9[%c0_21, %c640] : memref<288x1152xbf16, #tpu.memory_space<vmem>>, vector<288x128xbf16>
    tpu.vector_store %arg9[%c0_21, %c640], %33 {strides = array<i32>} : memref<288x1152xbf16, #tpu.memory_space<vmem>>, vector<288x128xbf16>,
    %c2_i32 = arith.constant 2 : i32
    %35 = arith.addi %1, %c2_i32 : i32
    %36 = arith.index_cast %35 : i32 to index
    %c0_22 = arith.constant 0 : index
    %c0_23 = arith.constant 0 : index
    %37 = vector.load %arg7[%36, %c0_22, %c0_23] : memref<20x18x128xbf16, #tpu.memory_space<vmem>>, vector<18x16x128xbf16>
    %38 = vector.shape_cast %37 : vector<18x16x128xbf16> to vector<288x128xbf16>
    %c0_24 = arith.constant 0 : index
    %c768 = arith.constant 768 : index
    %39 = vector.load %arg9[%c0_24, %c768] : memref<288x1152xbf16, #tpu.memory_space<vmem>>, vector<288x128xbf16>
    tpu.vector_store %arg9[%c0_24, %c768], %38 {strides = array<i32>} : memref<288x1152xbf16, #tpu.memory_space<vmem>>, vector<288x128xbf16>,
    %c2_i32_25 = arith.constant 2 : i32
    %40 = arith.addi %1, %c2_i32_25 : i32
    %41 = arith.index_cast %40 : i32 to index
    %c1_26 = arith.constant 1 : index
    %c0_27 = arith.constant 0 : index
    %42 = vector.load %arg7[%41, %c1_26, %c0_27] : memref<20x18x128xbf16, #tpu.memory_space<vmem>>, vector<18x16x128xbf16>
    %43 = vector.shape_cast %42 : vector<18x16x128xbf16> to vector<288x128xbf16>
    %c0_28 = arith.constant 0 : index
    %c896 = arith.constant 896 : index
    %44 = vector.load %arg9[%c0_28, %c896] : memref<288x1152xbf16, #tpu.memory_space<vmem>>, vector<288x128xbf16>
    tpu.vector_store %arg9[%c0_28, %c896], %43 {strides = array<i32>} : memref<288x1152xbf16, #tpu.memory_space<vmem>>, vector<288x128xbf16>,
    %c2_i32_29 = arith.constant 2 : i32
    %45 = arith.addi %1, %c2_i32_29 : i32
    %46 = arith.index_cast %45 : i32 to index
    %c2_30 = arith.constant 2 : index
    %c0_31 = arith.constant 0 : index
    %47 = vector.load %arg7[%46, %c2_30, %c0_31] : memref<20x18x128xbf16, #tpu.memory_space<vmem>>, vector<18x16x128xbf16>
    %48 = vector.shape_cast %47 : vector<18x16x128xbf16> to vector<288x128xbf16>
    %c0_32 = arith.constant 0 : index
    %c1024 = arith.constant 1024 : index
    %49 = vector.load %arg9[%c0_32, %c1024] : memref<288x1152xbf16, #tpu.memory_space<vmem>>, vector<288x128xbf16>
    tpu.vector_store %arg9[%c0_32, %c1024], %48 {strides = array<i32>} : memref<288x1152xbf16, #tpu.memory_space<vmem>>, vector<288x128xbf16>,
    %c0_33 = arith.constant 0 : index
    %c0_34 = arith.constant 0 : index
    %50 = vector.load %arg9[%c0_33, %c0_34] : memref<288x1152xbf16, #tpu.memory_space<vmem>>, vector<288x1152xbf16>
    %c0_35 = arith.constant 0 : index
    %c0_36 = arith.constant 0 : index
    %51 = vector.load %arg3[%c0_35, %c0_36] : memref<1152x128xbf16, #tpu.memory_space<vmem>>, vector<1152x128xbf16>
    %cst = arith.constant dense<0.000000e+00> : vector<288x128xf32>
    %52 = tpu.matmul %50, %51, %cst {dimension_numbers = #tpu.dot_dimension_numbers<[1], [0], [0], [1], [0, 0, 1, 1], [], []>} : vector<288x1152xbf16>, vector<1152x128xbf16>, vector<288x128xf32> -> vector<288x128xf32>
    %c0_37 = arith.constant 0 : index
    %c0_38 = arith.constant 0 : index
    %53 = vector.load %arg5[%c0_37, %c0_38] : memref<8x128xf32, #tpu.memory_space<vmem>>, vector<1x128xf32>
    %54 = vector.broadcast %53 : vector<1x128xf32> to vector<288x128xf32>
    %55 = arith.mulf %52, %54 : vector<288x128xf32>
    %c1_39 = arith.constant 1 : index
    %c0_40 = arith.constant 0 : index
    %56 = vector.load %arg5[%c1_39, %c0_40] : memref<8x128xf32, #tpu.memory_space<vmem>>, vector<1x128xf32>
    %57 = vector.broadcast %56 : vector<1x128xf32> to vector<288x128xf32>
    %58 = arith.addf %55, %57 : vector<288x128xf32>
    %cst_41 = arith.constant 0.000000e+00 : f32
    %59 = vector.broadcast %cst_41 : f32 to vector<288x128xf32>
    %60 = arith.maximumf %58, %59 : vector<288x128xf32>
    %61 = vector.shape_cast %60 : vector<288x128xf32> to vector<18x16x128xf32>
    %62 = arith.truncf %61 : vector<18x16x128xf32> to vector<18x16x128xbf16>
    %c0_42 = arith.constant 0 : index
    %c1_43 = arith.constant 1 : index
    %c0_44 = arith.constant 0 : index
    %63 = vector.load %arg8[%c0_42, %c1_43, %c0_44] : memref<18x18x128xbf16, #tpu.memory_space<vmem>>, vector<18x16x128xbf16>
    tpu.vector_store %arg8[%c0_42, %c1_43, %c0_44], %62 {strides = array<i32>} : memref<18x18x128xbf16, #tpu.memory_space<vmem>>, vector<18x16x128xbf16>,
    %c0_i32_45 = arith.constant 0 : i32
    %64 = arith.cmpi eq, %arg1, %c0_i32_45 : i32
    %65 = arith.extui %64 : i1 to i32
    %c0_i32_46 = arith.constant 0 : i32
    %66 = arith.cmpi ne, %65, %c0_i32_46 : i32
    scf.if %66 {
      %cst_110 = arith.constant 0.000000e+00 : bf16
      %117 = vector.broadcast %cst_110 : bf16 to vector<1x18x128xbf16>
      %c0_111 = arith.constant 0 : index
      %c0_112 = arith.constant 0 : index
      %c0_113 = arith.constant 0 : index
      %118 = vector.load %arg8[%c0_111, %c0_112, %c0_113] : memref<18x18x128xbf16, #tpu.memory_space<vmem>>, vector<1x18x128xbf16>
      tpu.vector_store %arg8[%c0_111, %c0_112, %c0_113], %117 {strides = array<i32>} : memref<18x18x128xbf16, #tpu.memory_space<vmem>>, vector<1x18x128xbf16>,
    } else {
    }
    %c0_i32_47 = arith.constant 0 : i32
    %67 = arith.cmpi eq, %arg1, %c0_i32_47 : i32
    %68 = arith.extui %67 : i1 to i32
    %c0_i32_48 = arith.constant 0 : i32
    %69 = arith.cmpi ne, %68, %c0_i32_48 : i32
    scf.if %69 {
      %cst_110 = arith.constant 0.000000e+00 : bf16
      %117 = vector.broadcast %cst_110 : bf16 to vector<1x18x128xbf16>
      %c17 = arith.constant 17 : index
      %c0_111 = arith.constant 0 : index
      %c0_112 = arith.constant 0 : index
      %118 = vector.load %arg8[%c17, %c0_111, %c0_112] : memref<18x18x128xbf16, #tpu.memory_space<vmem>>, vector<1x18x128xbf16>
      tpu.vector_store %arg8[%c17, %c0_111, %c0_112], %117 {strides = array<i32>} : memref<18x18x128xbf16, #tpu.memory_space<vmem>>, vector<1x18x128xbf16>,
    } else {
    }
    %c0_49 = arith.constant 0 : index
    %c0_50 = arith.constant 0 : index
    %c0_51 = arith.constant 0 : index
    %70 = vector.load %arg8[%c0_49, %c0_50, %c0_51] : memref<18x18x128xbf16, #tpu.memory_space<vmem>>, vector<16x16x128xbf16>
    %71 = vector.shape_cast %70 : vector<16x16x128xbf16> to vector<256x128xbf16>
    %c0_52 = arith.constant 0 : index
    %c0_53 = arith.constant 0 : index
    %72 = vector.load %arg9[%c0_52, %c0_53] : memref<288x1152xbf16, #tpu.memory_space<vmem>>, vector<256x128xbf16>
    tpu.vector_store %arg9[%c0_52, %c0_53], %71 {strides = array<i32>} : memref<288x1152xbf16, #tpu.memory_space<vmem>>, vector<256x128xbf16>,
    %c0_54 = arith.constant 0 : index
    %c1_55 = arith.constant 1 : index
    %c0_56 = arith.constant 0 : index
    %73 = vector.load %arg8[%c0_54, %c1_55, %c0_56] : memref<18x18x128xbf16, #tpu.memory_space<vmem>>, vector<16x16x128xbf16>
    %74 = vector.shape_cast %73 : vector<16x16x128xbf16> to vector<256x128xbf16>
    %c0_57 = arith.constant 0 : index
    %c128_58 = arith.constant 128 : index
    %75 = vector.load %arg9[%c0_57, %c128_58] : memref<288x1152xbf16, #tpu.memory_space<vmem>>, vector<256x128xbf16>
    tpu.vector_store %arg9[%c0_57, %c128_58], %74 {strides = array<i32>} : memref<288x1152xbf16, #tpu.memory_space<vmem>>, vector<256x128xbf16>,
    %c0_59 = arith.constant 0 : index
    %c2_60 = arith.constant 2 : index
    %c0_61 = arith.constant 0 : index
    %76 = vector.load %arg8[%c0_59, %c2_60, %c0_61] : memref<18x18x128xbf16, #tpu.memory_space<vmem>>, vector<16x16x128xbf16>
    %77 = vector.shape_cast %76 : vector<16x16x128xbf16> to vector<256x128xbf16>
    %c0_62 = arith.constant 0 : index
    %c256_63 = arith.constant 256 : index
    %78 = vector.load %arg9[%c0_62, %c256_63] : memref<288x1152xbf16, #tpu.memory_space<vmem>>, vector<256x128xbf16>
    tpu.vector_store %arg9[%c0_62, %c256_63], %77 {strides = array<i32>} : memref<288x1152xbf16, #tpu.memory_space<vmem>>, vector<256x128xbf16>,
    %c1_64 = arith.constant 1 : index
    %c0_65 = arith.constant 0 : index
    %c0_66 = arith.constant 0 : index
    %79 = vector.load %arg8[%c1_64, %c0_65, %c0_66] : memref<18x18x128xbf16, #tpu.memory_space<vmem>>, vector<16x16x128xbf16>
    %80 = vector.shape_cast %79 : vector<16x16x128xbf16> to vector<256x128xbf16>
    %c0_67 = arith.constant 0 : index
    %c384_68 = arith.constant 384 : index
    %81 = vector.load %arg9[%c0_67, %c384_68] : memref<288x1152xbf16, #tpu.memory_space<vmem>>, vector<256x128xbf16>
    tpu.vector_store %arg9[%c0_67, %c384_68], %80 {strides = array<i32>} : memref<288x1152xbf16, #tpu.memory_space<vmem>>, vector<256x128xbf16>,
    %c1_69 = arith.constant 1 : index
    %c1_70 = arith.constant 1 : index
    %c0_71 = arith.constant 0 : index
    %82 = vector.load %arg8[%c1_69, %c1_70, %c0_71] : memref<18x18x128xbf16, #tpu.memory_space<vmem>>, vector<16x16x128xbf16>
    %83 = vector.shape_cast %82 : vector<16x16x128xbf16> to vector<256x128xbf16>
    %c0_72 = arith.constant 0 : index
    %c512_73 = arith.constant 512 : index
    %84 = vector.load %arg9[%c0_72, %c512_73] : memref<288x1152xbf16, #tpu.memory_space<vmem>>, vector<256x128xbf16>
    tpu.vector_store %arg9[%c0_72, %c512_73], %83 {strides = array<i32>} : memref<288x1152xbf16, #tpu.memory_space<vmem>>, vector<256x128xbf16>,
    %c1_74 = arith.constant 1 : index
    %c2_75 = arith.constant 2 : index
    %c0_76 = arith.constant 0 : index
    %85 = vector.load %arg8[%c1_74, %c2_75, %c0_76] : memref<18x18x128xbf16, #tpu.memory_space<vmem>>, vector<16x16x128xbf16>
    %86 = vector.shape_cast %85 : vector<16x16x128xbf16> to vector<256x128xbf16>
    %c0_77 = arith.constant 0 : index
    %c640_78 = arith.constant 640 : index
    %87 = vector.load %arg9[%c0_77, %c640_78] : memref<288x1152xbf16, #tpu.memory_space<vmem>>, vector<256x128xbf16>
    tpu.vector_store %arg9[%c0_77, %c640_78], %86 {strides = array<i32>} : memref<288x1152xbf16, #tpu.memory_space<vmem>>, vector<256x128xbf16>,
    %c2_79 = arith.constant 2 : index
    %c0_80 = arith.constant 0 : index
    %c0_81 = arith.constant 0 : index
    %88 = vector.load %arg8[%c2_79, %c0_80, %c0_81] : memref<18x18x128xbf16, #tpu.memory_space<vmem>>, vector<16x16x128xbf16>
    %89 = vector.shape_cast %88 : vector<16x16x128xbf16> to vector<256x128xbf16>
    %c0_82 = arith.constant 0 : index
    %c768_83 = arith.constant 768 : index
    %90 = vector.load %arg9[%c0_82, %c768_83] : memref<288x1152xbf16, #tpu.memory_space<vmem>>, vector<256x128xbf16>
    tpu.vector_store %arg9[%c0_82, %c768_83], %89 {strides = array<i32>} : memref<288x1152xbf16, #tpu.memory_space<vmem>>, vector<256x128xbf16>,
    %c2_84 = arith.constant 2 : index
    %c1_85 = arith.constant 1 : index
    %c0_86 = arith.constant 0 : index
    %91 = vector.load %arg8[%c2_84, %c1_85, %c0_86] : memref<18x18x128xbf16, #tpu.memory_space<vmem>>, vector<16x16x128xbf16>
    %92 = vector.shape_cast %91 : vector<16x16x128xbf16> to vector<256x128xbf16>
    %c0_87 = arith.constant 0 : index
    %c896_88 = arith.constant 896 : index
    %93 = vector.load %arg9[%c0_87, %c896_88] : memref<288x1152xbf16, #tpu.memory_space<vmem>>, vector<256x128xbf16>
    tpu.vector_store %arg9[%c0_87, %c896_88], %92 {strides = array<i32>} : memref<288x1152xbf16, #tpu.memory_space<vmem>>, vector<256x128xbf16>,
    %c2_89 = arith.constant 2 : index
    %c2_90 = arith.constant 2 : index
    %c0_91 = arith.constant 0 : index
    %94 = vector.load %arg8[%c2_89, %c2_90, %c0_91] : memref<18x18x128xbf16, #tpu.memory_space<vmem>>, vector<16x16x128xbf16>
    %95 = vector.shape_cast %94 : vector<16x16x128xbf16> to vector<256x128xbf16>
    %c0_92 = arith.constant 0 : index
    %c1024_93 = arith.constant 1024 : index
    %96 = vector.load %arg9[%c0_92, %c1024_93] : memref<288x1152xbf16, #tpu.memory_space<vmem>>, vector<256x128xbf16>
    tpu.vector_store %arg9[%c0_92, %c1024_93], %95 {strides = array<i32>} : memref<288x1152xbf16, #tpu.memory_space<vmem>>, vector<256x128xbf16>,
    %c0_94 = arith.constant 0 : index
    %c0_95 = arith.constant 0 : index
    %97 = vector.load %arg9[%c0_94, %c0_95] : memref<288x1152xbf16, #tpu.memory_space<vmem>>, vector<256x1152xbf16>
    %c0_96 = arith.constant 0 : index
    %c0_97 = arith.constant 0 : index
    %98 = vector.load %arg4[%c0_96, %c0_97] : memref<1152x128xbf16, #tpu.memory_space<vmem>>, vector<1152x128xbf16>
    %cst_98 = arith.constant dense<0.000000e+00> : vector<256x128xf32>
    %99 = tpu.matmul %97, %98, %cst_98 {dimension_numbers = #tpu.dot_dimension_numbers<[1], [0], [0], [1], [0, 0, 1, 1], [], []>} : vector<256x1152xbf16>, vector<1152x128xbf16>, vector<256x128xf32> -> vector<256x128xf32>
    %c0_99 = arith.constant 0 : index
    %100 = arith.index_cast %1 : i32 to index
    %c0_100 = arith.constant 0 : index
    %c0_101 = arith.constant 0 : index
    %101 = vector.load %arg2[%c0_99, %100, %c0_100, %c0_101] : memref<1x16x16x128xf32, #tpu.memory_space<vmem>>, vector<1x16x16x128xf32>
    %102 = vector.shape_cast %101 : vector<1x16x16x128xf32> to vector<16x16x128xf32>
    %103 = vector.shape_cast %102 : vector<16x16x128xf32> to vector<256x128xf32>
    %c2_102 = arith.constant 2 : index
    %c0_103 = arith.constant 0 : index
    %104 = vector.load %arg5[%c2_102, %c0_103] : memref<8x128xf32, #tpu.memory_space<vmem>>, vector<1x128xf32>
    %105 = vector.broadcast %104 : vector<1x128xf32> to vector<256x128xf32>
    %106 = arith.mulf %99, %105 : vector<256x128xf32>
    %c3 = arith.constant 3 : index
    %c0_104 = arith.constant 0 : index
    %107 = vector.load %arg5[%c3, %c0_104] : memref<8x128xf32, #tpu.memory_space<vmem>>, vector<1x128xf32>
    %108 = vector.broadcast %107 : vector<1x128xf32> to vector<256x128xf32>
    %109 = arith.addf %106, %108 : vector<256x128xf32>
    %110 = arith.addf %109, %103 : vector<256x128xf32>
    %cst_105 = arith.constant 0.000000e+00 : f32
    %111 = vector.broadcast %cst_105 : f32 to vector<256x128xf32>
    %112 = arith.maximumf %110, %111 : vector<256x128xf32>
    %113 = vector.shape_cast %112 : vector<256x128xf32> to vector<16x16x128xf32>
    %c0_106 = arith.constant 0 : index
    %c0_107 = arith.constant 0 : index
    %c0_108 = arith.constant 0 : index
    %c0_109 = arith.constant 0 : index
    %114 = vector.load %arg6[%c0_106, %c0_107, %c0_108, %c0_109] : memref<1x16x16x128xf32, #tpu.memory_space<vmem>>, vector<1x16x16x128xf32>
    %115 = vector.shape_cast %114 : vector<1x16x16x128xf32> to vector<16x16x128xf32>
    %116 = vector.shape_cast %113 : vector<16x16x128xf32> to vector<1x16x16x128xf32>
    tpu.vector_store %arg6[%c0_106, %c0_107, %c0_108, %c0_109], %116 {strides = array<i32>} : memref<1x16x16x128xf32, #tpu.memory_space<vmem>>, vector<1x16x16x128xf32>,
    return
  }
  func.func @transform_0(%arg0: i32, %arg1: i32) -> (i32, i32, i32, i32) {
    %c0_i32 = arith.constant 0 : i32
    %c0_i32_0 = arith.constant 0 : i32
    %c0_i32_1 = arith.constant 0 : i32
    %c0_i32_2 = arith.constant 0 : i32
    return %arg0, %c0_i32, %c0_i32_0, %c0_i32_1 : i32, i32, i32, i32
  }
  func.func @transform_1(%arg0: i32, %arg1: i32) -> (i32, i32) {
    %c0_i32 = arith.constant 0 : i32
    %c0_i32_0 = arith.constant 0 : i32
    %c0_i32_1 = arith.constant 0 : i32
    return %c0_i32, %c0_i32_0 : i32, i32
  }
  func.func @transform_2(%arg0: i32, %arg1: i32) -> (i32, i32) {
    %c0_i32 = arith.constant 0 : i32
    %c0_i32_0 = arith.constant 0 : i32
    %c0_i32_1 = arith.constant 0 : i32
    return %c0_i32, %c0_i32_0 : i32, i32
  }
  func.func @transform_3(%arg0: i32, %arg1: i32) -> (i32, i32) {
    %c0_i32 = arith.constant 0 : i32
    %c0_i32_0 = arith.constant 0 : i32
    %c0_i32_1 = arith.constant 0 : i32
    return %c0_i32, %c0_i32_0 : i32, i32
  }
  func.func @transform_4(%arg0: i32, %arg1: i32) -> (i32, i32, i32, i32) {
    %c0_i32 = arith.constant 0 : i32
    %c0_i32_0 = arith.constant 0 : i32
    %c0_i32_1 = arith.constant 0 : i32
    return %arg0, %arg1, %c0_i32, %c0_i32_0 : i32, i32, i32, i32
  }
}

</mosaic_0001>

<bundles_post_ra>
// kernel: resblock_forward.1
= control target key start
LH: loop header
LB: loop body
LE: loop exit
PB: predicated region body
PF: predicated region fallthrough
CT: control target
= control target key end

     0   :  { %s13412_s15 = smov 0   ;;  %s13414_s16 = smov 0   ;;  %s16964_s0 = inlined_call_operand.vmem [shape: f32[2,16,16,128], index: 0, kind: input, shape index: {}]   ;;  %s16965_s1 = inlined_call_operand.vmem [shape: bf16[1152,128], index: 1, kind: input, shape index: {}]   ;;  %s16966_s2 = inlined_call_operand.vmem [shape: bf16[1152,128], index: 2, kind: input, shape index: {}]   ;;  %s16967_s3 = inlined_call_operand.vmem [shape: f32[8,128], index: 3, kind: input, shape index: {}]   ;;  %s16968_s4 = inlined_call_operand.vmem [shape: f32[2,16,16,128], index: 4, kind: output, shape index: {}]  }
   0x1   :  { %s13416_s17 = smov 0  }
   0x2 LB: > { %s26_s18 = sadd.s32 1, %s13380_s16  ;;  %p11262_p0 = scmp.ge.s32.totalorder %s13384_s17, 1  ;;  %s13384_s17 = sphi %s13416_s17, %s14_s17   ;;  %s13380_s16 = sphi %s13414_s16, %s17009_s16   ;;  %s13376_s15 = sphi %s13412_s15, %s17008_s15  }
   0x3   : > { %p28_p1 = scmp.ge.s32.totalorder %s26_s18, 2  ;;  %p176_p2 = scmp.lt.s32.totalorder %s13384_s17, 3 }
   0x5   : > { %s17011_s18 = smov (%p28_p1, %s26_s18), 0  ;;  %p177_p3 = pnand %p11262_p0, %p176_p2 }
   0x7   : > { %180 = sbr.rel (%p177_p3) target bundleno = 1705 (0x6a9), region = 36 }
   0xe   : > { %v13106_v0 = vld [vmem:[%s16965_s1] sm:$0xff]   ;;  %v13386_v1 = vmov 0   ;;  %v13107_v2 = vld [vmem:[%s16965_s1 + $0x8] sm:$0xff]   ;;  %v13108_v3 = vld [vmem:[%s16965_s1 + $0x10] sm:$0xff]   ;;  %p207_p4 = scmp.lt.s32.totalorder %s13376_s15, 1  ;;  %vm242_vm0 = vcmask 1040384  }
   0xf   : > { %4981 = vmatprep.subr.bf16.mxu0 %v13386_v1  ;;  %229 = vst [vmem:[#allocation2] sm:$0xf] %v13386_v1  ;;  %230 = vst [vmem:[#allocation2 + $0x4] sm:$0xf] %v13386_v1  ;;  %v13109_v4 = vld [vmem:[%s16965_s1 + $0x18] sm:$0xff]   ;;  %v13110_v5 = vld [vmem:[%s16965_s1 + $0x20] sm:$0xff]  }
  0x10   : > { %231 = vst [vmem:[#allocation2 + $0x8] sm:$0x1] %v13386_v1  ;;  %232 = vst [vmem:[#allocation2 + $0xc] sm:$0xf] %v13386_v1  ;;  %4982 = vmatpush1.bf16.msra.mxu0 %v13106_v0  ;;  %s17013_s15 = smov (!%p207_p4, %s13376_s15), 1  ;;  %v13111_v10 = vld [vmem:[%s16965_s1 + $0x28] sm:$0xff]  }
  0x11   : > { %233 = vst [vmem:[#allocation2 + $0x10] sm:$0xf] %v13386_v1  ;;  %234 = vst [vmem:[#allocation2 + $0x14] sm:$0x1] %v13386_v1  ;;  %4983 = vmatprep.subr.bf16.mxu0 %v13386_v1  ;;  %s12181_s29 = sshll.u32 %s17013_s15, 8  ;;  %v13112_v19 = vld [vmem:[%s16965_s1 + $0x30] sm:$0xff]  }
  0x12   : > { %236 = vst [vmem:[#allocation2 + $0xd8] sm:$0xf] %v13386_v1  ;;  %237 = vst [vmem:[#allocation2 + $0xdc] sm:$0xf] %v13386_v1  ;;  %vm243_vm1 = vsmask.f32 256  ;;  %s13492_s8 = scalar_lea.vmem %s16964_s0, %s12181_s29  ;;  %s16808_s19 = scalar_lea.vmem %s16968_s4, %s12181_s29 }
  0x13   : > { %238 = vst [vmem:[#allocation2 + $0xe0] sm:$0x1] %v13386_v1  ;;  %239 = vst [vmem:[#allocation2 + $0xe4] sm:$0xf] %v13386_v1  ;;  %vm305_vm2 = vsmask.f32 7938 }
  0x14   : > { %240 = vst [vmem:[#allocation2 + $0xe8] sm:$0xf] %v13386_v1  ;;  %241 = vst [vmem:[#allocation2 + $0xec] sm:$0x1] %v13386_v1  ;;  %4984 = vmatpush1.bf16.msra.mxu0 %v13107_v2  ;;  %vm1259_vm5 = vsmask.f32 3328 }
  0x15   : > { %4985 = vmatprep.subr.bf16.mxu0 %v13386_v1  ;;  %vm13470_vm3 = vmand %vm242_vm0, %vm243_vm1  ;;  %vm1260_vm6 = vsmask.f32 7440  ;;  %v367_v26 = vld [vmem:[%s13492_s8] sm:$0xff]  ;;  %v251_v28 = vld [vmem:[#allocation2 + $0x18] sm:$0x1]  ;;  %vm818_vm8 = vcmask 1043456  }
  0x16   : > { %v245_v6 = vld [vmem:[#allocation2] sm:$0x1]  ;;  %v1206_v9 = vld [vmem:[#allocation2 + $0x4] sm:$0xf]  ;;  %vm13480_vm4 = vmand %vm242_vm0, %vm305_vm2  ;;  %v12183_v29 = vpack.c.bf16 %v367_v26, %v367_v26  ;;  %v252_v32 = vsel %vm13470_vm3, 0, %v251_v28  ;;  %vm1892_vm12 = vcmask 1042432  }
  0x17   : > { %v307_v8 = vld [vmem:[#allocation2 + $0x8] sm:$0x1]  ;;  %v246_v11 = vsel %vm13470_vm3, 0, %v245_v6  ;;  %v1272_v13 = vshll.u32 %v1206_v9, 16  ;;  %v1276_v14 = vshrl.u32 %v1206_v9, 16  ;;  %v13113_v37 = vld [vmem:[%s16965_s1 + $0x38] sm:$0xff]   ;;  %vm13522_vm9 = vmor %vm1259_vm5, %vm1260_vm6 }
  0x18   : > { %4986 = vmatpush1.bf16.msra.mxu0 %v13108_v3  ;;  %247 = vst [vmem:[#allocation2] sm:$0x1] %v246_v11  ;;  %v308_v15 = vsel %vm13480_vm4, 0, %v307_v8  ;;  %v248_v18 = vld [vmem:[#allocation2 + $0xc] sm:$0x1]  ;;  %v498_v36 = vshrl.u32 %v12183_v29, 16  ;;  %vm13532_vm10 = vmand %vm818_vm8, %vm305_vm2 }
  0x19   : > { %4987 = vmatprep.subr.bf16.mxu0 %v13386_v1  ;;  %309 = vst [vmem:[#allocation2 + $0x8] sm:$0x1] %v308_v15  ;;  %v13494_v16 = vrot.slane %v1272_v13, 5  ;;  %v1278_v17 = vrot.slane %v1276_v14, 4  ;;  %v249_v20 = vsel %vm13470_vm3, 0, %v248_v18  ;;  %v368_v35 = vld [vmem:[%s13492_s8 + $0x8] sm:$0xff] }
  0x1a   : > { %v310_v21 = vld [vmem:[#allocation2 + $0x14] sm:$0x1]  ;;  %v1209_v22 = vld [vmem:[#allocation2 + $0x10] sm:$0xf]  ;;  %250 = vst [vmem:[#allocation2 + $0xc] sm:$0x1] %v249_v20  ;;  %v12184_v40 = vpack.c.bf16 %v368_v35, %v368_v35 }
  0x1b   : > { %v311_v23 = vsel %vm13480_vm4, 0, %v310_v21  ;;  %v1296_v24 = vshll.u32 %v1209_v22, 16  ;;  %v1300_v25 = vshrl.u32 %v1209_v22, 16  ;;  %v1279_v27 = vor.u32 %v1278_v17, %v13494_v16  ;;  %v313_v33 = vld [vmem:[#allocation2 + $0x20] sm:$0x1]  ;;  %v369_v3 = vld [vmem:[%s13492_s8 + $0x10] sm:$0xff] }
  0x1c   : > { %4988 = vmatpush1.bf16.msra.mxu0 %v13109_v4  ;;  %312 = vst [vmem:[#allocation2 + $0x14] sm:$0x1] %v311_v23  ;;  %253 = vst [vmem:[#allocation2 + $0x18] sm:$0x1] %v252_v32  ;;  %v314_v34 = vsel %vm13480_vm4, 0, %v313_v33  ;;  %v501_v41 = vshll.u32 %v12183_v29, 16  ;;  %v12185_v11 = vpack.c.bf16 %v369_v3, %v369_v3 }
  0x1d   : > { %4989 = vmatprep.subr.bf16.mxu0 %v13386_v1  ;;  %v13506_v30 = vrot.slane %v1296_v24, 5  ;;  %v1302_v31 = vrot.slane %v1300_v25, 4  ;;  %vm495_vm7 = vsmask.f32 4368  ;;  %315 = vst [vmem:[#allocation2 + $0x20] sm:$0x1] %v314_v34 }
  0x1e   : > { %v1280_v45 = vrot.slane %v1279_v27, 4  ;;  %v500_v46 = vrot.slane %v498_v36, 7  ;;  %v506_v49 = vshrl.u32 %v12184_v40, 16  ;;  %v509_v50 = vshll.u32 %v12184_v40, 16  ;;  %v13114_v55 = vld [vmem:[%s16965_s1 + $0x40] sm:$0xff]   ;;  %vm13541_vm11 = vmor %vm243_vm1, %vm495_vm7  ;;  %v13115_v20 = vld [vmem:[%s16965_s1 + $0x48] sm:$0xff]  }
  0x1f   : > { %v1205_v38 = vld [vmem:[#allocation2] sm:$0xf]  ;;  %v1303_v39 = vor.u32 %v1302_v31, %v13506_v30  ;;  %v316_v24 = vld [vmem:[#allocation2 + $0x2c] sm:$0x1]  ;;  %v257_v29 = vld [vmem:[#allocation2 + $0x30] sm:$0x1] }
  0x20   : > { %4990 = vmatpush1.bf16.msra.mxu0 %v13110_v5  ;;  %v1207_v42 = vld [vmem:[#allocation2 + $0x8] sm:$0x1]  ;;  %v1263_v43 = vshrl.u32 %v1205_v38, 16  ;;  %v1266_v44 = vshll.u32 %v1205_v38, 16  ;;  %v503_v60 = vor.u32 %v501_v41, %v500_v46  ;;  %v504_v63 = vrot.slane %v500_v46, 4  ;;  %v13116_v32 = vld [vmem:[%s16965_s1 + $0x50] sm:$0xff]  }
  0x21   : > { %4991 = vmatprep.subr.bf16.mxu0 %v13386_v1  ;;  %v1282_v47 = vshll.u32 %v1207_v42, 16  ;;  %v13518_v48 = vrot.slane %v1303_v39, 4  ;;  %v1208_v54 = vld [vmem:[#allocation2 + $0xc] sm:$0xf]  ;;  %v508_v0 = vrot.slane %v506_v49, 7  ;;  %v515_v35 = vshrl.u32 %v12185_v11, 16 }
  0x22   : > { %v1265_v52 = vrot.slane %v1263_v43, 4  ;;  %v1268_v53 = vrot.slane %v1266_v44, 5  ;;  %v1287_v58 = vshrl.u32 %v1208_v54, 16  ;;  %v1290_v59 = vshll.u32 %v1208_v54, 16  ;;  %v319_v31 = vld [vmem:[#allocation2 + $0x38] sm:$0x1] }
  0x23   : > { %v1284_v56 = vrot.slane %v1282_v47, 5  ;;  %v1210_v57 = vld [vmem:[#allocation2 + $0x14] sm:$0x1]  ;;  %v820_v9 = vld [vmem:[#allocation2 + $0x18] sm:$0xf]  ;;  %v511_v15 = vor.u32 %v509_v50, %v508_v0  ;;  %v513_v17 = vrot.slane %v508_v0, 4 }
  0x24   : > { %4992 = vmatpush1.bf16.msra.mxu0 %v13111_v10  ;;  %v1269_v61 = vor.u32 %v1268_v53, %v1265_v52  ;;  %v1306_v62 = vshll.u32 %v1210_v57, 16  ;;  %v1289_v5 = vrot.slane %v1287_v58, 4  ;;  %v1292_v6 = vrot.slane %v1290_v59, 5  ;;  %v254_v10 = vld [vmem:[#allocation2 + $0x24] sm:$0x1]  ;;  %v13117_v50 = vld [vmem:[%s16965_s1 + $0x58] sm:$0xff]  }
  0x25   : > { %4993 = vmatprep.subr.bf16.mxu0 %v13386_v1  ;;  %v1285_v4 = vsel %vm13522_vm9, %v1280_v45, %v1284_v56  ;;  %v824_v18 = vld [vmem:[#allocation2 + $0x20] sm:$0x1]  ;;  %v821_v22 = vsel %vm13532_vm10, %v503_v60, %v820_v9  ;;  %v255_v23 = vsel %vm13470_vm3, 0, %v254_v10  ;;  %v512_v27 = vsel %vm13541_vm11, %v504_v63, %v511_v15  ;;  %v260_v45 = vld [vmem:[#allocation2 + $0x3c] sm:$0x1]  ;;  %v373_v56 = vld [vmem:[%s13492_s8 + $0x30] sm:$0xff] }
  0x26   : > { %v1270_v13 = vrot.slane %v1269_v61, 4  ;;  %v13545_v14 = vrot.slane %v1306_v62, 5  ;;  %v1293_v21 = vor.u32 %v1292_v6, %v1289_v5  ;;  %822 = vst [vmem:[#allocation2 + $0x18] sm:$0xf] %v821_v22  ;;  %v825_v28 = vsel %vm13470_vm3, %v513_v17, %v824_v18  ;;  %256 = vst [vmem:[#allocation2 + $0x24] sm:$0x1] %v255_v23 }
  0x27   : > { %823 = vst [vmem:[#allocation2 + $0x1c] sm:$0xf] %v512_v27  ;;  %826 = vst [vmem:[#allocation2 + $0x20] sm:$0x1] %v825_v28  ;;  %v371_v36 = vld [vmem:[%s13492_s8 + $0x20] sm:$0xff]  ;;  %v518_v38 = vshll.u32 %v12185_v11, 16 }
  0x28   : > { %4994 = vmatpush1.bf16.msra.mxu0 %v13112_v19  ;;  %v370_v19 = vld [vmem:[%s13492_s8 + $0x18] sm:$0xff]  ;;  %v1275_v26 = vsel %vm13522_vm9, %v1270_v13, %v13494_v16  ;;  %v13566_v34 = vrot.slane %v1293_v21, 4  ;;  %v317_v16 = vsel %vm13480_vm4, 0, %v316_v24  ;;  %v258_v41 = vsel %vm13470_vm3, 0, %v257_v29  ;;  %v322_v15 = vld [vmem:[#allocation2 + $0x44] sm:$0x1] }
  0x29   : > { %4995 = vmatprep.subr.bf16.mxu0 %v13386_v1  ;;  %v12186_v25 = vpack.c.bf16 %v370_v19, %v370_v19  ;;  %v11317_v33 = vcombine.low %v1275_v26, %v1285_v4  ;;  %318 = vst [vmem:[#allocation2 + $0x2c] sm:$0x1] %v317_v16  ;;  %v517_v42 = vrot.slane %v515_v35, 7  ;;  %259 = vst [vmem:[#allocation2 + $0x30] sm:$0x1] %v258_v41  ;;  %v320_v43 = vsel %vm13480_vm4, 0, %v319_v31 }
  0x2a   : > { %v12187_v44 = vpack.c.bf16 %v371_v36, %v371_v36  ;;  %321 = vst [vmem:[#allocation2 + $0x38] sm:$0x1] %v320_v43  ;;  %v261_v49 = vsel %vm13470_vm3, 0, %v260_v45  ;;  %v374_v61 = vld [vmem:[%s13492_s8 + $0x38] sm:$0xff]  ;;  %v1299_v62 = vsel %vm13522_vm9, %v13566_v34, %v13506_v30  ;;  %v1309_v63 = vsel %vm13522_vm9, %v13518_v48, %v13545_v14  ;;  %v13118_v22 = vld [vmem:[%s16965_s1 + $0x60] sm:$0xff]   ;;  %v13253_v7 = vld [vmem:[%s16966_s2 + $0xc8] sm:$0xff]  }
  0x2b   : > { %v523_v39 = vshrl.u32 %v12186_v25, 16  ;;  %v526_v40 = vshll.u32 %v12186_v25, 16  ;;  %5013 = vmatprep.mubr.bf16.mxu0 %v11317_v33  ;;  %v520_v52 = vor.u32 %v518_v38, %v517_v42  ;;  %v521_v53 = vrot.slane %v517_v42, 4  ;;  %262 = vst [vmem:[#allocation2 + $0x3c] sm:$0x1] %v261_v49  ;;  %v13119_v42 = vld [vmem:[%s16965_s1 + $0x68] sm:$0xff]  }
  0x2c   : > { %4996 = vmatpush1.bf16.msra.mxu0 %v13113_v37  ;;  %v372_v37 = vld [vmem:[%s13492_s8 + $0x28] sm:$0xff]  ;;  %v532_v54 = vshrl.u32 %v12187_v44, 16  ;;  %v12189_v48 = vpack.c.bf16 %v373_v56, %v373_v56  ;;  %v13597_v14 = vpack.c.bf16 %v374_v61, %v374_v61  ;;  %v323_v35 = vsel %vm13480_vm4, 0, %v322_v15  ;;  %v13120_v56 = vld [vmem:[%s16965_s1 + $0x70] sm:$0xff]   ;;  %v13250_v8 = vld [vmem:[%s16966_s2 + $0x80] sm:$0xff]  }
  0x2d   : > { %4997 = vmatprep.subr.bf16.mxu0 %v13386_v1  ;;  %v525_v46 = vrot.slane %v523_v39, 7  ;;  %v12188_v47 = vpack.c.bf16 %v372_v37, %v372_v37  ;;  %v1211_v0 = vld [vmem:[#allocation2 + $0x18] sm:$0xf]  ;;  %v827_v3 = vld [vmem:[#allocation2 + $0x24] sm:$0xf]  ;;  %v13626_v49 = vcombine.low %v1299_v62, %v1309_v63  ;;  %v376_v61 = vld [vmem:[%s13492_s8 + $0x48] sm:$0xff] }
  0x2e   : > { %v1212_v4 = vld [vmem:[#allocation2 + $0x1c] sm:$0xf]  ;;  %v1213_v5 = vld [vmem:[#allocation2 + $0x20] sm:$0x1]  ;;  %v1311_v6 = vshrl.u32 %v1211_v0, 16  ;;  %v1314_v9 = vshll.u32 %v1211_v0, 16  ;;  %v828_v11 = vsel %vm13532_vm10, %v520_v52, %v827_v3 }
  0x2f   : > { %v528_v57 = vor.u32 %v526_v40, %v525_v46  ;;  %v530_v58 = vrot.slane %v525_v46, 4  ;;  %v540_v59 = vshrl.u32 %v12188_v47, 16  ;;  %v543_v60 = vshll.u32 %v12188_v47, 16  ;;  %829 = vst [vmem:[#allocation2 + $0x24] sm:$0xf] %v828_v11  ;;  %v375_v37 = vld [vmem:[%s13492_s8 + $0x40] sm:$0xff] }
  0x30   : > { %4998 = vmatpush1.bf16.msra.mxu0 %v13114_v55  ;;  %v535_v55 = vshll.u32 %v12187_v44, 16  ;;  %v1320_v30 = vshll.u32 %v1212_v4, 16  ;;  %v1324_v13 = vshrl.u32 %v1212_v4, 16  ;;  %v1313_v17 = vrot.slane %v1311_v6, 4  ;;  %v831_v19 = vld [vmem:[#allocation2 + $0x2c] sm:$0x1] }
  0x31   : > { %4999 = vmatprep.subr.bf16.mxu0 %v13386_v1  ;;  %v529_v10 = vsel %vm13541_vm11, %v521_v53, %v528_v57  ;;  %v1316_v18 = vrot.slane %v1314_v9, 5  ;;  %v542_v21 = vrot.slane %v540_v59, 7  ;;  %v1330_v25 = vshll.u32 %v1213_v5, 16  ;;  %v834_v27 = vld [vmem:[#allocation2 + $0x30] sm:$0xf] }
  0x32   : > { %830 = vst [vmem:[#allocation2 + $0x28] sm:$0xf] %v529_v10  ;;  %v13602_v23 = vrot.slane %v1320_v30, 5  ;;  %v1326_v24 = vrot.slane %v1324_v13, 4  ;;  %v832_v26 = vsel %vm13470_vm3, %v530_v58, %v831_v19  ;;  %v838_v33 = vld [vmem:[#allocation2 + $0x38] sm:$0x1] }
  0x33   : > { %v1317_v28 = vor.u32 %v1316_v18, %v1313_v17  ;;  %833 = vst [vmem:[#allocation2 + $0x2c] sm:$0x1] %v832_v26  ;;  %v547_v16 = vrot.slane %v542_v21, 4  ;;  %v549_v36 = vshrl.u32 %v12189_v48, 16  ;;  %324 = vst [vmem:[#allocation2 + $0x44] sm:$0x1] %v323_v35 }
  0x34   : > { %5000 = vmatpush1.bf16.msra.mxu0 %v13115_v20  ;;  %v534_v20 = vrot.slane %v532_v54, 7  ;;  %v1327_v34 = vor.u32 %v1326_v24, %v13602_v23  ;;  %v552_v41 = vshll.u32 %v12189_v48, 16  ;;  %v13620_v43 = vrot.slane %v1330_v25, 5  ;;  %v841_v47 = vld [vmem:[#allocation2 + $0x3c] sm:$0xf]  ;;  %v377_v0 = vld [vmem:[%s13492_s8 + $0x50] sm:$0xff] }
  0x35   : > { %5001 = vmatprep.subr.bf16.mxu0 %v13386_v1  ;;  %v13611_v38 = vrot.slane %v1317_v28, 4  ;;  %v839_v44 = vsel %vm13470_vm3, %v547_v16, %v838_v33  ;;  %v551_v45 = vrot.slane %v549_v36, 7  ;;  %v557_v46 = vshrl.u32 %v13597_v14, 16  ;;  %v263_v53 = vld [vmem:[#allocation2 + $0x48] sm:$0x1]  ;;  %v13121_v17 = vld [vmem:[%s16965_s1 + $0x78] sm:$0xff]  }
  0x36   : > { %v537_v29 = vor.u32 %v535_v55, %v534_v20  ;;  %v538_v31 = vrot.slane %v534_v20, 4  ;;  %840 = vst [vmem:[#allocation2 + $0x38] sm:$0x1] %v839_v44  ;;  %v325_v54 = vld [vmem:[#allocation2 + $0x50] sm:$0x1]  ;;  %v13628_v55 = vpack.c.bf16 %v375_v37, %v375_v37  ;;  %v13633_v57 = vrot.slane %v1327_v34, 4 }
  0x37   : > { %v1323_v62 = vsel %vm13522_vm9, %v13611_v38, %v13602_v23  ;;  %v554_v3 = vor.u32 %v552_v41, %v551_v45  ;;  %v555_v4 = vrot.slane %v551_v45, 4  ;;  %v559_v11 = vrot.slane %v557_v46, 7  ;;  %v13122_v46 = vld [vmem:[#allocation2] sm:$0xff]  }
  0x38   : > { %5002 = vmatpush1.bf16.msra.mxu0 %v13116_v32  ;;  %v545_v32 = vor.u32 %v543_v60, %v542_v21  ;;  %v835_v40 = vsel %vm13532_vm10, %v537_v29, %v834_v27  ;;  %v560_v15 = vshll.u32 %v13597_v14, 16  ;;  %v264_v20 = vsel %vm13470_vm3, 0, %v263_v53  ;;  %v266_v53 = vld [vmem:[#allocation2 + $0x54] sm:$0x1] }
  0x39   : > { %5003 = vmatprep.subr.bf16.mxu0 %v13386_v1  ;;  %836 = vst [vmem:[#allocation2 + $0x30] sm:$0xf] %v835_v40  ;;  %v1215_v52 = vld [vmem:[#allocation2 + $0x28] sm:$0xf]  ;;  %v842_v48 = vsel %vm13532_vm10, %v554_v3, %v841_v47  ;;  %v564_v19 = vrot.slane %v559_v11, 4  ;;  %v326_v21 = vsel %vm13480_vm4, 0, %v325_v54  ;;  %v13656_v28 = vpack.c.bf16 %v376_v61, %v376_v61 }
  0x3a   : > { %v546_v39 = vsel %vm13541_vm11, %v538_v31, %v545_v32  ;;  %v1344_v60 = vshll.u32 %v1215_v52, 16  ;;  %v1348_v63 = vshrl.u32 %v1215_v52, 16  ;;  %v1216_v5 = vld [vmem:[#allocation2 + $0x2c] sm:$0x1]  ;;  %843 = vst [vmem:[#allocation2 + $0x3c] sm:$0xf] %v842_v48  ;;  %v562_v26 = vor.u32 %v560_v15, %v559_v11 }
  0x3b   : > { %837 = vst [vmem:[#allocation2 + $0x34] sm:$0xf] %v546_v39  ;;  %v1354_v13 = vshll.u32 %v1216_v5, 16  ;;  %v845_v27 = vld [vmem:[#allocation2 + $0x44] sm:$0x1]  ;;  %v13658_v29 = vpack.c.bf16 %v377_v0, %v377_v0  ;;  %v1333_v47 = vsel %vm13522_vm9, %v13633_v57, %v13620_v43  ;;  %v569_v43 = vshll.u32 %v13628_v55, 16 }
  0x3c   : > { %5004 = vmatpush1.bf16.msra.mxu0 %v13117_v50  ;;  %v1214_v50 = vld [vmem:[#allocation2 + $0x24] sm:$0xf]  ;;  %v13641_v10 = vrot.slane %v1344_v60, 5  ;;  %v1350_v30 = vrot.slane %v1348_v63, 4  ;;  %265 = vst [vmem:[#allocation2 + $0x48] sm:$0x1] %v264_v20  ;;  %v563_v39 = vsel %vm13541_vm11, %v555_v4, %v562_v26  ;;  %v846_v52 = vsel %vm13470_vm3, %v564_v19, %v845_v27 }
  0x3d   : > { %5005 = vmatprep.subr.bf16.mxu0 %v13386_v1  ;;  %v1335_v58 = vshrl.u32 %v1214_v50, 16  ;;  %v1338_v59 = vshll.u32 %v1214_v50, 16  ;;  %327 = vst [vmem:[#allocation2 + $0x50] sm:$0x1] %v326_v21  ;;  %v1219_v32 = vld [vmem:[#allocation2 + $0x38] sm:$0x1] }
  0x3e   : > { %v1351_v24 = vor.u32 %v1350_v30, %v13641_v10  ;;  %v1356_v36 = vrot.slane %v1354_v13, 5  ;;  %v13123_v40 = vld [vmem:[%s16965_s1 + $0x80] sm:$0xff]   ;;  %v1378_v45 = vshll.u32 %v1219_v32, 16  ;;  %844 = vst [vmem:[#allocation2 + $0x40] sm:$0xf] %v563_v39  ;;  %v574_v63 = vshrl.u32 %v13656_v28, 16 }
  0x3f   : > { %v1337_v6 = vrot.slane %v1335_v58, 4  ;;  %v1340_v9 = vrot.slane %v1338_v59, 5  ;;  %847 = vst [vmem:[#allocation2 + $0x44] sm:$0x1] %v846_v52  ;;  %v566_v59 = vshrl.u32 %v13628_v55, 16  ;;  %v577_v3 = vshll.u32 %v13656_v28, 16 }
  0x40   : > { %5006 = vmatpush1.bf16.msra.mxu0 %v13118_v22  ;;  %v378_v22 = vld [vmem:[%s13492_s8 + $0x58] sm:$0xff]  ;;  %v1217_v14 = vld [vmem:[#allocation2 + $0x30] sm:$0xf]  ;;  %v1352_v35 = vrot.slane %v1351_v24, 4  ;;  %v13690_v4 = vrot.slane %v1378_v45, 5  ;;  %v379_v55 = vld [vmem:[%s13492_s8 + $0x60] sm:$0xff] }
  0x41   : > { %5007 = vmatprep.subr.bf16.mxu0 %v13386_v1  ;;  %v1341_v18 = vor.u32 %v1340_v9, %v1337_v6  ;;  %v1359_v33 = vshrl.u32 %v1217_v14, 16  ;;  %v1362_v34 = vshll.u32 %v1217_v14, 16  ;;  %v13676_v54 = vpack.c.bf16 %v378_v22, %v378_v22  ;;  %v328_v57 = vld [vmem:[#allocation2 + $0x5c] sm:$0x1]  ;;  %v380_v48 = vld [vmem:[%s13492_s8 + $0x68] sm:$0xff] }
  0x42   : > { %v1218_v25 = vld [vmem:[#allocation2 + $0x34] sm:$0xf]  ;;  %v1357_v60 = vsel %vm13522_vm9, %v1352_v35, %v1356_v36  ;;  %v1220_v0 = vld [vmem:[#allocation2 + $0x3c] sm:$0xf]  ;;  %v568_v9 = vrot.slane %v566_v59, 7  ;;  %v576_v30 = vrot.slane %v574_v63, 7  ;;  %v13712_v26 = vpack.c.bf16 %v379_v55, %v379_v55 }
  0x43   : > { %v13660_v31 = vrot.slane %v1341_v18, 4  ;;  %v1368_v16 = vshll.u32 %v1218_v25, 16  ;;  %v1372_v37 = vshrl.u32 %v1218_v25, 16  ;;  %v1361_v41 = vrot.slane %v1359_v33, 4  ;;  %v848_v21 = vld [vmem:[#allocation2 + $0x48] sm:$0xf] }
  0x44   : > { %5008 = vmatpush1.bf16.msra.mxu0 %v13119_v42  ;;  %v1364_v42 = vrot.slane %v1362_v34, 5  ;;  %v1383_v5 = vshrl.u32 %v1220_v0, 16  ;;  %v1386_v6 = vshll.u32 %v1220_v0, 16  ;;  %v267_v13 = vsel %vm13470_vm3, 0, %v266_v53  ;;  %v852_v22 = vld [vmem:[#allocation2 + $0x50] sm:$0x1] }
  0x45   : > { %5009 = vmatprep.subr.bf16.mxu0 %v13386_v1  ;;  %v13668_v44 = vrot.slane %v1368_v16, 5  ;;  %v1374_v50 = vrot.slane %v1372_v37, 4  ;;  %v329_v15 = vsel %vm13480_vm4, 0, %v328_v57  ;;  %v571_v20 = vor.u32 %v569_v43, %v568_v9  ;;  %268 = vst [vmem:[#allocation2 + $0x54] sm:$0x1] %v267_v13  ;;  %v13124_v28 = vld [vmem:[#allocation2 + $0xc] sm:$0xff]  }
  0x46   : > { %v1365_v58 = vor.u32 %v1364_v42, %v1361_v41  ;;  %v1385_v18 = vrot.slane %v1383_v5, 4  ;;  %v1388_v19 = vrot.slane %v1386_v6, 5  ;;  %330 = vst [vmem:[#allocation2 + $0x5c] sm:$0x1] %v329_v15  ;;  %v1221_v14 = vld [vmem:[#allocation2 + $0x40] sm:$0xf]  ;;  %v13726_v41 = vpack.c.bf16 %v380_v48, %v380_v48 }
  0x47   : > { %v1375_v61 = vor.u32 %v1374_v50, %v13668_v44  ;;  %v572_v25 = vrot.slane %v568_v9, 4  ;;  %v1392_v38 = vshll.u32 %v1221_v14, 16  ;;  %v581_v33 = vrot.slane %v576_v30, 4  ;;  %v13127_v35 = vld [vmem:[%s16965_s1 + $0x90] sm:$0xff]   ;;  %v331_v50 = vld [vmem:[#allocation2 + $0x68] sm:$0x1] }
  0x48   : > { %5010 = vmatpush1.bf16.msra.mxu0 %v13120_v56  ;;  %v1347_v56 = vsel %vm13522_vm9, %v13660_v31, %v13641_v10  ;;  %v13125_v10 = vld [vmem:[%s16965_s1 + $0x88] sm:$0xff]   ;;  %v13696_v11 = vrot.slane %v1365_v58, 4  ;;  %v1389_v23 = vor.u32 %v1388_v19, %v1385_v18  ;;  %v1222_v31 = vld [vmem:[#allocation2 + $0x44] sm:$0x1]  ;;  %v849_v34 = vsel %vm13532_vm10, %v571_v20, %v848_v21  ;;  %v13129_v52 = vld [vmem:[%s16965_s1 + $0x98] sm:$0xff]  }
  0x49   : > { %5011 = vmatprep.subr.bf16.mxu0 %v13386_v1  ;;  %v13710_v24 = vrot.slane %v1375_v61, 4  ;;  %v13714_v27 = vcombine.low %v1347_v56, %v1357_v60  ;;  %v583_v16 = vshrl.u32 %v13658_v29, 16  ;;  %v13724_v36 = vrot.slane %v1392_v38, 5  ;;  %850 = vst [vmem:[#allocation2 + $0x48] sm:$0xf] %v849_v34  ;;  %v381_v0 = vld [vmem:[%s13492_s8 + $0x70] sm:$0xff] }
  0x4a   : > { %v1402_v39 = vshll.u32 %v1222_v31, 16  ;;  %v853_v42 = vsel %vm13470_vm3, %v581_v33, %v852_v22  ;;  %v1371_v53 = vsel %vm13522_vm9, %v13696_v11, %v13668_v44  ;;  %v13746_v59 = vrot.slane %v1389_v23, 4  ;;  %v13126_v9 = vld [vmem:[#allocation2 + $0x18] sm:$0xff]   ;;  %v272_v15 = vld [vmem:[#allocation2 + $0x6c] sm:$0x1]  ;;  %v13131_v48 = vld [vmem:[%s16965_s1 + $0xa0] sm:$0xff]  }
  0x4b   : > { %v585_v45 = vrot.slane %v583_v16, 7  ;;  %v1381_v56 = vsel %vm13522_vm9, %v13710_v24, %v13690_v4  ;;  %854 = vst [vmem:[#allocation2 + $0x50] sm:$0x1] %v853_v42  ;;  %v332_v6 = vsel %vm13480_vm4, 0, %v331_v50  ;;  %v603_v13 = vshll.u32 %v13712_v26, 16  ;;  %v384_v44 = vld [vmem:[%s13492_s8 + $0x88] sm:$0xff] }
  0x4c   : > { %5012 = vmatpush1.bf16.msra.mxu0 %v13121_v17  ;;  %v11319_v17 = vcombine.low %v1323_v62, %v1333_v47  ;;  %v1396_v62 = vshrl.u32 %v1221_v14, 16  ;;  %v591_v47 = vshrl.u32 %v13676_v54, 16  ;;  %v855_v61 = vld [vmem:[#allocation2 + $0x54] sm:$0xf]  ;;  %v13749_v63 = vrot.slane %v1402_v39, 5 }
  0x4d   : > { %5158 = vmatprep.subr.bf16.mxu0 %v13386_v1  ;;  %v589_v57 = vrot.slane %v585_v45, 4  ;;  %333 = vst [vmem:[#allocation2 + $0x68] sm:$0x1] %v332_v6  ;;  %v608_v19 = vshrl.u32 %v13726_v41, 16  ;;  %v611_v20 = vshll.u32 %v13726_v41, 16  ;;  %v1395_v22 = vsel %vm13522_vm9, %v13746_v59, %v13724_v36  ;;  %v13128_v6 = vld [vmem:[#allocation2 + $0x24] sm:$0xff]  }
  0x4e   : > { %v1398_v37 = vrot.slane %v1396_v62, 4  ;;  %v593_v60 = vrot.slane %v591_v47, 7  ;;  %v334_v21 = vld [vmem:[#allocation2 + $0x74] sm:$0x1]  ;;  %v13775_v23 = vpack.c.bf16 %v381_v0, %v381_v0  ;;  %vm1893_vm13 = vcmask 1046532  }
  0x4f   : > { %5014 = vmatmul.mubr.bf16.vlgmr.msra.gmra.mrb[0].mxu0 %v13122_v46  ;;  %v586_v46 = vshll.u32 %v13658_v29, 16  ;;  %v594_v29 = vshll.u32 %v13676_v54, 16  ;;  %v600_v54 = vshrl.u32 %v13712_v26, 16  ;;  %v610_v16 = vrot.slane %v608_v19, 7  ;;  %vm14154_vm14 = vmor %vm1892_vm12, %vm1893_vm13 }
  0x50   : > { %5159 = vmatpush1.bf16.msra.mxu0 %v13123_v40  ;;  %5021 = vmatprep.mubr.bf16.mxu0 %v13626_v49  ;;  %v579_v49 = vor.u32 %v577_v3, %v576_v30  ;;  %v269_v40 = vld [vmem:[#allocation2 + $0x60] sm:$0x1]  ;;  %v1399_v58 = vor.u32 %v1398_v37, %v13724_v36  ;;  %v859_v3 = vld [vmem:[#allocation2 + $0x5c] sm:$0x1]  ;;  %v1223_v14 = vld [vmem:[#allocation2 + $0x48] sm:$0xf] }
  0x51   : > { %5160 = vmatprep.subr.bf16.mxu0 %v13386_v1  ;;  %v588_v43 = vor.u32 %v586_v46, %v585_v45  ;;  %v270_v5 = vsel %vm13470_vm3, 0, %v269_v40  ;;  %v596_v55 = vor.u32 %v594_v29, %v593_v60  ;;  %v602_v18 = vrot.slane %v600_v54, 7  ;;  %v382_v37 = vld [vmem:[%s13492_s8 + $0x78] sm:$0xff] }
  0x52   : > { %v580_v32 = vsel %vm13541_vm11, %v572_v25, %v579_v49  ;;  %271 = vst [vmem:[#allocation2 + $0x60] sm:$0x1] %v270_v5  ;;  %v1407_v38 = vshrl.u32 %v1223_v14, 16  ;;  %v1410_v62 = vshll.u32 %v1223_v14, 16  ;;  %v613_v46 = vor.u32 %v611_v20, %v610_v16  ;;  %v275_v20 = vld [vmem:[#allocation2 + $0x78] sm:$0x1] }
  0x53   : > { %851 = vst [vmem:[#allocation2 + $0x4c] sm:$0xf] %v580_v32  ;;  %v856_v30 = vsel %vm13532_vm10, %v588_v43, %v855_v61  ;;  %v597_v49 = vsel %vm13541_vm11, %v589_v57, %v596_v55  ;;  %v1225_v32 = vld [vmem:[#allocation2 + $0x50] sm:$0x1]  ;;  %v605_v33 = vor.u32 %v603_v13, %v602_v18  ;;  %v606_v34 = vrot.slane %v602_v18, 4 }
  0x54   : > { %5161 = vmatpush1.bf16.msra.mxu0 %v13125_v10  ;;  %v598_v10 = vrot.slane %v593_v60, 4  ;;  %857 = vst [vmem:[#allocation2 + $0x54] sm:$0xf] %v856_v30  ;;  %858 = vst [vmem:[#allocation2 + $0x58] sm:$0xf] %v597_v49  ;;  %v1409_v39 = vrot.slane %v1407_v38, 4  ;;  %v13790_v60 = vpack.c.bf16 %v382_v37, %v382_v37 }
  0x55   : > { %5162 = vmatprep.subr.bf16.mxu0 %v13386_v1  ;;  %v1412_v40 = vrot.slane %v1410_v62, 5  ;;  %v1426_v45 = vshll.u32 %v1225_v32, 16  ;;  %v615_v47 = vrot.slane %v610_v16, 4  ;;  %v335_v50 = vsel %vm13480_vm4, 0, %v334_v21  ;;  %v866_v57 = vld [vmem:[#allocation2 + $0x68] sm:$0x1] }
  0x56   : > { %v860_v26 = vsel %vm13470_vm3, %v598_v10, %v859_v3  ;;  %336 = vst [vmem:[#allocation2 + $0x74] sm:$0x1] %v335_v50  ;;  %v614_v0 = vsel %vm13541_vm11, %v606_v34, %v613_v46  ;;  %v617_v10 = vshrl.u32 %v13775_v23, 16  ;;  %v383_v30 = vld [vmem:[%s13492_s8 + $0x80] sm:$0xff]  ;;  %v385_v49 = vld [vmem:[%s13492_s8 + $0x90] sm:$0xff]  ;;  %v388_v34 = vld [vmem:[%s13492_s8 + $0xa8] sm:$0xff] }
  0x57   : > { %5022 = vmatmul.mubr.bf16.gmra.mrb[4].mxu0 %v13124_v28  ;;  %861 = vst [vmem:[#allocation2 + $0x5c] sm:$0x1] %v860_v26  ;;  %v867_v5 = vsel %vm13470_vm3, %v615_v47, %v866_v57  ;;  %v1428_v54 = vrot.slane %v1426_v45, 5  ;;  %865 = vst [vmem:[#allocation2 + $0x64] sm:$0xf] %v614_v0  ;;  %v276_v26 = vsel %vm13470_vm3, 0, %v275_v20  ;;  %v13851_v45 = vpack.c.bf16 %v385_v49, %v385_v49 }
  0x58   : > { %5029 = vmatprep.mubr.bf16.mxu0 %v11319_v17  ;;  %5163 = vmatpush1.bf16.msra.mxu0 %v13127_v35  ;;  %v13763_v17 = vrot.slane %v1399_v58, 4  ;;  %v273_v35 = vsel %vm13470_vm3, 0, %v272_v15  ;;  %v1413_v58 = vor.u32 %v1412_v40, %v1409_v39  ;;  %868 = vst [vmem:[#allocation2 + $0x68] sm:$0x1] %v867_v5  ;;  %v619_v11 = vrot.slane %v617_v10, 7  ;;  %v13130_v16 = vld [vmem:[#allocation2 + $0x30] sm:$0xff]  }
  0x59   : > { %5164 = vmatprep.subr.bf16.mxu0 %v13386_v1  ;;  %274 = vst [vmem:[#allocation2 + $0x6c] sm:$0x1] %v273_v35  ;;  %v862_v43 = vld [vmem:[#allocation2 + $0x60] sm:$0xf]  ;;  %277 = vst [vmem:[#allocation2 + $0x78] sm:$0x1] %v276_v26 }
  0x5a   : > { %v1224_v25 = vld [vmem:[#allocation2 + $0x4c] sm:$0xf]  ;;  %v1405_v61 = vsel %vm13522_vm9, %v13763_v17, %v13749_v63  ;;  %v863_v3 = vsel %vm13532_vm10, %v605_v33, %v862_v43  ;;  %v13135_v63 = vld [vmem:[%s16965_s1 + $0xb0] sm:$0xff]   ;;  %v1414_v13 = vrot.slane %v1413_v58, 4  ;;  %v11321_v17 = vcombine.low %v1371_v53, %v1381_v56  ;;  %v387_v33 = vld [vmem:[%s13492_s8 + $0xa0] sm:$0xff] }
  0x5b   : > { %v1416_v28 = vshll.u32 %v1224_v25, 16  ;;  %v1420_v31 = vshrl.u32 %v1224_v25, 16  ;;  %864 = vst [vmem:[#allocation2 + $0x60] sm:$0xf] %v863_v3  ;;  %v13823_v21 = vcombine.low %v1395_v22, %v1405_v61  ;;  %v620_v53 = vshll.u32 %v13775_v23, 16  ;;  %v386_v23 = vld [vmem:[%s13492_s8 + $0x98] sm:$0xff] }
  0x5c   : > { %5165 = vmatpush1.bf16.msra.mxu0 %v13129_v52  ;;  %v13133_v52 = vld [vmem:[%s16965_s1 + $0xa8] sm:$0xff]   ;;  %v625_v56 = vshrl.u32 %v13790_v60, 16  ;;  %v13829_v25 = vpack.c.bf16 %v383_v30, %v383_v30  ;;  %v628_v22 = vshll.u32 %v13790_v60, 16  ;;  %v623_v40 = vrot.slane %v619_v11, 4  ;;  %v337_v58 = vld [vmem:[#allocation2 + $0x80] sm:$0x1] }
  0x5d   : > { %5166 = vmatprep.subr.bf16.mxu0 %v13386_v1  ;;  %v13781_v41 = vrot.slane %v1416_v28, 5  ;;  %v1422_v42 = vrot.slane %v1420_v31, 4  ;;  %v13138_v31 = vld [vmem:[%s16965_s1 + $0xb8] sm:$0xff]   ;;  %v873_v61 = vld [vmem:[#allocation2 + $0x74] sm:$0x1]  ;;  %v13860_v0 = vpack.c.bf16 %v387_v33, %v387_v33  ;;  %v13870_v30 = vpack.c.bf16 %v388_v34, %v388_v34 }
  0x5e   : > { %v1228_v4 = vld [vmem:[#allocation2 + $0x5c] sm:$0x1]  ;;  %v627_v32 = vrot.slane %v625_v56, 7  ;;  %v1230_v39 = vld [vmem:[#allocation2 + $0x64] sm:$0xf]  ;;  %v338_v20 = vsel %vm13480_vm4, 0, %v337_v58 }
  0x5f   : > { %5030 = vmatmul.mubr.bf16.gmra.mrb[8].mxu0 %v13126_v9  ;;  %v1423_v29 = vor.u32 %v1422_v42, %v13781_v41  ;;  %v1419_v36 = vsel %vm13522_vm9, %v1414_v13, %v13781_v41  ;;  %v1450_v28 = vshll.u32 %v1228_v4, 16  ;;  %v13849_v42 = vpack.c.bf16 %v384_v44, %v384_v44  ;;  %v1231_v46 = vld [vmem:[#allocation2 + $0x68] sm:$0x1]  ;;  %339 = vst [vmem:[#allocation2 + $0x80] sm:$0x1] %v338_v20 }
  0x60   : > { %5037 = vmatprep.mubr.bf16.mxu0 %v13714_v27  ;;  %5167 = vmatpush1.bf16.msra.mxu0 %v13131_v48  ;;  %v1226_v27 = vld [vmem:[#allocation2 + $0x54] sm:$0xf]  ;;  %v1227_v48 = vld [vmem:[#allocation2 + $0x58] sm:$0xf]  ;;  %v869_v41 = vld [vmem:[#allocation2 + $0x6c] sm:$0xf]  ;;  %v630_v60 = vor.u32 %v628_v22, %v627_v32 }
  0x61   : > { %5168 = vmatprep.subr.bf16.mxu0 %v13386_v1  ;;  %v1431_v9 = vshrl.u32 %v1226_v27, 16  ;;  %v1434_v55 = vshll.u32 %v1226_v27, 16  ;;  %v1424_v15 = vrot.slane %v1423_v29, 4  ;;  %v1440_v24 = vshll.u32 %v1227_v48, 16  ;;  %v13140_v27 = vld [vmem:[%s16965_s1 + $0xc0] sm:$0xff]  }
  0x62   : > { %v1444_v14 = vshrl.u32 %v1227_v48, 16  ;;  %v1229_v37 = vld [vmem:[#allocation2 + $0x60] sm:$0xf]  ;;  %v13853_v29 = vpack.c.bf16 %v386_v23, %v386_v23  ;;  %v1464_v57 = vshll.u32 %v1230_v39, 16  ;;  %v13864_v5 = vrot.slane %v1450_v28, 5 }
  0x63   : > { %v1433_v18 = vrot.slane %v1431_v9, 4  ;;  %v1436_v19 = vrot.slane %v1434_v55, 5  ;;  %v1429_v59 = vsel %vm13522_vm9, %v1424_v15, %v1428_v54  ;;  %v13841_v62 = vrot.slane %v1440_v24, 5  ;;  %v278_v9 = vld [vmem:[#allocation2 + $0x84] sm:$0x1]  ;;  %v13132_v28 = vld [vmem:[#allocation2 + $0x3c] sm:$0xff]  }
  0x64   : > { %5169 = vmatpush1.bf16.msra.mxu0 %v13133_v52  ;;  %v1446_v35 = vrot.slane %v1444_v14, 4  ;;  %v1455_v47 = vshrl.u32 %v1229_v37, 16  ;;  %v1458_v50 = vshll.u32 %v1229_v37, 16  ;;  %v622_v52 = vor.u32 %v620_v53, %v619_v11  ;;  %v13142_v14 = vld [vmem:[%s16965_s1 + $0xc8] sm:$0xff]   ;;  %v876_v26 = vld [vmem:[#allocation2 + $0x78] sm:$0xf] }
  0x65   : > { %5170 = vmatprep.subr.bf16.mxu0 %v13386_v1  ;;  %v1437_v38 = vor.u32 %v1436_v19, %v1433_v18  ;;  %v13855_v43 = vcombine.low %v1419_v36, %v1429_v59  ;;  %v632_v54 = vrot.slane %v627_v32, 4  ;;  %v631_v10 = vsel %vm13541_vm11, %v623_v40, %v630_v60  ;;  %v340_v18 = vld [vmem:[#allocation2 + $0x8c] sm:$0x1]  ;;  %v13144_v40 = vld [vmem:[%s16965_s1 + $0xd0] sm:$0xff]  }
  0x66   : > { %v1447_v55 = vor.u32 %v1446_v35, %v13841_v62  ;;  %v13872_v13 = vrot.slane %v1455_v47, 4  ;;  %v13874_v15 = vrot.slane %v1458_v50, 5  ;;  %v870_v48 = vsel %vm13532_vm10, %v622_v52, %v869_v41  ;;  %872 = vst [vmem:[#allocation2 + $0x70] sm:$0xf] %v631_v10  ;;  %v281_v41 = vld [vmem:[#allocation2 + $0x90] sm:$0x1] }
  0x67   : > { %5038 = vmatmul.mubr.bf16.gmra.mrb[12].mxu0 %v13128_v6  ;;  %v13862_v3 = vrot.slane %v1437_v38, 4  ;;  %v1468_v6 = vshrl.u32 %v1230_v39, 16  ;;  %v13880_v19 = vrot.slane %v1464_v57, 5  ;;  %871 = vst [vmem:[#allocation2 + $0x6c] sm:$0xf] %v870_v48  ;;  %v634_v4 = vshrl.u32 %v13829_v25, 16 }
  0x68   : > { %5045 = vmatprep.mubr.bf16.mxu0 %v11321_v17  ;;  %5171 = vmatpush1.bf16.msra.mxu0 %v13135_v63  ;;  %v1474_v63 = vshll.u32 %v1231_v46, 16  ;;  %v874_v17 = vsel %vm13470_vm3, %v632_v54, %v873_v61  ;;  %v637_v24 = vshll.u32 %v13829_v25, 16  ;;  %v642_v11 = vshrl.u32 %v13849_v42, 16  ;;  %v343_v52 = vld [vmem:[#allocation2 + $0x98] sm:$0x1] }
  0x69   : > { %5172 = vmatprep.subr.bf16.mxu0 %v13386_v1  ;;  %875 = vst [vmem:[#allocation2 + $0x74] sm:$0x1] %v874_v17  ;;  %v13890_v44 = vrot.slane %v1468_v6, 4  ;;  %v645_v53 = vshll.u32 %v13849_v42, 16  ;;  %v279_v56 = vsel %vm13470_vm3, 0, %v278_v9  ;;  %v1443_v25 = vsel %vm13522_vm9, %v13862_v3, %v13841_v62  ;;  %v13146_v6 = vld [vmem:[%s16965_s1 + $0xd8] sm:$0xff]  }
  0x6a   : > { %v636_v49 = vrot.slane %v634_v4, 7  ;;  %280 = vst [vmem:[#allocation2 + $0x84] sm:$0x1] %v279_v56  ;;  %v651_v36 = vshrl.u32 %v13851_v45, 16  ;;  %v13904_v59 = vrot.slane %v1447_v55, 4  ;;  %v644_v22 = vrot.slane %v642_v11, 7 }
  0x6b   : > { %v654_v23 = vshll.u32 %v13851_v45, 16  ;;  %v659_v38 = vshrl.u32 %v13853_v29, 16  ;;  %v1471_v35 = vor.u32 %v13890_v44, %v13880_v19  ;;  %v662_v50 = vshll.u32 %v13853_v29, 16  ;;  %v284_v10 = vld [vmem:[#allocation2 + $0x9c] sm:$0x1] }
  0x6c   : > { %5173 = vmatpush1.bf16.msra.mxu0 %v13138_v31  ;;  %v13908_v31 = vrot.slane %v1474_v63, 5  ;;  %v639_v32 = vor.u32 %v637_v24, %v636_v49  ;;  %v640_v33 = vrot.slane %v636_v49, 4  ;;  %v653_v34 = vrot.slane %v651_v36, 7  ;;  %v880_v48 = vld [vmem:[#allocation2 + $0x80] sm:$0x1]  ;;  %v13134_v49 = vld [vmem:[#allocation2 + $0x48] sm:$0xff]  }
  0x6d   : > { %5174 = vmatprep.subr.bf16.mxu0 %v13386_v1  ;;  %v647_v37 = vor.u32 %v645_v53, %v644_v22  ;;  %v661_v39 = vrot.slane %v659_v38, 7  ;;  %v1233_v42 = vld [vmem:[#allocation2 + $0x70] sm:$0xf]  ;;  %v649_v45 = vrot.slane %v644_v22, 4  ;;  %v1453_v29 = vsel %vm13522_vm9, %v13904_v59, %v13864_v5 }
  0x6e   : > { %v877_v46 = vsel %vm13532_vm10, %v639_v32, %v876_v26  ;;  %v656_v47 = vor.u32 %v654_v23, %v653_v34  ;;  %v1232_v58 = vld [vmem:[#allocation2 + $0x6c] sm:$0xf]  ;;  %v1488_v57 = vshll.u32 %v1233_v42, 16  ;;  %v1492_v60 = vshrl.u32 %v1233_v42, 16  ;;  %v13148_v32 = vld [vmem:[%s16965_s1 + $0xe0] sm:$0xff]   ;;  %v389_v42 = vld [vmem:[%s13492_s8 + $0xb0] sm:$0xff] }
  0x6f   : > { %5046 = vmatmul.mubr.bf16.gmra.mrb[16].mxu0 %v13130_v16  ;;  %v1461_v16 = vor.u32 %v13874_v15, %v13872_v13  ;;  %v648_v61 = vsel %vm13541_vm11, %v640_v33, %v647_v37  ;;  %878 = vst [vmem:[#allocation2 + $0x78] sm:$0xf] %v877_v46  ;;  %v1479_v9 = vshrl.u32 %v1232_v58, 16  ;;  %v1482_v55 = vshll.u32 %v1232_v58, 16  ;;  %v13136_v58 = vld [vmem:[#allocation2 + $0x54] sm:$0xff]  }
  0x70   : > { %5053 = vmatprep.mubr.bf16.mxu0 %v13823_v21  ;;  %5175 = vmatpush1.bf16.msra.mxu0 %v13140_v27  ;;  %v341_v21 = vsel %vm13480_vm4, 0, %v340_v18  ;;  %v657_v27 = vrot.slane %v653_v34, 4  ;;  %v1234_v54 = vld [vmem:[#allocation2 + $0x74] sm:$0x1]  ;;  %879 = vst [vmem:[#allocation2 + $0x7c] sm:$0xf] %v648_v61  ;;  %v664_v63 = vor.u32 %v662_v50, %v661_v39  ;;  %v881_v24 = vsel %vm13470_vm3, %v649_v45, %v880_v48 }
  0x71   : > { %5176 = vmatprep.subr.bf16.mxu0 %v13386_v1  ;;  %342 = vst [vmem:[#allocation2 + $0x8c] sm:$0x1] %v341_v21  ;;  %v13931_v13 = vrot.slane %v1488_v57, 5  ;;  %v1494_v15 = vrot.slane %v1492_v60, 4  ;;  %v666_v17 = vrot.slane %v661_v39, 4  ;;  %v282_v18 = vsel %vm13470_vm3, 0, %v281_v41 }
  0x72   : > { %v13935_v20 = vrot.slane %v1461_v16, 4  ;;  %v1481_v5 = vrot.slane %v1479_v9, 4  ;;  %v1484_v4 = vrot.slane %v1482_v55, 5  ;;  %283 = vst [vmem:[#allocation2 + $0x90] sm:$0x1] %v282_v18  ;;  %v665_v44 = vsel %vm13541_vm11, %v657_v27, %v664_v63  ;;  %v390_v45 = vld [vmem:[%s13492_s8 + $0xb8] sm:$0xff] }
  0x73   : > { %882 = vst [vmem:[#allocation2 + $0x80] sm:$0x1] %v881_v24  ;;  %v344_v56 = vsel %vm13480_vm4, 0, %v343_v52  ;;  %v1498_v21 = vshll.u32 %v1234_v54, 16  ;;  %886 = vst [vmem:[#allocation2 + $0x88] sm:$0xf] %v665_v44  ;;  %v11324_v26 = vcombine.low %v1443_v25, %v1453_v29  ;;  %v1495_v38 = vor.u32 %v1494_v15, %v13931_v13 }
  0x74   : > { %5177 = vmatpush1.bf16.msra.mxu0 %v13142_v14  ;;  %v883_v14 = vld [vmem:[#allocation2 + $0x84] sm:$0xf]  ;;  %345 = vst [vmem:[#allocation2 + $0x98] sm:$0x1] %v344_v56  ;;  %v668_v59 = vshrl.u32 %v13860_v0, 16  ;;  %v671_v22 = vshll.u32 %v13860_v0, 16  ;;  %v1485_v23 = vor.u32 %v1484_v4, %v1481_v5  ;;  %v1467_v3 = vsel %vm13522_vm9, %v13935_v20, %v13880_v19 }
  0x75   : > { %5178 = vmatprep.subr.bf16.mxu0 %v13386_v1  ;;  %v884_v11 = vsel %vm13532_vm10, %v656_v47, %v883_v14  ;;  %v676_v62 = vshrl.u32 %v13870_v30, 16  ;;  %v13972_v37 = vrot.slane %v1498_v21, 5  ;;  %v13150_v19 = vld [vmem:[%s16965_s1 + $0xe8] sm:$0xff]   ;;  %v1496_v47 = vrot.slane %v1495_v38, 4  ;;  %v391_v5 = vld [vmem:[%s13492_s8 + $0xc0] sm:$0xff] }
  0x76   : > { %885 = vst [vmem:[#allocation2 + $0x84] sm:$0xf] %v884_v11  ;;  %v1235_v0 = vld [vmem:[#allocation2 + $0x78] sm:$0xf]  ;;  %v13961_v33 = vrot.slane %v668_v59, 7  ;;  %v1486_v46 = vrot.slane %v1485_v23, 4  ;;  %v12205_v15 = vpack.c.bf16 %v389_v42, %v389_v42  ;;  %v13986_v20 = vpack.c.bf16 %v390_v45, %v390_v45 }
  0x77   : > { %5054 = vmatmul.mubr.bf16.gmra.mrb[20].mxu0 %v13132_v28  ;;  %v285_v28 = vsel %vm13470_vm3, 0, %v284_v10  ;;  %v1236_v34 = vld [vmem:[#allocation2 + $0x7c] sm:$0xf]  ;;  %v1503_v16 = vshrl.u32 %v1235_v0, 16  ;;  %v679_v27 = vshll.u32 %v13870_v30, 16  ;;  %v678_v63 = vrot.slane %v676_v62, 7 }
  0x78   : > { %5061 = vmatprep.mubr.bf16.mxu0 %v13855_v43  ;;  %5179 = vmatpush1.bf16.msra.mxu0 %v13144_v40  ;;  %v1472_v43 = vrot.slane %v1471_v35, 4  ;;  %v887_v53 = vld [vmem:[#allocation2 + $0x8c] sm:$0x1]  ;;  %286 = vst [vmem:[#allocation2 + $0x9c] sm:$0x1] %v285_v28  ;;  %v1506_v35 = vshll.u32 %v1235_v0, 16  ;;  %v673_v41 = vor.u32 %v671_v22, %v13961_v33  ;;  %v1491_v24 = vsel %vm13522_vm9, %v1486_v46, %v13931_v13 }
  0x79   : > { %5180 = vmatprep.subr.bf16.mxu0 %v13386_v1  ;;  %v888_v36 = vsel %vm13470_vm3, %v666_v17, %v887_v53  ;;  %v1512_v39 = vshll.u32 %v1236_v34, 16  ;;  %v1516_v40 = vshrl.u32 %v1236_v34, 16  ;;  %v890_v52 = vld [vmem:[#allocation2 + $0x90] sm:$0xf]  ;;  %v346_v10 = vld [vmem:[#allocation2 + $0xa4] sm:$0x1]  ;;  %v1501_v14 = vsel %vm13522_vm9, %v1496_v47, %v13972_v37 }
  0x7a   : > { %889 = vst [vmem:[#allocation2 + $0x8c] sm:$0x1] %v888_v36  ;;  %v1477_v25 = vsel %vm13522_vm9, %v1472_v43, %v13908_v31  ;;  %v1505_v31 = vrot.slane %v1503_v16, 4  ;;  %v1508_v50 = vrot.slane %v1506_v35, 5  ;;  %v1237_v57 = vld [vmem:[#allocation2 + $0x80] sm:$0x1]  ;;  %v11326_v37 = vcombine.low %v1491_v24, %v1501_v14 }
  0x7b   : > { %v13980_v60 = vrot.slane %v1512_v39, 5  ;;  %v1518_v61 = vrot.slane %v1516_v40, 4  ;;  %v1522_v54 = vshll.u32 %v1237_v57, 16  ;;  %v1239_v55 = vld [vmem:[#allocation2 + $0x88] sm:$0xf]  ;;  %v11325_v48 = vcombine.low %v1467_v3, %v1477_v25  ;;  %v393_v11 = vld [vmem:[%s13492_s8 + $0xd0] sm:$0xff] }
  0x7c   : > { %5181 = vmatpush1.bf16.msra.mxu0 %v13146_v6  ;;  %v891_v6 = vsel %vm13532_vm10, %v673_v41, %v890_v52  ;;  %v1509_v29 = vor.u32 %v1508_v50, %v1505_v31  ;;  %v392_v4 = vld [vmem:[%s13492_s8 + $0xc8] sm:$0xff]  ;;  %v674_v44 = vrot.slane %v13961_v33, 4  ;;  %v13152_v53 = vld [vmem:[%s16965_s1 + $0xf0] sm:$0xff]   ;;  %v1536_v36 = vshll.u32 %v1239_v55, 16  ;;  %v894_v23 = vld [vmem:[#allocation2 + $0x98] sm:$0x1] }
  0x7d   : > { %5182 = vmatprep.subr.bf16.mxu0 %v13386_v1  ;;  %v1238_v9 = vld [vmem:[#allocation2 + $0x84] sm:$0xf]  ;;  %892 = vst [vmem:[#allocation2 + $0x90] sm:$0xf] %v891_v6  ;;  %v1519_v43 = vor.u32 %v1518_v61, %v13980_v60  ;;  %v14005_v13 = vrot.slane %v1522_v54, 5  ;;  %v1540_v59 = vshrl.u32 %v1239_v55, 16  ;;  %v14012_v33 = vpack.c.bf16 %v391_v5, %v391_v5 }
  0x7e   : > { %v1527_v18 = vshrl.u32 %v1238_v9, 16  ;;  %v1530_v30 = vshll.u32 %v1238_v9, 16  ;;  %v14002_v56 = vrot.slane %v1509_v29, 4  ;;  %v287_v38 = vld [vmem:[#allocation2 + $0xa8] sm:$0x1]  ;;  %v13155_v28 = vld [vmem:[%s16965_s1 + $0xf8] sm:$0xff]   ;;  %v14014_v62 = vpack.c.bf16 %v392_v4, %v392_v4 }
  0x7f   : > { %5062 = vmatmul.mubr.bf16.gmra.mrb[24].mxu0 %v13134_v49  ;;  %v347_v0 = vsel %vm13480_vm4, 0, %v346_v10  ;;  %v1520_v3 = vrot.slane %v1519_v43, 4  ;;  %v685_v34 = vshrl.u32 %v12205_v15, 16  ;;  %v14018_v16 = vpack.c.bf16 %v393_v11, %v393_v11  ;;  %v13137_v35 = vld [vmem:[#allocation2 + $0x60] sm:$0xff]   ;;  %v349_v31 = vld [vmem:[#allocation2 + $0xb0] sm:$0x1] }
  0x80   : > { %5069 = vmatprep.mubr.bf16.mxu0 %v11324_v26  ;;  %5183 = vmatpush1.bf16.msra.mxu0 %v13148_v32  ;;  %v1529_v49 = vrot.slane %v1527_v18, 4  ;;  %v1532_v21 = vrot.slane %v1530_v30, 5  ;;  %v681_v26 = vor.u32 %v679_v27, %v678_v63  ;;  %v683_v32 = vrot.slane %v678_v63, 4  ;;  %348 = vst [vmem:[#allocation2 + $0xa4] sm:$0x1] %v347_v0  ;;  %v394_v9 = vld [vmem:[%s13492_s8 + $0xd8] sm:$0xff] }
  0x81   : > { %5184 = vmatprep.subr.bf16.mxu0 %v13386_v1  ;;  %v1240_v17 = vld [vmem:[#allocation2 + $0x8c] sm:$0x1]  ;;  %v688_v42 = vshll.u32 %v12205_v15, 16  ;;  %v14023_v45 = vrot.slane %v1536_v36, 5  ;;  %v687_v47 = vrot.slane %v685_v34, 7  ;;  %v693_v52 = vshrl.u32 %v13986_v20, 16 }
  0x82   : > { %v1546_v22 = vshll.u32 %v1240_v17, 16  ;;  %v682_v25 = vsel %vm13541_vm11, %v674_v44, %v681_v26  ;;  %v1533_v39 = vor.u32 %v1532_v21, %v1529_v49  ;;  %v895_v40 = vsel %vm13470_vm3, %v683_v32, %v894_v23  ;;  %v897_v57 = vld [vmem:[#allocation2 + $0x9c] sm:$0xf]  ;;  %v13139_v26 = vld [vmem:[#allocation2 + $0x6c] sm:$0xff]  }
  0x83   : > { %893 = vst [vmem:[#allocation2 + $0x94] sm:$0xf] %v682_v25  ;;  %896 = vst [vmem:[#allocation2 + $0x98] sm:$0x1] %v895_v40  ;;  %v288_v61 = vsel %vm13470_vm3, 0, %v287_v38  ;;  %v1515_v27 = vsel %vm13522_vm9, %v14002_v56, %v13980_v60  ;;  %v1525_v6 = vsel %vm13522_vm9, %v1520_v3, %v14005_v13  ;;  %v690_v54 = vor.u32 %v688_v42, %v687_v47  ;;  %v395_v40 = vld [vmem:[%s13492_s8 + $0xe0] sm:$0xff] }
  0x84   : > { %5185 = vmatpush1.bf16.msra.mxu0 %v13150_v19  ;;  %v1241_v41 = vld [vmem:[#allocation2 + $0x90] sm:$0xf]  ;;  %v1542_v19 = vrot.slane %v1540_v59, 4  ;;  %v14036_v29 = vrot.slane %v1546_v22, 5  ;;  %289 = vst [vmem:[#allocation2 + $0xa8] sm:$0x1] %v288_v61  ;;  %v11327_v44 = vcombine.low %v1515_v27, %v1525_v6  ;;  %v14055_v49 = vpack.c.bf16 %v394_v9, %v394_v9 }
  0x85   : > { %5186 = vmatprep.subr.bf16.mxu0 %v13386_v1  ;;  %v1551_v46 = vshrl.u32 %v1241_v41, 16  ;;  %v1554_v50 = vshll.u32 %v1241_v41, 16  ;;  %v14039_v55 = vrot.slane %v1533_v39, 4  ;;  %v691_v63 = vrot.slane %v687_v47, 4 }
  0x86   : > { %v695_v10 = vrot.slane %v693_v52, 7  ;;  %v350_v15 = vsel %vm13480_vm4, 0, %v349_v31  ;;  %v1543_v60 = vor.u32 %v1542_v19, %v14023_v45  ;;  %v898_v18 = vsel %vm13532_vm10, %v690_v54, %v897_v57  ;;  %v293_v54 = vld [vmem:[#allocation2 + $0xc0] sm:$0x1] }
  0x87   : > { %5070 = vmatmul.mubr.bf16.gmra.mrb[28].mxu0 %v13136_v58  ;;  %v696_v58 = vshll.u32 %v13986_v20, 16  ;;  %v14045_v17 = vrot.slane %v1551_v46, 4  ;;  %351 = vst [vmem:[#allocation2 + $0xb0] sm:$0x1] %v350_v15  ;;  %v702_v30 = vshrl.u32 %v14012_v33, 16  ;;  %v14050_v5 = vrot.slane %v1554_v50, 5 }
  0x88   : > { %5077 = vmatprep.mubr.bf16.mxu0 %v11325_v48  ;;  %5187 = vmatpush1.bf16.msra.mxu0 %v13152_v53  ;;  %v290_v48 = vld [vmem:[#allocation2 + $0xb4] sm:$0x1]  ;;  %v352_v20 = vld [vmem:[#allocation2 + $0xbc] sm:$0x1]  ;;  %v700_v24 = vrot.slane %v695_v10, 4  ;;  %v710_v43 = vshrl.u32 %v14014_v62, 16  ;;  %v1539_v41 = vsel %vm13522_vm9, %v14039_v55, %v14023_v45 }
  0x89   : > { %5188 = vmatprep.subr.bf16.mxu0 %v13386_v1  ;;  %v698_v4 = vor.u32 %v696_v58, %v695_v10  ;;  %899 = vst [vmem:[#allocation2 + $0x9c] sm:$0xf] %v898_v18  ;;  %v901_v14 = vld [vmem:[#allocation2 + $0xa4] sm:$0x1]  ;;  %v705_v53 = vshll.u32 %v14012_v33, 16  ;;  %v713_v56 = vshll.u32 %v14014_v62, 16  ;;  %v1557_v42 = vor.u32 %v14050_v5, %v14045_v17 }
  0x8a   : > { %v1242_v11 = vld [vmem:[#allocation2 + $0x94] sm:$0xf]  ;;  %v1243_v21 = vld [vmem:[#allocation2 + $0x98] sm:$0x1]  ;;  %v902_v22 = vsel %vm13470_vm3, %v700_v24, %v901_v14  ;;  %v1544_v23 = vrot.slane %v1543_v60, 4  ;;  %v704_v38 = vrot.slane %v702_v30, 7  ;;  %v14089_v30 = vpack.c.bf16 %v395_v40, %v395_v40 }
  0x8b   : > { %v1560_v36 = vshll.u32 %v1242_v11, 16  ;;  %v1564_v13 = vshrl.u32 %v1242_v11, 16  ;;  %v699_v59 = vsel %vm13541_vm11, %v691_v63, %v698_v4  ;;  %903 = vst [vmem:[#allocation2 + $0xa4] sm:$0x1] %v902_v22  ;;  %v291_v32 = vsel %vm13470_vm3, 0, %v290_v48  ;;  %v13141_v15 = vld [vmem:[#allocation2 + $0x78] sm:$0xff]  }
  0x8c   : > { %5189 = vmatpush1.bf16.msra.mxu0 %v13155_v28  ;;  %900 = vst [vmem:[#allocation2 + $0xa0] sm:$0xf] %v699_v59  ;;  %v712_v28 = vrot.slane %v710_v43, 7  ;;  %v1570_v33 = vshll.u32 %v1243_v21, 16  ;;  %v904_v62 = vld [vmem:[#allocation2 + $0xa8] sm:$0xf]  ;;  %v1549_v45 = vsel %vm13522_vm9, %v1544_v23, %v14036_v29 }
  0x8d   : > { %5335 = vmatprep.subr.bf16.mxu0 %v13386_v1  ;;  %v14063_v0 = vrot.slane %v1560_v36, 5  ;;  %292 = vst [vmem:[#allocation2 + $0xb4] sm:$0x1] %v291_v32  ;;  %v353_v3 = vsel %vm13480_vm4, 0, %v352_v20  ;;  %v719_v25 = vshrl.u32 %v14018_v16, 16  ;;  %v1566_v34 = vrot.slane %v1564_v13, 4 }
  0x8e   : > { %v715_v39 = vor.u32 %v713_v56, %v712_v28  ;;  %354 = vst [vmem:[#allocation2 + $0xbc] sm:$0x1] %v353_v3  ;;  %v717_v19 = vrot.slane %v712_v28, 4  ;;  %v908_v46 = vld [vmem:[#allocation2 + $0xb0] sm:$0x1]  ;;  %v722_v58 = vshll.u32 %v14018_v16, 16  ;;  %v11328_v14 = vcombine.low %v1539_v41, %v1549_v45 }
  0x8f   : > { %5078 = vmatmul.mubr.bf16.gmra.mrb[32].mxu0 %v13137_v35  ;;  %v707_v35 = vor.u32 %v705_v53, %v704_v38  ;;  %v721_v47 = vrot.slane %v719_v25, 7  ;;  %v727_v57 = vshrl.u32 %v14055_v49, 16  ;;  %v1567_v9 = vor.u32 %v1566_v34, %v14063_v0  ;;  %v355_v10 = vld [vmem:[#allocation2 + $0xc8] sm:$0x1] }
  0x90   : > { %5085 = vmatprep.mubr.bf16.mxu0 %v11326_v37  ;;  %v708_v37 = vrot.slane %v704_v38, 4  ;;  %v1244_v31 = vld [vmem:[#allocation2 + $0x9c] sm:$0xf]  ;;  %v909_v6 = vsel %vm13470_vm3, %v717_v19, %v908_v46  ;;  %v730_v63 = vshll.u32 %v14055_v49, 16  ;;  %v396_v18 = vld [vmem:[%s13492_s8 + $0xe8] sm:$0xff]  ;;  %v1558_v20 = vrot.slane %v1557_v42, 4 }
  0x91   : > { %v905_v52 = vsel %vm13532_vm10, %v707_v35, %v904_v62  ;;  %v1575_v61 = vshrl.u32 %v1244_v31, 16  ;;  %v1578_v27 = vshll.u32 %v1244_v31, 16  ;;  %910 = vst [vmem:[#allocation2 + $0xb0] sm:$0x1] %v909_v6  ;;  %v724_v16 = vor.u32 %v722_v58, %v721_v47  ;;  %v13143_v42 = vld [vmem:[#allocation2 + $0x84] sm:$0xff]   ;;  %v397_v31 = vld [vmem:[%s13492_s8 + $0xf0] sm:$0xff] }
  0x92   : > { %v716_v50 = vsel %vm13541_vm11, %v708_v37, %v715_v39  ;;  %906 = vst [vmem:[#allocation2 + $0xa8] sm:$0xf] %v905_v52  ;;  %v729_v55 = vrot.slane %v727_v57, 7  ;;  %v725_v17 = vrot.slane %v721_v47, 4  ;;  %v1572_v5 = vrot.slane %v1570_v33, 5 }
  0x93   : > { %907 = vst [vmem:[#allocation2 + $0xac] sm:$0xf] %v716_v50  ;;  %v1245_v29 = vld [vmem:[#allocation2 + $0xa0] sm:$0xf]  ;;  %v1577_v48 = vrot.slane %v1575_v61, 4  ;;  %v1580_v60 = vrot.slane %v1578_v27, 5  ;;  %v12212_v33 = vpack.c.bf16 %v396_v18, %v396_v18  ;;  %v1563_v19 = vsel %vm13522_vm9, %v1558_v20, %v14063_v0 }
  0x94   : > { %v1584_v4 = vshll.u32 %v1245_v29, 16  ;;  %v1588_v24 = vshrl.u32 %v1245_v29, 16  ;;  %v732_v43 = vor.u32 %v730_v63, %v729_v55  ;;  %v911_v11 = vld [vmem:[#allocation2 + $0xb4] sm:$0xf]  ;;  %v294_v56 = vsel %vm13470_vm3, 0, %v293_v54 }
  0x95   : > { %v915_v53 = vld [vmem:[#allocation2 + $0xbc] sm:$0x1]  ;;  %v1568_v49 = vrot.slane %v1567_v9, 4  ;;  %v1246_v21 = vld [vmem:[#allocation2 + $0xa4] sm:$0x1]  ;;  %v912_v59 = vsel %vm13532_vm10, %v724_v16, %v911_v11  ;;  %v1581_v22 = vor.u32 %v1580_v60, %v1577_v48  ;;  %v356_v38 = vsel %vm13480_vm4, 0, %v355_v10 }
  0x96   : > { %v14093_v36 = vrot.slane %v1584_v4, 5  ;;  %v1590_v13 = vrot.slane %v1588_v24, 4  ;;  %295 = vst [vmem:[#allocation2 + $0xc0] sm:$0x1] %v294_v56  ;;  %913 = vst [vmem:[#allocation2 + $0xb4] sm:$0xf] %v912_v59  ;;  %v12213_v18 = vpack.c.bf16 %v397_v31, %v397_v31 }
  0x97   : > { %5086 = vmatmul.mubr.bf16.gmra.mrb[36].mxu0 %v13139_v26  ;;  %v733_v26 = vsel %vm13541_vm11, %v725_v17, %v732_v43  ;;  %357 = vst [vmem:[#allocation2 + $0xc8] sm:$0x1] %v356_v38  ;;  %v1594_v3 = vshll.u32 %v1246_v21, 16  ;;  %v296_v37 = vld [vmem:[#allocation2 + $0xcc] sm:$0x1]  ;;  %v736_v41 = vshrl.u32 %v14089_v30, 16  ;;  %v1573_v46 = vsel %vm13522_vm9, %v1568_v49, %v1572_v5 }
  0x98   : > { %5093 = vmatprep.mubr.bf16.mxu0 %v11327_v44  ;;  %v734_v44 = vrot.slane %v729_v55, 4  ;;  %914 = vst [vmem:[#allocation2 + $0xb8] sm:$0xf] %v733_v26  ;;  %v1591_v62 = vor.u32 %v1590_v13, %v14093_v36  ;;  %v1249_v25 = vld [vmem:[#allocation2 + $0xb0] sm:$0x1]  ;;  %v1582_v47 = vrot.slane %v1581_v22, 4  ;;  %v11329_v54 = vcombine.low %v1563_v19, %v1573_v46 }
  0x99   : > { %v1247_v28 = vld [vmem:[#allocation2 + $0xa8] sm:$0xf]  ;;  %v738_v58 = vrot.slane %v736_v41, 7  ;;  %v739_v57 = vshll.u32 %v14089_v30, 16  ;;  %v1596_v61 = vrot.slane %v1594_v3, 5  ;;  %v1618_v27 = vshll.u32 %v1249_v25, 16 }
  0x9a   : > { %v916_v23 = vsel %vm13470_vm3, %v734_v44, %v915_v53  ;;  %v1248_v32 = vld [vmem:[#allocation2 + $0xac] sm:$0xf]  ;;  %v1599_v34 = vshrl.u32 %v1247_v28, 16  ;;  %v1602_v35 = vshll.u32 %v1247_v28, 16  ;;  %v1592_v45 = vrot.slane %v1591_v62, 4  ;;  %v398_v10 = vld [vmem:[%s13492_s8 + $0xf8] sm:$0xff] }
  0x9b   : > { %917 = vst [vmem:[#allocation2 + $0xbc] sm:$0x1] %v916_v23  ;;  %v1608_v39 = vshll.u32 %v1248_v32, 16  ;;  %v1612_v40 = vshrl.u32 %v1248_v32, 16  ;;  %v744_v6 = vshrl.u32 %v12212_v33, 16  ;;  %v297_v0 = vsel %vm13470_vm3, 0, %v296_v37 }
  0x9c   : > { %v1601_v50 = vrot.slane %v1599_v34, 4  ;;  %v1604_v52 = vrot.slane %v1602_v35, 5  ;;  %v747_v63 = vshll.u32 %v12212_v33, 16  ;;  %298 = vst [vmem:[#allocation2 + $0xcc] sm:$0x1] %v297_v0  ;;  %v741_v60 = vor.u32 %v739_v57, %v738_v58  ;;  %v13145_v13 = vld [vmem:[#allocation2 + $0x90] sm:$0xff]  }
  0x9d   : > { %v14112_v9 = vrot.slane %v1608_v39, 5  ;;  %v1614_v16 = vrot.slane %v1612_v40, 4  ;;  %v1250_v55 = vld [vmem:[#allocation2 + $0xb4] sm:$0xf]  ;;  %v1597_v30 = vsel %vm13522_vm9, %v1592_v45, %v1596_v61  ;;  %v1620_v20 = vrot.slane %v1618_v27, 5  ;;  %v13147_v0 = vld [vmem:[#allocation2 + $0x9c] sm:$0xff]  }
  0x9e   : > { %v1605_v29 = vor.u32 %v1604_v52, %v1601_v50  ;;  %v358_v17 = vld [vmem:[#allocation2 + $0xd4] sm:$0x1]  ;;  %v742_v5 = vrot.slane %v738_v58, 4  ;;  %v746_v4 = vrot.slane %v744_v6, 7  ;;  %v918_v24 = vld [vmem:[#allocation2 + $0xc0] sm:$0xf]  ;;  %v12214_v53 = vpack.c.bf16 %v398_v10, %v398_v10 }
  0x9f   : > { %5094 = vmatmul.mubr.bf16.gmra.mrb[40].mxu0 %v13141_v15  ;;  %v1587_v15 = vsel %vm13522_vm9, %v1582_v47, %v14093_v36  ;;  %v1251_v48 = vld [vmem:[#allocation2 + $0xb8] sm:$0xf]  ;;  %v1623_v43 = vshrl.u32 %v1250_v55, 16  ;;  %v1626_v44 = vshll.u32 %v1250_v55, 16  ;;  %v922_v11 = vld [vmem:[#allocation2 + $0xc8] sm:$0x1]  ;;  %v919_v26 = vsel %vm13532_vm10, %v741_v60, %v918_v24 }
  0xa0   : > { %5101 = vmatprep.mubr.bf16.mxu0 %v11328_v14  ;;  %v1615_v14 = vor.u32 %v1614_v16, %v14112_v9  ;;  %v1632_v56 = vshll.u32 %v1251_v48, 16  ;;  %v1636_v49 = vshrl.u32 %v1251_v48, 16  ;;  %v749_v21 = vor.u32 %v747_v63, %v746_v4  ;;  %920 = vst [vmem:[#allocation2 + $0xc0] sm:$0xf] %v919_v26 }
  0xa1   : > { %v751_v36 = vrot.slane %v746_v4, 4  ;;  %v11330_v59 = vcombine.low %v1587_v15, %v1597_v30  ;;  %v1606_v22 = vrot.slane %v1605_v29, 4  ;;  %v359_v23 = vsel %vm13480_vm4, 0, %v358_v17 }
  0xa2   : > { %v750_v38 = vsel %vm13541_vm11, %v742_v5, %v749_v21  ;;  %360 = vst [vmem:[#allocation2 + $0xd4] sm:$0x1] %v359_v23  ;;  %v753_v32 = vshrl.u32 %v12213_v18, 16  ;;  %v756_v33 = vshll.u32 %v12213_v18, 16  ;;  %v1616_v62 = vrot.slane %v1615_v14, 4 }
  0xa3   : > { %v923_v28 = vsel %vm13470_vm3, %v751_v36, %v922_v11  ;;  %v1252_v3 = vld [vmem:[#allocation2 + $0xbc] sm:$0x1]  ;;  %v1625_v25 = vrot.slane %v1623_v43, 4  ;;  %921 = vst [vmem:[#allocation2 + $0xc4] sm:$0xf] %v750_v38  ;;  %v761_v34 = vshrl.u32 %v12214_v53, 16  ;;  %v1611_v31 = vsel %vm13522_vm9, %v1606_v22, %v14112_v9 }
  0xa4   : > { %924 = vst [vmem:[#allocation2 + $0xc8] sm:$0x1] %v923_v28  ;;  %v764_v35 = vshll.u32 %v12214_v53, 16  ;;  %v1628_v37 = vrot.slane %v1626_v44, 5  ;;  %v1634_v39 = vrot.slane %v1632_v56, 5  ;;  %v1638_v40 = vrot.slane %v1636_v49, 4 }
  0xa5   : > { %v755_v41 = vrot.slane %v753_v32, 7  ;;  %v925_v19 = vld [vmem:[#allocation2 + $0xcc] sm:$0xf]  ;;  %v1642_v50 = vshll.u32 %v1252_v3, 16  ;;  %v1621_v57 = vsel %vm13522_vm9, %v1616_v62, %v1620_v20 }
  0xa6   : > { %v1629_v45 = vor.u32 %v1628_v37, %v1625_v25  ;;  %v1639_v61 = vor.u32 %v1638_v40, %v1634_v39  ;;  %v11331_v15 = vcombine.low %v1611_v31, %v1621_v57  ;;  %v1785_v57 = vld [vmem:[#allocation2 + $0x4] sm:$0xf] }
  0xa7   : > { %5102 = vmatmul.mubr.bf16.gmra.mrb[44].mxu0 %v13143_v42  ;;  %v763_v42 = vrot.slane %v761_v34, 7  ;;  %v758_v46 = vor.u32 %v756_v33, %v755_v41  ;;  %v759_v47 = vrot.slane %v755_v41, 4  ;;  %v1253_v6 = vld [vmem:[#allocation2 + $0xc0] sm:$0xf]  ;;  %v1644_v29 = vrot.slane %v1642_v50, 5  ;;  %v13151_v41 = vld [vmem:[#allocation2 + $0xb4] sm:$0xff]  }
  0xa8   : > { %5109 = vmatprep.mubr.bf16.mxu0 %v11329_v54  ;;  %v1647_v9 = vshrl.u32 %v1253_v6, 16  ;;  %v1650_v63 = vshll.u32 %v1253_v6, 16  ;;  %v1630_v17 = vrot.slane %v1629_v45, 4  ;;  %v1640_v18 = vrot.slane %v1639_v61, 4  ;;  %v1784_v45 = vld [vmem:[#allocation2] sm:$0xe] }
  0xa9   : > { %v766_v52 = vor.u32 %v764_v35, %v763_v42  ;;  %v768_v58 = vrot.slane %v763_v42, 4  ;;  %v926_v27 = vsel %vm13532_vm10, %v758_v46, %v925_v19  ;;  %v929_v16 = vld [vmem:[#allocation2 + $0xd4] sm:$0x1]  ;;  %v1897_v61 = vrot.slane %v1785_v57, 5 }
  0xaa   : > { %927 = vst [vmem:[#allocation2 + $0xcc] sm:$0xf] %v926_v27  ;;  %v1254_v55 = vld [vmem:[#allocation2 + $0xc4] sm:$0xf]  ;;  %v1649_v20 = vrot.slane %v1647_v9, 4  ;;  %v1652_v5 = vrot.slane %v1650_v63, 5  ;;  %v1635_v11 = vsel %vm13522_vm9, %v1630_v17, %v1634_v39  ;;  %v1645_v53 = vsel %vm13522_vm9, %v1640_v18, %v1644_v29 }
  0xab   : > { %v767_v54 = vsel %vm13541_vm11, %v759_v47, %v766_v52  ;;  %v930_v10 = vsel %vm13470_vm3, %v768_v58, %v929_v16  ;;  %v1656_v48 = vshll.u32 %v1254_v55, 16  ;;  %v1660_v60 = vshrl.u32 %v1254_v55, 16  ;;  %v1255_v30 = vld [vmem:[#allocation2 + $0xc8] sm:$0x1]  ;;  %v13153_v52 = vld [vmem:[#allocation2 + $0xc0] sm:$0xff]  }
  0xac   : > { %928 = vst [vmem:[#allocation2 + $0xd0] sm:$0xf] %v767_v54  ;;  %931 = vst [vmem:[#allocation2 + $0xd4] sm:$0x1] %v930_v10  ;;  %v1653_v14 = vor.u32 %v1652_v5, %v1649_v20  ;;  %v1666_v44 = vshll.u32 %v1255_v30, 16  ;;  %v11332_v26 = vcombine.low %v1635_v11, %v1645_v53  ;;  %v13156_v54 = vld [vmem:[#allocation2 + $0xc] sm:$0xff]  }
  0xad   : > { %v1658_v4 = vrot.slane %v1656_v48, 5  ;;  %v1662_v24 = vrot.slane %v1660_v60, 4  ;;  %v1786_v27 = vld [vmem:[#allocation2 + $0x8] sm:$0x1]  ;;  %v11335_v16 = vrot.slane %v1784_v45, 9  ;;  %v1899_v55 = vrot.slane %v1897_v61, 4 }
  0xae   : > { %v1654_v23 = vrot.slane %v1653_v14, 4  ;;  %v1668_v28 = vrot.slane %v1666_v44, 5  ;;  %v1900_v9 = vrot.slane %v1786_v27, 5  ;;  %v16983_v63 = vmov 0  ;;  %v1787_v48 = vld [vmem:[#allocation2 + $0xc] sm:$0xe] }
  0xaf   : > { %5110 = vmatmul.mubr.bf16.gmra.mrb[48].mxu0 %v13145_v13  ;;  %v1663_v43 = vor.u32 %v1662_v24, %v1658_v4  ;;  %v13149_v13 = vld [vmem:[#allocation2 + $0xa8] sm:$0xff]   ;;  %v16984_v63 = vsel %vm14154_vm14, 4294967295, %v16983_v63  ;;  %v1898_v10 = vsel %vm14154_vm14, %v11335_v16, %v1897_v61  ;;  %v1789_v60 = vld [vmem:[#allocation2 + $0x14] sm:$0x1]  ;;  %v13157_v18 = vld [vmem:[%s16965_s1 + $0x100] sm:$0xff]   ;;  %v11336_v20 = vrot.slane %v1787_v48, 9 }
  0xb0   : > { %5117 = vmatprep.mubr.bf16.mxu0 %v11330_v59  ;;  %v1659_v34 = vsel %vm13522_vm9, %v1654_v23, %v1658_v4  ;;  %16985 = vst [vmem:[#allocation5_spill] sm:$0xff] %v16984_v63  ;;  %v13158_v30 = vld [vmem:[#allocation2 + $0x18] sm:$0xff]   ;;  %v1907_v4 = vrot.slane %v1789_v60, 5  ;;  %v13159_v44 = vld [vmem:[%s16965_s1 + $0x108] sm:$0xff]   ;;  %v1800_v61 = vld [vmem:[#allocation2 + $0x40] sm:$0xf] }
  0xb1   : > { %v1256_v56 = vld [vmem:[#allocation2 + $0xcc] sm:$0xf]  ;;  %v1664_v38 = vrot.slane %v1663_v43, 4  ;;  %v1791_v24 = vld [vmem:[#allocation2 + $0x1c] sm:$0xf]  ;;  %v13170_v27 = vld [vmem:[%s16965_s1 + $0x130] sm:$0xff]  }
  0xb2   : > { %v1671_v21 = vshrl.u32 %v1256_v56, 16  ;;  %v1674_v36 = vshll.u32 %v1256_v56, 16  ;;  %v1790_v11 = vld [vmem:[#allocation2 + $0x18] sm:$0xe]  ;;  %v1911_v53 = vrot.slane %v1791_v24, 5  ;;  %v1932_v16 = vrot.slane %v1800_v61, 5 }
  0xb3   : > { %v1257_v49 = vld [vmem:[#allocation2 + $0xd0] sm:$0xf]  ;;  %v1258_v25 = vld [vmem:[#allocation2 + $0xd4] sm:$0x1]  ;;  %v1669_v35 = vsel %vm13522_vm9, %v1664_v38, %v1668_v28  ;;  %v1792_v56 = vld [vmem:[#allocation2 + $0x20] sm:$0x1] }
  0xb4   : > { %v1680_v59 = vshll.u32 %v1257_v49, 16  ;;  %v1684_v22 = vshrl.u32 %v1257_v49, 16  ;;  %v1673_v32 = vrot.slane %v1671_v21, 4  ;;  %v1676_v33 = vrot.slane %v1674_v36, 5  ;;  %v13154_v6 = vld [vmem:[#allocation2 + $0xcc] sm:$0xff]  }
  0xb5   : > { %v1690_v40 = vshll.u32 %v1258_v25, 16  ;;  %v11333_v42 = vcombine.low %v1659_v34, %v1669_v35  ;;  %v299_v49 = vld [vmem:[#allocation2 + $0xd8] sm:$0x1]  ;;  %v1914_v23 = vrot.slane %v1792_v56, 5  ;;  %v1794_v38 = vld [vmem:[#allocation2 + $0x28] sm:$0xf] }
  0xb6   : > { %v1682_v62 = vrot.slane %v1680_v59, 5  ;;  %v1686_v3 = vrot.slane %v1684_v22, 4  ;;  %v1677_v37 = vor.u32 %v1676_v33, %v1673_v32  ;;  %v300_v21 = vsel %vm13470_vm3, 0, %v299_v49  ;;  %v13161_v22 = vld [vmem:[%s16965_s1 + $0x110] sm:$0xff]   ;;  %v1795_v25 = vld [vmem:[#allocation2 + $0x2c] sm:$0x1] }
  0xb7   : > { %5118 = vmatmul.mubr.bf16.gmra.mrb[52].mxu0 %v13147_v0  ;;  %v1692_v47 = vrot.slane %v1690_v40, 5  ;;  %v1788_v0 = vld [vmem:[#allocation2 + $0x10] sm:$0xf]  ;;  %v11337_v59 = vrot.slane %v1790_v11, 9  ;;  %301 = vst [vmem:[#allocation2 + $0xd8] sm:$0x1] %v300_v21 }
  0xb8   : > { %5125 = vmatprep.mubr.bf16.mxu0 %v11331_v15  ;;  %v1687_v39 = vor.u32 %v1686_v3, %v1682_v62  ;;  %v1678_v19 = vrot.slane %v1677_v37, 4  ;;  %v1901_v15 = vsel %vm14154_vm14, %v1899_v55, %v1900_v9  ;;  %v1904_v29 = vrot.slane %v1788_v0, 5  ;;  %v1793_v3 = vld [vmem:[#allocation2 + $0x24] sm:$0xe]  ;;  %v13162_v35 = vld [vmem:[#allocation2 + $0x30] sm:$0xff]   ;;  %v13166_v48 = vld [vmem:[#allocation2 + $0x48] sm:$0xff]  }
  0xb9   : > { %v11353_v17 = vcombine.low %v1898_v10, %v1901_v15  ;;  %v1912_v28 = vsel %vm14154_vm14, %v11337_v59, %v1911_v53  ;;  %v1918_v33 = vrot.slane %v1794_v38, 5  ;;  %v11338_v37 = vrot.slane %v1793_v3, 9  ;;  %v1799_v9 = vld [vmem:[#allocation2 + $0x3c] sm:$0xe]  ;;  %v1801_v15 = vld [vmem:[#allocation2 + $0x44] sm:$0x1] }
  0xba   : > { %v1688_v46 = vrot.slane %v1687_v39, 4  ;;  %v1683_v31 = vsel %vm13522_vm9, %v1678_v19, %v1682_v62  ;;  %v1906_v5 = vrot.slane %v1904_v29, 4  ;;  %v1905_v14 = vsel %vm14154_vm14, %v11336_v20, %v1904_v29  ;;  %v13163_v62 = vld [vmem:[%s16965_s1 + $0x118] sm:$0xff]   ;;  %v1803_v20 = vld [vmem:[#allocation2 + $0x4c] sm:$0xf] }
  0xbb   : > { %v1920_v39 = vrot.slane %v1918_v33, 4  ;;  %v1921_v40 = vrot.slane %v1795_v25, 5  ;;  %v1919_v19 = vsel %vm14154_vm14, %v11338_v37, %v1918_v33  ;;  %v13172_v10 = vld [vmem:[%s16965_s1 + $0x138] sm:$0xff]   ;;  %v11340_v60 = vrot.slane %v1799_v9, 9  ;;  %v1805_v38 = vld [vmem:[#allocation2 + $0x54] sm:$0xe] }
  0xbc   : > { %v1693_v50 = vsel %vm13522_vm9, %v1688_v46, %v1692_v47  ;;  %v1908_v43 = vsel %vm14154_vm14, %v1906_v5, %v1907_v4  ;;  %v1796_v47 = vld [vmem:[#allocation2 + $0x30] sm:$0xe]  ;;  %v1939_v24 = vrot.slane %v1803_v20, 5  ;;  %v13169_v33 = vld [vmem:[#allocation2 + $0x60] sm:$0xff]  }
  0xbd   : > { %v11334_v58 = vcombine.low %v1683_v31, %v1693_v50  ;;  %v11354_v36 = vcombine.low %v1905_v14, %v1908_v43  ;;  %v1922_v46 = vsel %vm14154_vm14, %v1920_v39, %v1921_v40  ;;  %v13167_v50 = vld [vmem:[%s16965_s1 + $0x128] sm:$0xff]   ;;  %v11339_v45 = vrot.slane %v1796_v47, 9  ;;  %v1808_v37 = vld [vmem:[#allocation2 + $0x60] sm:$0xe] }
  0xbe   : > { %v11356_v57 = vcombine.low %v1919_v19, %v1922_v46  ;;  %v1933_v5 = vsel %vm14154_vm14, %v11340_v60, %v1932_v16  ;;  %v13176_v14 = vld [vmem:[%s16965_s1 + $0x148] sm:$0xff]   ;;  %v1941_v49 = vrot.slane %v1939_v24, 4 }
  0xbf   : > { %5126 = vmatmul.mubr.bf16.gmra.mrb[56].mxu0 %v13149_v13  ;;  %v13160_v13 = vld [vmem:[#allocation2 + $0x24] sm:$0xff]   ;;  %v13171_v47 = vld [vmem:[#allocation2 + $0x6c] sm:$0xff]  }
  0xc0   : > { %5133 = vmatprep.mubr.bf16.mxu0 %v11332_v26  ;;  %v1913_v26 = vrot.slane %v1911_v53, 4  ;;  %v1802_v43 = vld [vmem:[#allocation2 + $0x48] sm:$0xe]  ;;  %v13168_v53 = vld [vmem:[#allocation2 + $0x54] sm:$0xff]  }
  0xc1   : > { %v11341_v56 = vrot.slane %v1802_v43, 9  ;;  %v13184_v19 = vld [vmem:[%s16965_s1 + $0x168] sm:$0xff]  }
  0xc2   : > { %v1915_v32 = vsel %vm14154_vm14, %v1913_v26, %v1914_v23  ;;  %v13180_v23 = vld [vmem:[%s16965_s1 + $0x158] sm:$0xff]   ;;  %v1818_v43 = vld [vmem:[#allocation2 + $0x88] sm:$0xf] }
  0xc3   : > { %v11355_v34 = vcombine.low %v1912_v28, %v1915_v32  ;;  %v1940_v59 = vsel %vm14154_vm14, %v11341_v56, %v1939_v24  ;;  %v1807_v28 = vld [vmem:[#allocation2 + $0x5c] sm:$0x1]  ;;  %v1817_v56 = vld [vmem:[#allocation2 + $0x84] sm:$0xe] }
  0xc4   : > { %v1949_v25 = vrot.slane %v1807_v28, 5 }
  0xc7   : > { %5134 = vmatmul.mubr.bf16.gmra.mrb[60].mxu0 %v13151_v41  ;;  %v13165_v41 = vld [vmem:[%s16965_s1 + $0x120] sm:$0xff]  }
  0xc8   : > { %5141 = vmatprep.mubr.bf16.mxu0 %v11333_v42  ;;  %v1797_v42 = vld [vmem:[#allocation2 + $0x34] sm:$0xf] }
  0xc9   : > { %v1925_v31 = vrot.slane %v1797_v42, 5 }
  0xcb   : > { %v1926_v0 = vsel %vm14154_vm14, %v11339_v45, %v1925_v31  ;;  %v1811_v45 = vld [vmem:[#allocation2 + $0x6c] sm:$0xe] }
  0xcc   : > { %v11344_v9 = vrot.slane %v1811_v45, 9 }
  0xcf   : > { %5142 = vmatmul.mubr.bf16.gmra.mrb[64].mxu0 %v13153_v52  ;;  %v1798_v52 = vld [vmem:[#allocation2 + $0x38] sm:$0x1] }
  0xd0   : > { %5149 = vmatprep.mubr.bf16.mxu0 %v11334_v58  ;;  %v13164_v58 = vld [vmem:[#allocation2 + $0x3c] sm:$0xff]  }
  0xd7   : > { %5150 = vmatmul.mubr.bf16.gmra.mrb[68].mxu0 %v13154_v6  ;;  %v1927_v6 = vrot.slane %v1925_v31, 4  ;;  %v11343_v31 = vrot.slane %v1808_v37, 9  ;;  %v1824_v37 = vld [vmem:[#allocation2 + $0xa0] sm:$0xf] }
  0xd8   : > { %5190 = vmatprep.mubr.bf16.mxu0 %v13156_v54  ;;  %v1928_v54 = vrot.slane %v1798_v52, 5  ;;  %v1812_v52 = vld [vmem:[#allocation2 + $0x70] sm:$0xf] }
  0xd9   : > { %v1960_v61 = vrot.slane %v1812_v52, 5 }
  0xda   : > { %v1929_v55 = vsel %vm14154_vm14, %v1927_v6, %v1928_v54  ;;  %v1813_v54 = vld [vmem:[#allocation2 + $0x74] sm:$0x1] }
  0xdb   : > { %v11357_v29 = vcombine.low %v1926_v0, %v1929_v55  ;;  %v13173_v55 = vld [vmem:[#allocation2 + $0x78] sm:$0xff]   ;;  %v1961_v60 = vsel %vm14154_vm14, %v11344_v9, %v1960_v61 }
  0xdf   : > { %5191 = vmatmul.mubr.bf16.vlgmr.msra.gmra.mrb[0].mxu0 %v11353_v17  ;;  %v1934_v17 = vrot.slane %v1932_v16, 4  ;;  %v13189_v16 = vld [vmem:[%s16965_s1 + $0x178] sm:$0xff]  }
  0xe0   : > { %5336 = vmatpush1.bf16.msra.mxu0 %v13157_v18  ;;  %5198 = vmatprep.mubr.bf16.mxu0 %v13158_v30  ;;  %v1935_v18 = vrot.slane %v1801_v15, 5  ;;  %v13174_v30 = vld [vmem:[%s16965_s1 + $0x140] sm:$0xff]   ;;  %v1963_v15 = vrot.slane %v1813_v54, 5 }
  0xe1   : > { %5337 = vmatprep.subr.bf16.mxu0 %v13386_v1 }
  0xe2   : > { %v1936_v4 = vsel %vm14154_vm14, %v1934_v17, %v1935_v18  ;;  %v1814_v18 = vld [vmem:[#allocation2 + $0x78] sm:$0xe] }
  0xe3   : > { %v11358_v11 = vcombine.low %v1933_v5, %v1936_v4  ;;  %v13175_v5 = vld [vmem:[#allocation2 + $0x84] sm:$0xff]   ;;  %v11345_v4 = vrot.slane %v1814_v18, 9 }
  0xe4   : > { %5338 = vmatpush1.bf16.msra.mxu0 %v13159_v44  ;;  %v1804_v44 = vld [vmem:[#allocation2 + $0x50] sm:$0x1] }
  0xe5   : > { %5339 = vmatprep.subr.bf16.mxu0 %v13386_v1  ;;  %v1942_v21 = vrot.slane %v1804_v44, 5  ;;  %v1974_v44 = vrot.slane %v1818_v43, 5 }
  0xe7   : > { %5199 = vmatmul.mubr.bf16.gmra.mrb[4].mxu0 %v11354_v36  ;;  %v13178_v36 = vld [vmem:[%s16965_s1 + $0x150] sm:$0xff]  }
  0xe8   : > { %5206 = vmatprep.mubr.bf16.mxu0 %v13160_v13  ;;  %5340 = vmatpush1.bf16.msra.mxu0 %v13161_v22  ;;  %v1806_v13 = vld [vmem:[#allocation2 + $0x58] sm:$0xf]  ;;  %v1943_v22 = vsel %vm14154_vm14, %v1941_v49, %v1942_v21  ;;  %v1819_v49 = vld [vmem:[#allocation2 + $0x8c] sm:$0x1] }
  0xe9   : > { %5341 = vmatprep.subr.bf16.mxu0 %v13386_v1  ;;  %v1946_v26 = vrot.slane %v1806_v13, 5  ;;  %v11359_v32 = vcombine.low %v1940_v59, %v1943_v22  ;;  %v11346_v13 = vrot.slane %v1817_v56, 9  ;;  %v1976_v59 = vrot.slane %v1974_v44, 4 }
  0xea   : > { %v1977_v22 = vrot.slane %v1819_v49, 5 }
  0xeb   : > { %v1948_v3 = vrot.slane %v1946_v26, 4 }
  0xec   : > { %5342 = vmatpush1.bf16.msra.mxu0 %v13163_v62  ;;  %v11342_v62 = vrot.slane %v1805_v38, 9  ;;  %v1975_v38 = vsel %vm14154_vm14, %v11346_v13, %v1974_v44  ;;  %v1978_v28 = vsel %vm14154_vm14, %v1976_v59, %v1977_v22  ;;  %v14302_v13 = vld [vmem:[#allocation2 + $0xd4] sm:$0x1] }
  0xed   : > { %5343 = vmatprep.subr.bf16.mxu0 %v13386_v1  ;;  %v1950_v40 = vsel %vm14154_vm14, %v1948_v3, %v1949_v25  ;;  %v13179_v3 = vld [vmem:[#allocation2 + $0x9c] sm:$0xff]  }
  0xee   : > { %v1947_v39 = vsel %vm14154_vm14, %v11342_v62, %v1946_v26  ;;  %v1821_v26 = vld [vmem:[#allocation2 + $0x94] sm:$0xf]  ;;  %v11364_v62 = vcombine.low %v1975_v38, %v1978_v28  ;;  %v14313_v28 = vld [vmem:[#allocation2 + $0x10] sm:$0xf] }
  0xef   : > { %5207 = vmatmul.mubr.bf16.gmra.mrb[8].mxu0 %v11355_v34  ;;  %v13182_v34 = vld [vmem:[%s16965_s1 + $0x160] sm:$0xff]   ;;  %v11360_v46 = vcombine.low %v1947_v39, %v1950_v40  ;;  %v1823_v39 = vld [vmem:[#allocation2 + $0x9c] sm:$0xe] }
  0xf0   : > { %5214 = vmatprep.mubr.bf16.mxu0 %v13162_v35  ;;  %5344 = vmatpush1.bf16.msra.mxu0 %v13165_v41  ;;  %v1809_v35 = vld [vmem:[#allocation2 + $0x64] sm:$0xf]  ;;  %v1810_v41 = vld [vmem:[#allocation2 + $0x68] sm:$0x1] }
  0xf1   : > { %5345 = vmatprep.subr.bf16.mxu0 %v13386_v1  ;;  %v1953_v42 = vrot.slane %v1809_v35, 5  ;;  %v1825_v40 = vld [vmem:[#allocation2 + $0xa4] sm:$0x1] }
  0xf4   : > { %5346 = vmatpush1.bf16.msra.mxu0 %v13167_v50  ;;  %v1956_v50 = vrot.slane %v1810_v41, 5  ;;  %v1988_v41 = vrot.slane %v1824_v37, 5  ;;  %v2019_v37 = vrot.slane %v14302_v13, 5 }
  0xf5   : > { %5347 = vmatprep.subr.bf16.mxu0 %v13386_v1 }
  0xf7   : > { %5215 = vmatmul.mubr.bf16.gmra.mrb[12].mxu0 %v11356_v57  ;;  %v13187_v57 = vld [vmem:[%s16965_s1 + $0x170] sm:$0xff]  }
  0xf8   : > { %5222 = vmatprep.mubr.bf16.mxu0 %v13164_v58  ;;  %5348 = vmatpush1.bf16.msra.mxu0 %v13170_v27  ;;  %v1955_v58 = vrot.slane %v1953_v42, 4  ;;  %v1954_v27 = vsel %vm14154_vm14, %v11343_v31, %v1953_v42  ;;  %v11348_v31 = vrot.slane %v1823_v39, 9 }
  0xf9   : > { %5349 = vmatprep.subr.bf16.mxu0 %v13386_v1 }
  0xfa   : > { %v1957_v6 = vsel %vm14154_vm14, %v1955_v58, %v1956_v50  ;;  %v1991_v50 = vrot.slane %v1825_v40, 5  ;;  %v1990_v58 = vrot.slane %v1988_v41, 4 }
  0xfb   : > { %v11361_v0 = vcombine.low %v1954_v27, %v1957_v6  ;;  %v1828_v27 = vld [vmem:[#allocation2 + $0xb0] sm:$0x1]  ;;  %v14278_v6 = vld [vmem:[#allocation2 + $0xb4] sm:$0xe] }
  0xfc   : > { %5350 = vmatpush1.bf16.msra.mxu0 %v13172_v10  ;;  %v1962_v10 = vrot.slane %v1960_v61, 4  ;;  %v14276_v61 = vld [vmem:[#allocation2 + $0xb8] sm:$0xf]  ;;  %v1992_v9 = vsel %vm14154_vm14, %v1990_v58, %v1991_v50  ;;  %v11350_v18 = vrot.slane %v14278_v6, 9 }
  0xfd   : > { %5351 = vmatprep.subr.bf16.mxu0 %v13386_v1 }
  0xfe   : > { %v1964_v17 = vsel %vm14154_vm14, %v1962_v10, %v1963_v15  ;;  %v1998_v15 = vrot.slane %v1828_v27, 5 }
  0xff   : > { %5223 = vmatmul.mubr.bf16.gmra.mrb[16].mxu0 %v11357_v29  ;;  %v1815_v29 = vld [vmem:[#allocation2 + $0x7c] sm:$0xf]  ;;  %v11362_v20 = vcombine.low %v1961_v60, %v1964_v17  ;;  %v14291_v60 = vld [vmem:[#allocation2 + $0xc8] sm:$0x1]  ;;  %v11425_v17 = vld [vmem:[#allocation2 + $0xc] sm:$0xf] }
 0x100   : > { %5230 = vmatprep.mubr.bf16.mxu0 %v13166_v48  ;;  %5352 = vmatpush1.bf16.msra.mxu0 %v13174_v30  ;;  %v1967_v48 = vrot.slane %v1815_v29, 5  ;;  %v1816_v30 = vld [vmem:[#allocation2 + $0x80] sm:$0x1]  ;;  %v14287_v29 = vld [vmem:[#allocation2 + $0xc0] sm:$0xe]  ;;  %v2012_v44 = vrot.slane %v14291_v60, 5 }
 0x101   : > { %5353 = vmatprep.subr.bf16.mxu0 %v13386_v1  ;;  %v11351_v43 = vrot.slane %v14287_v29, 9  ;;  %v2335_v56 = vshll.u32 %v11425_v17, 16 }
 0x102   : > { %v1969_v24 = vrot.slane %v1967_v48, 4 }
 0x104   : > { %5354 = vmatpush1.bf16.msra.mxu0 %v13176_v14  ;;  %v1970_v14 = vrot.slane %v1816_v30, 5 }
 0x105   : > { %5355 = vmatprep.subr.bf16.mxu0 %v13386_v1 }
 0x107   : > { %5231 = vmatmul.mubr.bf16.gmra.mrb[20].mxu0 %v11358_v11  ;;  %v1968_v11 = vsel %vm14154_vm14, %v11345_v4, %v1967_v48  ;;  %v14289_v48 = vld [vmem:[#allocation2 + $0xc4] sm:$0xf]  ;;  %v13183_v4 = vld [vmem:[#allocation2 + $0xb4] sm:$0xff]  }
 0x108   : > { %5238 = vmatprep.mubr.bf16.mxu0 %v13168_v53  ;;  %5356 = vmatpush1.bf16.msra.mxu0 %v13178_v36  ;;  %v1971_v53 = vsel %vm14154_vm14, %v1969_v24, %v1970_v14  ;;  %v13177_v36 = vld [vmem:[#allocation2 + $0x90] sm:$0xff]   ;;  %v2009_v14 = vrot.slane %v14289_v48, 5 }
 0x109   : > { %5357 = vmatprep.subr.bf16.mxu0 %v13386_v1  ;;  %v11363_v21 = vcombine.low %v1968_v11, %v1971_v53  ;;  %v14298_v11 = vld [vmem:[#allocation2 + $0xcc] sm:$0xe]  ;;  %v2332_v53 = vshrl.u32 %v11425_v17, 16 }
 0x10a   : > { %v14306_v59 = vrot.slane %v2009_v14, 4  ;;  %v11352_v22 = vrot.slane %v14298_v11, 9 }
 0x10c   : > { %5358 = vmatpush1.bf16.msra.mxu0 %v13180_v23  ;;  %v1981_v23 = vrot.slane %v1821_v26, 5  ;;  %v11428_v26 = vld [vmem:[#allocation2 + $0x18] sm:$0xf] }
 0x10d   : > { %5359 = vmatprep.subr.bf16.mxu0 %v13386_v1  ;;  %v2356_v39 = vshrl.u32 %v11428_v26, 16  ;;  %v2359_v40 = vshll.u32 %v11428_v26, 16  ;;  %v14352_v26 = vld [vmem:[#allocation2 + $0x20] sm:$0x1] }
 0x10f   : > { %5239 = vmatmul.mubr.bf16.gmra.mrb[24].mxu0 %v11359_v32  ;;  %v1820_v32 = vld [vmem:[#allocation2 + $0x90] sm:$0xe]  ;;  %v2361_v27 = vrot.slane %v2359_v40, 5 }
 0x110   : > { %5246 = vmatprep.mubr.bf16.mxu0 %v13169_v33  ;;  %5360 = vmatpush1.bf16.msra.mxu0 %v13182_v34  ;;  %v1822_v33 = vld [vmem:[#allocation2 + $0x98] sm:$0x1]  ;;  %v11347_v25 = vrot.slane %v1820_v32, 9  ;;  %v1983_v34 = vrot.slane %v1981_v23, 4  ;;  %v11427_v32 = vld [vmem:[#allocation2 + $0x14] sm:$0x1] }
 0x111   : > { %5361 = vmatprep.subr.bf16.mxu0 %v13386_v1  ;;  %v1984_v35 = vrot.slane %v1822_v33, 5  ;;  %v2334_v33 = vrot.slane %v2332_v53, 4  ;;  %v2351_v50 = vshll.u32 %v11427_v32, 16 }
 0x112   : > { %v1982_v42 = vsel %vm14154_vm14, %v11347_v25, %v1981_v23 }
 0x114   : > { %5362 = vmatpush1.bf16.msra.mxu0 %v13184_v19  ;;  %v1985_v19 = vsel %vm14154_vm14, %v1983_v34, %v1984_v35  ;;  %v11429_v34 = vld [vmem:[#allocation2 + $0x1c] sm:$0xf] }
 0x115   : > { %5363 = vmatprep.subr.bf16.mxu0 %v13386_v1  ;;  %v11365_v52 = vcombine.low %v1982_v42, %v1985_v19  ;;  %v14319_v42 = vld [vmem:[#allocation2 + $0xc] sm:$0xe]  ;;  %v13185_v19 = vld [vmem:[#allocation2 + $0xc0] sm:$0xff]   ;;  %v2369_v6 = vshrl.u32 %v11429_v34, 16 }
 0x117   : > { %5247 = vmatmul.mubr.bf16.gmra.mrb[28].mxu0 %v11360_v46  ;;  %v1827_v46 = vld [vmem:[#allocation2 + $0xac] sm:$0xf]  ;;  %v2371_v53 = vrot.slane %v2369_v6, 4 }
 0x118   : > { %5254 = vmatprep.mubr.bf16.mxu0 %v13171_v47  ;;  %5364 = vmatpush1.bf16.msra.mxu0 %v13187_v57  ;;  %v13181_v47 = vld [vmem:[#allocation2 + $0xa8] sm:$0xff]   ;;  %v1995_v45 = vrot.slane %v1827_v46, 5  ;;  %v14321_v46 = vld [vmem:[#allocation2 + $0x14] sm:$0x1] }
 0x119   : > { %5365 = vmatprep.subr.bf16.mxu0 %v13386_v1  ;;  %v1826_v57 = vld [vmem:[#allocation2 + $0xa8] sm:$0xe] }
 0x11a   : > { %v11349_v54 = vrot.slane %v1826_v57, 9  ;;  %v1997_v10 = vrot.slane %v1995_v45, 4  ;;  %v14325_v57 = vld [vmem:[#allocation2 + $0x1c] sm:$0xf] }
 0x11c   : > { %5366 = vmatpush1.bf16.msra.mxu0 %v13189_v16  ;;  %v14280_v16 = vld [vmem:[#allocation2 + $0xbc] sm:$0x1]  ;;  %v1996_v23 = vsel %vm14154_vm14, %v11349_v54, %v1995_v45  ;;  %v1999_v38 = vsel %vm14154_vm14, %v1997_v10, %v1998_v15  ;;  %v11430_v10 = vld [vmem:[#allocation2 + $0x20] sm:$0x1] }
 0x11d   : > { %5512 = vmatprep.subr.bf16.mxu0 %v13386_v1  ;;  %v2005_v30 = vrot.slane %v14280_v16, 5 }
 0x11f   : > { %5255 = vmatmul.mubr.bf16.gmra.mrb[32].mxu0 %v11361_v0  ;;  %v2002_v0 = vrot.slane %v14276_v61, 5  ;;  %v2358_v61 = vrot.slane %v2356_v39, 4  ;;  %v2973_v39 = vrot.slane %v14352_v26, 5 }
 0x120   : > { %5262 = vmatprep.mubr.bf16.mxu0 %v13173_v55  ;;  %v1989_v55 = vsel %vm14154_vm14, %v11348_v31, %v1988_v41  ;;  %v11367_v41 = vcombine.low %v1996_v23, %v1999_v38  ;;  %v13186_v23 = vld [vmem:[#allocation2 + $0xcc] sm:$0xff]  }
 0x121   : > { %v2004_v24 = vrot.slane %v2002_v0, 4  ;;  %v2003_v54 = vsel %vm14154_vm14, %v11350_v18, %v2002_v0  ;;  %v2970_v0 = vrot.slane %v14325_v57, 5 }
 0x123   : > { %v2006_v16 = vsel %vm14154_vm14, %v2004_v24, %v2005_v30  ;;  %v2362_v24 = vor.u32 %v2361_v27, %v2358_v61  ;;  %v14357_v32 = vrot.slane %v2970_v0, 4  ;;  %v14378_v61 = vld [vmem:[#allocation2 + $0x24] sm:$0xe]  ;;  %v11433_v27 = vld [vmem:[#allocation2 + $0x2c] sm:$0x1] }
 0x125   : > { %v14360_v40 = vrot.slane %v2362_v24, 4 }
 0x127   : > { %5263 = vmatmul.mubr.bf16.gmra.mrb[36].mxu0 %v11362_v20  ;;  %v11426_v20 = vld [vmem:[#allocation2 + $0x10] sm:$0xf] }
 0x128   : > { %5270 = vmatprep.mubr.bf16.mxu0 %v13175_v5  ;;  %v11366_v5 = vcombine.low %v1989_v55, %v1992_v9  ;;  %v2341_v49 = vshll.u32 %v11426_v20, 16  ;;  %v11551_v55 = vrot.slane %v14319_v42, 9  ;;  %v2966_v9 = vrot.slane %v14321_v46, 5  ;;  %v11438_v46 = vld [vmem:[#allocation2 + $0x40] sm:$0xf] }
 0x12f   : > { %5271 = vmatmul.mubr.bf16.gmra.mrb[40].mxu0 %v11363_v21  ;;  %v2345_v21 = vshrl.u32 %v11426_v20, 16  ;;  %v14343_v20 = vrot.slane %v2351_v50, 5  ;;  %v11434_v50 = vld [vmem:[#allocation2 + $0x30] sm:$0xf] }
 0x130   : > { %5278 = vmatprep.mubr.bf16.mxu0 %v13177_v36  ;;  %v14300_v36 = vld [vmem:[#allocation2 + $0xd0] sm:$0xf] }
 0x131   : > { %v2347_v25 = vrot.slane %v2345_v21, 4  ;;  %v2016_v35 = vrot.slane %v14300_v36, 5  ;;  %v11368_v21 = vcombine.low %v2003_v54, %v2006_v16  ;;  %v14380_v16 = vld [vmem:[#allocation2 + $0x2c] sm:$0x1] }
 0x133   : > { %v14329_v45 = vrot.slane %v2016_v35, 4 }
 0x137   : > { %5279 = vmatmul.mubr.bf16.gmra.mrb[44].mxu0 %v11364_v62  ;;  %v2337_v62 = vrot.slane %v2335_v56, 5  ;;  %v2375_v56 = vshll.u32 %v11430_v10, 16  ;;  %v11435_v10 = vld [vmem:[#allocation2 + $0x34] sm:$0xf] }
 0x138   : > { %5286 = vmatprep.mubr.bf16.mxu0 %v13179_v3  ;;  %v14315_v3 = vrot.slane %v2341_v49, 5  ;;  %v11432_v49 = vld [vmem:[#allocation2 + $0x28] sm:$0xf] }
 0x139   : > { %v2338_v31 = vor.u32 %v2337_v62, %v2334_v33 }
 0x13a   : > { %v2348_v58 = vor.u32 %v2347_v25, %v14315_v3  ;;  %v2389_v25 = vshll.u32 %v11432_v49, 16 }
 0x13b   : > { %v14341_v17 = vrot.slane %v2338_v31, 4  ;;  %v14365_v31 = vld [vmem:[#allocation2 + $0x28] sm:$0xf] }
 0x13c   : > { %v14348_v18 = vrot.slane %v2348_v58, 4  ;;  %v2013_v58 = vsel %vm14154_vm14, %v14306_v59, %v2012_v44  ;;  %v14382_v48 = vrot.slane %v2389_v25, 5  ;;  %v2977_v60 = vrot.slane %v14365_v31, 5  ;;  %v14387_v44 = vld [vmem:[#allocation2 + $0x34] sm:$0xf]  ;;  %v13188_v59 = vld [vmem:[#allocation2 + $0xd8] sm:$0xff]  }
 0x13d   : > { %v2980_v25 = vrot.slane %v14380_v16, 5 }
 0x13f   : > { %5287 = vmatmul.mubr.bf16.gmra.mrb[48].mxu0 %v11365_v52  ;;  %v2365_v52 = vshll.u32 %v11429_v34, 16  ;;  %v2393_v34 = vshrl.u32 %v11432_v49, 16  ;;  %v2413_v49 = vshll.u32 %v11435_v10, 16 }
 0x140   : > { %5294 = vmatprep.mubr.bf16.mxu0 %v13181_v47  ;;  %v2963_v47 = vrot.slane %v14313_v28, 5 }
 0x141   : > { %v14350_v30 = vrot.slane %v2365_v52, 5  ;;  %v2010_v52 = vsel %vm14154_vm14, %v11351_v43, %v2009_v14  ;;  %v2395_v29 = vrot.slane %v2393_v34, 4  ;;  %v2404_v14 = vshrl.u32 %v11434_v50, 16  ;;  %v14394_v34 = vld [vmem:[#allocation2 + $0x38] sm:$0x1] }
 0x142   : > { %v14339_v15 = vrot.slane %v2963_v47, 4  ;;  %v2407_v43 = vshll.u32 %v11434_v50, 16  ;;  %v11369_v24 = vcombine.low %v2010_v52, %v2013_v58  ;;  %v2017_v50 = vsel %vm14154_vm14, %v11352_v22, %v2016_v35  ;;  %v11436_v58 = vld [vmem:[#allocation2 + $0x38] sm:$0x1] }
 0x143   : > { %v2020_v52 = vsel %vm14154_vm14, %v14329_v45, %v2019_v37  ;;  %v14414_v11 = vrot.slane %v2413_v49, 5  ;;  %v2964_v13 = vsel %vm14154_vm14, %v11551_v55, %v2963_v47  ;;  %v11437_v45 = vld [vmem:[#allocation2 + $0x3c] sm:$0xf]  ;;  %v2423_v47 = vshll.u32 %v11436_v58, 16  ;;  %v11439_v49 = vld [vmem:[#allocation2 + $0x44] sm:$0x1] }
 0x144   : > { %v2967_v22 = vsel %vm14154_vm14, %v14339_v15, %v2966_v9  ;;  %v14438_v9 = vld [vmem:[#allocation2 + $0x3c] sm:$0xe]  ;;  %v14440_v15 = vld [vmem:[#allocation2 + $0x40] sm:$0xf] }
 0x145   : > { %v14454_v58 = vrot.slane %v2423_v47, 5 }
 0x147   : > { %5295 = vmatmul.mubr.bf16.gmra.mrb[52].mxu0 %v11366_v5  ;;  %v14345_v5 = vld [vmem:[#allocation2 + $0x18] sm:$0xe] }
 0x148   : > { %5302 = vmatprep.mubr.bf16.mxu0 %v13183_v4  ;;  %v11431_v4 = vld [vmem:[#allocation2 + $0x24] sm:$0xf]  ;;  %v11552_v38 = vrot.slane %v14345_v5, 9 }
 0x149   : > { %v2380_v33 = vshrl.u32 %v11431_v4, 16  ;;  %v2383_v62 = vshll.u32 %v11431_v4, 16  ;;  %v13190_v5 = vld [vmem:[%s16965_s1 + $0x180] sm:$0xff]  }
 0x14a   : > { %v2971_v47 = vsel %vm14154_vm14, %v11552_v38, %v2970_v0 }
 0x14b   : > { %v2382_v6 = vrot.slane %v2380_v33, 4  ;;  %v2385_v54 = vrot.slane %v2383_v62, 5  ;;  %v2396_v33 = vor.u32 %v2395_v29, %v14382_v48  ;;  %v14391_v62 = vld [vmem:[#allocation2 + $0x30] sm:$0xe] }
 0x14d   : > { %v14429_v37 = vrot.slane %v2396_v33, 4  ;;  %v14450_v33 = vld [vmem:[#allocation2 + $0x44] sm:$0x1] }
 0x14f   : > { %5303 = vmatmul.mubr.bf16.gmra.mrb[56].mxu0 %v11367_v41  ;;  %v2372_v41 = vor.u32 %v2371_v53, %v14350_v30  ;;  %v11553_v53 = vrot.slane %v14378_v61, 9  ;;  %v13192_v61 = vld [vmem:[%s16965_s1 + $0x190] sm:$0xff]  }
 0x150   : > { %5310 = vmatprep.mubr.bf16.mxu0 %v13185_v19  ;;  %v14363_v19 = vrot.slane %v2375_v56, 5  ;;  %v2399_v56 = vshll.u32 %v11433_v27, 16  ;;  %v2406_v27 = vrot.slane %v2404_v14, 4  ;;  %v11370_v14 = vcombine.low %v2017_v50, %v2020_v52  ;;  %v11440_v50 = vld [vmem:[#allocation2 + $0x48] sm:$0xf] }
 0x151   : > { %v14384_v4 = vrot.slane %v2372_v41, 4  ;;  %v2984_v41 = vrot.slane %v14387_v44, 5  ;;  %v2452_v42 = vshrl.u32 %v11440_v50, 16  ;;  %v13194_v44 = vld [vmem:[%s16965_s1 + $0x1a0] sm:$0xff]  }
 0x152   : > { %v14412_v36 = vrot.slane %v2399_v56, 5  ;;  %v11569_v56 = vcombine.low %v2964_v13, %v2967_v22  ;;  %v2447_v22 = vshll.u32 %v11439_v49, 16  ;;  %v14485_v49 = vld [vmem:[#allocation2 + $0x4c] sm:$0xf] }
 0x153   : > { %v14434_v28 = vrot.slane %v2984_v41, 4 }
 0x154   : > { %v14483_v26 = vrot.slane %v2447_v22, 5  ;;  %v14493_v22 = vld [vmem:[#allocation2 + $0x50] sm:$0x1] }
 0x157   : > { %5311 = vmatmul.mubr.bf16.gmra.mrb[60].mxu0 %v11368_v21  ;;  %v2417_v21 = vshrl.u32 %v11435_v10, 16  ;;  %v11554_v10 = vrot.slane %v14391_v62, 9 }
 0x158   : > { %5318 = vmatprep.mubr.bf16.mxu0 %v13186_v23  ;;  %v2386_v23 = vor.u32 %v2385_v54, %v2382_v6  ;;  %v2409_v6 = vrot.slane %v2407_v43, 5  ;;  %v14410_v54 = vrot.slane %v2977_v60, 4 }
 0x159   : > { %v2419_v29 = vrot.slane %v2417_v21, 4  ;;  %v2344_v21 = vsel %vm13522_vm9, %v14341_v17, %v14315_v3  ;;  %v2991_v3 = vrot.slane %v14440_v15, 5 }
 0x15a   : > { %v14427_v35 = vrot.slane %v2386_v23, 4  ;;  %v2410_v55 = vor.u32 %v2409_v6, %v2406_v27  ;;  %v2354_v23 = vsel %vm13522_vm9, %v14348_v18, %v14343_v20  ;;  %v2437_v27 = vshll.u32 %v11438_v46, 16  ;;  %v11442_v20 = vld [vmem:[#allocation2 + $0x50] sm:$0x1] }
 0x15b   : > { %v2420_v43 = vor.u32 %v2419_v29, %v14414_v11  ;;  %v2441_v6 = vshrl.u32 %v11438_v46, 16  ;;  %v361_v29 = vld [vmem:[#allocation2 + $0xe0] sm:$0x1]  ;;  %v2974_v46 = vsel %vm14154_vm14, %v14357_v32, %v2973_v39  ;;  %v14481_v0 = vrot.slane %v2991_v3, 4 }
 0x15c   : > { %v14452_v52 = vrot.slane %v2410_v55, 4  ;;  %v11441_v55 = vld [vmem:[#allocation2 + $0x4c] sm:$0xf]  ;;  %v11570_v39 = vcombine.low %v2971_v47, %v2974_v46  ;;  %v14505_v47 = vld [vmem:[#allocation2 + $0x58] sm:$0xf] }
 0x15d   : > { %v14456_v13 = vrot.slane %v2420_v43, 4  ;;  %v11443_v43 = vld [vmem:[#allocation2 + $0x54] sm:$0xf]  ;;  %v2443_v57 = vrot.slane %v2441_v6, 4  ;;  %v2461_v38 = vshll.u32 %v11441_v55, 16  ;;  %v2465_v32 = vshrl.u32 %v11441_v55, 16 }
 0x15e   : > { %v2454_v6 = vrot.slane %v2452_v42, 4  ;;  %v2368_v55 = vsel %vm13522_vm9, %v14360_v40, %v14350_v30  ;;  %v2378_v42 = vsel %vm13522_vm9, %v14384_v4, %v14363_v19  ;;  %v11444_v46 = vld [vmem:[#allocation2 + $0x58] sm:$0xf]  ;;  %v2978_v30 = vsel %vm14154_vm14, %v11553_v53, %v2977_v60 }
 0x15f   : > { %5319 = vmatmul.mubr.bf16.gmra.mrb[64].mxu0 %v11369_v24  ;;  %v2428_v24 = vshrl.u32 %v11437_v45, 16  ;;  %v2981_v40 = vsel %vm14154_vm14, %v14410_v54, %v2980_v25  ;;  %v3001_v53 = vrot.slane %v14493_v22, 5  ;;  %v11445_v25 = vld [vmem:[#allocation2 + $0x5c] sm:$0x1]  ;;  %v2485_v54 = vshll.u32 %v11444_v46, 16 }
 0x160   : > { %5326 = vmatprep.mubr.bf16.mxu0 %v13188_v59  ;;  %v2431_v59 = vshll.u32 %v11437_v45, 16 }
 0x161   : > { %v2430_v17 = vrot.slane %v2428_v24, 4  ;;  %v362_v24 = vsel %vm13480_vm4, 0, %v361_v29 }
 0x162   : > { %v2433_v45 = vrot.slane %v2431_v59, 5  ;;  %v11479_v59 = vcombine.low %v2344_v21, %v2354_v23  ;;  %363 = vst [vmem:[#allocation2 + $0xe0] sm:$0x1] %v362_v24  ;;  %v2476_v21 = vshrl.u32 %v11443_v43, 16  ;;  %v2479_v23 = vshll.u32 %v11443_v43, 16  ;;  %v13191_v24 = vld [vmem:[%s16965_s1 + $0x188] sm:$0xff]  }
 0x163   : > { %v2998_v43 = vrot.slane %v14485_v49, 5 }
 0x164   : > { %v2478_v19 = vrot.slane %v2476_v21, 4  ;;  %v2481_v4 = vrot.slane %v2479_v23, 5  ;;  %v11571_v21 = vcombine.low %v2978_v30, %v2981_v40  ;;  %v14533_v23 = vld [vmem:[#allocation2 + $0x5c] sm:$0x1] }
 0x167   : > { %5327 = vmatmul.mubr.bf16.gmra.mrb[68].mxu0 %v11370_v14  ;;  %v2455_v14 = vshll.u32 %v11440_v50, 16  ;;  %v2434_v50 = vor.u32 %v2433_v45, %v2430_v17  ;;  %v14503_v17 = vrot.slane %v2461_v38, 5  ;;  %v2467_v45 = vrot.slane %v2465_v32, 4  ;;  %v14530_v38 = vld [vmem:[#allocation2 + $0x54] sm:$0xe] }
 0x168   : > { %5367 = vmatprep.mubr.bf16.mxu0 %v11569_v56  ;;  %v14474_v56 = vrot.slane %v2437_v27, 5  ;;  %v14487_v27 = vld [vmem:[#allocation2 + $0x48] sm:$0xe]  ;;  %v3005_v32 = vrot.slane %v14505_v47, 5 }
 0x169   : > { %v2457_v29 = vrot.slane %v2455_v14, 5  ;;  %v14519_v14 = vrot.slane %v2434_v50, 4  ;;  %v11556_v16 = vrot.slane %v14487_v27, 9  ;;  %v14538_v50 = vrot.slane %v2998_v43, 4 }
 0x16a   : > { %v2444_v18 = vor.u32 %v2443_v57, %v14474_v56  ;;  %v11480_v57 = vcombine.low %v2368_v55, %v2378_v42  ;;  %v2495_v55 = vshll.u32 %v11445_v25, 16  ;;  %v13193_v42 = vld [vmem:[%s16965_s1 + $0x198] sm:$0xff]  }
 0x16b   : > { %v2458_v31 = vor.u32 %v2457_v29, %v2454_v6 }
 0x16c   : > { %v14525_v60 = vrot.slane %v2444_v18, 4  ;;  %v2482_v18 = vor.u32 %v2481_v4, %v2478_v19  ;;  %v11557_v19 = vrot.slane %v14530_v38, 9  ;;  %v14556_v4 = vrot.slane %v3005_v32, 4  ;;  %v11457_v38 = vld [vmem:[#allocation2 + $0x8c] sm:$0x1] }
 0x16d   : > { %v14540_v6 = vrot.slane %v2458_v31, 4  ;;  %v3008_v31 = vrot.slane %v14533_v23, 5 }
 0x16f   : > { %5368 = vmatmul.mubr.bf16.vlgmr.msra.gmra.mrb[0].mxu0 %v11479_v59  ;;  %v2471_v59 = vshll.u32 %v11442_v20, 16  ;;  %v2489_v20 = vshrl.u32 %v11444_v46, 16 }
 0x170   : > { %5513 = vmatpush1.bf16.msra.mxu0 %v13190_v5  ;;  %5375 = vmatprep.mubr.bf16.mxu0 %v11570_v39  ;;  %v2468_v5 = vor.u32 %v2467_v45, %v14503_v17  ;;  %v11446_v39 = vld [vmem:[#allocation2 + $0x60] sm:$0xf]  ;;  %v11447_v45 = vld [vmem:[#allocation2 + $0x64] sm:$0xf] }
 0x171   : > { %5514 = vmatprep.subr.bf16.mxu0 %v13386_v1  ;;  %v14542_v29 = vrot.slane %v2471_v59, 5  ;;  %v2500_v46 = vshrl.u32 %v11446_v39, 16  ;;  %v2503_v30 = vshll.u32 %v11446_v39, 16  ;;  %v14565_v59 = vrot.slane %v2485_v54, 5 }
 0x172   : > { %v14551_v40 = vrot.slane %v2468_v5, 4  ;;  %v2491_v25 = vrot.slane %v2489_v20, 4  ;;  %v2985_v5 = vsel %vm14154_vm14, %v11554_v10, %v2984_v41  ;;  %v2509_v54 = vshll.u32 %v11447_v45, 16  ;;  %v14589_v20 = vld [vmem:[#allocation2 + $0x64] sm:$0xf] }
 0x173   : > { %v2502_v62 = vrot.slane %v2500_v46, 4  ;;  %v2505_v39 = vrot.slane %v2503_v30, 5  ;;  %v14592_v41 = vld [vmem:[#allocation2 + $0x60] sm:$0xe]  ;;  %v14594_v10 = vld [vmem:[#allocation2 + $0x68] sm:$0x1] }
 0x174   : > { %5515 = vmatpush1.bf16.msra.mxu0 %v13191_v24  ;;  %v2392_v24 = vsel %vm13522_vm9, %v14427_v35, %v14382_v48  ;;  %v2402_v48 = vsel %vm13522_vm9, %v14429_v37, %v14412_v36  ;;  %v14563_v35 = vrot.slane %v2482_v18, 4  ;;  %v16986_v36 = vrot.slane %v14394_v34, 5  ;;  %v11449_v18 = vld [vmem:[#allocation2 + $0x6c] sm:$0xf]  ;;  %v11448_v30 = vld [vmem:[#allocation2 + $0x68] sm:$0x1] }
 0x175   : > { %5516 = vmatprep.subr.bf16.mxu0 %v13386_v1  ;;  %v11481_v34 = vcombine.low %v2392_v24, %v2402_v48  ;;  %v2513_v46 = vshrl.u32 %v11447_v45, 16  ;;  %v13195_v24 = vld [vmem:[%s16965_s1 + $0x1a8] sm:$0xff]   ;;  %v2506_v48 = vor.u32 %v2505_v39, %v2502_v62  ;;  %v2527_v45 = vshll.u32 %v11449_v18, 16  ;;  %v14644_v39 = vld [vmem:[#allocation2 + $0x70] sm:$0xf] }
 0x176   : > { %v2988_v37 = vsel %vm14154_vm14, %v14434_v28, %v16986_v36  ;;  %v11450_v36 = vld [vmem:[#allocation2 + $0x70] sm:$0xf] }
 0x177   : > { %5376 = vmatmul.mubr.bf16.gmra.mrb[4].mxu0 %v11480_v57  ;;  %v14570_v57 = vld [vmem:[%s16965_s1 + $0x200] sm:$0xff]   ;;  %v11572_v28 = vcombine.low %v2985_v5, %v2988_v37  ;;  %v2524_v5 = vshrl.u32 %v11449_v18, 16  ;;  %v14642_v15 = vrot.slane %v2506_v48, 4  ;;  %v2533_v18 = vshll.u32 %v11450_v36, 16  ;;  %v14648_v48 = vld [vmem:[#allocation2 + $0x6c] sm:$0xe] }
 0x178   : > { %5383 = vmatprep.mubr.bf16.mxu0 %v11571_v21  ;;  %5517 = vmatpush1.bf16.msra.mxu0 %v13192_v61  ;;  %v14584_v61 = vrot.slane %v2495_v55, 5  ;;  %v2492_v21 = vor.u32 %v2491_v25, %v14565_v59  ;;  %v16969_v55 = vrot.slane %v14589_v20, 5  ;;  %v2426_v25 = vsel %vm13522_vm9, %v14456_v13, %v14454_v58 }
 0x179   : > { %5518 = vmatprep.subr.bf16.mxu0 %v13386_v1  ;;  %12849 = vmatprep.subr.bf16.mxu1 %v14570_v57  ;;  %v16987_v58 = vrot.slane %v14438_v9, 9  ;;  %v13196_v9 = vld [vmem:[%s16965_s1 + $0x1b0] sm:$0xff]  }
 0x17a   : > { %12857 = vmatpush3.bf16.msra.mxu1 %v14570_v57  ;;  %v14611_v37 = vrot.slane %v2492_v21, 4  ;;  %v2515_v21 = vrot.slane %v2513_v46, 4 }
 0x17b   : > { %v2992_v13 = vsel %vm14154_vm14, %v16987_v58, %v2991_v3  ;;  %v2519_v3 = vshll.u32 %v11448_v30, 16  ;;  %v14650_v30 = vld [vmem:[#allocation2 + $0x74] sm:$0x1] }
 0x17c   : > { %5519 = vmatpush1.bf16.msra.mxu0 %v13193_v42  ;;  %v2416_v42 = vsel %vm13522_vm9, %v14452_v52, %v14414_v11  ;;  %v13208_v11 = vld [vmem:[%s16965_s1 + $0x208] sm:$0xff]   ;;  %v13209_v52 = vld [vmem:[%s16965_s1 + $0x210] sm:$0xff]  }
 0x17d   : > { %5520 = vmatprep.subr.bf16.mxu0 %v13386_v1  ;;  %12850 = vmatprep.subr.bf16.mxu1 %v13208_v11  ;;  %v11482_v58 = vcombine.low %v2416_v42, %v2426_v25  ;;  %v11451_v42 = vld [vmem:[#allocation2 + $0x74] sm:$0x1]  ;;  %v14653_v25 = vrot.slane %v2533_v18, 5 }
 0x17e   : > { %12858 = vmatpush3.bf16.msra.mxu1 %v13208_v11 }
 0x17f   : > { %5384 = vmatmul.mubr.bf16.gmra.mrb[8].mxu0 %v11481_v34  ;;  %v14615_v34 = vrot.slane %v2509_v54, 5  ;;  %12851 = vmatprep.subr.bf16.mxu1 %v13209_v52 }
 0x180   : > { %5391 = vmatprep.mubr.bf16.mxu0 %v11572_v28  ;;  %5521 = vmatpush1.bf16.msra.mxu0 %v13194_v44  ;;  %v16988_v44 = vrot.slane %v14450_v33, 5  ;;  %v14637_v28 = vrot.slane %v16969_v55, 4  ;;  %v2537_v33 = vshrl.u32 %v11450_v36, 16  ;;  %v11452_v55 = vld [vmem:[#allocation2 + $0x78] sm:$0xf]  ;;  %v3019_v36 = vrot.slane %v14644_v39, 5 }
 0x181   : > { %5522 = vmatprep.subr.bf16.mxu0 %v13386_v1  ;;  %v2516_v46 = vor.u32 %v2515_v21, %v14615_v34  ;;  %v2548_v11 = vshrl.u32 %v11452_v55, 16  ;;  %v13197_v21 = vld [vmem:[%s16965_s1 + $0x1b8] sm:$0xff]  }
 0x182   : > { %v2995_v54 = vsel %vm14154_vm14, %v14481_v0, %v16988_v44  ;;  %v2526_v0 = vrot.slane %v2524_v5, 4  ;;  %v2529_v44 = vrot.slane %v2527_v45, 5  ;;  %v2450_v5 = vsel %vm13522_vm9, %v14525_v60, %v14483_v26  ;;  %12859 = vmatpush3.bf16.msra.mxu1 %v13209_v52 }
 0x183   : > { %v11573_v62 = vcombine.low %v2992_v13, %v2995_v54  ;;  %v13211_v13 = vld [vmem:[%s16965_s1 + $0x218] sm:$0xff]   ;;  %v2539_v54 = vrot.slane %v2537_v33, 4  ;;  %v2999_v26 = vsel %vm14154_vm14, %v11556_v16, %v2998_v43  ;;  %v3002_v60 = vsel %vm14154_vm14, %v14538_v50, %v3001_v53 }
 0x184   : > { %5523 = vmatpush1.bf16.msra.mxu0 %v13195_v24  ;;  %v2440_v24 = vsel %vm13522_vm9, %v14519_v14, %v14474_v56  ;;  %v2530_v45 = vor.u32 %v2529_v44, %v2526_v0  ;;  %v2551_v56 = vshll.u32 %v11452_v55, 16  ;;  %v13212_v14 = vld [vmem:[%s16965_s1 + $0x220] sm:$0xff]   ;;  %v14685_v55 = vrot.slane %v2519_v3, 5  ;;  %12852 = vmatprep.subr.bf16.mxu1 %v13211_v13  ;;  %v11453_v43 = vld [vmem:[#allocation2 + $0x7c] sm:$0xf] }
 0x185   : > { %5524 = vmatprep.subr.bf16.mxu0 %v13386_v1  ;;  %v11483_v52 = vcombine.low %v2440_v24, %v2450_v5  ;;  %v14694_v22 = vrot.slane %v3019_v36, 4  ;;  %v2543_v53 = vshll.u32 %v11451_v42, 16  ;;  %v2550_v50 = vrot.slane %v2548_v11, 4  ;;  %v14702_v0 = vld [vmem:[#allocation2 + $0x78] sm:$0xe] }
 0x186   : > { %v14696_v16 = vrot.slane %v2530_v45, 4  ;;  %12860 = vmatpush3.bf16.msra.mxu1 %v13211_v13  ;;  %v11574_v3 = vcombine.low %v2999_v26, %v3002_v60  ;;  %v2540_v18 = vor.u32 %v2539_v54, %v14653_v25  ;;  %v2553_v33 = vrot.slane %v2551_v56, 5  ;;  %v14704_v44 = vld [vmem:[#allocation2 + $0x80] sm:$0x1]  ;;  %v11455_v5 = vld [vmem:[#allocation2 + $0x84] sm:$0xf] }
 0x187   : > { %5392 = vmatmul.mubr.bf16.gmra.mrb[12].mxu0 %v11482_v58  ;;  %v13198_v58 = vld [vmem:[%s16965_s1 + $0x1c0] sm:$0xff]   ;;  %12853 = vmatprep.subr.bf16.mxu1 %v13212_v14  ;;  %v2557_v24 = vshll.u32 %v11453_v43, 16  ;;  %v2464_v45 = vsel %vm13522_vm9, %v14540_v6, %v14503_v17  ;;  %v2561_v11 = vshrl.u32 %v11453_v43, 16  ;;  %v13214_v13 = vld [vmem:[%s16965_s1 + $0x228] sm:$0xff]   ;;  %v2474_v54 = vsel %vm13522_vm9, %v14551_v40, %v14542_v29  ;;  %v13215_v6 = vld [vmem:[%s16965_s1 + $0x230] sm:$0xff]  }
 0x188   : > { %5399 = vmatprep.mubr.bf16.mxu0 %v11573_v62  ;;  %5525 = vmatpush1.bf16.msra.mxu0 %v13196_v9  ;;  %v14683_v62 = vrot.slane %v2516_v46, 4  ;;  %v14690_v9 = vld [vmem:[#allocation2 + $0x7c] sm:$0xf]  ;;  %v11454_v42 = vld [vmem:[#allocation2 + $0x80] sm:$0x1]  ;;  %v14721_v56 = vrot.slane %v2543_v53, 5  ;;  %v2554_v26 = vor.u32 %v2553_v33, %v2550_v50  ;;  %v3006_v29 = vsel %vm14154_vm14, %v11557_v19, %v3005_v32 }
 0x189   : > { %5526 = vmatprep.subr.bf16.mxu0 %v13386_v1  ;;  %v16970_v46 = vrot.slane %v14690_v9, 5  ;;  %v13199_v17 = vld [vmem:[%s16965_s1 + $0x1c8] sm:$0xff]   ;;  %v3009_v40 = vsel %vm14154_vm14, %v14556_v4, %v3008_v31  ;;  %v2572_v60 = vshrl.u32 %v11455_v5, 16  ;;  %v2575_v19 = vshll.u32 %v11455_v5, 16  ;;  %v13200_v33 = vld [vmem:[%s16965_s1 + $0x1d0] sm:$0xff]  }
 0x18a   : > { %12861 = vmatpush3.bf16.msra.mxu1 %v13212_v14  ;;  %v2567_v14 = vshll.u32 %v11454_v42, 16  ;;  %v11456_v32 = vld [vmem:[#allocation2 + $0x88] sm:$0xf]  ;;  %v11484_v23 = vcombine.low %v2464_v45, %v2474_v54  ;;  %v14747_v43 = vrot.slane %v2557_v24, 5  ;;  %v2563_v53 = vrot.slane %v2561_v11, 4 }
 0x18b   : > { %12854 = vmatprep.subr.bf16.mxu1 %v13214_v13  ;;  %v14744_v47 = vrot.slane %v16970_v46, 4  ;;  %v14749_v4 = vld [vmem:[#allocation2 + $0x88] sm:$0xf]  ;;  %v11575_v31 = vcombine.low %v3006_v29, %v3009_v40  ;;  %v2488_v50 = vsel %vm13522_vm9, %v14563_v35, %v14565_v59  ;;  %v14766_v24 = vrot.slane %v2572_v60, 4  ;;  %v11726_v35 = vld [vmem:[#allocation2 + $0x4c] sm:$0xf] }
 0x18c   : > { %5527 = vmatpush1.bf16.msra.mxu0 %v13197_v21  ;;  %v14719_v21 = vrot.slane %v2540_v18, 4  ;;  %v14759_v18 = vrot.slane %v2554_v26, 4  ;;  %v2581_v42 = vshll.u32 %v11456_v32, 16  ;;  %v2585_v5 = vshrl.u32 %v11456_v32, 16  ;;  %v11729_v45 = vld [vmem:[#allocation2 + $0x58] sm:$0xf] }
 0x18d   : > { %5528 = vmatprep.subr.bf16.mxu0 %v13386_v1  ;;  %v14769_v59 = vrot.slane %v2575_v19, 5  ;;  %v16990_v54 = vrot.slane %v14592_v41, 9  ;;  %v14780_v29 = vld [vmem:[#allocation2 + $0x84] sm:$0xe]  ;;  %v14782_v40 = vld [vmem:[#allocation2 + $0x8c] sm:$0x1] }
 0x18e   : > { %12862 = vmatpush3.bf16.msra.mxu1 %v13214_v13  ;;  %v16989_v13 = vrot.slane %v14589_v20, 5  ;;  %v13217_v60 = vld [vmem:[%s16965_s1 + $0x238] sm:$0xff]   ;;  %v11725_v32 = vld [vmem:[#allocation2 + $0x48] sm:$0xe]  ;;  %v11727_v20 = vld [vmem:[#allocation2 + $0x50] sm:$0x1] }
 0x18f   : > { %5400 = vmatmul.mubr.bf16.gmra.mrb[16].mxu0 %v11483_v52  ;;  %12855 = vmatprep.subr.bf16.mxu1 %v13215_v6  ;;  %v16991_v41 = vrot.slane %v14594_v10, 5  ;;  %v11730_v10 = vld [vmem:[#allocation2 + $0x5c] sm:$0x1]  ;;  %v11561_v46 = vrot.slane %v14780_v29, 9  ;;  %v3036_v27 = vrot.slane %v14782_v40, 5 }
 0x190   : > { %5407 = vmatprep.mubr.bf16.mxu0 %v11574_v3  ;;  %5529 = vmatpush1.bf16.msra.mxu0 %v13198_v58  ;;  %v2498_v3 = vsel %vm13522_vm9, %v14611_v37, %v14584_v61  ;;  %v14764_v58 = vrot.slane %v2567_v14, 5  ;;  %v14771_v61 = vld [vmem:[#allocation2 + $0x90] sm:$0xf]  ;;  %v4057_v37 = vrot.slane %v11726_v35, 5  ;;  %v3013_v26 = vsel %vm14154_vm14, %v16990_v54, %v16989_v13 }
 0x191   : > { %5530 = vmatprep.subr.bf16.mxu0 %v13386_v1  ;;  %v11485_v11 = vcombine.low %v2488_v50, %v2498_v3  ;;  %v3033_v14 = vrot.slane %v14749_v4, 5  ;;  %v3016_v19 = vsel %vm14154_vm14, %v14637_v28, %v16991_v41  ;;  %v4060_v50 = vrot.slane %v11727_v20, 5  ;;  %v11728_v3 = vld [vmem:[#allocation2 + $0x54] sm:$0xe] }
 0x192   : > { %12863 = vmatpush3.bf16.msra.mxu1 %v13215_v6  ;;  %v4059_v6 = vrot.slane %v4057_v37, 4  ;;  %v14796_v35 = vrot.slane %v2581_v42, 5  ;;  %v2587_v13 = vrot.slane %v2585_v5, 4  ;;  %v4064_v54 = vrot.slane %v11729_v45, 5  ;;  %v11459_v28 = vld [vmem:[#allocation2 + $0x94] sm:$0xf] }
 0x193   : > { %12856 = vmatprep.subr.bf16.mxu1 %v13217_v60  ;;  %v4067_v20 = vrot.slane %v11730_v10, 5  ;;  %v11576_v45 = vcombine.low %v3013_v26, %v3016_v19  ;;  %v2599_v49 = vshll.u32 %v14771_v61, 16  ;;  %v14824_v19 = vld [vmem:[#allocation2 + $0x90] sm:$0xe] }
 0x194   : > { %5531 = vmatpush1.bf16.msra.mxu0 %v13199_v17  ;;  %v2564_v17 = vor.u32 %v2563_v53, %v14747_v43  ;;  %v11771_v53 = vrot.slane %v11725_v32, 9  ;;  %v4061_v32 = vsel %vm14154_vm14, %v4059_v6, %v4060_v50  ;;  %v2605_v50 = vshll.u32 %v11459_v28, 16 }
 0x195   : > { %5532 = vmatprep.subr.bf16.mxu0 %v13386_v1 }
 0x196   : > { %v4058_v41 = vsel %vm14154_vm14, %v11771_v53, %v4057_v37  ;;  %v14804_v42 = vrot.slane %v2564_v17, 4  ;;  %12864 = vmatpush3.bf16.msra.mxu1 %v13217_v60  ;;  %v13202_v37 = vld [vmem:[%s16965_s1 + $0x1e0] sm:$0xff]   ;;  %v14816_v17 = vrot.slane %v3033_v14, 4  ;;  %v2578_v60 = vor.u32 %v14769_v59, %v14766_v24 }
 0x197   : > { %5408 = vmatmul.mubr.bf16.gmra.mrb[20].mxu0 %v11484_v23  ;;  %v13201_v23 = vld [vmem:[%s16965_s1 + $0x1d8] sm:$0xff]   ;;  %v11789_v5 = vcombine.low %v4058_v41, %v4061_v32  ;;  %v2591_v53 = vshll.u32 %v11457_v38, 16  ;;  %v2512_v38 = vsel %vm13522_vm9, %v14642_v15, %v14615_v34  ;;  %v2522_v24 = vsel %vm13522_vm9, %v14683_v62, %v14685_v55  ;;  %v11462_v41 = vld [vmem:[#allocation2 + $0xa0] sm:$0xf] }
 0x198   : > { %5415 = vmatprep.mubr.bf16.mxu0 %v11575_v31  ;;  %5533 = vmatpush1.bf16.msra.mxu0 %v13200_v33  ;;  %v11772_v31 = vrot.slane %v11728_v3, 9  ;;  %v2596_v33 = vshrl.u32 %v14771_v61, 16  ;;  %v4066_v3 = vrot.slane %v4064_v54, 4  ;;  %v2588_v61 = vor.u32 %v2587_v13, %v14796_v35 }
 0x199   : > { %5534 = vmatprep.subr.bf16.mxu0 %v13386_v1  ;;  %12773 = vmatprep.mubr.bf16.mxu1 %v11789_v5  ;;  %v2601_v59 = vrot.slane %v2599_v49, 5  ;;  %v16993_v34 = vrot.slane %v14650_v30, 5  ;;  %v2609_v55 = vshrl.u32 %v11459_v28, 16  ;;  %v14854_v49 = vrot.slane %v2578_v60, 4  ;;  %v13204_v5 = vld [vmem:[%s16965_s1 + $0x1f0] sm:$0xff]  }
 0x19a   : > { %v4065_v52 = vsel %vm14154_vm14, %v11772_v31, %v4064_v54  ;;  %v4068_v26 = vsel %vm14154_vm14, %v4066_v3, %v4067_v20  ;;  %v2598_v6 = vrot.slane %v2596_v33, 4  ;;  %v14828_v31 = vld [vmem:[#allocation2 + $0x98] sm:$0x1]  ;;  %v14856_v39 = vrot.slane %v2588_v61, 4  ;;  %v11461_v54 = vld [vmem:[#allocation2 + $0x9c] sm:$0xf] }
 0x19b   : > { %v11790_v10 = vcombine.low %v4065_v52, %v4068_v26  ;;  %v13203_v52 = vld [vmem:[%s16965_s1 + $0x1e8] sm:$0xff]   ;;  %v3023_v15 = vsel %vm14154_vm14, %v14694_v22, %v16993_v34  ;;  %v11486_v30 = vcombine.low %v2512_v38, %v2522_v24  ;;  %v11460_v33 = vld [vmem:[#allocation2 + $0x98] sm:$0x1]  ;;  %v2536_v22 = vsel %vm13522_vm9, %v14696_v16, %v14653_v25 }
 0x19c   : > { %5535 = vmatpush1.bf16.msra.mxu0 %v13201_v23  ;;  %v14826_v23 = vld [vmem:[#allocation2 + $0x94] sm:$0xf]  ;;  %v3043_v28 = vrot.slane %v14828_v31, 5  ;;  %v2602_v20 = vor.u32 %v2601_v59, %v2598_v6  ;;  %v2620_v60 = vshrl.u32 %v11461_v54, 16  ;;  %v2615_v25 = vshll.u32 %v11460_v33, 16 }
 0x19d   : > { %5536 = vmatprep.subr.bf16.mxu0 %v13386_v1  ;;  %v3040_v62 = vrot.slane %v14826_v23, 5  ;;  %12774 = vmatmul.mubr.bf16.vlgmr.msra.gmra.mrb[0].mxu1 %v11790_v10  ;;  %v2623_v16 = vshll.u32 %v11461_v54, 16  ;;  %v2629_v26 = vshll.u32 %v11462_v41, 16  ;;  %v11735_v6 = vld [vmem:[#allocation2 + $0x70] sm:$0xf]  ;;  %v2546_v10 = vsel %vm13522_vm9, %v14719_v21, %v14721_v56 }
 0x19e   : > { %v16994_v38 = vrot.slane %v14690_v9, 5  ;;  %v2633_v59 = vshrl.u32 %v11462_v41, 16  ;;  %v16996_v34 = vrot.slane %v14704_v44, 5  ;;  %v13205_v9 = vld [vmem:[%s16965_s1 + $0x1f8] sm:$0xff]   ;;  %v14894_v54 = vrot.slane %v2602_v20, 4 }
 0x19f   : > { %5416 = vmatmul.mubr.bf16.gmra.mrb[24].mxu0 %v11485_v11  ;;  %v16992_v11 = vrot.slane %v14648_v48, 9  ;;  %v14858_v48 = vrot.slane %v2591_v53, 5  ;;  %v14871_v3 = vrot.slane %v3040_v62, 4  ;;  %v11732_v53 = vld [vmem:[#allocation2 + $0x64] sm:$0xf] }
 0x1a0   : > { %5423 = vmatprep.mubr.bf16.mxu0 %v11576_v45  ;;  %5537 = vmatpush1.bf16.msra.mxu0 %v13202_v37  ;;  %v14873_v45 = vrot.slane %v2605_v50, 5  ;;  %v2611_v37 = vrot.slane %v2609_v55, 4  ;;  %v4071_v61 = vrot.slane %v11732_v53, 5  ;;  %v16995_v50 = vrot.slane %v14702_v0, 9  ;;  %v11734_v55 = vld [vmem:[#allocation2 + $0x6c] sm:$0xe] }
 0x1a1   : > { %v3020_v13 = vsel %vm14154_vm14, %v16992_v11, %v3019_v36  ;;  %5538 = vmatprep.subr.bf16.mxu0 %v13386_v1  ;;  %v11562_v36 = vrot.slane %v14824_v19, 9  ;;  %v11733_v11 = vld [vmem:[#allocation2 + $0x68] sm:$0x1]  ;;  %v11736_v33 = vld [vmem:[#allocation2 + $0x74] sm:$0x1]  ;;  %v11774_v44 = vrot.slane %v11734_v55, 9 }
 0x1a2   : > { %v11577_v32 = vcombine.low %v3020_v13, %v3023_v15  ;;  %v3027_v24 = vsel %vm14154_vm14, %v16995_v50, %v16994_v38  ;;  %v4078_v13 = vrot.slane %v11735_v6, 5  ;;  %v3030_v15 = vsel %vm14154_vm14, %v14744_v47, %v16996_v34  ;;  %v11463_v50 = vld [vmem:[#allocation2 + $0xa4] sm:$0x1]  ;;  %v11740_v19 = vld [vmem:[#allocation2 + $0x84] sm:$0xe] }
 0x1a3   : > { %v4073_v21 = vrot.slane %v4071_v61, 4  ;;  %v4074_v56 = vrot.slane %v11733_v11, 5  ;;  %v2625_v47 = vrot.slane %v2623_v16, 5  ;;  %v4081_v6 = vrot.slane %v11736_v33, 5 }
 0x1a4   : > { %5539 = vmatpush1.bf16.msra.mxu0 %v13203_v52  ;;  %v11731_v52 = vld [vmem:[#allocation2 + $0x60] sm:$0xe]  ;;  %v4080_v41 = vrot.slane %v4078_v13, 4  ;;  %v11487_v38 = vcombine.low %v2536_v22, %v2546_v10  ;;  %v2612_v20 = vor.u32 %v2611_v37, %v14873_v45  ;;  %v11578_v11 = vcombine.low %v3027_v24, %v3030_v15  ;;  %v14920_v10 = vld [vmem:[#allocation2 + $0xa4] sm:$0x1] }
 0x1a5   : > { %5540 = vmatprep.subr.bf16.mxu0 %v13386_v1  ;;  %v11773_v0 = vrot.slane %v11731_v52, 9  ;;  %v4075_v53 = vsel %vm14154_vm14, %v4073_v21, %v4074_v56  ;;  %v4079_v52 = vsel %vm14154_vm14, %v11774_v44, %v4078_v13  ;;  %v14906_v34 = vrot.slane %v2629_v26, 5  ;;  %v11464_v15 = vld [vmem:[#allocation2 + $0xa8] sm:$0xf] }
 0x1a6   : > { %v2635_v55 = vrot.slane %v2633_v59, 4  ;;  %v4082_v16 = vsel %vm14154_vm14, %v4080_v41, %v4081_v6  ;;  %v2560_v22 = vsel %vm13522_vm9, %v14759_v18, %v14747_v43  ;;  %v2570_v37 = vsel %vm13522_vm9, %v14804_v42, %v14764_v58 }
 0x1a7   : > { %5424 = vmatmul.mubr.bf16.gmra.mrb[28].mxu0 %v11486_v30  ;;  %v2622_v30 = vrot.slane %v2620_v60, 4  ;;  %v11792_v26 = vcombine.low %v4079_v52, %v4082_v16  ;;  %v14923_v24 = vrot.slane %v2615_v25, 5  ;;  %v14926_v43 = vrot.slane %v2612_v20, 4  ;;  %v11741_v20 = vld [vmem:[#allocation2 + $0x88] sm:$0xf] }
 0x1a8   : > { %5431 = vmatprep.mubr.bf16.mxu0 %v11577_v32  ;;  %5541 = vmatpush1.bf16.msra.mxu0 %v13204_v5  ;;  %v14897_v32 = vld [vmem:[#allocation2 + $0xa0] sm:$0xf]  ;;  %v4072_v5 = vsel %vm14154_vm14, %v11773_v0, %v4071_v61  ;;  %v14918_v61 = vld [vmem:[#allocation2 + $0x9c] sm:$0xe]  ;;  %v2639_v18 = vshll.u32 %v11463_v50, 16  ;;  %v11488_v58 = vcombine.low %v2560_v22, %v2570_v37  ;;  %v2636_v42 = vor.u32 %v2635_v55, %v14906_v34 }
 0x1a9   : > { %5542 = vmatprep.subr.bf16.mxu0 %v13386_v1  ;;  %v11791_v60 = vcombine.low %v4072_v5, %v4075_v53  ;;  %v3047_v59 = vrot.slane %v14897_v32, 5  ;;  %v2626_v13 = vor.u32 %v2625_v47, %v2622_v30  ;;  %v3037_v25 = vsel %vm14154_vm14, %v14816_v17, %v3036_v27  ;;  %v11467_v53 = vld [vmem:[#allocation2 + $0xb4] sm:$0xf]  ;;  %v11739_v55 = vld [vmem:[#allocation2 + $0x80] sm:$0x1] }
 0x1aa   : > { %v2644_v0 = vshrl.u32 %v11464_v15, 16  ;;  %v2647_v21 = vshll.u32 %v11464_v15, 16  ;;  %v11563_v56 = vrot.slane %v14918_v61, 9  ;;  %v3050_v4 = vrot.slane %v14920_v10, 5 }
 0x1ab   : > { %12777 = vmatprep.mubr.bf16.mxu1 %v11791_v60  ;;  %v14943_v30 = vrot.slane %v3047_v59, 4  ;;  %v14946_v29 = vrot.slane %v2626_v13, 4  ;;  %v2594_v27 = vsel %vm13522_vm9, %v14856_v39, %v14858_v48  ;;  %v14956_v40 = vrot.slane %v2639_v18, 5  ;;  %v11468_v39 = vld [vmem:[#allocation2 + $0xb8] sm:$0xf] }
 0x1ac   : > { %5543 = vmatpush1.bf16.msra.mxu0 %v13205_v9  ;;  %12778 = vmatmul.mubr.bf16.gmra.mrb[4].mxu1 %v11792_v26  ;;  %v11465_v9 = vld [vmem:[#allocation2 + $0xac] sm:$0xf]  ;;  %v14960_v44 = vrot.slane %v2636_v42, 4  ;;  %v14962_v47 = vrot.slane %v2644_v0, 4  ;;  %v14964_v5 = vrot.slane %v2647_v21, 5  ;;  %v3041_v50 = vsel %vm14154_vm14, %v11562_v36, %v3040_v62 }
 0x1ad   : > { %12749 = vmatprep.subr.bf16.mxu0 %v14570_v57  ;;  %v3034_v57 = vsel %vm14154_vm14, %v11561_v46, %v3033_v14  ;;  %v2584_v46 = vsel %vm13522_vm9, %v14854_v49, %v14796_v35  ;;  %v14958_v14 = vld [vmem:[#allocation2 + $0xac] sm:$0xf]  ;;  %v2653_v17 = vshll.u32 %v11465_v9, 16  ;;  %v2657_v41 = vshrl.u32 %v11465_v9, 16  ;;  %v11738_v35 = vld [vmem:[#allocation2 + $0x7c] sm:$0xf] }
 0x1ae   : > { %v11579_v33 = vcombine.low %v3034_v57, %v3037_v25  ;;  %v11489_v49 = vcombine.low %v2584_v46, %v2594_v27  ;;  %v3054_v6 = vrot.slane %v14958_v14, 5  ;;  %v4085_v48 = vrot.slane %v11738_v35, 5  ;;  %v11742_v62 = vld [vmem:[#allocation2 + $0x8c] sm:$0x1]  ;;  %v11536_v18 = vld [vmem:[#allocation2 + $0xa8] sm:$0xe] }
 0x1af   : > { %5432 = vmatmul.mubr.bf16.gmra.mrb[32].mxu0 %v11487_v38  ;;  %v11466_v38 = vld [vmem:[#allocation2 + $0xb0] sm:$0x1]  ;;  %v3044_v60 = vsel %vm14154_vm14, %v14871_v3, %v3043_v28  ;;  %v14978_v52 = vrot.slane %v2653_v17, 5  ;;  %v4092_v16 = vrot.slane %v11741_v20, 5  ;;  %v2668_v22 = vshrl.u32 %v11467_v53, 16 }
 0x1b0   : > { %5439 = vmatprep.mubr.bf16.mxu0 %v11578_v11  ;;  %v11737_v11 = vld [vmem:[#allocation2 + $0x78] sm:$0xe]  ;;  %v4087_v23 = vrot.slane %v4085_v48, 4  ;;  %v4088_v26 = vrot.slane %v11739_v55, 5  ;;  %v2671_v13 = vshll.u32 %v11467_v53, 16  ;;  %v2677_v15 = vshll.u32 %v11468_v39, 16 }
 0x1b1   : > { %v11775_v37 = vrot.slane %v11737_v11, 9  ;;  %v11776_v36 = vrot.slane %v11740_v19, 9  ;;  %v4094_v31 = vrot.slane %v4092_v16, 4  ;;  %v4095_v42 = vrot.slane %v11742_v62, 5  ;;  %v11538_v27 = vld [vmem:[#allocation2 + $0xb0] sm:$0x1] }
 0x1b2   : > { %v4089_v3 = vsel %vm14154_vm14, %v4087_v23, %v4088_v26  ;;  %v2659_v9 = vrot.slane %v2657_v41, 4  ;;  %v2663_v57 = vshll.u32 %v11466_v38, 16  ;;  %v11580_v21 = vcombine.low %v3041_v50, %v3044_v60  ;;  %v14990_v17 = vld [vmem:[#allocation2 + $0xb8] sm:$0xf]  ;;  %v11471_v26 = vld [vmem:[#allocation2 + $0xc4] sm:$0xf] }
 0x1b3   : > { %v4086_v28 = vsel %vm14154_vm14, %v11775_v37, %v4085_v48  ;;  %v4093_v0 = vsel %vm14154_vm14, %v11776_v36, %v4092_v16  ;;  %v2608_v46 = vsel %vm13522_vm9, %v14894_v54, %v14873_v45  ;;  %v2618_v41 = vsel %vm13522_vm9, %v14926_v43, %v14923_v24  ;;  %v15000_v48 = vld [vmem:[#allocation2 + $0xb4] sm:$0xe]  ;;  %v11469_v45 = vld [vmem:[#allocation2 + $0xbc] sm:$0x1] }
 0x1b4   : > { %v11793_v25 = vcombine.low %v4086_v28, %v4089_v3  ;;  %v2670_v53 = vrot.slane %v2668_v22, 4  ;;  %v2673_v35 = vrot.slane %v2671_v13, 5  ;;  %v15002_v54 = vrot.slane %v2677_v15, 5  ;;  %v11744_v36 = vld [vmem:[#allocation2 + $0x94] sm:$0xf] }
 0x1b5   : > { %v11564_v50 = vrot.slane %v11536_v18, 9  ;;  %v2660_v60 = vor.u32 %v2659_v9, %v14978_v52  ;;  %v3061_v11 = vrot.slane %v14990_v17, 5  ;;  %v11490_v24 = vcombine.low %v2608_v46, %v2618_v41  ;;  %v15046_v28 = vld [vmem:[#allocation2 + $0xc4] sm:$0xf] }
 0x1b6   : > { %12781 = vmatprep.mubr.bf16.mxu1 %v11793_v25  ;;  %v3048_v43 = vsel %vm14154_vm14, %v11563_v56, %v3047_v59  ;;  %v2674_v55 = vor.u32 %v2673_v35, %v2670_v53  ;;  %v2687_v16 = vshll.u32 %v11469_v45, 16  ;;  %v3056_v22 = vrot.slane %v3054_v6, 4  ;;  %v11470_v56 = vld [vmem:[#allocation2 + $0xc0] sm:$0xf]  ;;  %v11745_v25 = vld [vmem:[#allocation2 + $0x98] sm:$0x1] }
 0x1b7   : > { %5440 = vmatmul.mubr.bf16.gmra.mrb[36].mxu0 %v11488_v58  ;;  %v2681_v58 = vshrl.u32 %v11468_v39, 16  ;;  %v2650_v39 = vor.u32 %v14964_v5, %v14962_v47  ;;  %v15012_v47 = vld [vmem:[#allocation2 + $0xbc] sm:$0x1]  ;;  %v3051_v5 = vsel %vm14154_vm14, %v14943_v30, %v3050_v4  ;;  %v15023_v61 = vrot.slane %v2663_v57, 5  ;;  %v11743_v57 = vld [vmem:[#allocation2 + $0x90] sm:$0xe] }
 0x1b8   : > { %5447 = vmatprep.mubr.bf16.mxu0 %v11579_v33  ;;  %v4096_v33 = vsel %vm14154_vm14, %v4094_v31, %v4095_v42  ;;  %v15026_v37 = vrot.slane %v2660_v60, 4  ;;  %v11565_v10 = vrot.slane %v15000_v48, 9  ;;  %v3063_v30 = vrot.slane %v3061_v11, 4  ;;  %v11747_v42 = vld [vmem:[#allocation2 + $0xa0] sm:$0xf] }
 0x1b9   : > { %v11794_v38 = vcombine.low %v4093_v0, %v4096_v33  ;;  %v2683_v20 = vrot.slane %v2681_v58, 4  ;;  %v15021_v32 = vrot.slane %v2650_v39, 4  ;;  %v3064_v4 = vrot.slane %v15012_v47, 5  ;;  %v11748_v53 = vld [vmem:[#allocation2 + $0xa4] sm:$0x1] }
 0x1ba   : > { %v11581_v23 = vcombine.low %v3048_v43, %v3051_v5  ;;  %v15032_v19 = vrot.slane %v2674_v55, 4  ;;  %v15034_v13 = vrot.slane %v2687_v16, 5  ;;  %v2692_v15 = vshrl.u32 %v11470_v56, 16  ;;  %v11474_v47 = vld [vmem:[#allocation2 + $0xd0] sm:$0xf] }
 0x1bb   : > { %12782 = vmatmul.mubr.bf16.gmra.mrb[8].mxu1 %v11794_v38  ;;  %v2684_v59 = vor.u32 %v2683_v20, %v15002_v54  ;;  %v2695_v62 = vshll.u32 %v11470_v56, 16  ;;  %v2632_v31 = vsel %vm13522_vm9, %v14946_v29, %v14906_v34  ;;  %v2642_v18 = vsel %vm13522_vm9, %v14960_v44, %v14956_v40  ;;  %v11472_v20 = vld [vmem:[#allocation2 + $0xc8] sm:$0x1] }
 0x1bc   : > { %v4099_v3 = vrot.slane %v11744_v36, 5  ;;  %v3055_v9 = vsel %vm14154_vm14, %v11564_v50, %v3054_v6  ;;  %v2701_v29 = vshll.u32 %v11471_v26, 16  ;;  %v4106_v0 = vrot.slane %v11747_v42, 5  ;;  %v11473_v50 = vld [vmem:[#allocation2 + $0xcc] sm:$0xf] }
 0x1bd   : > { %v15044_v58 = vrot.slane %v2684_v59, 4  ;;  %v2705_v40 = vshrl.u32 %v11471_v26, 16  ;;  %v11777_v44 = vrot.slane %v11743_v57, 9  ;;  %v4102_v46 = vrot.slane %v11745_v25, 5  ;;  %v11542_v26 = vld [vmem:[#allocation2 + $0xc0] sm:$0xe] }
 0x1be   : > { %v2694_v33 = vrot.slane %v2692_v15, 4  ;;  %v2697_v41 = vrot.slane %v2695_v62, 5  ;;  %v4108_v35 = vrot.slane %v4106_v0, 4  ;;  %v3068_v6 = vrot.slane %v15046_v28, 5  ;;  %v11544_v15 = vld [vmem:[#allocation2 + $0xc8] sm:$0x1] }
 0x1bf   : > { %5448 = vmatmul.mubr.bf16.gmra.mrb[40].mxu0 %v11489_v49  ;;  %v3057_v49 = vrot.slane %v11538_v27, 5  ;;  %v11746_v27 = vld [vmem:[#allocation2 + $0x9c] sm:$0xe]  ;;  %v4100_v38 = vsel %vm14154_vm14, %v11777_v44, %v4099_v3  ;;  %v4109_v48 = vrot.slane %v11748_v53, 5  ;;  %v11491_v45 = vcombine.low %v2632_v31, %v2642_v18  ;;  %v15088_v28 = vld [vmem:[#allocation2 + $0xcc] sm:$0xe] }
 0x1c0   : > { %5455 = vmatprep.mubr.bf16.mxu0 %v11580_v21  ;;  %v4101_v21 = vrot.slane %v4099_v3, 4  ;;  %v11778_v14 = vrot.slane %v11746_v27, 9  ;;  %v2707_v55 = vrot.slane %v2705_v40, 4  ;;  %v2666_v59 = vsel %vm13522_vm9, %v15026_v37, %v15023_v61  ;;  %v15090_v3 = vld [vmem:[#allocation2 + $0xd0] sm:$0xf] }
 0x1c1   : > { %v3058_v34 = vsel %vm14154_vm14, %v3056_v22, %v3057_v49  ;;  %v4110_v5 = vsel %vm14154_vm14, %v4108_v35, %v4109_v48  ;;  %v15063_v49 = vrot.slane %v2701_v29, 5  ;;  %v2656_v22 = vsel %vm13522_vm9, %v15021_v32, %v14978_v52  ;;  %v15092_v42 = vld [vmem:[#allocation2 + $0xd4] sm:$0x1]  ;;  %v11750_v27 = vld [vmem:[#allocation2 + $0xac] sm:$0xf] }
 0x1c2   : > { %v4103_v39 = vsel %vm14154_vm14, %v4101_v21, %v4102_v46  ;;  %v11582_v43 = vcombine.low %v3055_v9, %v3058_v34  ;;  %v3062_v56 = vsel %vm14154_vm14, %v11565_v10, %v3061_v11  ;;  %v2716_v62 = vshrl.u32 %v11473_v50, 16 }
 0x1c3   : > { %v11795_v60 = vcombine.low %v4100_v38, %v4103_v39  ;;  %v2719_v36 = vshll.u32 %v11473_v50, 16  ;;  %v2725_v31 = vshll.u32 %v11474_v47, 16  ;;  %v2729_v52 = vshrl.u32 %v11474_v47, 16  ;;  %v11753_v38 = vld [vmem:[#allocation2 + $0xb8] sm:$0xf] }
 0x1c4   : > { %v2680_v17 = vsel %vm13522_vm9, %v15032_v19, %v15002_v54  ;;  %v2690_v11 = vsel %vm13522_vm9, %v15044_v58, %v15034_v13  ;;  %v2698_v32 = vor.u32 %v2697_v41, %v2694_v33  ;;  %v2711_v61 = vshll.u32 %v11472_v20, 16  ;;  %v11475_v54 = vld [vmem:[#allocation2 + $0xd4] sm:$0x1]  ;;  %v11749_v20 = vld [vmem:[#allocation2 + $0xa8] sm:$0xe] }
 0x1c5   : > { %12785 = vmatprep.mubr.bf16.mxu1 %v11795_v60  ;;  %v11566_v37 = vrot.slane %v11542_v26, 9  ;;  %v3070_v10 = vrot.slane %v3068_v6, 4  ;;  %v11492_v18 = vcombine.low %v2656_v22, %v2666_v59  ;;  %v2718_v19 = vrot.slane %v2716_v62, 4  ;;  %v11751_v50 = vld [vmem:[#allocation2 + $0xb0] sm:$0x1] }
 0x1c6   : > { %v2721_v9 = vrot.slane %v2719_v36, 5  ;;  %v15094_v34 = vrot.slane %v2725_v31, 5  ;;  %v2731_v13 = vrot.slane %v2729_v52, 4  ;;  %v11493_v29 = vcombine.low %v2680_v17, %v2690_v11  ;;  %v11754_v22 = vld [vmem:[#allocation2 + $0xbc] sm:$0x1] }
 0x1c7   : > { %5456 = vmatmul.mubr.bf16.gmra.mrb[44].mxu0 %v11490_v24  ;;  %v4107_v24 = vsel %vm14154_vm14, %v11778_v14, %v4106_v0  ;;  %v15096_v57 = vrot.slane %v2698_v32, 4  ;;  %v15098_v25 = vrot.slane %v2711_v61, 5  ;;  %v11476_v0 = vld [vmem:[#allocation2 + $0xd8] sm:$0xf]  ;;  %v11567_v44 = vrot.slane %v15088_v28, 9 }
 0x1c8   : > { %5463 = vmatprep.mubr.bf16.mxu0 %v11581_v23  ;;  %v11796_v16 = vcombine.low %v4107_v24, %v4110_v5  ;;  %v3065_v23 = vsel %vm14154_vm14, %v3063_v30, %v3064_v4  ;;  %v3071_v30 = vrot.slane %v11544_v15, 5  ;;  %v2708_v4 = vor.u32 %v2707_v55, %v15063_v49  ;;  %v11477_v14 = vld [vmem:[#allocation2 + $0xdc] sm:$0xf]  ;;  %v11752_v5 = vld [vmem:[#allocation2 + $0xb4] sm:$0xe] }
 0x1c9   : > { %v11583_v58 = vcombine.low %v3062_v56, %v3065_v23  ;;  %v3075_v21 = vrot.slane %v15090_v3, 5  ;;  %v3078_v46 = vrot.slane %v15092_v42, 5  ;;  %v3069_v33 = vsel %vm14154_vm14, %v11566_v37, %v3068_v6  ;;  %v11549_v52 = vld [vmem:[#allocation2 + $0xdc] sm:$0xf] }
 0x1ca   : > { %12786 = vmatmul.mubr.bf16.gmra.mrb[12].mxu1 %v11796_v16  ;;  %v15100_v40 = vrot.slane %v2708_v4, 4  ;;  %v3072_v41 = vsel %vm14154_vm14, %v3070_v10, %v3071_v30  ;;  %v2735_v53 = vshll.u32 %v11475_v54, 16  ;;  %v4113_v35 = vrot.slane %v11750_v27, 5  ;;  %v11641_v10 = vld [vmem:[#allocation2 + $0x18] sm:$0xf] }
 0x1cb   : > { %v2722_v39 = vor.u32 %v2721_v9, %v2718_v19  ;;  %v2732_v48 = vor.u32 %v2731_v13, %v15094_v34  ;;  %v4120_v60 = vrot.slane %v11753_v38, 5  ;;  %v2743_v24 = vshll.u32 %v11476_v0, 16  ;;  %v11642_v30 = vld [vmem:[#allocation2 + $0x1c] sm:$0xf]  ;;  %v11548_v9 = vld [vmem:[#allocation2 + $0xd8] sm:$0xe] }
 0x1cc   : > { %v4115_v47 = vrot.slane %v4113_v35, 4  ;;  %v4116_v6 = vrot.slane %v11751_v50, 5  ;;  %v2749_v55 = vshll.u32 %v11477_v14, 16  ;;  %v2753_v16 = vshrl.u32 %v11477_v14, 16  ;;  %v11644_v38 = vld [vmem:[#allocation2 + $0x24] sm:$0xf] }
 0x1cd   : > { %v11780_v59 = vrot.slane %v11752_v5, 9  ;;  %v4122_v56 = vrot.slane %v4120_v60, 4  ;;  %v3077_v23 = vrot.slane %v3075_v21, 4  ;;  %v4123_v62 = vrot.slane %v11754_v22, 5 }
 0x1ce   : > { %v4117_v15 = vsel %vm14154_vm14, %v4115_v47, %v4116_v6  ;;  %v2723_v36 = vrot.slane %v2722_v39, 4  ;;  %v2737_v31 = vrot.slane %v2735_v53, 5  ;;  %v11584_v32 = vcombine.low %v3069_v33, %v3072_v41 }
 0x1cf   : > { %5464 = vmatmul.mubr.bf16.gmra.mrb[48].mxu0 %v11491_v45  ;;  %v2740_v45 = vshrl.u32 %v11476_v0, 16  ;;  %v4121_v11 = vsel %vm14154_vm14, %v11780_v59, %v4120_v60  ;;  %v2745_v37 = vrot.slane %v2743_v24, 5  ;;  %v4124_v4 = vsel %vm14154_vm14, %v4122_v56, %v4123_v62  ;;  %v11550_v0 = vld [vmem:[#allocation2 + $0xe0] sm:$0x1]  ;;  %v11645_v24 = vld [vmem:[#allocation2 + $0x28] sm:$0xf] }
 0x1d0   : > { %5471 = vmatprep.mubr.bf16.mxu0 %v11582_v43  ;;  %v11779_v43 = vrot.slane %v11749_v20, 9  ;;  %v15118_v28 = vrot.slane %v2749_v55, 5  ;;  %v2755_v3 = vrot.slane %v2753_v16, 4  ;;  %v11798_v42 = vcombine.low %v4121_v11, %v4124_v4  ;;  %v11756_v59 = vld [vmem:[#allocation2 + $0xc4] sm:$0xf] }
 0x1d1   : > { %v2742_v61 = vrot.slane %v2740_v45, 4  ;;  %v2704_v54 = vsel %vm13522_vm9, %v15096_v57, %v15063_v49  ;;  %v2714_v19 = vsel %vm13522_vm9, %v15100_v40, %v15098_v25  ;;  %v3082_v13 = vrot.slane %v11549_v52, 5  ;;  %v11755_v11 = vld [vmem:[#allocation2 + $0xc0] sm:$0xe] }
 0x1d2   : > { %v4114_v26 = vsel %vm14154_vm14, %v11779_v43, %v4113_v35  ;;  %v3398_v27 = vshrl.u32 %v11641_v10, 16  ;;  %v3401_v33 = vshll.u32 %v11641_v10, 16  ;;  %v3407_v41 = vshll.u32 %v11642_v30, 16 }
 0x1d3   : > { %v11797_v17 = vcombine.low %v4114_v26, %v4117_v15  ;;  %v3411_v53 = vshrl.u32 %v11642_v30, 16  ;;  %v3076_v14 = vsel %vm14154_vm14, %v11567_v44, %v3075_v21  ;;  %v3079_v49 = vsel %vm14154_vm14, %v3077_v23, %v3078_v46  ;;  %v11643_v44 = vld [vmem:[#allocation2 + $0x20] sm:$0x1]  ;;  %v11647_v15 = vld [vmem:[#allocation2 + $0x30] sm:$0xf] }
 0x1d4   : > { %v2746_v57 = vor.u32 %v2745_v37, %v2742_v61  ;;  %v2728_v25 = vsel %vm13522_vm9, %v2723_v36, %v15094_v34  ;;  %v2756_v40 = vor.u32 %v2755_v3, %v15118_v28  ;;  %v11494_v39 = vcombine.low %v2704_v54, %v2714_v19  ;;  %v11759_v36 = vld [vmem:[#allocation2 + $0xd0] sm:$0xf]  ;;  %v11760_v54 = vld [vmem:[#allocation2 + $0xd4] sm:$0x1] }
 0x1d5   : > { %12789 = vmatprep.mubr.bf16.mxu1 %v11797_v17  ;;  %v3084_v45 = vrot.slane %v3082_v13, 4  ;;  %v3085_v20 = vrot.slane %v11550_v0, 5  ;;  %v3400_v21 = vrot.slane %v3398_v27, 4  ;;  %v3403_v50 = vrot.slane %v3401_v33, 5 }
 0x1d6   : > { %12790 = vmatmul.mubr.bf16.gmra.mrb[16].mxu1 %v11798_v42  ;;  %v15138_v46 = vrot.slane %v3407_v41, 5  ;;  %v3413_v60 = vrot.slane %v3411_v53, 4  ;;  %v11585_v43 = vcombine.low %v3076_v14, %v3079_v49  ;;  %v15140_v47 = vrot.slane %v2746_v57, 4 }
 0x1d7   : > { %5472 = vmatmul.mubr.bf16.gmra.mrb[52].mxu0 %v11492_v18  ;;  %v2733_v18 = vrot.slane %v2732_v48, 4  ;;  %v11568_v48 = vrot.slane %v11548_v9, 9  ;;  %v3422_v6 = vshrl.u32 %v11644_v38, 16  ;;  %v15142_v5 = vrot.slane %v2756_v40, 4  ;;  %v11646_v40 = vld [vmem:[#allocation2 + $0x2c] sm:$0x1] }
 0x1d8   : > { %5479 = vmatprep.mubr.bf16.mxu0 %v11583_v58  ;;  %v11478_v58 = vld [vmem:[#allocation2 + $0xe0] sm:$0x1]  ;;  %v3417_v16 = vshll.u32 %v11643_v44, 16  ;;  %v3425_v22 = vshll.u32 %v11644_v38, 16  ;;  %v3086_v23 = vsel %vm14154_vm14, %v3084_v45, %v3085_v20  ;;  %v3431_v26 = vshll.u32 %v11645_v24, 16 }
 0x1d9   : > { %v2759_v35 = vshll.u32 %v11478_v58, 16  ;;  %v3083_v56 = vsel %vm14154_vm14, %v11568_v48, %v3082_v13  ;;  %v4127_v62 = vrot.slane %v11756_v59, 5  ;;  %v3414_v52 = vor.u32 %v3413_v60, %v15138_v46  ;;  %v11648_v13 = vld [vmem:[#allocation2 + $0x34] sm:$0xf]  ;;  %v11649_v59 = vld [vmem:[#allocation2 + $0x38] sm:$0x1] }
 0x1da   : > { %v3435_v17 = vshrl.u32 %v11645_v24, 16  ;;  %v4134_v61 = vrot.slane %v11759_v36, 5  ;;  %v3424_v37 = vrot.slane %v3422_v6, 4  ;;  %v11781_v10 = vrot.slane %v11755_v11, 9  ;;  %v364_v24 = vld [vmem:[#allocation2 + $0xec] sm:$0x1] }
 0x1db   : > { %v15144_v55 = vrot.slane %v2759_v35, 5  ;;  %v4129_v30 = vrot.slane %v4127_v62, 4  ;;  %v3427_v3 = vrot.slane %v3425_v22, 5  ;;  %v3446_v42 = vshrl.u32 %v11647_v15, 16 }
 0x1dc   : > { %v4136_v9 = vrot.slane %v4134_v61, 4  ;;  %v3449_v58 = vshll.u32 %v11647_v15, 16  ;;  %v4128_v0 = vsel %vm14154_vm14, %v11781_v10, %v4127_v62  ;;  %v4137_v33 = vrot.slane %v11760_v54, 5  ;;  %v11761_v54 = vld [vmem:[#allocation2 + $0xd8] sm:$0xe] }
 0x1dd   : > { %v15155_v41 = vrot.slane %v3431_v26, 5  ;;  %v3437_v53 = vrot.slane %v3435_v17, 4  ;;  %v11586_v57 = vcombine.low %v3083_v56, %v3086_v23  ;;  %v3415_v38 = vrot.slane %v3414_v52, 4  ;;  %v11650_v26 = vld [vmem:[#allocation2 + $0x3c] sm:$0xf] }
 0x1de   : > { %v4138_v35 = vsel %vm14154_vm14, %v4136_v9, %v4137_v33  ;;  %v3459_v48 = vshrl.u32 %v11648_v13, 16  ;;  %v3448_v20 = vrot.slane %v3446_v42, 4  ;;  %v3451_v44 = vrot.slane %v3449_v58, 5  ;;  %v11764_v33 = vld [vmem:[#allocation2 + $0xe4] sm:$0xe] }
 0x1df   : > { %5480 = vmatmul.mubr.bf16.gmra.mrb[56].mxu0 %v11493_v29  ;;  %v2738_v29 = vsel %vm13522_vm9, %v2733_v18, %v2737_v31  ;;  %v3404_v31 = vor.u32 %v3403_v50, %v3400_v21  ;;  %v11758_v18 = vld [vmem:[#allocation2 + $0xcc] sm:$0xe]  ;;  %v3428_v21 = vor.u32 %v3427_v3, %v3424_v37  ;;  %v3438_v50 = vor.u32 %v3437_v53, %v15155_v41 }
 0x1e0   : > { %5487 = vmatprep.mubr.bf16.mxu0 %v11584_v32  ;;  %v11495_v34 = vcombine.low %v2728_v25, %v2738_v29  ;;  %v11757_v32 = vld [vmem:[#allocation2 + $0xc8] sm:$0x1]  ;;  %v11782_v19 = vrot.slane %v11758_v18, 9  ;;  %v3419_v29 = vrot.slane %v3417_v16, 5  ;;  %v3441_v60 = vshll.u32 %v11646_v40, 16 }
 0x1e1   : > { %v4130_v4 = vrot.slane %v11757_v32, 5  ;;  %v3405_v25 = vrot.slane %v3404_v31, 4  ;;  %v2762_v6 = vsel %vm13522_vm9, %v15142_v5, %v15144_v55  ;;  %v3461_v23 = vrot.slane %v3459_v48, 4  ;;  %v11651_v31 = vld [vmem:[#allocation2 + $0x40] sm:$0xf] }
 0x1e2   : > { %v4135_v49 = vsel %vm14154_vm14, %v11782_v19, %v4134_v61  ;;  %v3420_v22 = vsel %vm13522_vm9, %v3415_v38, %v3419_v29  ;;  %v3429_v15 = vrot.slane %v3428_v21, 4  ;;  %v3439_v62 = vrot.slane %v3438_v50, 4  ;;  %v11762_v32 = vld [vmem:[#allocation2 + $0xdc] sm:$0xf]  ;;  %v11763_v19 = vld [vmem:[#allocation2 + $0xe0] sm:$0x1] }
 0x1e3   : > { %v4131_v27 = vsel %vm14154_vm14, %v4129_v30, %v4130_v4  ;;  %v11800_v45 = vcombine.low %v4135_v49, %v4138_v35  ;;  %v3410_v16 = vsel %vm13522_vm9, %v3405_v25, %v15138_v46  ;;  %v3443_v36 = vrot.slane %v3441_v60, 5  ;;  %v11765_v4 = vld [vmem:[#allocation2 + $0xe8] sm:$0xf]  ;;  %v13207_v38 = vld [vmem:[#allocation2 + $0x18] sm:$0xff]   ;;  %v11652_v21 = vld [vmem:[#allocation2 + $0x44] sm:$0x1] }
 0x1e4   : > { %v11799_v14 = vcombine.low %v4128_v0, %v4131_v27  ;;  %v11695_v46 = vcombine.low %v3410_v16, %v3420_v22  ;;  %v3465_v52 = vshll.u32 %v11649_v59, 16  ;;  %v3470_v11 = vshrl.u32 %v11650_v26, 16  ;;  %v11653_v60 = vld [vmem:[#allocation2 + $0x48] sm:$0xf] }
 0x1e5   : > { %v3473_v37 = vshll.u32 %v11650_v26, 16  ;;  %v3479_v10 = vshll.u32 %v11651_v31, 16  ;;  %v4141_v30 = vrot.slane %v11762_v32, 5  ;;  %v3434_v18 = vsel %vm13522_vm9, %v3429_v15, %v15155_v41  ;;  %v11655_v32 = vld [vmem:[#allocation2 + $0x50] sm:$0x1] }
 0x1e6   : > { %12793 = vmatprep.mubr.bf16.mxu1 %v11799_v14  ;;  %v3444_v3 = vsel %vm13522_vm9, %v3439_v62, %v3443_v36  ;;  %v3483_v42 = vshrl.u32 %v11651_v31, 16  ;;  %v4148_v9 = vrot.slane %v11765_v4, 5  ;;  %v11783_v58 = vrot.slane %v11761_v54, 9 }
 0x1e7   : > { %5488 = vmatmul.mubr.bf16.gmra.mrb[60].mxu0 %v11494_v39  ;;  %v3455_v39 = vshll.u32 %v11648_v13, 16  ;;  %12794 = vmatmul.mubr.bf16.gmra.mrb[20].mxu1 %v11800_v45  ;;  %v3467_v13 = vrot.slane %v3465_v52, 5  ;;  %v4143_v0 = vrot.slane %v4141_v30, 4  ;;  %v4144_v27 = vrot.slane %v11763_v19, 5 }
 0x1e8   : > { %5495 = vmatprep.mubr.bf16.mxu0 %v11585_v43  ;;  %v2752_v43 = vsel %vm13522_vm9, %v15140_v47, %v15118_v28  ;;  %v302_v28 = vld [vmem:[#allocation2 + $0xe4] sm:$0x1]  ;;  %v3452_v47 = vor.u32 %v3451_v44, %v3448_v20  ;;  %v3472_v14 = vrot.slane %v3470_v11, 4  ;;  %v4150_v25 = vrot.slane %v4148_v9, 4 }
 0x1e9   : > { %v15177_v56 = vrot.slane %v3455_v39, 5  ;;  %v303_v5 = vsel %vm13470_vm3, 0, %v302_v28  ;;  %v11496_v55 = vcombine.low %v2752_v43, %v2762_v6  ;;  %v3475_v29 = vrot.slane %v3473_v37, 5  ;;  %v11656_v37 = vld [vmem:[#allocation2 + $0x54] sm:$0xf] }
 0x1ea   : > { %304 = vst [vmem:[#allocation2 + $0xe4] sm:$0x1] %v303_v5  ;;  %v3453_v61 = vrot.slane %v3452_v47, 4  ;;  %v4142_v41 = vsel %vm14154_vm14, %v11783_v58, %v4141_v30  ;;  %v4145_v40 = vsel %vm14154_vm14, %v4143_v0, %v4144_v27  ;;  %v3481_v39 = vrot.slane %v3479_v10, 5  ;;  %v11657_v10 = vld [vmem:[#allocation2 + $0x58] sm:$0xf] }
 0x1eb   : > { %v3462_v17 = vor.u32 %v3461_v23, %v15177_v56  ;;  %v3485_v48 = vrot.slane %v3483_v42, 4  ;;  %v11801_v45 = vcombine.low %v4142_v41, %v4145_v40  ;;  %v11696_v44 = vcombine.low %v3434_v18, %v3444_v3  ;;  %v13352_v23 = vld [vmem:[%s16965_s1 + $0x200] sm:$0xff]   ;;  %v13355_v58 = vld [vmem:[%s16965_s1 + $0x218] sm:$0xff]   ;;  %v13213_v0 = vld [vmem:[#allocation2 + $0x30] sm:$0xff]  }
 0x1ec   : > { %v3458_v6 = vsel %vm13522_vm9, %v3453_v61, %v15177_v56  ;;  %v3476_v16 = vor.u32 %v3475_v29, %v3472_v14  ;;  %v3489_v59 = vshll.u32 %v11652_v21, 16  ;;  %v3494_v28 = vshrl.u32 %v11653_v60, 16  ;;  %v13353_v56 = vld [vmem:[%s16965_s1 + $0x208] sm:$0xff]   ;;  %v13354_v61 = vld [vmem:[%s16965_s1 + $0x210] sm:$0xff]   ;;  %v11659_v27 = vld [vmem:[#allocation2 + $0x60] sm:$0xf] }
 0x1ed   : > { %v3463_v53 = vrot.slane %v3462_v17, 4  ;;  %12797 = vmatprep.mubr.bf16.mxu1 %v11801_v45  ;;  %v3486_v22 = vor.u32 %v3485_v48, %v3481_v39  ;;  %v3497_v47 = vshll.u32 %v11653_v60, 16  ;;  %v3513_v42 = vshll.u32 %v11655_v32, 16 }
 0x1ee   : > { %v3477_v62 = vrot.slane %v3476_v16, 4  ;;  %v3491_v31 = vrot.slane %v3489_v59, 5  ;;  %v3518_v54 = vshrl.u32 %v11656_v37, 16  ;;  %v3521_v19 = vshll.u32 %v11656_v37, 16  ;;  %v13216_v59 = vld [vmem:[#allocation2 + $0x3c] sm:$0xff]  }
 0x1ef   : > { %5496 = vmatmul.mubr.bf16.gmra.mrb[64].mxu0 %v11495_v34  ;;  %v365_v34 = vsel %vm13480_vm4, 0, %v364_v24  ;;  %v11654_v24 = vld [vmem:[#allocation2 + $0x4c] sm:$0xf]  ;;  %v3487_v36 = vrot.slane %v3486_v22, 4  ;;  %v3499_v52 = vrot.slane %v3497_v47, 5  ;;  %v3545_v48 = vshll.u32 %v11659_v27, 16 }
 0x1f0   : > { %5503 = vmatprep.mubr.bf16.mxu0 %v11586_v57  ;;  %366 = vst [vmem:[#allocation2 + $0xec] sm:$0x1] %v365_v34  ;;  %v11784_v57 = vrot.slane %v11764_v33, 9  ;;  %v3468_v34 = vsel %vm13522_vm9, %v3463_v53, %v3467_v13  ;;  %v3503_v26 = vshll.u32 %v11654_v24, 16  ;;  %v3507_v5 = vshrl.u32 %v11654_v24, 16  ;;  %v13359_v37 = vld [vmem:[%s16965_s1 + $0x238] sm:$0xff]  }
 0x1f1   : > { %v11697_v15 = vcombine.low %v3458_v6, %v3468_v34  ;;  %v3482_v30 = vsel %vm13522_vm9, %v3477_v62, %v3481_v39  ;;  %v3492_v4 = vsel %vm13522_vm9, %v3487_v36, %v3491_v31  ;;  %v3531_v13 = vshrl.u32 %v11657_v10, 16  ;;  %v11660_v33 = vld [vmem:[#allocation2 + $0x64] sm:$0xf]  ;;  %v11662_v47 = vld [vmem:[#allocation2 + $0x6c] sm:$0xf] }
 0x1f2   : > { %v4149_v20 = vsel %vm14154_vm14, %v11784_v57, %v4148_v9  ;;  %v3505_v17 = vrot.slane %v3503_v26, 5  ;;  %v3509_v11 = vrot.slane %v3507_v5, 4  ;;  %v3527_v9 = vshll.u32 %v11657_v10, 16  ;;  %v11663_v26 = vld [vmem:[#allocation2 + $0x70] sm:$0xf] }
 0x1f3   : > { %v11698_v53 = vcombine.low %v3482_v30, %v3492_v4  ;;  %v3515_v57 = vrot.slane %v3513_v42, 5  ;;  %v3523_v29 = vrot.slane %v3521_v19, 5  ;;  %v3533_v40 = vrot.slane %v3531_v13, 4  ;;  %v11664_v13 = vld [vmem:[#allocation2 + $0x74] sm:$0x1] }
 0x1f4   : > { %v3510_v3 = vor.u32 %v3509_v11, %v3505_v17  ;;  %v3529_v41 = vrot.slane %v3527_v9, 5  ;;  %v3542_v39 = vshrl.u32 %v11659_v27, 16  ;;  %v3551_v45 = vshll.u32 %v11660_v33, 16 }
 0x1f5   : > { %v3547_v34 = vrot.slane %v3545_v48, 5  ;;  %v3579_v11 = vshrl.u32 %v11663_v26, 16 }
 0x1f6   : > { %v3534_v60 = vor.u32 %v3533_v40, %v3529_v41  ;;  %v3544_v6 = vrot.slane %v3542_v39, 4  ;;  %v3553_v16 = vrot.slane %v3551_v45, 5  ;;  %v13219_v40 = vld [vmem:[#allocation2 + $0x54] sm:$0xff]  }
 0x1f7   : > { %5504 = vmatmul.mubr.bf16.gmra.mrb[68].mxu0 %v11496_v55  ;;  %v11766_v49 = vld [vmem:[#allocation2 + $0xec] sm:$0x1]  ;;  %v13210_v55 = vld [vmem:[#allocation2 + $0x24] sm:$0xff]   ;;  %v3581_v19 = vrot.slane %v3579_v11, 4 }
 0x1f8   : > { %5544 = vmatprep.mubr.bf16.mxu0 %v11695_v46  ;;  %v4151_v35 = vrot.slane %v11766_v49, 5  ;;  %v3496_v46 = vrot.slane %v3494_v28, 4  ;;  %v3511_v49 = vrot.slane %v3510_v3, 4  ;;  %v3548_v62 = vor.u32 %v3547_v34, %v3544_v6  ;;  %v11670_v11 = vld [vmem:[#allocation2 + $0x8c] sm:$0x1] }
 0x1fa   : > { %v4152_v50 = vsel %vm14154_vm14, %v4150_v25, %v4151_v35  ;;  %v3500_v18 = vor.u32 %v3499_v52, %v3496_v46  ;;  %v3520_v25 = vrot.slane %v3518_v54, 4  ;;  %v13356_v35 = vld [vmem:[%s16965_s1 + $0x220] sm:$0xff]   ;;  %v3516_v21 = vsel %vm13522_vm9, %v3511_v49, %v3515_v57 }
 0x1fb   : > { %v11802_v43 = vcombine.low %v4149_v20, %v4152_v50  ;;  %v3555_v20 = vshrl.u32 %v11660_v33, 16  ;;  %v3566_v46 = vshrl.u32 %v11662_v47, 16  ;;  %v3569_v52 = vshll.u32 %v11662_v47, 16 }
 0x1fc   : > { %v3501_v14 = vrot.slane %v3500_v18, 4  ;;  %v3524_v50 = vor.u32 %v3523_v29, %v3520_v25  ;;  %v3549_v10 = vrot.slane %v3548_v62, 4  ;;  %v13218_v18 = vld [vmem:[#allocation2 + $0x48] sm:$0xff]   ;;  %v3585_v49 = vshll.u32 %v11664_v13, 16 }
 0x1fd   : > { %12798 = vmatmul.mubr.bf16.gmra.mrb[24].mxu1 %v11802_v43  ;;  %v13357_v43 = vld [vmem:[%s16965_s1 + $0x228] sm:$0xff]   ;;  %v3557_v22 = vrot.slane %v3555_v20, 4  ;;  %v3568_v3 = vrot.slane %v3566_v46, 4  ;;  %v3571_v42 = vrot.slane %v3569_v52, 5 }
 0x1fe   : > { %v3525_v5 = vrot.slane %v3524_v50, 4  ;;  %v3554_v27 = vsel %vm13522_vm9, %v3549_v10, %v3553_v16  ;;  %v3587_v48 = vrot.slane %v3585_v49, 5  ;;  %v11667_v50 = vld [vmem:[#allocation2 + $0x80] sm:$0x1] }
 0x1ff   : > { %5545 = vmatmul.mubr.bf16.vlgmr.msra.gmra.mrb[0].mxu0 %v13207_v38  ;;  %v11658_v38 = vld [vmem:[#allocation2 + $0x5c] sm:$0x1]  ;;  %v3558_v36 = vor.u32 %v3557_v22, %v3553_v16  ;;  %v3609_v22 = vshll.u32 %v11667_v50, 16 }
 0x200   : > { %12750 = vmatpush3.bf16.msra.mxu0 %v13352_v23  ;;  %5552 = vmatprep.mubr.bf16.mxu0 %v11696_v44  ;;  %v3506_v44 = vsel %vm13522_vm9, %v3501_v14, %v3505_v17  ;;  %v3537_v24 = vshll.u32 %v11658_v38, 16  ;;  %v11661_v23 = vld [vmem:[#allocation2 + $0x68] sm:$0x1]  ;;  %v3575_v17 = vshll.u32 %v11663_v26, 16  ;;  %v3530_v32 = vsel %vm13522_vm9, %v3525_v5, %v3529_v41  ;;  %v13220_v26 = vld [vmem:[#allocation2 + $0x60] sm:$0xff]   ;;  %v13222_v50 = vld [vmem:[#allocation2 + $0x78] sm:$0xff]  }
 0x201   : > { %12751 = vmatprep.subr.bf16.mxu0 %v13353_v56  ;;  %v11699_v28 = vcombine.low %v3506_v44, %v3516_v21  ;;  %v3561_v31 = vshll.u32 %v11661_v23, 16  ;;  %v3559_v30 = vrot.slane %v3558_v36, 4  ;;  %v11671_v5 = vld [vmem:[#allocation2 + $0x90] sm:$0xf]  ;;  %v3611_v36 = vrot.slane %v3609_v22, 5 }
 0x202   : > { %v3577_v54 = vrot.slane %v3575_v17, 5  ;;  %v11677_v22 = vld [vmem:[#allocation2 + $0xa8] sm:$0xf] }
 0x203   : > { %v3563_v4 = vrot.slane %v3561_v31, 5 }
 0x204   : > { %12752 = vmatpush3.bf16.msra.mxu0 %v13353_v56  ;;  %v3535_v56 = vrot.slane %v3534_v60, 4  ;;  %v3582_v14 = vor.u32 %v3581_v19, %v3577_v54  ;;  %v11668_v60 = vld [vmem:[#allocation2 + $0x84] sm:$0xf] }
 0x205   : > { %12753 = vmatprep.subr.bf16.mxu0 %v13354_v61  ;;  %v3564_v33 = vsel %vm13522_vm9, %v3559_v30, %v3563_v4  ;;  %v3617_v23 = vshll.u32 %v11668_v60, 16 }
 0x206   : > { %v3583_v39 = vrot.slane %v3582_v14, 4 }
 0x207   : > { %5553 = vmatmul.mubr.bf16.gmra.mrb[4].mxu0 %v13210_v55  ;;  %v3539_v55 = vrot.slane %v3537_v24, 5  ;;  %v11669_v24 = vld [vmem:[#allocation2 + $0x88] sm:$0xf]  ;;  %v3619_v46 = vrot.slane %v3617_v23, 5 }
 0x208   : > { %5560 = vmatprep.mubr.bf16.mxu0 %v11697_v15  ;;  %12754 = vmatpush3.bf16.msra.mxu0 %v13354_v61  ;;  %v13358_v15 = vld [vmem:[%s16965_s1 + $0x230] sm:$0xff]   ;;  %v3588_v6 = vsel %vm13522_vm9, %v3583_v39, %v3587_v48  ;;  %v3627_v47 = vshrl.u32 %v11669_v24, 16 }
 0x209   : > { %12755 = vmatprep.subr.bf16.mxu0 %v13355_v58  ;;  %v3540_v61 = vsel %vm13522_vm9, %v3535_v56, %v3539_v55  ;;  %v11672_v56 = vld [vmem:[#allocation2 + $0x94] sm:$0xf] }
 0x20a   : > { %v11700_v9 = vcombine.low %v3530_v32, %v3540_v61  ;;  %v3629_v17 = vrot.slane %v3627_v47, 4  ;;  %v3638_v32 = vshrl.u32 %v11671_v5, 16  ;;  %v3641_v61 = vshll.u32 %v11671_v5, 16 }
 0x20b   : > { %v3651_v10 = vshrl.u32 %v11672_v56, 16 }
 0x20c   : > { %12756 = vmatpush3.bf16.msra.mxu0 %v13355_v58  ;;  %v11665_v58 = vld [vmem:[#allocation2 + $0x78] sm:$0xf]  ;;  %v3643_v19 = vrot.slane %v3641_v61, 5 }
 0x20d   : > { %12757 = vmatprep.subr.bf16.mxu0 %v13356_v35  ;;  %v3590_v57 = vshrl.u32 %v11665_v58, 16  ;;  %v3593_v25 = vshll.u32 %v11665_v58, 16  ;;  %v3653_v13 = vrot.slane %v3651_v10, 4  ;;  %v13221_v58 = vld [vmem:[#allocation2 + $0x6c] sm:$0xff]  }
 0x20e   : > { %v11679_v10 = vld [vmem:[#allocation2 + $0xb0] sm:$0x1] }
 0x20f   : > { %5561 = vmatmul.mubr.bf16.gmra.mrb[8].mxu0 %v13213_v0  ;;  %v11666_v0 = vld [vmem:[#allocation2 + $0x7c] sm:$0xf]  ;;  %v3592_v45 = vrot.slane %v3590_v57, 4  ;;  %v3595_v20 = vrot.slane %v3593_v25, 5 }
 0x210   : > { %5568 = vmatprep.mubr.bf16.mxu0 %v11698_v53  ;;  %12758 = vmatpush3.bf16.msra.mxu0 %v13356_v35  ;;  %v3572_v53 = vor.u32 %v3571_v42, %v3568_v3  ;;  %v3599_v29 = vshll.u32 %v11666_v0, 16  ;;  %v3603_v41 = vshrl.u32 %v11666_v0, 16  ;;  %v11701_v35 = vcombine.low %v3554_v27, %v3564_v33  ;;  %v11673_v0 = vld [vmem:[#allocation2 + $0x98] sm:$0x1]  ;;  %v11674_v33 = vld [vmem:[#allocation2 + $0x9c] sm:$0xf] }
 0x211   : > { %12759 = vmatprep.subr.bf16.mxu0 %v13357_v43  ;;  %v3596_v34 = vor.u32 %v3595_v20, %v3592_v45  ;;  %v3633_v42 = vshll.u32 %v11670_v11, 16 }
 0x212   : > { %v3573_v38 = vrot.slane %v3572_v53, 4  ;;  %v3601_v44 = vrot.slane %v3599_v29, 5  ;;  %v3605_v21 = vrot.slane %v3603_v41, 4  ;;  %v11675_v53 = vld [vmem:[#allocation2 + $0xa0] sm:$0xf]  ;;  %v3657_v41 = vshll.u32 %v11673_v0, 16 }
 0x213   : > { %v3635_v57 = vrot.slane %v3633_v42, 5  ;;  %v3675_v39 = vshrl.u32 %v11675_v53, 16 }
 0x214   : > { %12760 = vmatpush3.bf16.msra.mxu0 %v13357_v43  ;;  %v3578_v43 = vsel %vm13522_vm9, %v3573_v38, %v3577_v54  ;;  %v3606_v16 = vor.u32 %v3605_v21, %v3601_v44  ;;  %v3640_v54 = vrot.slane %v3638_v32, 4  ;;  %v3671_v38 = vshll.u32 %v11675_v53, 16  ;;  %v11684_v53 = vld [vmem:[#allocation2 + $0xc4] sm:$0xf] }
 0x215   : > { %12761 = vmatprep.subr.bf16.mxu0 %v13358_v15  ;;  %v11702_v55 = vcombine.low %v3578_v43, %v3588_v6  ;;  %v3659_v21 = vrot.slane %v3657_v41, 5  ;;  %v3677_v6 = vrot.slane %v3675_v39, 4 }
 0x216   : > { %v3607_v62 = vrot.slane %v3606_v16, 4  ;;  %v3644_v25 = vor.u32 %v3643_v19, %v3640_v54  ;;  %v3673_v43 = vrot.slane %v3671_v38, 5  ;;  %v11676_v16 = vld [vmem:[#allocation2 + $0xa4] sm:$0x1]  ;;  %v3705_v19 = vshll.u32 %v11679_v10, 16  ;;  %v13226_v10 = vld [vmem:[#allocation2 + $0xa8] sm:$0xff]  }
 0x217   : > { %5569 = vmatmul.mubr.bf16.gmra.mrb[12].mxu0 %v13216_v59  ;;  %v3614_v59 = vshrl.u32 %v11668_v60, 16  ;;  %v3681_v5 = vshll.u32 %v11676_v16, 16  ;;  %v11682_v38 = vld [vmem:[#allocation2 + $0xbc] sm:$0x1] }
 0x218   : > { %5576 = vmatprep.mubr.bf16.mxu0 %v11699_v28  ;;  %12762 = vmatpush3.bf16.msra.mxu0 %v13358_v15  ;;  %v3623_v28 = vshll.u32 %v11669_v24, 16  ;;  %v3597_v15 = vrot.slane %v3596_v34, 4  ;;  %v3612_v4 = vsel %vm13522_vm9, %v3607_v62, %v3611_v36  ;;  %v3645_v20 = vrot.slane %v3644_v25, 4  ;;  %v13223_v36 = vld [vmem:[#allocation2 + $0x84] sm:$0xff]  }
 0x219   : > { %12763 = vmatprep.subr.bf16.mxu0 %v13359_v37  ;;  %v3616_v31 = vrot.slane %v3614_v59, 4  ;;  %v11678_v59 = vld [vmem:[#allocation2 + $0xac] sm:$0xf]  ;;  %v3707_v25 = vrot.slane %v3705_v19, 5  ;;  %v11689_v19 = vld [vmem:[#allocation2 + $0xd8] sm:$0xf] }
 0x21a   : > { %v3625_v52 = vrot.slane %v3623_v28, 5  ;;  %v3602_v30 = vsel %vm13522_vm9, %v3597_v15, %v3601_v44  ;;  %v3695_v15 = vshll.u32 %v11678_v59, 16  ;;  %v3699_v62 = vshrl.u32 %v11678_v59, 16  ;;  %v11685_v59 = vld [vmem:[#allocation2 + $0xc8] sm:$0x1] }
 0x21b   : > { %v11703_v27 = vcombine.low %v3602_v30, %v3612_v4  ;;  %v11680_v30 = vld [vmem:[#allocation2 + $0xb4] sm:$0xf]  ;;  %v11681_v4 = vld [vmem:[#allocation2 + $0xb8] sm:$0xf] }
 0x21c   : > { %12764 = vmatpush3.bf16.msra.mxu0 %v13359_v37  ;;  %v3647_v37 = vshll.u32 %v11672_v56, 16  ;;  %v3630_v3 = vor.u32 %v3629_v17, %v3625_v52  ;;  %v3686_v56 = vshrl.u32 %v11677_v22, 16  ;;  %v3683_v17 = vrot.slane %v3681_v5, 5 }
 0x21d   : > { %v3697_v61 = vrot.slane %v3695_v15, 5  ;;  %v3723_v0 = vshrl.u32 %v11681_v4, 16 }
 0x21e   : > { %v3631_v49 = vrot.slane %v3630_v3, 4  ;;  %v3688_v11 = vrot.slane %v3686_v56, 4 }
 0x21f   : > { %5577 = vmatmul.mubr.bf16.gmra.mrb[16].mxu0 %v13218_v18  ;;  %v3620_v18 = vor.u32 %v3619_v46, %v3616_v31 }
 0x220   : > { %5584 = vmatprep.mubr.bf16.mxu0 %v11700_v9  ;;  %v3649_v9 = vrot.slane %v3647_v37, 5  ;;  %v3636_v45 = vsel %vm13522_vm9, %v3631_v49, %v3635_v57  ;;  %v3701_v37 = vrot.slane %v3699_v62, 4  ;;  %v3753_v62 = vshll.u32 %v11685_v59, 16 }
 0x221   : > { %v3621_v14 = vrot.slane %v3620_v18, 4 }
 0x222   : > { %v3654_v29 = vor.u32 %v3653_v13, %v3649_v9  ;;  %v3650_v23 = vsel %vm13522_vm9, %v3645_v20, %v3649_v9  ;;  %v3702_v54 = vor.u32 %v3701_v37, %v3697_v61  ;;  %v3710_v9 = vshrl.u32 %v11680_v30, 16 }
 0x223   : > { %v3626_v48 = vsel %vm13522_vm9, %v3621_v14, %v3625_v52  ;;  %v3713_v13 = vshll.u32 %v11680_v30, 16  ;;  %v3747_v20 = vshrl.u32 %v11684_v53, 16  ;;  %v3755_v37 = vrot.slane %v3753_v62, 5 }
 0x224   : > { %v3655_v44 = vrot.slane %v3654_v29, 4  ;;  %v11704_v34 = vcombine.low %v3626_v48, %v3636_v45  ;;  %v3703_v57 = vrot.slane %v3702_v54, 4  ;;  %v3712_v29 = vrot.slane %v3710_v9, 4  ;;  %v11688_v54 = vld [vmem:[#allocation2 + $0xd4] sm:$0x1] }
 0x225   : > { %v3715_v41 = vrot.slane %v3713_v13, 5  ;;  %v3743_v45 = vshll.u32 %v11684_v53, 16  ;;  %v3749_v16 = vrot.slane %v3747_v20, 4  ;;  %v11690_v9 = vld [vmem:[#allocation2 + $0xdc] sm:$0xf]  ;;  %v3782_v53 = vshrl.u32 %v11689_v19, 16 }
 0x226   : > { %v3660_v28 = vsel %vm13522_vm9, %v3655_v44, %v3659_v21  ;;  %v3708_v21 = vsel %vm13522_vm9, %v3703_v57, %v3707_v25  ;;  %v3795_v57 = vshrl.u32 %v11690_v9, 16  ;;  %v13227_v25 = vld [vmem:[#allocation2 + $0xb4] sm:$0xff]   ;;  %v11691_v20 = vld [vmem:[#allocation2 + $0xe0] sm:$0x1] }
 0x227   : > { %5585 = vmatmul.mubr.bf16.gmra.mrb[20].mxu0 %v13219_v40  ;;  %v3662_v40 = vshrl.u32 %v11674_v33, 16  ;;  %v11705_v31 = vcombine.low %v3650_v23, %v3660_v28  ;;  %v11686_v28 = vld [vmem:[#allocation2 + $0xcc] sm:$0xf] }
 0x228   : > { %5592 = vmatprep.mubr.bf16.mxu0 %v11701_v35  ;;  %v3665_v35 = vshll.u32 %v11674_v33, 16  ;;  %v11683_v33 = vld [vmem:[#allocation2 + $0xc0] sm:$0xf] }
 0x229   : > { %v3664_v60 = vrot.slane %v3662_v40, 4  ;;  %v3734_v39 = vshrl.u32 %v11683_v33, 16  ;;  %v3737_v48 = vshll.u32 %v11683_v33, 16  ;;  %v3777_v33 = vshll.u32 %v11688_v54, 16  ;;  %v11714_v54 = vld [vmem:[#allocation2 + $0x1c] sm:$0xf] }
 0x22a   : > { %v3667_v24 = vrot.slane %v3665_v35, 5  ;;  %v3725_v35 = vrot.slane %v3723_v0, 4 }
 0x22c   : > { %v3668_v47 = vor.u32 %v3667_v24, %v3664_v60  ;;  %v3729_v24 = vshll.u32 %v11682_v38, 16  ;;  %v3784_v38 = vrot.slane %v3782_v53, 4  ;;  %v13230_v53 = vld [vmem:[#allocation2 + $0xd8] sm:$0xff]  }
 0x22e   : > { %v3669_v46 = vrot.slane %v3668_v47, 4  ;;  %v11687_v47 = vld [vmem:[#allocation2 + $0xd0] sm:$0xf]  ;;  %v3731_v56 = vrot.slane %v3729_v24, 5 }
 0x22f   : > { %5593 = vmatmul.mubr.bf16.gmra.mrb[24].mxu0 %v13220_v26  ;;  %v3678_v26 = vor.u32 %v3677_v6, %v3673_v43  ;;  %v3739_v6 = vrot.slane %v3737_v48, 5 }
 0x230   : > { %5600 = vmatprep.mubr.bf16.mxu0 %v11702_v55  ;;  %v3689_v55 = vshll.u32 %v11677_v22, 16  ;;  %v3674_v18 = vsel %vm13522_vm9, %v3669_v46, %v3673_v43  ;;  %v3736_v43 = vrot.slane %v3734_v39, 4  ;;  %v13225_v22 = vld [vmem:[#allocation2 + $0x9c] sm:$0xff]   ;;  %v3767_v46 = vshll.u32 %v11687_v47, 16 }
 0x231   : > { %v3679_v52 = vrot.slane %v3678_v26, 4 }
 0x232   : > { %v3691_v32 = vrot.slane %v3689_v55, 5  ;;  %v3740_v55 = vor.u32 %v3739_v6, %v3736_v43  ;;  %v3801_v6 = vshll.u32 %v11691_v20, 16  ;;  %v11718_v20 = vld [vmem:[#allocation2 + $0x2c] sm:$0x1] }
 0x233   : > { %v3684_v3 = vsel %vm13522_vm9, %v3679_v52, %v3683_v17  ;;  %v3771_v52 = vshrl.u32 %v11687_v47, 16 }
 0x234   : > { %v3692_v42 = vor.u32 %v3691_v32, %v3688_v11  ;;  %v11706_v14 = vcombine.low %v3674_v18, %v3684_v3  ;;  %v3741_v32 = vrot.slane %v3740_v55, 4  ;;  %v3769_v18 = vrot.slane %v3767_v46, 5 }
 0x235   : > { %v3773_v3 = vrot.slane %v3771_v52, 4 }
 0x236   : > { %v3693_v49 = vrot.slane %v3692_v42, 4 }
 0x237   : > { %5601 = vmatmul.mubr.bf16.gmra.mrb[28].mxu0 %v13221_v58  ;;  %v3719_v58 = vshll.u32 %v11681_v4, 16 }
 0x238   : > { %5608 = vmatprep.mubr.bf16.mxu0 %v11703_v27  ;;  %v13224_v27 = vld [vmem:[#allocation2 + $0x90] sm:$0xff]   ;;  %v3698_v44 = vsel %vm13522_vm9, %v3693_v49, %v3697_v61  ;;  %v3791_v49 = vshll.u32 %v11690_v9, 16 }
 0x239   : > { %v3721_v40 = vrot.slane %v3719_v58, 5  ;;  %v11707_v23 = vcombine.low %v3698_v44, %v3708_v21  ;;  %v11692_v44 = vld [vmem:[#allocation2 + $0xe4] sm:$0xf]  ;;  %v11693_v21 = vld [vmem:[#allocation2 + $0xe8] sm:$0xf] }
 0x23a   : > { %v3793_v48 = vrot.slane %v3791_v49, 5  ;;  %v3819_v59 = vshrl.u32 %v11693_v21, 16 }
 0x23b   : > { %v3726_v60 = vor.u32 %v3725_v35, %v3721_v40  ;;  %v3779_v35 = vrot.slane %v3777_v33, 5  ;;  %v11715_v33 = vld [vmem:[#allocation2 + $0x20] sm:$0x1] }
 0x23c   : > { %v3821_v62 = vrot.slane %v3819_v59, 4 }
 0x23d   : > { %v3727_v5 = vrot.slane %v3726_v60, 4 }
 0x23f   : > { %5609 = vmatmul.mubr.bf16.gmra.mrb[32].mxu0 %v13222_v50  ;;  %v3716_v50 = vor.u32 %v3715_v41, %v3712_v29  ;;  %v3732_v11 = vsel %vm13522_vm9, %v3727_v5, %v3731_v56  ;;  %v3803_v5 = vrot.slane %v3801_v6, 5  ;;  %v13231_v6 = vld [vmem:[#allocation2 + $0xe4] sm:$0xff]  }
 0x240   : > { %5616 = vmatprep.mubr.bf16.mxu0 %v11704_v34  ;;  %v3745_v34 = vrot.slane %v3743_v45, 5  ;;  %v3797_v45 = vrot.slane %v3795_v57, 4 }
 0x241   : > { %v3717_v26 = vrot.slane %v3716_v50, 4 }
 0x242   : > { %v3750_v15 = vor.u32 %v3749_v16, %v3745_v34  ;;  %v3746_v13 = vsel %vm13522_vm9, %v3741_v32, %v3745_v34  ;;  %v3798_v43 = vor.u32 %v3797_v45, %v3793_v48  ;;  %v3806_v34 = vshrl.u32 %v11692_v44, 16  ;;  %v944_v32 = vld [vmem:[#allocation3 + $0x30] sm:$0x1] }
 0x243   : > { %v3722_v17 = vsel %vm13522_vm9, %v3717_v26, %v3721_v40  ;;  %v3809_v16 = vshll.u32 %v11692_v44, 16 }
 0x244   : > { %v3751_v61 = vrot.slane %v3750_v15, 4  ;;  %v11708_v42 = vcombine.low %v3722_v17, %v3732_v11  ;;  %v3799_v26 = vrot.slane %v3798_v43, 4  ;;  %v3808_v56 = vrot.slane %v3806_v34, 4 }
 0x245   : > { %v3811_v55 = vrot.slane %v3809_v16, 5  ;;  %v1001_v16 = vld [vmem:[#allocation3 + $0x44] sm:$0x1] }
 0x246   : > { %v3756_v58 = vsel %vm13522_vm9, %v3751_v61, %v3755_v37  ;;  %v3804_v46 = vsel %vm13522_vm9, %v3799_v26, %v3803_v5  ;;  %v13229_v61 = vld [vmem:[#allocation2 + $0xcc] sm:$0xff]   ;;  %v945_v37 = vsel %vm13470_vm3, 0, %v944_v32  ;;  %v11724_v32 = vld [vmem:[#allocation2 + $0x44] sm:$0x1] }
 0x247   : > { %5617 = vmatmul.mubr.bf16.gmra.mrb[36].mxu0 %v13223_v36  ;;  %v3758_v36 = vshrl.u32 %v11686_v28, 16  ;;  %v11709_v29 = vcombine.low %v3746_v13, %v3756_v58  ;;  %v3812_v52 = vor.u32 %v3811_v55, %v3808_v56  ;;  %946 = vst [vmem:[#allocation3 + $0x30] sm:$0x1] %v945_v37 }
 0x248   : > { %5624 = vmatprep.mubr.bf16.mxu0 %v11705_v31  ;;  %v3761_v31 = vshll.u32 %v11686_v28, 16 }
 0x249   : > { %v3760_v30 = vrot.slane %v3758_v36, 4  ;;  %v11694_v36 = vld [vmem:[#allocation2 + $0xec] sm:$0x1] }
 0x24a   : > { %v3763_v4 = vrot.slane %v3761_v31, 5  ;;  %v3825_v11 = vshll.u32 %v11694_v36, 16 }
 0x24c   : > { %v3764_v0 = vor.u32 %v3763_v4, %v3760_v30  ;;  %v3813_v4 = vrot.slane %v3812_v52, 4 }
 0x24e   : > { %v3765_v41 = vrot.slane %v3764_v0, 4  ;;  %v4029_v0 = vrot.slane %v11714_v54, 5  ;;  %v4053_v54 = vrot.slane %v11724_v32, 5  ;;  %v971_v32 = vld [vmem:[#allocation3 + $0x9c] sm:$0x1] }
 0x24f   : > { %5625 = vmatmul.mubr.bf16.gmra.mrb[40].mxu0 %v13224_v27  ;;  %v3774_v27 = vor.u32 %v3773_v3, %v3769_v18  ;;  %v3827_v3 = vrot.slane %v3825_v11, 5  ;;  %v11722_v11 = vld [vmem:[#allocation2 + $0x3c] sm:$0xe] }
 0x250   : > { %5632 = vmatprep.mubr.bf16.mxu0 %v11706_v14  ;;  %v3785_v14 = vshll.u32 %v11689_v19, 16  ;;  %v3770_v50 = vsel %vm13522_vm9, %v3765_v41, %v3769_v18  ;;  %v4032_v41 = vrot.slane %v11715_v33, 5 }
 0x251   : > { %v3775_v40 = vrot.slane %v3774_v27, 4  ;;  %v11713_v27 = vld [vmem:[#allocation2 + $0x18] sm:$0xe] }
 0x252   : > { %v3787_v39 = vrot.slane %v3785_v14, 5  ;;  %v998_v14 = vld [vmem:[#allocation3 + $0x38] sm:$0x1] }
 0x253   : > { %v3780_v60 = vsel %vm13522_vm9, %v3775_v40, %v3779_v35  ;;  %v999_v57 = vsel %vm13480_vm4, 0, %v998_v14  ;;  %v11717_v40 = vld [vmem:[#allocation2 + $0x28] sm:$0xf]  ;;  %v11720_v35 = vld [vmem:[#allocation2 + $0x34] sm:$0xf] }
 0x254   : > { %v3788_v24 = vor.u32 %v3787_v39, %v3784_v38  ;;  %v11710_v28 = vcombine.low %v3770_v50, %v3780_v60  ;;  %1000 = vst [vmem:[#allocation3 + $0x38] sm:$0x1] %v999_v57  ;;  %v11716_v38 = vld [vmem:[#allocation2 + $0x24] sm:$0xe]  ;;  %v4036_v39 = vrot.slane %v11717_v40, 5  ;;  %v4043_v44 = vrot.slane %v11720_v35, 5 }
 0x255   : > { %v11719_v50 = vld [vmem:[#allocation2 + $0x30] sm:$0xe]  ;;  %v11721_v60 = vld [vmem:[#allocation2 + $0x38] sm:$0x1]  ;;  %v11768_v34 = vrot.slane %v11716_v38, 9 }
 0x256   : > { %v3789_v47 = vrot.slane %v3788_v24, 4  ;;  %v11769_v5 = vrot.slane %v11719_v50, 9  ;;  %v4045_v56 = vrot.slane %v4043_v44, 4  ;;  %v4046_v55 = vrot.slane %v11721_v60, 5  ;;  %v956_v35 = vld [vmem:[#allocation3 + $0x60] sm:$0x1] }
 0x257   : > { %5633 = vmatmul.mubr.bf16.gmra.mrb[44].mxu0 %v13225_v22  ;;  %v3815_v22 = vshll.u32 %v11693_v21, 16  ;;  %v947_v21 = vld [vmem:[#allocation3 + $0x3c] sm:$0x1]  ;;  %v4037_v36 = vsel %vm14154_vm14, %v11768_v34, %v4036_v39  ;;  %v957_v38 = vsel %vm13470_vm3, 0, %v956_v35  ;;  %v1013_v50 = vld [vmem:[#allocation3 + $0x74] sm:$0x1] }
 0x258   : > { %5640 = vmatprep.mubr.bf16.mxu0 %v11707_v23  ;;  %v13228_v23 = vld [vmem:[#allocation2 + $0xc0] sm:$0xff]   ;;  %v3794_v31 = vsel %vm13522_vm9, %v3789_v47, %v3793_v48  ;;  %v948_v24 = vsel %vm13470_vm3, 0, %v947_v21  ;;  %v1002_v47 = vsel %vm13480_vm4, 0, %v1001_v16  ;;  %v4044_v52 = vsel %vm14154_vm14, %v11769_v5, %v4043_v44  ;;  %958 = vst [vmem:[#allocation3 + $0x60] sm:$0x1] %v957_v38 }
 0x259   : > { %v3817_v15 = vrot.slane %v3815_v22, 5  ;;  %949 = vst [vmem:[#allocation3 + $0x3c] sm:$0x1] %v948_v24  ;;  %1003 = vst [vmem:[#allocation3 + $0x44] sm:$0x1] %v1002_v47  ;;  %v1014_v24 = vsel %vm13480_vm4, 0, %v1013_v50 }
 0x25a   : > { %1015 = vst [vmem:[#allocation3 + $0x74] sm:$0x1] %v1014_v24  ;;  %v962_v34 = vld [vmem:[#allocation3 + $0x78] sm:$0x1] }
 0x25b   : > { %v3822_v17 = vor.u32 %v3821_v62, %v3817_v15  ;;  %v3818_v13 = vsel %vm13522_vm9, %v3813_v4, %v3817_v15  ;;  %v11723_v15 = vld [vmem:[#allocation2 + $0x40] sm:$0xf]  ;;  %v963_v16 = vsel %vm13470_vm3, 0, %v962_v34 }
 0x25c   : > { %964 = vst [vmem:[#allocation3 + $0x78] sm:$0x1] %v963_v16  ;;  %v980_v16 = vld [vmem:[#allocation3 + $0xc0] sm:$0x1] }
 0x25d   : > { %v3823_v18 = vrot.slane %v3822_v17, 4  ;;  %v4047_v17 = vsel %vm14154_vm14, %v4045_v56, %v4046_v55  ;;  %v1019_v55 = vld [vmem:[#allocation3 + $0x8c] sm:$0x1] }
 0x25e   : > { %v11787_v4 = vcombine.low %v4044_v52, %v4047_v17  ;;  %v1022_v17 = vld [vmem:[#allocation3 + $0x98] sm:$0x1] }
 0x25f   : > { %5641 = vmatmul.mubr.bf16.gmra.mrb[48].mxu0 %v13226_v10  ;;  %v11711_v10 = vcombine.low %v3794_v31, %v3804_v46  ;;  %v3828_v58 = vsel %vm13522_vm9, %v3823_v18, %v3827_v3  ;;  %v4050_v46 = vrot.slane %v11723_v15, 5  ;;  %v11770_v18 = vrot.slane %v11722_v11, 9 }
 0x260   : > { %5648 = vmatprep.mubr.bf16.mxu0 %v11708_v42  ;;  %v11712_v49 = vcombine.low %v3818_v13, %v3828_v58  ;;  %v1004_v13 = vld [vmem:[#allocation3 + $0x50] sm:$0x1]  ;;  %v1023_v11 = vsel %vm13480_vm4, 0, %v1022_v17 }
 0x261   : > { %v4052_v3 = vrot.slane %v4050_v46, 4  ;;  %v1005_v58 = vsel %vm13480_vm4, 0, %v1004_v13  ;;  %1024 = vst [vmem:[#allocation3 + $0x98] sm:$0x1] %v1023_v11  ;;  %v974_v13 = vld [vmem:[#allocation3 + $0xa8] sm:$0x1] }
 0x262   : > { %1006 = vst [vmem:[#allocation3 + $0x50] sm:$0x1] %v1005_v58  ;;  %v975_v58 = vsel %vm13470_vm3, 0, %v974_v13  ;;  %v13233_v13 = vld [vmem:[%s16966_s2] sm:$0xff]  }
 0x263   : > { %976 = vst [vmem:[#allocation3 + $0xa8] sm:$0x1] %v975_v58 }
 0x267   : > { %5649 = vmatmul.mubr.bf16.gmra.mrb[52].mxu0 %v13227_v25  ;;  %v11767_v25 = vrot.slane %v11713_v27, 9  ;;  %v4054_v27 = vsel %vm14154_vm14, %v4052_v3, %v4053_v54 }
 0x268   : > { %5656 = vmatprep.mubr.bf16.mxu0 %v11709_v29  ;;  %v4031_v29 = vrot.slane %v4029_v0, 4 }
 0x269   : > { %v4030_v48 = vsel %vm14154_vm14, %v11767_v25, %v4029_v0  ;;  %v4051_v0 = vsel %vm14154_vm14, %v11770_v18, %v4050_v46  ;;  %v1007_v25 = vld [vmem:[#allocation3 + $0x5c] sm:$0x1]  ;;  %v968_v46 = vld [vmem:[#allocation3 + $0x90] sm:$0x1] }
 0x26a   : > { %v4033_v45 = vsel %vm14154_vm14, %v4031_v29, %v4032_v41  ;;  %v11788_v33 = vcombine.low %v4051_v0, %v4054_v27  ;;  %v1008_v41 = vsel %vm13480_vm4, 0, %v1007_v25  ;;  %v969_v52 = vsel %vm13470_vm3, 0, %v968_v46  ;;  %v1028_v0 = vld [vmem:[#allocation3 + $0xb0] sm:$0x1] }
 0x26b   : > { %v11785_v59 = vcombine.low %v4030_v48, %v4033_v45  ;;  %1009 = vst [vmem:[#allocation3 + $0x5c] sm:$0x1] %v1008_v41  ;;  %v959_v45 = vld [vmem:[#allocation3 + $0x6c] sm:$0x1]  ;;  %970 = vst [vmem:[#allocation3 + $0x90] sm:$0x1] %v969_v52 }
 0x26c   : > { %v960_v44 = vsel %vm13470_vm3, 0, %v959_v45  ;;  %v1029_v27 = vsel %vm13480_vm4, 0, %v1028_v0  ;;  %v983_v52 = vld [vmem:[#allocation3 + $0xcc] sm:$0x1] }
 0x26d   : > { %961 = vst [vmem:[#allocation3 + $0x6c] sm:$0x1] %v960_v44  ;;  %1030 = vst [vmem:[#allocation3 + $0xb0] sm:$0x1] %v1029_v27  ;;  %v984_v11 = vsel %vm13470_vm3, 0, %v983_v52 }
 0x26e   : > { %985 = vst [vmem:[#allocation3 + $0xcc] sm:$0x1] %v984_v11  ;;  %v935_v27 = vld [vmem:[#allocation3 + $0xc] sm:$0x1] }
 0x26f   : > { %5657 = vmatmul.mubr.bf16.gmra.mrb[56].mxu0 %v13228_v23  ;;  %v4038_v23 = vrot.slane %v4036_v39, 4  ;;  %v1010_v39 = vld [vmem:[#allocation3 + $0x68] sm:$0x1] }
 0x270   : > { %5664 = vmatprep.mubr.bf16.mxu0 %v11710_v28  ;;  %v15282_v30 = vpop.f32.mrb[0].mxu1  ;;  %v4039_v28 = vrot.slane %v11718_v20, 5  ;;  %v1011_v48 = vsel %vm13480_vm4, 0, %v1010_v39 }
 0x271   : > { %v15284_v42 = vpop.f32.mrb[1].mxu1  ;;  %1012 = vst [vmem:[#allocation3 + $0x68] sm:$0x1] %v1011_v48  ;;  %v1031_v48 = vld [vmem:[#allocation3 + $0xbc] sm:$0x1] }
 0x272   : > { %v15286_v19 = vpop.f32.mrb[2].mxu1  ;;  %v4040_v31 = vsel %vm14154_vm14, %v4038_v23, %v4039_v28  ;;  %v965_v28 = vld [vmem:[#allocation3 + $0x84] sm:$0x1]  ;;  %v1032_v44 = vsel %vm13480_vm4, 0, %v1031_v48  ;;  %v13234_v48 = vld [vmem:[%s16966_s2 + $0x48] sm:$0xff]  }
 0x273   : > { %v15288_v9 = vpop.f32.mrb[3].mxu1  ;;  %v11786_v37 = vcombine.low %v4037_v36, %v4040_v31  ;;  %v966_v5 = vsel %vm13470_vm3, 0, %v965_v28  ;;  %v1020_v36 = vsel %vm13480_vm4, 0, %v1019_v55  ;;  %1033 = vst [vmem:[#allocation3 + $0xbc] sm:$0x1] %v1032_v44 }
 0x274   : > { %967 = vst [vmem:[#allocation3 + $0x84] sm:$0x1] %v966_v5  ;;  %1021 = vst [vmem:[#allocation3 + $0x8c] sm:$0x1] %v1020_v36  ;;  %v1034_v5 = vld [vmem:[#allocation3 + $0xc8] sm:$0x1] }
 0x275   : > { %v1035_v55 = vsel %vm13480_vm4, 0, %v1034_v5  ;;  %v13235_v5 = vld [vmem:[%s16966_s2 + $0x8] sm:$0xff]  }
 0x276   : > { %1036 = vst [vmem:[#allocation3 + $0xc8] sm:$0x1] %v1035_v55 }
 0x277   : > { %5665 = vmatmul.mubr.bf16.gmra.mrb[60].mxu0 %v13229_v61  ;;  %v950_v61 = vld [vmem:[#allocation3 + $0x48] sm:$0x1] }
 0x278   : > { %5672 = vmatprep.mubr.bf16.mxu0 %v11711_v10  ;;  %v951_v10 = vsel %vm13470_vm3, 0, %v950_v61 }
 0x279   : > { %952 = vst [vmem:[#allocation3 + $0x48] sm:$0x1] %v951_v10 }
 0x27f   : > { %5673 = vmatmul.mubr.bf16.gmra.mrb[64].mxu0 %v13230_v53  ;;  %v15302_v43 = vpop.f32.mrb[4].mxu1  ;;  %v953_v53 = vld [vmem:[#allocation3 + $0x54] sm:$0x1] }
 0x280   : > { %5680 = vmatprep.mubr.bf16.mxu0 %v11712_v49  ;;  %v15304_v22 = vpop.f32.mrb[5].mxu1  ;;  %v954_v49 = vsel %vm13470_vm3, 0, %v953_v53 }
 0x281   : > { %v15308_v26 = vpop.f32.mrb[6].mxu1  ;;  %955 = vst [vmem:[#allocation3 + $0x54] sm:$0x1] %v954_v49  ;;  %v977_v49 = vld [vmem:[#allocation3 + $0xb4] sm:$0x1] }
 0x282   : > { %v15310_v62 = vpop.f32.mrb[7].mxu1  ;;  %v978_v35 = vsel %vm13470_vm3, 0, %v977_v49  ;;  %v936_v49 = vsel %vm13470_vm3, 0, %v935_v27 }
 0x283   : > { %979 = vst [vmem:[#allocation3 + $0xb4] sm:$0x1] %v978_v35  ;;  %v932_v35 = vld [vmem:[#allocation3] sm:$0x1]  ;;  %937 = vst [vmem:[#allocation3 + $0xc] sm:$0x1] %v936_v49 }
 0x284   : > { %v933_v44 = vsel %vm13470_vm3, 0, %v932_v35  ;;  %v13237_v49 = vld [vmem:[%s16966_s2 + $0x10] sm:$0xff]   ;;  %v938_v35 = vld [vmem:[#allocation3 + $0x18] sm:$0x1] }
 0x285   : > { %934 = vst [vmem:[#allocation3] sm:$0x1] %v933_v44 }
 0x287   : > { %5681 = vmatmul.mubr.bf16.gmra.mrb[68].mxu0 %v13231_v6 }
 0x288   : > { %12765 = vmatprep.mubr.bf16.mxu0 %v11785_v59  ;;  %v1016_v59 = vld [vmem:[#allocation3 + $0x80] sm:$0x1] }
 0x289   : > { %v1017_v23 = vsel %vm13480_vm4, 0, %v1016_v59 }
 0x28a   : > { %1018 = vst [vmem:[#allocation3 + $0x80] sm:$0x1] %v1017_v23  ;;  %v981_v23 = vsel %vm13470_vm3, 0, %v980_v16 }
 0x28b   : > { %982 = vst [vmem:[#allocation3 + $0xc0] sm:$0x1] %v981_v23  ;;  %v986_v23 = vld [vmem:[#allocation3 + $0x8] sm:$0x1] }
 0x28e   : > { %v15328_v14 = vpop.f32.mrb[8].mxu1 }
 0x28f   : > { %12766 = vmatmul.mubr.bf16.vlgmr.msra.gmra.mrb[72].mxu0 %v11786_v37  ;;  %v15332_v57 = vpop.f32.mrb[9].mxu1  ;;  %v972_v37 = vsel %vm13470_vm3, 0, %v971_v32 }
 0x290   : > { %12769 = vmatprep.mubr.bf16.mxu0 %v11787_v4  ;;  %v15334_v29 = vpop.f32.mrb[10].mxu1  ;;  %973 = vst [vmem:[#allocation3 + $0x9c] sm:$0x1] %v972_v37  ;;  %v1025_v4 = vld [vmem:[#allocation3 + $0xa4] sm:$0x1] }
 0x291   : > { %v15338_v40 = vpop.f32.mrb[11].mxu1  ;;  %v1026_v3 = vsel %vm13480_vm4, 0, %v1025_v4  ;;  %v1037_v37 = vld [vmem:[#allocation3 + $0xd4] sm:$0x1] }
 0x292   : > { %1027 = vst [vmem:[#allocation3 + $0xa4] sm:$0x1] %v1026_v3  ;;  %v1038_v4 = vsel %vm13480_vm4, 0, %v1037_v37  ;;  %v13232_v3 = vld [vmem:[%s16966_s2 + $0x40] sm:$0xff]  }
 0x293   : > { %1039 = vst [vmem:[#allocation3 + $0xd4] sm:$0x1] %v1038_v4  ;;  %12277 = vmatprep.subr.bf16.mxu1 %v13232_v3  ;;  %v15457_v37 = vld [vmem:[%s16967_s3 + $0x1] ss:$0 sm:$0xff]  ;;  %v13236_v3 = vld [vmem:[%s16966_s2 + $0x50] sm:$0xff]  }
 0x294   : > { %12278 = vmatpush3.bf16.msra.mxu1 %v13233_v13 }
 0x295   : > { %12279 = vmatprep.subr.bf16.mxu1 %v13234_v48 }
 0x297   : > { %12770 = vmatmul.mubr.bf16.gmra.mrb[76].mxu0 %v11788_v33 }
 0x298   : > { %12280 = vmatpush3.bf16.msra.mxu1 %v13235_v5  ;;  %v13239_v5 = vld [vmem:[%s16966_s2 + $0x18] sm:$0xff]  }
 0x299   : > { %12281 = vmatprep.subr.bf16.mxu1 %v13236_v3 }
 0x29c   : > { %12282 = vmatpush3.bf16.msra.mxu1 %v13237_v49 }
 0x29d   : > { %v15344_v20 = vpop.f32.mrb[12].mxu1 }
 0x29e   : > { %v15348_v21 = vpop.f32.mrb[13].mxu1 }
 0x29f   : > { %v15350_v60 = vpop.f32.mrb[14].mxu1 }
 0x2a0   : > { %v15354_v6 = vpop.f32.mrb[15].mxu1 }
 0x2a9   : > { %v15360_v47 = vpop.f32.mrb[16].mxu1 }
 0x2aa   : > { %v15364_v56 = vpop.f32.mrb[17].mxu1 }
 0x2ab   : > { %v15366_v15 = vpop.f32.mrb[18].mxu1 }
 0x2ac   : > { %v15370_v31 = vpop.f32.mrb[19].mxu1 }
 0x2ba   : > { %v15376_v61 = vpop.f32.mrb[20].mxu1 }
 0x2bb   : > { %v15380_v10 = vpop.f32.mrb[21].mxu1 }
 0x2bc   : > { %v15382_v18 = vpop.f32.mrb[22].mxu1 }
 0x2bd   : > { %v15386_v54 = vpop.f32.mrb[23].mxu1 }
 0x2d0   : > { %v15394_v25 = vpop.f32.mrb[24].mxu1 }
 0x2d1   : > { %v15400_v38 = vpop.f32.mrb[25].mxu1 }
 0x2d2   : > { %v15392_v33 = vpop.f32.mrb[0].mxu0  ;;  %v15402_v45 = vpop.f32.mrb[26].mxu1 }
 0x2d3   : > { %v5548_v53 = vpop.f32.mrb[1].mxu0  ;;  %v15406_v50 = vpop.f32.mrb[27].mxu1 }
 0x2d4   : > { %v15396_v41 = vpop.f32.mrb[2].mxu0 }
 0x2d5   : > { %v5551_v39 = vpop.f32.mrb[3].mxu0 }
 0x2da   : > { %v15408_v24 = vpop.f32.mrb[4].mxu0 }
 0x2db   : > { %v5556_v34 = vpop.f32.mrb[5].mxu0 }
 0x2dc   : > { %v15410_v59 = vpop.f32.mrb[6].mxu0  ;;  %v989_v34 = vld [vmem:[#allocation3 + $0x14] sm:$0x1] }
 0x2dd   : > { %v5559_v28 = vpop.f32.mrb[7].mxu0  ;;  %v990_v16 = vsel %vm13480_vm4, 0, %v989_v34  ;;  %v995_v34 = vld [vmem:[#allocation3 + $0x2c] sm:$0x1] }
 0x2de   : > { %991 = vst [vmem:[#allocation3 + $0x14] sm:$0x1] %v990_v16  ;;  %v987_v28 = vsel %vm13480_vm4, 0, %v986_v23  ;;  %v996_v16 = vsel %vm13480_vm4, 0, %v995_v34 }
 0x2df   : > { %988 = vst [vmem:[#allocation3 + $0x8] sm:$0x1] %v987_v28  ;;  %997 = vst [vmem:[#allocation3 + $0x2c] sm:$0x1] %v996_v16 }
 0x2e2   : > { %v15416_v36 = vpop.f32.mrb[8].mxu0 }
 0x2e3   : > { %v5564_v46 = vpop.f32.mrb[9].mxu0 }
 0x2e4   : > { %v15418_v17 = vpop.f32.mrb[10].mxu0  ;;  %v15451_v46 = vld [vmem:[%s16967_s3] ss:$0 sm:$0xff] }
 0x2e5   : > { %v5567_v32 = vpop.f32.mrb[11].mxu0 }
 0x2e6   : > { %v941_v32 = vld [vmem:[#allocation3 + $0x24] sm:$0x1] }
 0x2e7   : > { %v942_v13 = vsel %vm13470_vm3, 0, %v941_v32 }
 0x2e8   : > { %943 = vst [vmem:[#allocation3 + $0x24] sm:$0x1] %v942_v13 }
 0x2ea   : > { %v15430_v58 = vpop.f32.mrb[12].mxu0 }
 0x2eb   : > { %v5572_v0 = vpop.f32.mrb[13].mxu0 }
 0x2ec   : > { %v15432_v53 = vpop.f32.mrb[14].mxu0 }
 0x2ed   : > { %v5575_v39 = vpop.f32.mrb[15].mxu0 }
 0x2ee   : > { %v939_v39 = vsel %vm13470_vm3, 0, %v938_v35 }
 0x2ef   : > { %940 = vst [vmem:[#allocation3 + $0x18] sm:$0x1] %v939_v39 }
 0x2f2   : > { %v5578_v55 = vpop.f32.mrb[16].mxu0 }
 0x2f3   : > { %v5756_v52 = vadd.f32 %v15284_v42, %v5578_v55  ;;  %v5580_v11 = vpop.f32.mrb[17].mxu0 }
 0x2f4   : > { %v5581_v4 = vpop.f32.mrb[18].mxu0 }
 0x2f5   : > { %v5879_v0 = vmul.f32 %v15451_v46, %v5756_v52  ;;  %v5759_v27 = vadd.f32 %v15288_v9, %v5581_v4  ;;  %v5583_v42 = vpop.f32.mrb[19].mxu0  ;;  %v13238_v9 = vld [vmem:[%s16966_s2 + $0x58] sm:$0xff]   ;;  %v992_v52 = vld [vmem:[#allocation3 + $0x20] sm:$0x1] }
 0x2f6   : > { %12283 = vmatprep.subr.bf16.mxu1 %v13238_v9  ;;  %v993_v13 = vsel %vm13480_vm4, 0, %v992_v52  ;;  %v6492_v52 = vld [vmem:[#allocation3 + $0x38] sm:$0x1] }
 0x2f7   : > { %v5920_v48 = vadd.f32 %v15457_v37, %v5879_v0  ;;  %v5880_v44 = vmul.f32 %v15451_v46, %v5759_v27  ;;  %12284 = vmatpush3.bf16.msra.mxu1 %v13239_v5  ;;  %994 = vst [vmem:[#allocation3 + $0x20] sm:$0x1] %v993_v13 }
 0x2f9   : > { %v5956_v23 = vmax.f32 %v5920_v48, 0.0  ;;  %v5921_v28 = vadd.f32 %v15457_v37, %v5880_v44 }
 0x2fa   : > { %v5586_v55 = vpop.f32.mrb[20].mxu0 }
 0x2fb   : > { %v12223_v11 = vpack.c.bf16 %v5956_v23, %v5956_v23  ;;  %v5957_v32 = vmax.f32 %v5921_v28, 0.0  ;;  %v5764_v4 = vadd.f32 %v15282_v30, %v5586_v55  ;;  %v5588_v3 = vpop.f32.mrb[21].mxu0  ;;  %v6488_v30 = vld [vmem:[#allocation3 + $0x30] sm:$0xf] }
 0x2fc   : > { %v5589_v0 = vpop.f32.mrb[22].mxu0 }
 0x2fd   : > { %v6164_v27 = vshrl.u32 %v12223_v11, 16  ;;  %v12224_v42 = vpack.c.bf16 %v5957_v32, %v5957_v32  ;;  %v5881_v49 = vmul.f32 %v15451_v46, %v5764_v4  ;;  %v5591_v35 = vpop.f32.mrb[23].mxu0  ;;  %v5767_v39 = vadd.f32 %v15286_v19, %v5589_v0 }
 0x2fe   : > { %v6167_v44 = vshll.u32 %v12223_v11, 16 }
 0x2ff   : > { %v6166_v48 = vrot.slane %v6164_v27, 7  ;;  %v6172_v34 = vshrl.u32 %v12224_v42, 16  ;;  %v5922_v9 = vadd.f32 %v15457_v37, %v5881_v49  ;;  %v5882_v16 = vmul.f32 %v15451_v46, %v5767_v39 }
 0x300   : > { %v6175_v28 = vshll.u32 %v12224_v42, 16 }
 0x301   : > { %v6169_v23 = vor.u32 %v6167_v44, %v6166_v48  ;;  %v6174_v12 = vrot.slane %v6172_v34, 7  ;;  %v5958_v5 = vmax.f32 %v5922_v9, 0.0  ;;  %v6170_v55 = vrot.slane %v6166_v48, 4  ;;  %v13240_v34 = vld [vmem:[%s16966_s2 + $0x60] sm:$0xff]  }
 0x302   : > { %v5923_v32 = vadd.f32 %v15457_v37, %v5882_v16  ;;  %v5594_v4 = vpop.f32.mrb[24].mxu0  ;;  %v13241_v16 = vld [vmem:[%s16966_s2 + $0x20] sm:$0xff]   ;;  %12285 = vmatprep.subr.bf16.mxu1 %v13240_v34 }
 0x303   : > { %v6489_v19 = vsel %vm13532_vm10, %v6169_v23, %v6488_v30  ;;  %v6177_v3 = vor.u32 %v6175_v28, %v6174_v12  ;;  %v6179_v11 = vrot.slane %v6174_v12, 4  ;;  %v12225_v13 = vpack.c.bf16 %v5958_v5, %v5958_v5  ;;  %v5596_v0 = vpop.f32.mrb[25].mxu0  ;;  %v6495_v28 = vld [vmem:[#allocation3 + $0x3c] sm:$0xf]  ;;  %12286 = vmatpush3.bf16.msra.mxu1 %v13241_v16  ;;  %v13245_v16 = vld [vmem:[%s16966_s2 + $0x30] sm:$0xff]  }
 0x304   : > { %6490 = vst [vmem:[#allocation3 + $0x30] sm:$0xf] %v6489_v19  ;;  %v5959_v27 = vmax.f32 %v5923_v32, 0.0  ;;  %v5772_v49 = vadd.f32 %v15304_v22, %v5594_v4  ;;  %v5597_v35 = vpop.f32.mrb[26].mxu0  ;;  %v13242_v4 = vld [vmem:[%s16966_s2 + $0x68] sm:$0xff]  }
 0x305   : > { %v6178_v42 = vsel %vm13541_vm11, %v6170_v55, %v6177_v3  ;;  %v6493_v39 = vsel %vm13470_vm3, %v6179_v11, %v6492_v52  ;;  %v6181_v48 = vshrl.u32 %v12225_v13, 16  ;;  %v5599_v44 = vpop.f32.mrb[27].mxu0  ;;  %v5775_v22 = vadd.f32 %v15310_v62, %v5597_v35  ;;  %12287 = vmatprep.subr.bf16.mxu1 %v13242_v4 }
 0x306   : > { %6491 = vst [vmem:[#allocation3 + $0x34] sm:$0xf] %v6178_v42  ;;  %6494 = vst [vmem:[#allocation3 + $0x38] sm:$0x1] %v6493_v39  ;;  %v12226_v9 = vpack.c.bf16 %v5959_v27, %v5959_v27  ;;  %v5883_v30 = vmul.f32 %v15451_v46, %v5772_v49  ;;  %v6184_v12 = vshll.u32 %v12225_v13, 16  ;;  %v13243_v13 = vld [vmem:[%s16966_s2 + $0x28] sm:$0xff]  }
 0x307   : > { %v6183_v23 = vrot.slane %v6181_v48, 7  ;;  %v5884_v52 = vmul.f32 %v15451_v46, %v5775_v22  ;;  %v13244_v27 = vld [vmem:[%s16966_s2 + $0x70] sm:$0xff]   ;;  %12288 = vmatpush3.bf16.msra.mxu1 %v13243_v13 }
 0x308   : > { %v6189_v5 = vshrl.u32 %v12226_v9, 16  ;;  %v5924_v55 = vadd.f32 %v15457_v37, %v5883_v30  ;;  %v6192_v19 = vshll.u32 %v12226_v9, 16  ;;  %v6499_v42 = vld [vmem:[#allocation3 + $0x44] sm:$0x1]  ;;  %12289 = vmatprep.subr.bf16.mxu1 %v13244_v27 }
 0x309   : > { %v6186_v32 = vor.u32 %v6184_v12, %v6183_v23  ;;  %v5925_v11 = vadd.f32 %v15457_v37, %v5884_v52  ;;  %v6187_v49 = vrot.slane %v6183_v23, 4 }
 0x30a   : > { %v6191_v62 = vrot.slane %v6189_v5, 7  ;;  %v5960_v3 = vmax.f32 %v5924_v55, 0.0  ;;  %v5602_v0 = vpop.f32.mrb[28].mxu0 }
 0x30b   : > { %v6496_v35 = vsel %vm13532_vm10, %v6186_v32, %v6495_v28  ;;  %v5780_v39 = vadd.f32 %v15302_v43, %v5602_v0  ;;  %v5604_v48 = vpop.f32.mrb[29].mxu0  ;;  %v5961_v30 = vmax.f32 %v5925_v11, 0.0  ;;  %v13246_v43 = vld [vmem:[%s16966_s2 + $0x78] sm:$0xff]   ;;  %12290 = vmatpush3.bf16.msra.mxu1 %v13245_v16  ;;  %v6506_v16 = vld [vmem:[#allocation3 + $0x50] sm:$0x1] }
 0x30c   : > { %6497 = vst [vmem:[#allocation3 + $0x3c] sm:$0xf] %v6496_v35  ;;  %v6194_v44 = vor.u32 %v6192_v19, %v6191_v62  ;;  %v6196_v34 = vrot.slane %v6191_v62, 4  ;;  %v12227_v9 = vpack.c.bf16 %v5960_v3, %v5960_v3  ;;  %v5605_v22 = vpop.f32.mrb[30].mxu0  ;;  %v13247_v3 = vld [vmem:[%s16966_s2 + $0x38] sm:$0xff]   ;;  %12291 = vmatprep.subr.bf16.mxu1 %v13246_v43 }
 0x30d   : > { %v5885_v23 = vmul.f32 %v15451_v46, %v5780_v39  ;;  %v5783_v12 = vadd.f32 %v15308_v26, %v5605_v22  ;;  %v5607_v28 = vpop.f32.mrb[31].mxu0  ;;  %v12228_v32 = vpack.c.bf16 %v5961_v30, %v5961_v30  ;;  %v6502_v11 = vld [vmem:[#allocation3 + $0x48] sm:$0xf] }
 0x30e   : > { %v6195_v5 = vsel %vm13541_vm11, %v6187_v49, %v6194_v44  ;;  %v6500_v55 = vsel %vm13470_vm3, %v6196_v34, %v6499_v42  ;;  %v6198_v52 = vshrl.u32 %v12227_v9, 16  ;;  %v6201_v19 = vshll.u32 %v12227_v9, 16  ;;  %v13249_v49 = vld [vmem:[%s16966_s2 + $0xc0] sm:$0xff]  }
 0x30f   : > { %6498 = vst [vmem:[#allocation3 + $0x40] sm:$0xf] %v6195_v5  ;;  %6501 = vst [vmem:[#allocation3 + $0x44] sm:$0x1] %v6500_v55  ;;  %v5926_v4 = vadd.f32 %v15457_v37, %v5885_v23  ;;  %v5886_v26 = vmul.f32 %v15451_v46, %v5783_v12  ;;  %v6206_v0 = vshrl.u32 %v12228_v32, 16  ;;  %v6209_v42 = vshll.u32 %v12228_v32, 16  ;;  %12292 = vmatpush3.bf16.msra.mxu1 %v13247_v3 }
 0x310   : > { %v6200_v62 = vrot.slane %v6198_v52, 7  ;;  %12389 = vmatprep.subr.bf16.mxu1 %v13249_v49  ;;  %v6509_v52 = vld [vmem:[#allocation3 + $0x54] sm:$0xf] }
 0x311   : > { %v5962_v13 = vmax.f32 %v5926_v4, 0.0  ;;  %v5927_v27 = vadd.f32 %v15457_v37, %v5886_v26  ;;  %v6208_v48 = vrot.slane %v6206_v0, 7 }
 0x312   : > { %v6203_v35 = vor.u32 %v6201_v19, %v6200_v62  ;;  %v5610_v39 = vpop.f32.mrb[32].mxu0  ;;  %v6204_v12 = vrot.slane %v6200_v62, 4 }
 0x313   : > { %v12229_v44 = vpack.c.bf16 %v5962_v13, %v5962_v13  ;;  %v5963_v34 = vmax.f32 %v5927_v27, 0.0  ;;  %v5788_v9 = vadd.f32 %v15332_v57, %v5610_v39  ;;  %v5612_v30 = vpop.f32.mrb[33].mxu0  ;;  %v6211_v28 = vor.u32 %v6209_v42, %v6208_v48 }
 0x314   : > { %v6503_v22 = vsel %vm13532_vm10, %v6203_v35, %v6502_v11  ;;  %v5613_v23 = vpop.f32.mrb[34].mxu0  ;;  %v6213_v43 = vrot.slane %v6208_v48, 4 }
 0x315   : > { %6504 = vst [vmem:[#allocation3 + $0x48] sm:$0xf] %v6503_v22  ;;  %v6215_v5 = vshrl.u32 %v12229_v44, 16  ;;  %v5615_v55 = vpop.f32.mrb[35].mxu0  ;;  %v12230_v32 = vpack.c.bf16 %v5963_v34, %v5963_v34  ;;  %v5887_v4 = vmul.f32 %v15451_v46, %v5788_v9  ;;  %v5791_v57 = vadd.f32 %v15338_v40, %v5613_v23  ;;  %v6513_v9 = vld [vmem:[#allocation3 + $0x5c] sm:$0x1] }
 0x316   : > { %v6212_v26 = vsel %vm13541_vm11, %v6204_v12, %v6211_v28  ;;  %v6507_v19 = vsel %vm13470_vm3, %v6213_v43, %v6506_v16  ;;  %v6218_v62 = vshll.u32 %v12229_v44, 16 }
 0x317   : > { %v6217_v3 = vrot.slane %v6215_v5, 7  ;;  %6505 = vst [vmem:[#allocation3 + $0x4c] sm:$0xf] %v6212_v26  ;;  %6508 = vst [vmem:[#allocation3 + $0x50] sm:$0x1] %v6507_v19  ;;  %v6223_v11 = vshrl.u32 %v12230_v32, 16  ;;  %v5928_v0 = vadd.f32 %v15457_v37, %v5887_v4  ;;  %v5888_v13 = vmul.f32 %v15451_v46, %v5791_v57 }
 0x318   : > { %v6226_v35 = vshll.u32 %v12230_v32, 16 }
 0x319   : > { %v6220_v27 = vor.u32 %v6218_v62, %v6217_v3  ;;  %v6225_v49 = vrot.slane %v6223_v11, 7  ;;  %v5964_v42 = vmax.f32 %v5928_v0, 0.0  ;;  %v5929_v40 = vadd.f32 %v15457_v37, %v5888_v13  ;;  %v6516_v62 = vld [vmem:[#allocation3 + $0x60] sm:$0xf] }
 0x31a   : > { %v5618_v39 = vpop.f32.mrb[36].mxu0  ;;  %v6221_v48 = vrot.slane %v6217_v3, 4 }
 0x31b   : > { %v6510_v34 = vsel %vm13532_vm10, %v6220_v27, %v6509_v52  ;;  %v5796_v44 = vadd.f32 %v15328_v14, %v5618_v39  ;;  %v5620_v30 = vpop.f32.mrb[37].mxu0  ;;  %v6228_v22 = vor.u32 %v6226_v35, %v6225_v49  ;;  %v6230_v16 = vrot.slane %v6225_v49, 4 }
 0x31c   : > { %6511 = vst [vmem:[#allocation3 + $0x54] sm:$0xf] %v6510_v34  ;;  %v12231_v23 = vpack.c.bf16 %v5964_v42, %v5964_v42  ;;  %v5965_v12 = vmax.f32 %v5929_v40, 0.0  ;;  %v5621_v28 = vpop.f32.mrb[38].mxu0 }
 0x31d   : > { %v5889_v43 = vmul.f32 %v15451_v46, %v5796_v44  ;;  %v5799_v5 = vadd.f32 %v15334_v29, %v5621_v28  ;;  %v5623_v55 = vpop.f32.mrb[39].mxu0  ;;  %v6229_v32 = vsel %vm13541_vm11, %v6221_v48, %v6228_v22  ;;  %v6514_v52 = vsel %vm13470_vm3, %v6230_v16, %v6513_v9  ;;  %v6520_v9 = vld [vmem:[#allocation3 + $0x68] sm:$0x1] }
 0x31e   : > { %v6232_v4 = vshrl.u32 %v12231_v23, 16  ;;  %6512 = vst [vmem:[#allocation3 + $0x58] sm:$0xf] %v6229_v32  ;;  %6515 = vst [vmem:[#allocation3 + $0x5c] sm:$0x1] %v6514_v52  ;;  %v12232_v14 = vpack.c.bf16 %v5965_v12, %v5965_v12  ;;  %v6235_v3 = vshll.u32 %v12231_v23, 16 }
 0x31f   : > { %v5930_v57 = vadd.f32 %v15457_v37, %v5889_v43  ;;  %v5890_v26 = vmul.f32 %v15451_v46, %v5799_v5 }
 0x320   : > { %v6234_v19 = vrot.slane %v6232_v4, 7  ;;  %v6240_v11 = vshrl.u32 %v12232_v14, 16  ;;  %v6243_v27 = vshll.u32 %v12232_v14, 16  ;;  %v6523_v4 = vld [vmem:[#allocation3 + $0x6c] sm:$0xf] }
 0x321   : > { %v5966_v29 = vmax.f32 %v5930_v57, 0.0  ;;  %v5931_v0 = vadd.f32 %v15457_v37, %v5890_v26 }
 0x322   : > { %v6237_v13 = vor.u32 %v6235_v3, %v6234_v19  ;;  %v5626_v49 = vpop.f32.mrb[40].mxu0  ;;  %v6242_v35 = vrot.slane %v6240_v11, 7  ;;  %v6238_v30 = vrot.slane %v6234_v19, 4 }
 0x323   : > { %v12233_v42 = vpack.c.bf16 %v5966_v29, %v5966_v29  ;;  %v5967_v40 = vmax.f32 %v5931_v0, 0.0  ;;  %v5804_v39 = vadd.f32 %v15348_v21, %v5626_v49  ;;  %v5628_v48 = vpop.f32.mrb[41].mxu0 }
 0x324   : > { %v6517_v34 = vsel %vm13532_vm10, %v6237_v13, %v6516_v62  ;;  %v5629_v44 = vpop.f32.mrb[42].mxu0  ;;  %v6245_v22 = vor.u32 %v6243_v27, %v6242_v35  ;;  %v6247_v16 = vrot.slane %v6242_v35, 4  ;;  %v6527_v27 = vld [vmem:[#allocation3 + $0x74] sm:$0x1] }
 0x325   : > { %6518 = vst [vmem:[#allocation3 + $0x60] sm:$0xf] %v6517_v34  ;;  %v6249_v23 = vshrl.u32 %v12233_v42, 16  ;;  %v5631_v12 = vpop.f32.mrb[43].mxu0  ;;  %v12234_v28 = vpack.c.bf16 %v5967_v40, %v5967_v40  ;;  %v5891_v43 = vmul.f32 %v15451_v46, %v5804_v39  ;;  %v5807_v5 = vadd.f32 %v15354_v6, %v5629_v44 }
 0x326   : > { %v6246_v21 = vsel %vm13541_vm11, %v6238_v30, %v6245_v22  ;;  %v6521_v55 = vsel %vm13470_vm3, %v6247_v16, %v6520_v9  ;;  %v6252_v52 = vshll.u32 %v12233_v42, 16 }
 0x327   : > { %v6251_v32 = vrot.slane %v6249_v23, 7  ;;  %6519 = vst [vmem:[#allocation3 + $0x64] sm:$0xf] %v6246_v21  ;;  %6522 = vst [vmem:[#allocation3 + $0x68] sm:$0x1] %v6521_v55  ;;  %v6257_v14 = vshrl.u32 %v12234_v28, 16  ;;  %v5932_v57 = vadd.f32 %v15457_v37, %v5891_v43  ;;  %v5892_v26 = vmul.f32 %v15451_v46, %v5807_v5 }
 0x328   : > { %v6260_v62 = vshll.u32 %v12234_v28, 16  ;;  %v6530_v21 = vld [vmem:[#allocation3 + $0x78] sm:$0xf] }
 0x329   : > { %v6254_v19 = vor.u32 %v6252_v52, %v6251_v32  ;;  %v6259_v3 = vrot.slane %v6257_v14, 7  ;;  %v5968_v6 = vmax.f32 %v5932_v57, 0.0  ;;  %v5933_v11 = vadd.f32 %v15457_v37, %v5892_v26 }
 0x32a   : > { %v5634_v29 = vpop.f32.mrb[44].mxu0  ;;  %v6255_v0 = vrot.slane %v6251_v32, 4 }
 0x32b   : > { %v6524_v13 = vsel %vm13532_vm10, %v6254_v19, %v6523_v4  ;;  %v5812_v49 = vadd.f32 %v15344_v20, %v5634_v29  ;;  %v5636_v35 = vpop.f32.mrb[45].mxu0  ;;  %v6262_v42 = vor.u32 %v6260_v62, %v6259_v3  ;;  %v6264_v40 = vrot.slane %v6259_v3, 4 }
 0x32c   : > { %6525 = vst [vmem:[#allocation3 + $0x6c] sm:$0xf] %v6524_v13  ;;  %v12235_v39 = vpack.c.bf16 %v5968_v6, %v5968_v6  ;;  %v5969_v48 = vmax.f32 %v5933_v11, 0.0  ;;  %v5637_v34 = vpop.f32.mrb[46].mxu0  ;;  %v6534_v11 = vld [vmem:[#allocation3 + $0x80] sm:$0x1] }
 0x32d   : > { %v5893_v9 = vmul.f32 %v15451_v46, %v5812_v49  ;;  %v5815_v44 = vadd.f32 %v15350_v60, %v5637_v34  ;;  %v5639_v30 = vpop.f32.mrb[47].mxu0  ;;  %v6263_v22 = vsel %vm13541_vm11, %v6255_v0, %v6262_v42  ;;  %v6528_v16 = vsel %vm13470_vm3, %v6264_v40, %v6527_v27 }
 0x32e   : > { %v6266_v23 = vshrl.u32 %v12235_v39, 16  ;;  %6526 = vst [vmem:[#allocation3 + $0x70] sm:$0xf] %v6263_v22  ;;  %6529 = vst [vmem:[#allocation3 + $0x74] sm:$0x1] %v6528_v16  ;;  %v12236_v20 = vpack.c.bf16 %v5969_v48, %v5969_v48  ;;  %v6269_v5 = vshll.u32 %v12235_v39, 16 }
 0x32f   : > { %v5934_v12 = vadd.f32 %v15457_v37, %v5893_v9  ;;  %v5894_v28 = vmul.f32 %v15451_v46, %v5815_v44  ;;  %v6537_v44 = vld [vmem:[#allocation3 + $0x84] sm:$0xf] }
 0x330   : > { %v6268_v43 = vrot.slane %v6266_v23, 7  ;;  %v6274_v55 = vshrl.u32 %v12236_v20, 16  ;;  %v6277_v4 = vshll.u32 %v12236_v20, 16 }
 0x331   : > { %v5970_v60 = vmax.f32 %v5934_v12, 0.0  ;;  %v5935_v32 = vadd.f32 %v15457_v37, %v5894_v28 }
 0x332   : > { %v6271_v52 = vor.u32 %v6269_v5, %v6268_v43  ;;  %v5642_v14 = vpop.f32.mrb[48].mxu0  ;;  %v6276_v57 = vrot.slane %v6274_v55, 7  ;;  %v6272_v0 = vrot.slane %v6268_v43, 4  ;;  %v6541_v55 = vld [vmem:[#allocation3 + $0x8c] sm:$0x1] }
 0x333   : > { %v12237_v26 = vpack.c.bf16 %v5970_v60, %v5970_v60  ;;  %v5971_v19 = vmax.f32 %v5935_v32, 0.0  ;;  %v5820_v3 = vadd.f32 %v15364_v56, %v5642_v14  ;;  %v5644_v62 = vpop.f32.mrb[49].mxu0 }
 0x334   : > { %v6531_v6 = vsel %vm13532_vm10, %v6271_v52, %v6530_v21  ;;  %v5645_v29 = vpop.f32.mrb[50].mxu0  ;;  %v6279_v13 = vor.u32 %v6277_v4, %v6276_v57  ;;  %v6281_v27 = vrot.slane %v6276_v57, 4 }
 0x335   : > { %6532 = vst [vmem:[#allocation3 + $0x78] sm:$0xf] %v6531_v6  ;;  %v6283_v49 = vshrl.u32 %v12237_v26, 16  ;;  %v5647_v35 = vpop.f32.mrb[51].mxu0  ;;  %v12238_v42 = vpack.c.bf16 %v5971_v19, %v5971_v19  ;;  %v5895_v40 = vmul.f32 %v15451_v46, %v5820_v3  ;;  %v5823_v39 = vadd.f32 %v15370_v31, %v5645_v29 }
 0x336   : > { %v6280_v56 = vsel %vm13541_vm11, %v6272_v0, %v6279_v13  ;;  %v6535_v48 = vsel %vm13470_vm3, %v6281_v27, %v6534_v11  ;;  %v6286_v9 = vshll.u32 %v12237_v26, 16  ;;  %v6544_v35 = vld [vmem:[#allocation3 + $0x90] sm:$0xf] }
 0x337   : > { %v6285_v34 = vrot.slane %v6283_v49, 7  ;;  %6533 = vst [vmem:[#allocation3 + $0x7c] sm:$0xf] %v6280_v56  ;;  %6536 = vst [vmem:[#allocation3 + $0x80] sm:$0x1] %v6535_v48  ;;  %v6291_v30 = vshrl.u32 %v12238_v42, 16  ;;  %v5936_v22 = vadd.f32 %v15457_v37, %v5895_v40  ;;  %v5896_v16 = vmul.f32 %v15451_v46, %v5823_v39 }
 0x338   : > { %v6294_v12 = vshll.u32 %v12238_v42, 16 }
 0x339   : > { %v6288_v23 = vor.u32 %v6286_v9, %v6285_v34  ;;  %v6293_v20 = vrot.slane %v6291_v30, 7  ;;  %v5972_v31 = vmax.f32 %v5936_v22, 0.0  ;;  %v5937_v28 = vadd.f32 %v15457_v37, %v5896_v16 }
 0x33a   : > { %v5650_v43 = vpop.f32.mrb[52].mxu0  ;;  %v6289_v5 = vrot.slane %v6285_v34, 4 }
 0x33b   : > { %v6538_v21 = vsel %vm13532_vm10, %v6288_v23, %v6537_v44  ;;  %v5828_v60 = vadd.f32 %v15360_v47, %v5650_v43  ;;  %v5652_v32 = vpop.f32.mrb[53].mxu0  ;;  %v6296_v52 = vor.u32 %v6294_v12, %v6293_v20  ;;  %v6298_v4 = vrot.slane %v6293_v20, 4  ;;  %v6548_v23 = vld [vmem:[#allocation3 + $0x98] sm:$0x1] }
 0x33c   : > { %6539 = vst [vmem:[#allocation3 + $0x84] sm:$0xf] %v6538_v21  ;;  %v12239_v14 = vpack.c.bf16 %v5972_v31, %v5972_v31  ;;  %v5973_v57 = vmax.f32 %v5937_v28, 0.0  ;;  %v5653_v26 = vpop.f32.mrb[54].mxu0 }
 0x33d   : > { %v5897_v19 = vmul.f32 %v15451_v46, %v5828_v60  ;;  %v5831_v3 = vadd.f32 %v15366_v15, %v5653_v26  ;;  %v5655_v62 = vpop.f32.mrb[55].mxu0  ;;  %v6297_v6 = vsel %vm13541_vm11, %v6289_v5, %v6296_v52  ;;  %v6542_v11 = vsel %vm13470_vm3, %v6298_v4, %v6541_v55 }
 0x33e   : > { %v6300_v29 = vshrl.u32 %v12239_v14, 16  ;;  %6540 = vst [vmem:[#allocation3 + $0x88] sm:$0xf] %v6297_v6  ;;  %6543 = vst [vmem:[#allocation3 + $0x8c] sm:$0x1] %v6542_v11  ;;  %v12240_v47 = vpack.c.bf16 %v5973_v57, %v5973_v57  ;;  %v6303_v49 = vshll.u32 %v12239_v14, 16 }
 0x33f   : > { %v5938_v0 = vadd.f32 %v15457_v37, %v5897_v19  ;;  %v5898_v13 = vmul.f32 %v15451_v46, %v5831_v3  ;;  %v6551_v14 = vld [vmem:[#allocation3 + $0x9c] sm:$0xf] }
 0x340   : > { %v6302_v27 = vrot.slane %v6300_v29, 7  ;;  %v6308_v42 = vshrl.u32 %v12240_v47, 16  ;;  %v6311_v56 = vshll.u32 %v12240_v47, 16 }
 0x341   : > { %v5974_v15 = vmax.f32 %v5938_v0, 0.0  ;;  %v5939_v40 = vadd.f32 %v15457_v37, %v5898_v13  ;;  %v6555_v13 = vld [vmem:[#allocation3 + $0xa4] sm:$0x1] }
 0x342   : > { %v6305_v39 = vor.u32 %v6303_v49, %v6302_v27  ;;  %v5658_v48 = vpop.f32.mrb[56].mxu0  ;;  %v6310_v34 = vrot.slane %v6308_v42, 7  ;;  %v6306_v12 = vrot.slane %v6302_v27, 4 }
 0x343   : > { %v12241_v9 = vpack.c.bf16 %v5974_v15, %v5974_v15  ;;  %v5975_v44 = vmax.f32 %v5939_v40, 0.0  ;;  %v5836_v30 = vadd.f32 %v15380_v10, %v5658_v48  ;;  %v5660_v22 = vpop.f32.mrb[57].mxu0 }
 0x344   : > { %v6545_v16 = vsel %vm13532_vm10, %v6305_v39, %v6544_v35  ;;  %v5661_v20 = vpop.f32.mrb[58].mxu0  ;;  %v6313_v31 = vor.u32 %v6311_v56, %v6310_v34  ;;  %v6315_v28 = vrot.slane %v6310_v34, 4 }
 0x345   : > { %6546 = vst [vmem:[#allocation3 + $0x90] sm:$0xf] %v6545_v16  ;;  %v6317_v43 = vshrl.u32 %v12241_v9, 16  ;;  %v5663_v5 = vpop.f32.mrb[59].mxu0  ;;  %v12242_v21 = vpack.c.bf16 %v5975_v44, %v5975_v44  ;;  %v5899_v55 = vmul.f32 %v15451_v46, %v5836_v30  ;;  %v5839_v60 = vadd.f32 %v15386_v54, %v5661_v20 }
 0x346   : > { %v6314_v10 = vsel %vm13541_vm11, %v6306_v12, %v6313_v31  ;;  %v6549_v32 = vsel %vm13470_vm3, %v6315_v28, %v6548_v23  ;;  %v6320_v4 = vshll.u32 %v12241_v9, 16  ;;  %v6558_v12 = vld [vmem:[#allocation3 + $0xa8] sm:$0xf] }
 0x347   : > { %v6319_v52 = vrot.slane %v6317_v43, 7  ;;  %6547 = vst [vmem:[#allocation3 + $0x94] sm:$0xf] %v6314_v10  ;;  %6550 = vst [vmem:[#allocation3 + $0x98] sm:$0x1] %v6549_v32  ;;  %v6325_v57 = vshrl.u32 %v12242_v21, 16  ;;  %v5940_v26 = vadd.f32 %v15457_v37, %v5899_v55  ;;  %v5900_v19 = vmul.f32 %v15451_v46, %v5839_v60 }
 0x348   : > { %v6328_v6 = vshll.u32 %v12242_v21, 16 }
 0x349   : > { %v6322_v3 = vor.u32 %v6320_v4, %v6319_v52  ;;  %v6327_v62 = vrot.slane %v6325_v57, 7  ;;  %v5976_v54 = vmax.f32 %v5940_v26, 0.0  ;;  %v5941_v11 = vadd.f32 %v15457_v37, %v5900_v19 }
 0x34a   : > { %v5666_v29 = vpop.f32.mrb[60].mxu0  ;;  %v6323_v47 = vrot.slane %v6319_v52, 4 }
 0x34b   : > { %v6552_v0 = vsel %vm13532_vm10, %v6322_v3, %v6551_v14  ;;  %v5844_v27 = vadd.f32 %v15376_v61, %v5666_v29  ;;  %v5668_v49 = vpop.f32.mrb[61].mxu0  ;;  %v6330_v35 = vor.u32 %v6328_v6, %v6327_v62  ;;  %v6332_v42 = vrot.slane %v6327_v62, 4  ;;  %v6562_v14 = vld [vmem:[#allocation3 + $0xb0] sm:$0x1] }
 0x34c   : > { %6553 = vst [vmem:[#allocation3 + $0x9c] sm:$0xf] %v6552_v0  ;;  %v12243_v15 = vpack.c.bf16 %v5976_v54, %v5976_v54  ;;  %v5977_v40 = vmax.f32 %v5941_v11, 0.0  ;;  %v5669_v39 = vpop.f32.mrb[62].mxu0 }
 0x34d   : > { %v5901_v56 = vmul.f32 %v15451_v46, %v5844_v27  ;;  %v5847_v48 = vadd.f32 %v15382_v18, %v5669_v39  ;;  %v5671_v34 = vpop.f32.mrb[63].mxu0  ;;  %v6331_v9 = vsel %vm13541_vm11, %v6323_v47, %v6330_v35  ;;  %v6556_v44 = vsel %vm13470_vm3, %v6332_v42, %v6555_v13  ;;  %v6565_v27 = vld [vmem:[#allocation3 + $0xb4] sm:$0xf] }
 0x34e   : > { %v6334_v30 = vshrl.u32 %v12243_v15, 16  ;;  %6554 = vst [vmem:[#allocation3 + $0xa0] sm:$0xf] %v6331_v9  ;;  %6557 = vst [vmem:[#allocation3 + $0xa4] sm:$0x1] %v6556_v44  ;;  %v12244_v61 = vpack.c.bf16 %v5977_v40, %v5977_v40  ;;  %v6337_v20 = vshll.u32 %v12243_v15, 16 }
 0x34f   : > { %v5942_v22 = vadd.f32 %v15457_v37, %v5901_v56  ;;  %v5902_v16 = vmul.f32 %v15451_v46, %v5847_v48  ;;  %v6569_v44 = vld [vmem:[#allocation3 + $0xbc] sm:$0x1] }
 0x350   : > { %v6336_v23 = vrot.slane %v6334_v30, 7  ;;  %v6342_v31 = vshrl.u32 %v12244_v61, 16  ;;  %v6345_v5 = vshll.u32 %v12244_v61, 16 }
 0x351   : > { %v5978_v18 = vmax.f32 %v5942_v22, 0.0  ;;  %v5943_v28 = vadd.f32 %v15457_v37, %v5902_v16 }
 0x352   : > { %v6339_v43 = vor.u32 %v6337_v20, %v6336_v23  ;;  %v5674_v21 = vpop.f32.mrb[64].mxu0  ;;  %v6344_v55 = vrot.slane %v6342_v31, 7  ;;  %v6340_v26 = vrot.slane %v6336_v23, 4 }
 0x353   : > { %v12245_v60 = vpack.c.bf16 %v5978_v18, %v5978_v18  ;;  %v5979_v10 = vmax.f32 %v5943_v28, 0.0  ;;  %v5852_v32 = vadd.f32 %v15400_v38, %v5674_v21  ;;  %v5676_v52 = vpop.f32.mrb[65].mxu0 }
 0x354   : > { %v6559_v4 = vsel %vm13532_vm10, %v6339_v43, %v6558_v12  ;;  %v5677_v57 = vpop.f32.mrb[66].mxu0  ;;  %v6347_v19 = vor.u32 %v6345_v5, %v6344_v55  ;;  %v6349_v3 = vrot.slane %v6344_v55, 4  ;;  %v6572_v52 = vld [vmem:[#allocation3 + $0xc0] sm:$0xf] }
 0x355   : > { %6560 = vst [vmem:[#allocation3 + $0xa8] sm:$0xf] %v6559_v4  ;;  %v6351_v62 = vshrl.u32 %v12245_v60, 16  ;;  %v5679_v6 = vpop.f32.mrb[67].mxu0  ;;  %v12246_v54 = vpack.c.bf16 %v5979_v10, %v5979_v10  ;;  %v5903_v11 = vmul.f32 %v15451_v46, %v5852_v32  ;;  %v5855_v29 = vadd.f32 %v15406_v50, %v5677_v57 }
 0x356   : > { %v6348_v38 = vsel %vm13541_vm11, %v6340_v26, %v6347_v19  ;;  %v6563_v47 = vsel %vm13470_vm3, %v6349_v3, %v6562_v14  ;;  %v6354_v13 = vshll.u32 %v12245_v60, 16 }
 0x357   : > { %v6353_v0 = vrot.slane %v6351_v62, 7  ;;  %6561 = vst [vmem:[#allocation3 + $0xac] sm:$0xf] %v6348_v38  ;;  %6564 = vst [vmem:[#allocation3 + $0xb0] sm:$0x1] %v6563_v47  ;;  %v6359_v49 = vshrl.u32 %v12246_v54, 16  ;;  %v5944_v35 = vadd.f32 %v15457_v37, %v5903_v11  ;;  %v5904_v42 = vmul.f32 %v15451_v46, %v5855_v29 }
 0x358   : > { %v6362_v39 = vshll.u32 %v12246_v54, 16  ;;  %v6576_v38 = vld [vmem:[#allocation3 + $0xc8] sm:$0x1] }
 0x359   : > { %v6356_v15 = vor.u32 %v6354_v13, %v6353_v0  ;;  %v6361_v40 = vrot.slane %v6359_v49, 7  ;;  %v5980_v50 = vmax.f32 %v5944_v35, 0.0  ;;  %v5945_v56 = vadd.f32 %v15457_v37, %v5904_v42 }
 0x35a   : > { %v5682_v48 = vpop.f32.mrb[68].mxu0  ;;  %v6357_v34 = vrot.slane %v6353_v0, 4 }
 0x35b   : > { %v6566_v9 = vsel %vm13532_vm10, %v6356_v15, %v6565_v27  ;;  %v5860_v30 = vadd.f32 %v15394_v25, %v5682_v48  ;;  %v5684_v61 = vpop.f32.mrb[69].mxu0  ;;  %v6364_v22 = vor.u32 %v6362_v39, %v6361_v40  ;;  %v6366_v16 = vrot.slane %v6361_v40, 4 }
 0x35c   : > { %6567 = vst [vmem:[#allocation3 + $0xb4] sm:$0xf] %v6566_v9  ;;  %v12247_v23 = vpack.c.bf16 %v5980_v50, %v5980_v50  ;;  %v5981_v20 = vmax.f32 %v5945_v56, 0.0  ;;  %v5685_v12 = vpop.f32.mrb[70].mxu0 }
 0x35d   : > { %v5905_v31 = vmul.f32 %v15451_v46, %v5860_v30  ;;  %v5863_v18 = vadd.f32 %v15402_v45, %v5685_v12  ;;  %v5687_v28 = vpop.f32.mrb[71].mxu0  ;;  %v6365_v43 = vsel %vm13541_vm11, %v6357_v34, %v6364_v22  ;;  %v6570_v5 = vsel %vm13470_vm3, %v6366_v16, %v6569_v44  ;;  %v6579_v34 = vld [vmem:[#allocation3 + $0xcc] sm:$0xf]  ;;  %v15681_v44 = vld [vmem:[%s16967_s3 + $0x1] ss:$0 sm:$0xff] }
 0x35e   : > { %v6368_v21 = vshrl.u32 %v12247_v23, 16  ;;  %6568 = vst [vmem:[#allocation3 + $0xb8] sm:$0xf] %v6365_v43  ;;  %6571 = vst [vmem:[#allocation3 + $0xbc] sm:$0x1] %v6570_v5  ;;  %v12248_v25 = vpack.c.bf16 %v5981_v20, %v5981_v20  ;;  %v6371_v32 = vshll.u32 %v12247_v23, 16 }
 0x35f   : > { %v5946_v55 = vadd.f32 %v15457_v37, %v5905_v31  ;;  %v5906_v60 = vmul.f32 %v15451_v46, %v5863_v18  ;;  %v6583_v43 = vld [vmem:[#allocation3 + $0xd4] sm:$0x1] }
 0x360   : > { %v6370_v10 = vrot.slane %v6368_v21, 7  ;;  %v6376_v4 = vshrl.u32 %v12248_v25, 16  ;;  %v6379_v26 = vshll.u32 %v12248_v25, 16 }
 0x361   : > { %v5982_v45 = vmax.f32 %v5946_v55, 0.0  ;;  %v5947_v14 = vadd.f32 %v15457_v37, %v5906_v60 }
 0x362   : > { %v6373_v57 = vor.u32 %v6371_v32, %v6370_v10  ;;  %v12767_v19 = vpop.f32.mrb[72].mxu0  ;;  %v6378_v3 = vrot.slane %v6376_v4, 7  ;;  %v6374_v29 = vrot.slane %v6370_v10, 4 }
 0x363   : > { %v12249_v62 = vpack.c.bf16 %v5982_v45, %v5982_v45  ;;  %v5983_v6 = vmax.f32 %v5947_v14, 0.0  ;;  %v5732_v54 = vadd.f32 %v12767_v19, %v15408_v24  ;;  %v5723_v11 = vpop.f32.mrb[73].mxu0  ;;  %v15668_v24 = vld [vmem:[%s16967_s3] ss:$0 sm:$0xff] }
 0x364   : > { %v6573_v46 = vsel %vm13532_vm10, %v6373_v57, %v6572_v52  ;;  %v5724_v47 = vadd.f32 %v5723_v11, %v15392_v33  ;;  %v12768_v0 = vpop.f32.mrb[74].mxu0  ;;  %v6381_v13 = vor.u32 %v6379_v26, %v6378_v3  ;;  %v6383_v37 = vrot.slane %v6378_v3, 4 }
 0x365   : > { %6574 = vst [vmem:[#allocation3 + $0xc0] sm:$0xf] %v6573_v46  ;;  %v6385_v27 = vshrl.u32 %v12249_v62, 16  ;;  %v6388_v49 = vshll.u32 %v12249_v62, 16  ;;  %v5726_v35 = vpop.f32.mrb[75].mxu0  ;;  %v12250_v42 = vpack.c.bf16 %v5983_v6, %v5983_v6  ;;  %v5873_v15 = vmul.f32 %v15668_v24, %v5732_v54 }
 0x366   : > { %v5871_v40 = vmul.f32 %v15668_v24, %v5724_v47  ;;  %v5735_v39 = vadd.f32 %v12768_v0, %v15410_v59  ;;  %v6382_v33 = vsel %vm13541_vm11, %v6374_v29, %v6381_v13  ;;  %v6577_v50 = vsel %vm13470_vm3, %v6383_v37, %v6576_v38  ;;  %v6467_v13 = vld [vmem:[#allocation3 + $0xc] sm:$0xf] }
 0x367   : > { %v6387_v56 = vrot.slane %v6385_v27, 7  ;;  %v5727_v48 = vadd.f32 %v5726_v35, %v15396_v41  ;;  %6575 = vst [vmem:[#allocation3 + $0xc4] sm:$0xf] %v6382_v33  ;;  %6578 = vst [vmem:[#allocation3 + $0xc8] sm:$0x1] %v6577_v50  ;;  %v6393_v9 = vshrl.u32 %v12250_v42, 16  ;;  %v5914_v59 = vadd.f32 %v15681_v44, %v5873_v15 }
 0x368   : > { %v5912_v30 = vadd.f32 %v15681_v44, %v5871_v40  ;;  %v6396_v22 = vshll.u32 %v12250_v42, 16  ;;  %v5874_v16 = vmul.f32 %v15668_v24, %v5735_v39  ;;  %v6458_v40 = vld [vmem:[#allocation3] sm:$0xf] }
 0x369   : > { %v6390_v61 = vor.u32 %v6388_v49, %v6387_v56  ;;  %v5872_v23 = vmul.f32 %v15668_v24, %v5727_v48  ;;  %v6391_v41 = vrot.slane %v6387_v56, 4  ;;  %v6395_v20 = vrot.slane %v6393_v9, 7 }
 0x36a   : > { %v5950_v12 = vmax.f32 %v5914_v59, 0.0  ;;  %v5948_v31 = vmax.f32 %v5912_v30, 0.0  ;;  %v12771_v18 = vpop.f32.mrb[76].mxu0  ;;  %v5915_v5 = vadd.f32 %v15681_v44, %v5874_v16  ;;  %v6471_v59 = vld [vmem:[#allocation3 + $0x14] sm:$0x1] }
 0x36b   : > { %v6580_v28 = vsel %vm13532_vm10, %v6390_v61, %v6579_v34  ;;  %v5913_v21 = vadd.f32 %v15681_v44, %v5872_v23  ;;  %v5748_v25 = vadd.f32 %v12771_v18, %v15430_v58  ;;  %v5739_v55 = vpop.f32.mrb[77].mxu0  ;;  %v6398_v60 = vor.u32 %v6396_v22, %v6395_v20 }
 0x36c   : > { %6581 = vst [vmem:[#allocation3 + $0xcc] sm:$0xf] %v6580_v28  ;;  %v6400_v10 = vrot.slane %v6395_v20, 4  ;;  %v12217_v32 = vpack.c.bf16 %v5950_v12, %v5950_v12  ;;  %v12215_v52 = vpack.c.bf16 %v5948_v31, %v5948_v31  ;;  %v12772_v4 = vpop.f32.mrb[78].mxu0  ;;  %v5951_v45 = vmax.f32 %v5915_v5, 0.0 }
 0x36d   : > { %6593 = vst [vmem:[#allocation3 + $0xcc] sm:$0xf] %v13386_v1  ;;  %v5949_v14 = vmax.f32 %v5913_v21, 0.0  ;;  %v5877_v57 = vmul.f32 %v15668_v24, %v5748_v25  ;;  %v5740_v26 = vadd.f32 %v5739_v55, %v15416_v36  ;;  %v5742_v19 = vpop.f32.mrb[79].mxu0  ;;  %v6399_v3 = vsel %vm13541_vm11, %v6391_v41, %v6398_v60  ;;  %v6464_v20 = vld [vmem:[#allocation3 + $0x8] sm:$0x1] }
 0x36e   : > { %v6584_v58 = vsel %vm13470_vm3, %v6400_v10, %v6583_v43  ;;  %v6113_v62 = vshrl.u32 %v12217_v32, 16  ;;  %v6116_v6 = vshll.u32 %v12217_v32, 16  ;;  %6582 = vst [vmem:[#allocation3 + $0xd0] sm:$0xf] %v6399_v3  ;;  %v6096_v54 = vshrl.u32 %v12215_v52, 16 }
 0x36f   : > { %6585 = vst [vmem:[#allocation3 + $0xd4] sm:$0x1] %v6584_v58  ;;  %v6099_v11 = vshll.u32 %v12215_v52, 16  ;;  %v12218_v29 = vpack.c.bf16 %v5951_v45, %v5951_v45  ;;  %v12216_v46 = vpack.c.bf16 %v5949_v14, %v5949_v14  ;;  %6594 = vst [vmem:[#allocation3 + $0xd0] sm:$0xf] %v13386_v1  ;;  %v5918_v38 = vadd.f32 %v15681_v44, %v5877_v57 }
 0x370   : > { %6595 = vst [vmem:[#allocation3 + $0xd4] sm:$0x1] %v13386_v1  ;;  %v6115_v36 = vrot.slane %v6113_v62, 7  ;;  %v5875_v47 = vmul.f32 %v15668_v24, %v5740_v26  ;;  %v5751_v0 = vadd.f32 %v12772_v4, %v15432_v53  ;;  %v6098_v37 = vrot.slane %v6096_v54, 7  ;;  %v6481_v52 = vld [vmem:[#allocation3 + $0x24] sm:$0xf] }
 0x371   : > { %v6121_v27 = vshrl.u32 %v12218_v29, 16  ;;  %v6124_v49 = vshll.u32 %v12218_v29, 16  ;;  %v6104_v35 = vshrl.u32 %v12216_v46, 16  ;;  %v6107_v39 = vshll.u32 %v12216_v46, 16 }
 0x372   : > { %v6118_v42 = vor.u32 %v6116_v6, %v6115_v36  ;;  %v6119_v15 = vrot.slane %v6115_v36, 4  ;;  %v5954_v33 = vmax.f32 %v5918_v38, 0.0  ;;  %v6101_v50 = vor.u32 %v6099_v11, %v6098_v37 }
 0x373   : > { %v6102_v56 = vrot.slane %v6098_v37, 4  ;;  %v6123_v48 = vrot.slane %v6121_v27, 7  ;;  %v6106_v34 = vrot.slane %v6104_v35, 7  ;;  %v5916_v53 = vadd.f32 %v15681_v44, %v5875_v47 }
 0x374   : > { %v6468_v9 = vsel %vm13532_vm10, %v6118_v42, %v6467_v13  ;;  %v12221_v30 = vpack.c.bf16 %v5954_v33, %v5954_v33  ;;  %v5878_v61 = vmul.f32 %v15668_v24, %v5751_v0  ;;  %v6459_v22 = vsel %vm13532_vm10, %v6101_v50, %v6458_v40 }
 0x375   : > { %6469 = vst [vmem:[#allocation3 + $0xc] sm:$0xf] %v6468_v9  ;;  %v6126_v16 = vor.u32 %v6124_v49, %v6123_v48  ;;  %v6128_v23 = vrot.slane %v6123_v48, 4  ;;  %v6109_v41 = vor.u32 %v6107_v39, %v6106_v34  ;;  %6460 = vst [vmem:[#allocation3] sm:$0xf] %v6459_v22  ;;  %v6111_v12 = vrot.slane %v6106_v34, 4 }
 0x376   : > { %v6147_v31 = vshrl.u32 %v12221_v30, 16  ;;  %v6150_v18 = vshll.u32 %v12221_v30, 16  ;;  %v5952_v28 = vmax.f32 %v5916_v53, 0.0  ;;  %6589 = vst [vmem:[#allocation3] sm:$0xf] %v13386_v1  ;;  %v5919_v25 = vadd.f32 %v15681_v44, %v5878_v61 }
 0x377   : > { %v6127_v43 = vsel %vm13541_vm11, %v6119_v15, %v6126_v16  ;;  %v6472_v5 = vsel %vm13470_vm3, %v6128_v23, %v6471_v59  ;;  %v6110_v21 = vsel %vm13541_vm11, %v6102_v56, %v6109_v41  ;;  %v6465_v55 = vsel %vm13470_vm3, %v6111_v12, %v6464_v20  ;;  %v6478_v22 = vld [vmem:[#allocation3 + $0x20] sm:$0x1] }
 0x378   : > { %6470 = vst [vmem:[#allocation3 + $0x10] sm:$0xf] %v6127_v43  ;;  %6473 = vst [vmem:[#allocation3 + $0x14] sm:$0x1] %v6472_v5  ;;  %v6149_v60 = vrot.slane %v6147_v31, 7  ;;  %v12219_v10 = vpack.c.bf16 %v5952_v28, %v5952_v28  ;;  %v5743_v32 = vadd.f32 %v5742_v19, %v15418_v17  ;;  %v5955_v4 = vmax.f32 %v5919_v25, 0.0 }
 0x379   : > { %6461 = vst [vmem:[#allocation3 + $0x4] sm:$0xf] %v6110_v21  ;;  %6466 = vst [vmem:[#allocation3 + $0x8] sm:$0x1] %v6465_v55  ;;  %v6474_v19 = vld [vmem:[#allocation3 + $0x18] sm:$0xf] }
 0x37a   : > { %6590 = vst [vmem:[#allocation3 + $0x4] sm:$0xf] %v13386_v1  ;;  %6591 = vst [vmem:[#allocation3 + $0x8] sm:$0x1] %v13386_v1  ;;  %v6152_v45 = vor.u32 %v6150_v18, %v6149_v60  ;;  %v6130_v14 = vshrl.u32 %v12219_v10, 16  ;;  %v12222_v57 = vpack.c.bf16 %v5955_v4, %v5955_v4  ;;  %v5876_v26 = vmul.f32 %v15668_v24, %v5743_v32 }
 0x37b   : > { %v6133_v62 = vshll.u32 %v12219_v10, 16  ;;  %v6153_v17 = vrot.slane %v6149_v60, 4  ;;  %v6485_v24 = vld [vmem:[#allocation3 + $0x2c] sm:$0x1] }
 0x37c   : > { %v6482_v3 = vsel %vm13532_vm10, %v6152_v45, %v6481_v52  ;;  %v15726_v58 = vrot.slane %v6130_v14, 7  ;;  %v6743_v6 = vld [vmem:[#allocation3 + $0xc] sm:$0xf]  ;;  %v6155_v54 = vshrl.u32 %v12222_v57, 16  ;;  %v5917_v11 = vadd.f32 %v15681_v44, %v5876_v26 }
 0x37d   : > { %6483 = vst [vmem:[#allocation3 + $0x24] sm:$0xf] %v6482_v3  ;;  %v6158_v29 = vshll.u32 %v12222_v57, 16  ;;  %v6740_v46 = vld [vmem:[#allocation3] sm:$0xf]  ;;  %v6813_v36 = vshrl.u32 %v6743_v6, 16 }
 0x37e   : > { %v6135_v1 = vor.u32 %v6133_v62, %v15726_v58  ;;  %v6157_v38 = vrot.slane %v6155_v54, 7  ;;  %v5953_v47 = vmax.f32 %v5917_v11, 0.0  ;;  %v6789_v0 = vshrl.u32 %v6740_v46, 16  ;;  %v6753_v54 = vld [vmem:[#allocation3 + $0x34] sm:$0xf] }
 0x37f   : > { %v6792_v13 = vshll.u32 %v6740_v46, 16  ;;  %v6136_v37 = vrot.slane %v15726_v58, 4  ;;  %v6816_v35 = vshll.u32 %v6743_v6, 16  ;;  %v6744_v33 = vld [vmem:[#allocation3 + $0x10] sm:$0xf]  ;;  %v6815_v53 = vrot.slane %v6813_v36, 4 }
 0x380   : > { %v6475_v27 = vsel %vm13532_vm10, %v6135_v1, %v6474_v19  ;;  %v6160_v42 = vor.u32 %v6158_v29, %v6157_v38  ;;  %v6162_v44 = vrot.slane %v6157_v38, 4  ;;  %v12220_v15 = vpack.c.bf16 %v5953_v47, %v5953_v47  ;;  %v6745_v30 = vld [vmem:[#allocation3 + $0x14] sm:$0x1] }
 0x381   : > { %v6741_v49 = vld [vmem:[#allocation3 + $0x4] sm:$0xf]  ;;  %6476 = vst [vmem:[#allocation3 + $0x18] sm:$0xf] %v6475_v27  ;;  %v6742_v40 = vld [vmem:[#allocation3 + $0x8] sm:$0x1] }
 0x382   : > { %v6791_v39 = vrot.slane %v6789_v0, 4  ;;  %v6794_v50 = vrot.slane %v6792_v13, 5  ;;  %v6798_v56 = vshll.u32 %v6741_v49, 16  ;;  %v6802_v48 = vshrl.u32 %v6741_v49, 16  ;;  %v13248_v6 = vld [vmem:[#allocation3] sm:$0xff]  }
 0x383   : > { %v6808_v34 = vshll.u32 %v6742_v40, 16  ;;  %v6161_v9 = vsel %vm13541_vm11, %v6153_v17, %v6160_v42  ;;  %v6486_v2 = vsel %vm13470_vm3, %v6162_v44, %v6485_v24  ;;  %v6138_v59 = vshrl.u32 %v12220_v15, 16  ;;  %v6752_v42 = vld [vmem:[#allocation3 + $0x30] sm:$0xf] }
 0x384   : > { %6484 = vst [vmem:[#allocation3 + $0x28] sm:$0xf] %v6161_v9  ;;  %6487 = vst [vmem:[#allocation3 + $0x2c] sm:$0x1] %v6486_v2  ;;  %v6141_v61 = vshll.u32 %v12220_v15, 16  ;;  %v6795_v16 = vor.u32 %v6794_v50, %v6791_v39  ;;  %v6800_v23 = vrot.slane %v6798_v56, 5 }
 0x385   : > { %v6804_v41 = vrot.slane %v6802_v48, 4  ;;  %v6140_v20 = vrot.slane %v6138_v59, 7  ;;  %v6818_v12 = vrot.slane %v6816_v35, 5  ;;  %v6822_v31 = vshll.u32 %v6744_v33, 16  ;;  %v6749_v14 = vld [vmem:[#allocation3 + $0x24] sm:$0xf] }
 0x386   : > { %v6826_v18 = vshrl.u32 %v6744_v33, 16  ;;  %v6796_v28 = vrot.slane %v6795_v16, 4  ;;  %v6810_v5 = vrot.slane %v6808_v34, 5  ;;  %v6832_v21 = vshll.u32 %v6745_v30, 16  ;;  %v13254_v15 = vld [vmem:[%s16966_s2 + $0x88] sm:$0xff]   ;;  %v13257_v33 = vld [vmem:[%s16966_s2 + $0xd0] sm:$0xff]  }
 0x387   : > { %v6805_v43 = vor.u32 %v6804_v41, %v6800_v23  ;;  %v6143_v25 = vor.u32 %v6141_v61, %v6140_v20  ;;  %v6145_v55 = vrot.slane %v6140_v20, 4  ;;  %v6819_v60 = vor.u32 %v6818_v12, %v6815_v53  ;;  %v13251_v41 = vld [vmem:[#allocation3 + $0xc] sm:$0xff]  }
 0x388   : > { %v6824_v10 = vrot.slane %v6822_v31, 5  ;;  %v6801_v32 = vsel %vm13522_vm9, %v6796_v28, %v6800_v23  ;;  %v6828_v4 = vrot.slane %v6826_v18, 4  ;;  %v6746_v45 = vld [vmem:[#allocation3 + $0x18] sm:$0xf]  ;;  %v6834_v1 = vrot.slane %v6832_v21, 5  ;;  %v13258_v23 = vld [vmem:[%s16966_s2 + $0x90] sm:$0xff]  }
 0x389   : > { %v6806_v52 = vrot.slane %v6805_v43, 4  ;;  %v6144_v57 = vsel %vm13541_vm11, %v6136_v37, %v6143_v25  ;;  %v6479_v26 = vsel %vm13470_vm3, %v6145_v55, %v6478_v22  ;;  %v6820_v3 = vrot.slane %v6819_v60, 4  ;;  %v13261_v28 = vld [vmem:[%s16966_s2 + $0xd8] sm:$0xff]   ;;  %v6756_v60 = vld [vmem:[#allocation3 + $0x40] sm:$0xf] }
 0x38a   : > { %v6837_v58 = vshrl.u32 %v6746_v45, 16  ;;  %6477 = vst [vmem:[#allocation3 + $0x1c] sm:$0xf] %v6144_v57  ;;  %6480 = vst [vmem:[#allocation3 + $0x20] sm:$0x1] %v6479_v26  ;;  %v6829_v17 = vor.u32 %v6828_v4, %v6824_v10  ;;  %v6840_v19 = vshll.u32 %v6746_v45, 16 }
 0x38b   : > { %v6811_v62 = vsel %vm13522_vm9, %v6806_v52, %v6810_v5  ;;  %v6750_v29 = vld [vmem:[#allocation3 + $0x28] sm:$0xf]  ;;  %v6861_v46 = vshrl.u32 %v6749_v14, 16  ;;  %v6864_v38 = vshll.u32 %v6749_v14, 16  ;;  %v6825_v0 = vsel %vm13522_vm9, %v6820_v3, %v6824_v10  ;;  %v6751_v50 = vld [vmem:[#allocation3 + $0x2c] sm:$0x1] }
 0x38c   : > { %v11929_v11 = vcombine.low %v6801_v32, %v6811_v62  ;;  %v6830_v36 = vrot.slane %v6829_v17, 4  ;;  %v6870_v24 = vshll.u32 %v6750_v29, 16  ;;  %v6874_v47 = vshrl.u32 %v6750_v29, 16  ;;  %v13262_v52 = vld [vmem:[%s16966_s2 + $0x98] sm:$0xff]   ;;  %v13265_v26 = vld [vmem:[%s16966_s2 + $0xe0] sm:$0xff]  }
 0x38d   : > { %v6839_v13 = vrot.slane %v6837_v58, 4  ;;  %v6842_v27 = vrot.slane %v6840_v19, 5  ;;  %v6894_v40 = vshll.u32 %v6753_v54, 16  ;;  %v6898_v39 = vshrl.u32 %v6753_v54, 16  ;;  %v6754_v3 = vld [vmem:[#allocation3 + $0x38] sm:$0x1] }
 0x38e   : > { %10182 = vmatprep.mubr.bf16.mxu1 %v11929_v11  ;;  %v6835_v37 = vsel %vm13522_vm9, %v6830_v36, %v6834_v1  ;;  %v15755_v49 = vrot.slane %v6870_v24, 5  ;;  %v6876_v35 = vrot.slane %v6874_v47, 4  ;;  %v6863_v56 = vrot.slane %v6861_v46, 4  ;;  %v6755_v62 = vld [vmem:[#allocation3 + $0x3c] sm:$0xf] }
 0x38f   : > { %10183 = vmatmul.mubr.bf16.vlgmr.msra.gmra.mrb[28].mxu1 %v13248_v6  ;;  %v11930_v44 = vcombine.low %v6825_v0, %v6835_v37  ;;  %v6866_v48 = vrot.slane %v6864_v38, 5  ;;  %v6843_v2 = vor.u32 %v6842_v27, %v6839_v13  ;;  %v6880_v61 = vshll.u32 %v6751_v50, 16  ;;  %v13269_v47 = vld [vmem:[%s16966_s2 + $0xe8] sm:$0xff]   ;;  %v6757_v50 = vld [vmem:[#allocation3 + $0x44] sm:$0x1] }
 0x390   : > { %12390 = vmatpush3.bf16.msra.mxu1 %v13250_v8  ;;  %v6877_v53 = vor.u32 %v6876_v35, %v15755_v49  ;;  %v6885_v22 = vshrl.u32 %v6752_v42, 16  ;;  %v6888_v16 = vshll.u32 %v6752_v42, 16  ;;  %v15770_v43 = vrot.slane %v6894_v40, 5  ;;  %v6759_v42 = vld [vmem:[#allocation3 + $0x4c] sm:$0xf] }
 0x391   : > { %12391 = vmatprep.subr.bf16.mxu1 %v13253_v7  ;;  %10190 = vmatprep.mubr.bf16.mxu1 %v11930_v44  ;;  %v6747_v34 = vld [vmem:[#allocation3 + $0x1c] sm:$0xf]  ;;  %v6748_v9 = vld [vmem:[#allocation3 + $0x20] sm:$0x1]  ;;  %v6867_v18 = vor.u32 %v6866_v48, %v6863_v56  ;;  %v6900_v5 = vrot.slane %v6898_v39, 4  ;;  %v6844_v21 = vrot.slane %v6843_v2, 4 }
 0x392   : > { %v6846_v59 = vshll.u32 %v6747_v34, 16  ;;  %v6850_v30 = vshrl.u32 %v6747_v34, 16  ;;  %v6856_v31 = vshll.u32 %v6748_v9, 16  ;;  %v6878_v55 = vrot.slane %v6877_v53, 4  ;;  %v13266_v7 = vld [vmem:[%s16966_s2 + $0xa0] sm:$0xff]   ;;  %v13252_v29 = vld [vmem:[#allocation3 + $0x18] sm:$0xff]  }
 0x393   : > { %v6887_v10 = vrot.slane %v6885_v22, 4  ;;  %v6890_v32 = vrot.slane %v6888_v16, 5  ;;  %v6868_v14 = vrot.slane %v6867_v18, 4  ;;  %v6882_v57 = vrot.slane %v6880_v61, 5  ;;  %v6758_v39 = vld [vmem:[#allocation3 + $0x48] sm:$0xf] }
 0x394   : > { %12392 = vmatpush3.bf16.msra.mxu1 %v13254_v15  ;;  %v6848_v20 = vrot.slane %v6846_v59, 5  ;;  %v6852_v12 = vrot.slane %v6850_v30, 4  ;;  %v6858_v45 = vrot.slane %v6856_v31, 5  ;;  %v6901_v58 = vor.u32 %v6900_v5, %v15770_v43  ;;  %v13274_v30 = vld [vmem:[%s16966_s2 + $0xb0] sm:$0xff]   ;;  %v6762_v5 = vld [vmem:[#allocation3 + $0x58] sm:$0xf] }
 0x395   : > { %12393 = vmatprep.subr.bf16.mxu1 %v13257_v33  ;;  %v6918_v6 = vshll.u32 %v6756_v60, 16  ;;  %v6883_v54 = vsel %vm13522_vm9, %v6878_v55, %v6882_v57  ;;  %v6922_v11 = vshrl.u32 %v6756_v60, 16  ;;  %v6891_v8 = vor.u32 %v6890_v32, %v6887_v10  ;;  %v13273_v33 = vld [vmem:[%s16966_s2 + $0xf0] sm:$0xff]   ;;  %v13281_v55 = vld [vmem:[%s16966_s2 + $0x140] sm:$0xff]   ;;  %v9142_v51 = vld [vmem:[#allocation3 + $0x18] sm:$0xe] }
 0x396   : > { %v6853_v25 = vor.u32 %v6852_v12, %v6848_v20  ;;  %v6849_v17 = vsel %vm13522_vm9, %v6844_v21, %v6848_v20  ;;  %v6873_v46 = vsel %vm13522_vm9, %v6868_v14, %v15755_v49  ;;  %v6904_v36 = vshll.u32 %v6754_v3, 16  ;;  %v13270_v49 = vld [vmem:[%s16966_s2 + $0xa8] sm:$0xff]   ;;  %v13255_v53 = vld [vmem:[#allocation3 + $0x24] sm:$0xff]   ;;  %v6760_v60 = vld [vmem:[#allocation3 + $0x50] sm:$0x1] }
 0x397   : > { %10191 = vmatmul.mubr.bf16.gmra.mrb[32].mxu1 %v13251_v41  ;;  %v6909_v38 = vshrl.u32 %v6755_v62, 16  ;;  %v6912_v24 = vshll.u32 %v6755_v62, 16  ;;  %v11932_v0 = vcombine.low %v6873_v46, %v6883_v54  ;;  %v6902_v13 = vrot.slane %v6901_v58, 4  ;;  %v6761_v10 = vld [vmem:[#allocation3 + $0x54] sm:$0xf] }
 0x398   : > { %12394 = vmatpush3.bf16.msra.mxu1 %v13258_v23  ;;  %v6854_v4 = vrot.slane %v6853_v25, 4  ;;  %v6920_v37 = vrot.slane %v6918_v6, 5  ;;  %v6924_v27 = vrot.slane %v6922_v11, 4  ;;  %v6892_v35 = vrot.slane %v6891_v8, 4  ;;  %v13277_v23 = vld [vmem:[%s16966_s2 + $0xf8] sm:$0xff]   ;;  %v13256_v57 = vld [vmem:[#allocation3 + $0x30] sm:$0xff]  }
 0x399   : > { %12395 = vmatprep.subr.bf16.mxu1 %v13261_v28  ;;  %v6906_v44 = vrot.slane %v6904_v36, 5  ;;  %v6911_v15 = vrot.slane %v6909_v38, 4  ;;  %v6914_v40 = vrot.slane %v6912_v24, 5  ;;  %v6942_v34 = vshll.u32 %v6759_v42, 16  ;;  %v6763_v46 = vld [vmem:[#allocation3 + $0x5c] sm:$0x1] }
 0x39a   : > { %v6859_v19 = vsel %vm13522_vm9, %v6854_v4, %v6858_v45  ;;  %v6925_v48 = vor.u32 %v6924_v27, %v6920_v37  ;;  %v6946_v9 = vshrl.u32 %v6759_v42, 16  ;;  %v6933_v2 = vshrl.u32 %v6758_v39, 16  ;;  %v6764_v36 = vld [vmem:[#allocation3 + $0x60] sm:$0xf] }
 0x39b   : > { %v11931_v1 = vcombine.low %v6849_v17, %v6859_v19  ;;  %v6907_v56 = vsel %vm13522_vm9, %v6902_v13, %v6906_v44  ;;  %v6936_v59 = vshll.u32 %v6758_v39, 16  ;;  %v6897_v61 = vsel %vm13522_vm9, %v6892_v35, %v15770_v43  ;;  %v13278_v43 = vld [vmem:[%s16966_s2 + $0xb8] sm:$0xff]  }
 0x39c   : > { %12396 = vmatpush3.bf16.msra.mxu1 %v13262_v52  ;;  %v6915_v22 = vor.u32 %v6914_v40, %v6911_v15  ;;  %v6928_v16 = vshll.u32 %v6757_v50, 16  ;;  %v11933_v41 = vcombine.low %v6897_v61, %v6907_v56  ;;  %v6926_v20 = vrot.slane %v6925_v48, 4 }
 0x39d   : > { %12397 = vmatprep.subr.bf16.mxu1 %v13265_v26  ;;  %10198 = vmatprep.mubr.bf16.mxu1 %v11931_v1  ;;  %v6944_v12 = vrot.slane %v6942_v34, 5  ;;  %v6948_v31 = vrot.slane %v6946_v9, 4  ;;  %v6935_v18 = vrot.slane %v6933_v2, 4  ;;  %v6938_v28 = vrot.slane %v6936_v59, 5  ;;  %v6765_v1 = vld [vmem:[#allocation3 + $0x64] sm:$0xf] }
 0x39e   : > { %v6916_v21 = vrot.slane %v6915_v22, 4  ;;  %v6930_v25 = vrot.slane %v6928_v16, 5  ;;  %v6966_v4 = vshll.u32 %v6762_v5, 16  ;;  %v6970_v45 = vshrl.u32 %v6762_v5, 16  ;;  %v6767_v9 = vld [vmem:[#allocation3 + $0x6c] sm:$0xf] }
 0x39f   : > { %10199 = vmatmul.mubr.bf16.gmra.mrb[36].mxu1 %v13252_v29  ;;  %v6949_v52 = vor.u32 %v6948_v31, %v6944_v12  ;;  %v6939_v14 = vor.u32 %v6938_v28, %v6935_v18  ;;  %v6952_v3 = vshll.u32 %v6760_v60, 16  ;;  %v6957_v58 = vshrl.u32 %v6761_v10, 16  ;;  %v6766_v2 = vld [vmem:[#allocation3 + $0x68] sm:$0x1] }
 0x3a0   : > { %10206 = vmatprep.mubr.bf16.mxu1 %v11932_v0  ;;  %12398 = vmatpush3.bf16.msra.mxu1 %v13266_v7  ;;  %v6931_v32 = vsel %vm13522_vm9, %v6926_v20, %v6930_v25  ;;  %v6921_v26 = vsel %vm13522_vm9, %v6916_v21, %v6920_v37  ;;  %v6960_v62 = vshll.u32 %v6761_v10, 16  ;;  %v6968_v19 = vrot.slane %v6966_v4, 5  ;;  %v13259_v37 = vld [vmem:[#allocation3 + $0x3c] sm:$0xff]   ;;  %v6769_v10 = vld [vmem:[#allocation3 + $0x74] sm:$0x1] }
 0x3a1   : > { %12399 = vmatprep.subr.bf16.mxu1 %v13269_v47  ;;  %v11934_v6 = vcombine.low %v6921_v26, %v6931_v32  ;;  %v6950_v17 = vrot.slane %v6949_v52, 4  ;;  %v6972_v54 = vrot.slane %v6970_v45, 4  ;;  %v6940_v11 = vrot.slane %v6939_v14, 4  ;;  %v6771_v25 = vld [vmem:[#allocation3 + $0x7c] sm:$0xf]  ;;  %v13263_v26 = vld [vmem:[#allocation3 + $0x54] sm:$0xff]  }
 0x3a2   : > { %v6954_v8 = vrot.slane %v6952_v3, 5  ;;  %v6959_v7 = vrot.slane %v6957_v58, 4  ;;  %v6962_v29 = vrot.slane %v6960_v62, 5  ;;  %v6990_v47 = vshll.u32 %v6765_v1, 16  ;;  %v6770_v32 = vld [vmem:[#allocation3 + $0x78] sm:$0xf] }
 0x3a3   : > { %v6973_v24 = vor.u32 %v6972_v54, %v6968_v19  ;;  %v6994_v0 = vshrl.u32 %v6765_v1, 16  ;;  %v6945_v13 = vsel %vm13522_vm9, %v6940_v11, %v6944_v12  ;;  %v6976_v35 = vshll.u32 %v6763_v46, 16 }
 0x3a4   : > { %12400 = vmatpush3.bf16.msra.mxu1 %v13270_v49  ;;  %v6955_v38 = vsel %vm13522_vm9, %v6950_v17, %v6954_v8  ;;  %v6963_v27 = vor.u32 %v6962_v29, %v6959_v7  ;;  %v6981_v42 = vshrl.u32 %v6764_v36, 16  ;;  %v6984_v49 = vshll.u32 %v6764_v36, 16  ;;  %v6774_v8 = vld [vmem:[#allocation3 + $0x88] sm:$0xf]  ;;  %v6772_v36 = vld [vmem:[#allocation3 + $0x80] sm:$0x1] }
 0x3a5   : > { %12401 = vmatprep.subr.bf16.mxu1 %v13273_v33  ;;  %v11935_v44 = vcombine.low %v6945_v13, %v6955_v38  ;;  %v6974_v15 = vrot.slane %v6973_v24, 4  ;;  %v6992_v40 = vrot.slane %v6990_v47, 5  ;;  %v6996_v39 = vrot.slane %v6994_v0, 4  ;;  %v6768_v33 = vld [vmem:[#allocation3 + $0x70] sm:$0xf] }
 0x3a6   : > { %v6964_v50 = vrot.slane %v6963_v27, 4  ;;  %v6978_v56 = vrot.slane %v6976_v35, 5  ;;  %v6983_v48 = vrot.slane %v6981_v42, 4  ;;  %v6986_v34 = vrot.slane %v6984_v49, 5  ;;  %v6773_v38 = vld [vmem:[#allocation3 + $0x84] sm:$0xf] }
 0x3a7   : > { %10207 = vmatmul.mubr.bf16.gmra.mrb[40].mxu1 %v13255_v53  ;;  %v7014_v53 = vshll.u32 %v6768_v33, 16  ;;  %v7018_v61 = vshrl.u32 %v6768_v33, 16  ;;  %v7005_v22 = vshrl.u32 %v6767_v9, 16  ;;  %v7008_v16 = vshll.u32 %v6767_v9, 16  ;;  %v13264_v27 = vld [vmem:[#allocation3 + $0x60] sm:$0xff]  }
 0x3a8   : > { %10214 = vmatprep.mubr.bf16.mxu1 %v11933_v41  ;;  %12402 = vmatpush3.bf16.msra.mxu1 %v13274_v30  ;;  %v6979_v59 = vsel %vm13522_vm9, %v6974_v15, %v6978_v56  ;;  %v6997_v30 = vor.u32 %v6996_v39, %v6992_v40  ;;  %v6969_v41 = vsel %vm13522_vm9, %v6964_v50, %v6968_v19  ;;  %v7000_v12 = vshll.u32 %v6766_v2, 16  ;;  %v6776_v50 = vld [vmem:[#allocation3 + $0x90] sm:$0xf]  ;;  %v6777_v56 = vld [vmem:[#allocation3 + $0x94] sm:$0xf] }
 0x3a9   : > { %12403 = vmatprep.subr.bf16.mxu1 %v13277_v23  ;;  %v13260_v23 = vld [vmem:[#allocation3 + $0x48] sm:$0xff]   ;;  %v6987_v20 = vor.u32 %v6986_v34, %v6983_v48  ;;  %v11936_v31 = vcombine.low %v6969_v41, %v6979_v59  ;;  %v7016_v28 = vrot.slane %v7014_v53, 5  ;;  %v7020_v5 = vrot.slane %v7018_v61, 4 }
 0x3aa   : > { %v6998_v18 = vrot.slane %v6997_v30, 4  ;;  %v7010_v21 = vrot.slane %v7008_v16, 5  ;;  %v7002_v60 = vrot.slane %v7000_v12, 5  ;;  %v7038_v45 = vshll.u32 %v6771_v25, 16  ;;  %v6775_v59 = vld [vmem:[#allocation3 + $0x8c] sm:$0x1] }
 0x3ab   : > { %v7021_v4 = vor.u32 %v7020_v5, %v7016_v28  ;;  %v7042_v14 = vshrl.u32 %v6771_v25, 16  ;;  %v7024_v58 = vshll.u32 %v6769_v10, 16  ;;  %v7029_v62 = vshrl.u32 %v6770_v32, 16  ;;  %v13267_v41 = vld [vmem:[#allocation3 + $0x6c] sm:$0xff]  }
 0x3ac   : > { %12404 = vmatpush3.bf16.msra.mxu1 %v13278_v43  ;;  %v7007_v43 = vrot.slane %v7005_v22, 4  ;;  %v7003_v52 = vsel %vm13522_vm9, %v6998_v18, %v7002_v60  ;;  %v7040_v54 = vrot.slane %v7038_v45, 5  ;;  %v7062_v0 = vshll.u32 %v6774_v8, 16 }
 0x3ad   : > { %12501 = vmatprep.subr.bf16.mxu1 %v13281_v55  ;;  %v6988_v55 = vrot.slane %v6987_v20, 4  ;;  %v7022_v19 = vrot.slane %v7021_v4, 4  ;;  %v7044_v11 = vrot.slane %v7042_v14, 4  ;;  %v7026_v7 = vrot.slane %v7024_v58, 5 }
 0x3ae   : > { %v7031_v29 = vrot.slane %v7029_v62, 4  ;;  %v7066_v13 = vshrl.u32 %v6774_v8, 16  ;;  %v7048_v42 = vshll.u32 %v6772_v36, 16  ;;  %v7053_v49 = vshrl.u32 %v6773_v38, 16 }
 0x3af   : > { %10215 = vmatmul.mubr.bf16.gmra.mrb[44].mxu1 %v13256_v57  ;;  %v7011_v57 = vor.u32 %v7010_v21, %v7007_v43  ;;  %v6993_v3 = vsel %vm13522_vm9, %v6988_v55, %v6992_v40  ;;  %v7027_v24 = vsel %vm13522_vm9, %v7022_v19, %v7026_v7  ;;  %v7045_v47 = vor.u32 %v7044_v11, %v7040_v54  ;;  %v6780_v55 = vld [vmem:[#allocation3 + $0xa0] sm:$0xf]  ;;  %v6783_v7 = vld [vmem:[#allocation3 + $0xac] sm:$0xf] }
 0x3b0   : > { %10222 = vmatprep.mubr.bf16.mxu1 %v11934_v6  ;;  %v7032_v6 = vshll.u32 %v6770_v32, 16  ;;  %v11937_v17 = vcombine.low %v6993_v3, %v7003_v52  ;;  %v7064_v39 = vrot.slane %v7062_v0, 5  ;;  %v7068_v33 = vrot.slane %v7066_v13, 4  ;;  %v6778_v32 = vld [vmem:[#allocation3 + $0x98] sm:$0x1] }
 0x3b1   : > { %v7012_v1 = vrot.slane %v7011_v57, 4  ;;  %v7046_v40 = vrot.slane %v7045_v47, 4  ;;  %v7050_v34 = vrot.slane %v7048_v42, 5  ;;  %v7055_v9 = vrot.slane %v7053_v49, 4  ;;  %v6779_v52 = vld [vmem:[#allocation3 + $0x9c] sm:$0xf] }
 0x3b2   : > { %v7034_v46 = vrot.slane %v7032_v6, 5  ;;  %v7069_v53 = vor.u32 %v7068_v33, %v7064_v39  ;;  %v7086_v61 = vshll.u32 %v6777_v56, 16  ;;  %v7090_v22 = vshrl.u32 %v6777_v56, 16  ;;  %v13268_v3 = vld [vmem:[#allocation3 + $0x78] sm:$0xff]  }
 0x3b3   : > { %v7051_v30 = vsel %vm13522_vm9, %v7046_v40, %v7050_v34  ;;  %v7077_v16 = vshrl.u32 %v6776_v50, 16  ;;  %v7110_v14 = vshll.u32 %v6780_v55, 16  ;;  %v7114_v57 = vshrl.u32 %v6780_v55, 16  ;;  %v6786_v56 = vld [vmem:[#allocation3 + $0xb8] sm:$0xf] }
 0x3b4   : > { %v7035_v35 = vor.u32 %v7034_v46, %v7031_v29  ;;  %v7088_v5 = vrot.slane %v7086_v61, 5  ;;  %v7092_v43 = vrot.slane %v7090_v22, 4  ;;  %v7096_v62 = vshll.u32 %v6778_v32, 16  ;;  %v6787_v32 = vld [vmem:[#allocation3 + $0xbc] sm:$0x1] }
 0x3b5   : > { %v7079_v21 = vrot.slane %v7077_v16, 4  ;;  %v7101_v6 = vshrl.u32 %v6779_v52, 16  ;;  %v7112_v11 = vrot.slane %v7110_v14, 5  ;;  %v7134_v13 = vshll.u32 %v6783_v7, 16 }
 0x3b6   : > { %v7036_v48 = vrot.slane %v7035_v35, 4  ;;  %v7093_v45 = vor.u32 %v7092_v43, %v7088_v5  ;;  %v7098_v29 = vrot.slane %v7096_v62, 5  ;;  %v13271_v35 = vld [vmem:[#allocation3 + $0x84] sm:$0xff]   ;;  %v7158_v22 = vshll.u32 %v6786_v56, 16 }
 0x3b7   : > { %10223 = vmatmul.mubr.bf16.gmra.mrb[48].mxu1 %v13259_v37  ;;  %v7017_v37 = vsel %vm13522_vm9, %v7012_v1, %v7016_v28  ;;  %v7070_v28 = vrot.slane %v7069_v53, 4  ;;  %v7116_v1 = vrot.slane %v7114_v57, 4  ;;  %v7103_v46 = vrot.slane %v7101_v6, 4 }
 0x3b8   : > { %10230 = vmatprep.mubr.bf16.mxu1 %v11935_v44  ;;  %v7056_v44 = vshll.u32 %v6773_v38, 16  ;;  %v11938_v15 = vcombine.low %v7017_v37, %v7027_v24  ;;  %v7041_v20 = vsel %vm13522_vm9, %v7036_v48, %v7040_v54  ;;  %v7094_v54 = vrot.slane %v7093_v45, 4  ;;  %v6781_v38 = vld [vmem:[#allocation3 + $0xa4] sm:$0x1]  ;;  %v6782_v24 = vld [vmem:[#allocation3 + $0xa8] sm:$0xf] }
 0x3b9   : > { %v11939_v18 = vcombine.low %v7041_v20, %v7051_v30  ;;  %v7117_v0 = vor.u32 %v7116_v1, %v7112_v11  ;;  %v7138_v37 = vshrl.u32 %v6783_v7, 16  ;;  %v7120_v49 = vshll.u32 %v6781_v38, 16  ;;  %v6785_v30 = vld [vmem:[#allocation3 + $0xb4] sm:$0xf]  ;;  %v13275_v45 = vld [vmem:[#allocation3 + $0x9c] sm:$0xff]  }
 0x3ba   : > { %v7058_v2 = vrot.slane %v7056_v44, 5  ;;  %v7099_v47 = vsel %vm13522_vm9, %v7094_v54, %v7098_v29  ;;  %v7125_v44 = vshrl.u32 %v6782_v24, 16  ;;  %v7136_v33 = vrot.slane %v7134_v13, 5  ;;  %v7252_v7 = vld [vmem:[#allocation3] sm:$0xe] }
 0x3bb   : > { %v7122_v34 = vrot.slane %v7120_v49, 5  ;;  %v7162_v16 = vshrl.u32 %v6786_v56, 16  ;;  %v7160_v43 = vrot.slane %v7158_v22, 5  ;;  %v7254_v29 = vld [vmem:[#allocation3 + $0x8] sm:$0x1]  ;;  %v13287_v56 = vld [vmem:[%s16966_s2 + $0x108] sm:$0xff]  }
 0x3bc   : > { %v7059_v12 = vor.u32 %v7058_v2, %v7055_v9  ;;  %v6784_v9 = vld [vmem:[#allocation3 + $0xb0] sm:$0x1]  ;;  %v7127_v2 = vrot.slane %v7125_v44, 4  ;;  %v7353_v38 = vrot.slane %v7254_v29, 5  ;;  %v7257_v49 = vld [vmem:[#allocation3 + $0x14] sm:$0x1] }
 0x3bd   : > { %v13285_v44 = vld [vmem:[%s16966_s2 + $0x148] sm:$0xff]   ;;  %v13293_v22 = vld [vmem:[%s16966_s2 + $0x158] sm:$0xff]   ;;  %v7268_v29 = vld [vmem:[#allocation3 + $0x40] sm:$0xf] }
 0x3be   : > { %v7060_v60 = vrot.slane %v7059_v12, 4 }
 0x3bf   : > { %10231 = vmatmul.mubr.bf16.gmra.mrb[52].mxu1 %v13260_v23  ;;  %v7080_v23 = vshll.u32 %v6776_v50, 16  ;;  %v7140_v50 = vrot.slane %v7138_v37, 4 }
 0x3c0   : > { %10238 = vmatprep.mubr.bf16.mxu1 %v11936_v31  ;;  %v7072_v31 = vshll.u32 %v6775_v59, 16  ;;  %v7065_v58 = vsel %vm13522_vm9, %v7060_v60, %v7064_v39  ;;  %v7118_v39 = vrot.slane %v7117_v0, 4  ;;  %v7256_v0 = vld [vmem:[#allocation3 + $0x10] sm:$0xf] }
 0x3c1   : > { %v7082_v25 = vrot.slane %v7080_v23, 5  ;;  %v7141_v61 = vor.u32 %v7140_v50, %v7136_v33  ;;  %v7144_v23 = vshll.u32 %v6784_v9, 16  ;;  %v7360_v50 = vrot.slane %v7257_v49, 5  ;;  %v7267_v49 = vld [vmem:[#allocation3 + $0x3c] sm:$0xe] }
 0x3c2   : > { %v7074_v10 = vrot.slane %v7072_v31, 5  ;;  %v7123_v53 = vsel %vm13522_vm9, %v7118_v39, %v7122_v34  ;;  %v7149_v31 = vshrl.u32 %v6785_v30, 16  ;;  %v7255_v39 = vld [vmem:[#allocation3 + $0xc] sm:$0xe] }
 0x3c3   : > { %v7146_v55 = vrot.slane %v7144_v23, 5  ;;  %v11946_v34 = vrot.slane %v7255_v39, 9 }
 0x3c4   : > { %v7075_v4 = vsel %vm13522_vm9, %v7070_v28, %v7074_v10  ;;  %v7151_v60 = vrot.slane %v7149_v31, 4  ;;  %v13295_v31 = vld [vmem:[%s16966_s2 + $0x118] sm:$0xff]  }
 0x3c5   : > { %v11940_v19 = vcombine.low %v7065_v58, %v7075_v4 }
 0x3c7   : > { %10239 = vmatmul.mubr.bf16.gmra.mrb[56].mxu1 %v13263_v26  ;;  %v7083_v26 = vor.u32 %v7082_v25, %v7079_v21  ;;  %v7164_v21 = vrot.slane %v7162_v16, 4  ;;  %v13284_v16 = vld [vmem:[#allocation3 + $0x24] sm:$0xff]  }
 0x3c8   : > { %10246 = vmatprep.mubr.bf16.mxu1 %v11937_v17  ;;  %v7104_v17 = vshll.u32 %v6779_v52, 16 }
 0x3c9   : > { %v7084_v8 = vrot.slane %v7083_v26, 4  ;;  %v7165_v4 = vor.u32 %v7164_v21, %v7160_v43  ;;  %v7168_v26 = vshll.u32 %v6787_v32, 16  ;;  %v13286_v32 = vld [vmem:[#allocation3 + $0x30] sm:$0xff]  }
 0x3ca   : > { %v7106_v36 = vrot.slane %v7104_v17, 5 }
 0x3cb   : > { %v7166_v58 = vrot.slane %v7165_v4, 4  ;;  %v7170_v6 = vrot.slane %v7168_v26, 5  ;;  %v7261_v4 = vld [vmem:[#allocation3 + $0x24] sm:$0xe] }
 0x3cc   : > { %v7107_v42 = vor.u32 %v7106_v36, %v7103_v46  ;;  %v11945_v46 = vrot.slane %v7252_v7, 9  ;;  %v13305_v26 = vld [vmem:[%s16966_s2 + $0x170] sm:$0xff]   ;;  %v7264_v7 = vld [vmem:[#allocation3 + $0x30] sm:$0xe] }
 0x3cd   : > { %v7171_v17 = vsel %vm13522_vm9, %v7166_v58, %v7170_v6 }
 0x3ce   : > { %v7108_v48 = vrot.slane %v7107_v42, 4  ;;  %v13283_v42 = vld [vmem:[%s16966_s2 + $0x100] sm:$0xff]  }
 0x3cf   : > { %10247 = vmatmul.mubr.bf16.gmra.mrb[60].mxu1 %v13264_v27  ;;  %v7089_v27 = vsel %vm13522_vm9, %v7084_v8, %v7088_v5  ;;  %v7142_v5 = vrot.slane %v7141_v61, 4  ;;  %v7260_v61 = vld [vmem:[#allocation3 + $0x20] sm:$0x1] }
 0x3d0   : > { %10254 = vmatprep.mubr.bf16.mxu1 %v11938_v15  ;;  %v7128_v15 = vshll.u32 %v6782_v24, 16  ;;  %v11941_v40 = vcombine.low %v7089_v27, %v7099_v47  ;;  %v7113_v20 = vsel %vm13522_vm9, %v7108_v48, %v7112_v11  ;;  %v7253_v11 = vld [vmem:[#allocation3 + $0x4] sm:$0xf]  ;;  %v13279_v24 = vld [vmem:[#allocation3 + $0xb4] sm:$0xff]   ;;  %v13280_v47 = vld [vmem:[#allocation3 + $0xc] sm:$0xff]   ;;  %v7357_v27 = vrot.slane %v7256_v0, 5 }
 0x3d1   : > { %v11942_v28 = vcombine.low %v7113_v20, %v7123_v53  ;;  %v7147_v52 = vsel %vm13522_vm9, %v7142_v5, %v7146_v55  ;;  %v7350_v8 = vrot.slane %v7253_v11, 5  ;;  %v13289_v48 = vld [vmem:[%s16966_s2 + $0x150] sm:$0xff]   ;;  %v7262_v20 = vld [vmem:[#allocation3 + $0x28] sm:$0xf]  ;;  %v7385_v0 = vrot.slane %v7268_v29, 5 }
 0x3d2   : > { %v7130_v59 = vrot.slane %v7128_v15, 5  ;;  %v13282_v15 = vld [vmem:[#allocation3 + $0x18] sm:$0xff]   ;;  %v13309_v11 = vld [vmem:[%s16966_s2 + $0x178] sm:$0xff]  }
 0x3d3   : > { %v7352_v36 = vrot.slane %v7350_v8, 4  ;;  %v7351_v13 = vsel %vm14154_vm14, %v11945_v46, %v7350_v8 }
 0x3d4   : > { %v7131_v12 = vor.u32 %v7130_v59, %v7127_v2  ;;  %v7358_v59 = vsel %vm14154_vm14, %v11946_v34, %v7357_v27  ;;  %v13292_v34 = vld [vmem:[#allocation3 + $0x54] sm:$0xff]  }
 0x3d5   : > { %v7354_v37 = vsel %vm14154_vm14, %v7352_v36, %v7353_v38  ;;  %v13311_v36 = vld [vmem:[%s16966_s2 + $0x138] sm:$0xff]   ;;  %v13312_v38 = vld [vmem:[%s16966_s2 + $0x1c0] sm:$0xff]  }
 0x3d6   : > { %v7132_v25 = vrot.slane %v7131_v12, 4  ;;  %v7367_v12 = vrot.slane %v7260_v61, 5 }
 0x3d7   : > { %10255 = vmatmul.mubr.bf16.gmra.mrb[64].mxu1 %v13267_v41  ;;  %v13272_v41 = vld [vmem:[#allocation3 + $0x90] sm:$0xff]  }
 0x3d8   : > { %10262 = vmatprep.mubr.bf16.mxu1 %v11939_v18  ;;  %v7152_v18 = vshll.u32 %v6785_v30, 16  ;;  %v7137_v14 = vsel %vm13522_vm9, %v7132_v25, %v7136_v33  ;;  %v7259_v33 = vld [vmem:[#allocation3 + $0x1c] sm:$0xf]  ;;  %v13291_v30 = vld [vmem:[%s16966_s2 + $0x110] sm:$0xff]   ;;  %v13299_v25 = vld [vmem:[%s16966_s2 + $0x120] sm:$0xff]  }
 0x3d9   : > { %v7364_v2 = vrot.slane %v7259_v33, 5 }
 0x3da   : > { %v7154_v10 = vrot.slane %v7152_v18, 5  ;;  %v13297_v18 = vld [vmem:[%s16966_s2 + $0x160] sm:$0xff]  }
 0x3db   : > { %v7366_v23 = vrot.slane %v7364_v2, 4 }
 0x3dc   : > { %v7155_v57 = vor.u32 %v7154_v10, %v7151_v60  ;;  %v7263_v60 = vld [vmem:[#allocation3 + $0x2c] sm:$0x1]  ;;  %v13301_v10 = vld [vmem:[%s16966_s2 + $0x168] sm:$0xff]  }
 0x3dd   : > { %v7368_v5 = vsel %vm14154_vm14, %v7366_v23, %v7367_v12 }
 0x3de   : > { %v7156_v62 = vrot.slane %v7155_v57, 4  ;;  %v13303_v57 = vld [vmem:[%s16966_s2 + $0x128] sm:$0xff]  }
 0x3df   : > { %10263 = vmatmul.mubr.bf16.gmra.mrb[68].mxu1 %v13268_v3  ;;  %v11943_v3 = vcombine.low %v7137_v14, %v7147_v52  ;;  %v7374_v14 = vrot.slane %v7263_v60, 5  ;;  %v7278_v60 = vld [vmem:[#allocation3 + $0x68] sm:$0x1] }
 0x3e0   : > { %10270 = vmatprep.mubr.bf16.mxu1 %v11940_v19  ;;  %v13276_v19 = vld [vmem:[#allocation3 + $0xa8] sm:$0xff]   ;;  %v7161_v54 = vsel %vm13522_vm9, %v7156_v62, %v7160_v43  ;;  %v7371_v43 = vrot.slane %v7262_v20, 5  ;;  %v13294_v20 = vld [vmem:[#allocation3 + $0x60] sm:$0xff]  }
 0x3e1   : > { %v11944_v1 = vcombine.low %v7161_v54, %v7171_v17  ;;  %v13307_v17 = vld [vmem:[%s16966_s2 + $0x130] sm:$0xff]   ;;  %v7266_v54 = vld [vmem:[#allocation3 + $0x38] sm:$0x1] }
 0x3e2   : > { %v7373_v52 = vrot.slane %v7371_v43, 4  ;;  %v7381_v46 = vrot.slane %v7266_v54, 5  ;;  %v7283_v54 = vld [vmem:[#allocation3 + $0x7c] sm:$0xf] }
 0x3e4   : > { %v7375_v58 = vsel %vm14154_vm14, %v7373_v52, %v7374_v14  ;;  %v7276_v52 = vld [vmem:[#allocation3 + $0x60] sm:$0xe] }
 0x3e5   : > { %v11953_v14 = vrot.slane %v7276_v52, 9 }
 0x3e7   : > { %10271 = vmatmul.mubr.bf16.gmra.mrb[72].mxu1 %v13271_v35  ;;  %v11961_v35 = vcombine.low %v7351_v13, %v7354_v37 }
 0x3e8   : > { %10278 = vmatprep.mubr.bf16.mxu1 %v11941_v40  ;;  %v7359_v40 = vrot.slane %v7357_v27, 4  ;;  %v7269_v27 = vld [vmem:[#allocation3 + $0x44] sm:$0x1] }
 0x3ea   : > { %v7361_v9 = vsel %vm14154_vm14, %v7359_v40, %v7360_v50  ;;  %v11950_v40 = vrot.slane %v7267_v49, 9 }
 0x3eb   : > { %v11962_v53 = vcombine.low %v7358_v59, %v7361_v9  ;;  %v7274_v59 = vld [vmem:[#allocation3 + $0x58] sm:$0xf] }
 0x3ec   : > { %v7386_v50 = vsel %vm14154_vm14, %v11950_v40, %v7385_v0 }
 0x3ef   : > { %10279 = vmatmul.mubr.bf16.gmra.mrb[76].mxu1 %v13272_v41  ;;  %v7258_v41 = vld [vmem:[#allocation3 + $0x18] sm:$0xe] }
 0x3f0   : > { %10286 = vmatprep.mubr.bf16.mxu1 %v11942_v28  ;;  %v11947_v28 = vrot.slane %v7258_v41, 9  ;;  %v7275_v41 = vld [vmem:[#allocation3 + $0x5c] sm:$0x1] }
 0x3f2   : > { %v7365_v21 = vsel %vm14154_vm14, %v11947_v28, %v7364_v2  ;;  %v7270_v2 = vld [vmem:[#allocation3 + $0x48] sm:$0xe]  ;;  %v7402_v28 = vrot.slane %v7275_v41, 5  ;;  %v13304_v41 = vld [vmem:[#allocation3 + $0x9c] sm:$0xff]  }
 0x3f3   : > { %v11963_v55 = vcombine.low %v7365_v21, %v7368_v5 }
 0x3f7   : > { %10287 = vmatmul.mubr.bf16.gmra.mrb[80].mxu1 %v13275_v45  ;;  %v7265_v45 = vld [vmem:[#allocation3 + $0x34] sm:$0xf] }
 0x3f8   : > { %10294 = vmatprep.mubr.bf16.mxu1 %v11943_v3  ;;  %v11948_v3 = vrot.slane %v7261_v4, 9  ;;  %v7378_v62 = vrot.slane %v7265_v45, 5  ;;  %v7280_v4 = vld [vmem:[#allocation3 + $0x70] sm:$0xf]  ;;  %v7409_v45 = vrot.slane %v7278_v60, 5 }
 0x3fa   : > { %v7372_v6 = vsel %vm14154_vm14, %v11948_v3, %v7371_v43  ;;  %v7380_v8 = vrot.slane %v7378_v62, 4 }
 0x3ff   : > { %10295 = vmatmul.mubr.bf16.gmra.mrb[84].mxu1 %v13276_v19  ;;  %v11964_v19 = vcombine.low %v7372_v6, %v7375_v58  ;;  %v13298_v6 = vld [vmem:[#allocation3 + $0x78] sm:$0xff]  }
 0x400   : > { %10302 = vmatprep.mubr.bf16.mxu1 %v11944_v1  ;;  %v13288_v1 = vld [vmem:[#allocation3 + $0x3c] sm:$0xff]  }
 0x407   : > { %10303 = vmatmul.mubr.bf16.gmra.mrb[88].mxu1 %v13279_v24  ;;  %v11949_v24 = vrot.slane %v7264_v7, 9  ;;  %v7420_v7 = vrot.slane %v7283_v54, 5 }
 0x408   : > { %10343 = vmatprep.mubr.bf16.mxu1 %v13280_v47  ;;  %v7382_v47 = vsel %vm14154_vm14, %v7380_v8, %v7381_v46 }
 0x409   : > { %v7379_v13 = vsel %vm14154_vm14, %v11949_v24, %v7378_v62  ;;  %v7281_v62 = vld [vmem:[#allocation3 + $0x74] sm:$0x1]  ;;  %v7422_v24 = vrot.slane %v7420_v7, 4 }
 0x40a   : > { %v11965_v37 = vcombine.low %v7379_v13, %v7382_v47  ;;  %v7282_v47 = vld [vmem:[#allocation3 + $0x78] sm:$0xe] }
 0x40f   : > { %10344 = vmatmul.mubr.bf16.vlgmr.msra.gmra.mrb[92].mxu1 %v11961_v35  ;;  %v13290_v35 = vld [vmem:[#allocation3 + $0x48] sm:$0xff]  }
 0x410   : > { %10351 = vmatprep.mubr.bf16.mxu1 %v13282_v15  ;;  %12502 = vmatpush3.bf16.msra.mxu1 %v13283_v42  ;;  %v7387_v42 = vrot.slane %v7385_v0, 4  ;;  %v7388_v15 = vrot.slane %v7269_v27, 5  ;;  %v7286_v0 = vld [vmem:[#allocation3 + $0x88] sm:$0xf] }
 0x411   : > { %12503 = vmatprep.subr.bf16.mxu1 %v13285_v44  ;;  %v7271_v44 = vld [vmem:[#allocation3 + $0x4c] sm:$0xf] }
 0x412   : > { %v7389_v39 = vsel %vm14154_vm14, %v7387_v42, %v7388_v15  ;;  %v7392_v33 = vrot.slane %v7271_v44, 5  ;;  %v7287_v44 = vld [vmem:[#allocation3 + $0x8c] sm:$0x1]  ;;  %v13302_v15 = vld [vmem:[#allocation3 + $0x90] sm:$0xff]  }
 0x414   : > { %12504 = vmatpush3.bf16.msra.mxu1 %v13287_v56  ;;  %v11966_v56 = vcombine.low %v7386_v50, %v7389_v39  ;;  %v7394_v9 = vrot.slane %v7392_v33, 4  ;;  %v7285_v39 = vld [vmem:[#allocation3 + $0x84] sm:$0xe]  ;;  %v7430_v50 = vrot.slane %v7287_v44, 5 }
 0x415   : > { %12505 = vmatprep.subr.bf16.mxu1 %v13289_v48  ;;  %v7272_v48 = vld [vmem:[#allocation3 + $0x50] sm:$0x1] }
 0x417   : > { %10352 = vmatmul.mubr.bf16.gmra.mrb[96].mxu1 %v11962_v53  ;;  %v11951_v53 = vrot.slane %v7270_v2, 9 }
 0x418   : > { %10359 = vmatprep.mubr.bf16.mxu1 %v13284_v16  ;;  %12506 = vmatpush3.bf16.msra.mxu1 %v13291_v30  ;;  %v7395_v30 = vrot.slane %v7272_v48, 5  ;;  %v11956_v48 = vrot.slane %v7285_v39, 9 }
 0x419   : > { %12507 = vmatprep.subr.bf16.mxu1 %v13293_v22  ;;  %v7399_v22 = vrot.slane %v7274_v59, 5  ;;  %v7393_v16 = vsel %vm14154_vm14, %v11951_v53, %v7392_v33  ;;  %v7289_v33 = vld [vmem:[#allocation3 + $0x94] sm:$0xf] }
 0x41a   : > { %v7396_v61 = vsel %vm14154_vm14, %v7394_v9, %v7395_v30  ;;  %v7434_v9 = vrot.slane %v7289_v33, 5 }
 0x41b   : > { %v11967_v23 = vcombine.low %v7393_v16, %v7396_v61  ;;  %v7401_v12 = vrot.slane %v7399_v22, 4  ;;  %v7290_v16 = vld [vmem:[#allocation3 + $0x98] sm:$0x1] }
 0x41c   : > { %12508 = vmatpush3.bf16.msra.mxu1 %v13295_v31  ;;  %v7273_v31 = vld [vmem:[#allocation3 + $0x54] sm:$0xe] }
 0x41d   : > { %12509 = vmatprep.subr.bf16.mxu1 %v13297_v18  ;;  %v7277_v18 = vld [vmem:[#allocation3 + $0x64] sm:$0xf]  ;;  %v11952_v5 = vrot.slane %v7273_v31, 9  ;;  %v7403_v43 = vsel %vm14154_vm14, %v7401_v12, %v7402_v28  ;;  %v7288_v12 = vld [vmem:[#allocation3 + $0x90] sm:$0xe] }
 0x41e   : > { %v7406_v21 = vrot.slane %v7277_v18, 5  ;;  %v7292_v31 = vld [vmem:[#allocation3 + $0xa0] sm:$0xf]  ;;  %v7437_v18 = vrot.slane %v7290_v16, 5 }
 0x41f   : > { %10360 = vmatmul.mubr.bf16.gmra.mrb[100].mxu1 %v11963_v55 }
 0x420   : > { %10367 = vmatprep.mubr.bf16.mxu1 %v13286_v32  ;;  %12510 = vmatpush3.bf16.msra.mxu1 %v13299_v25  ;;  %v7400_v25 = vsel %vm14154_vm14, %v11952_v5, %v7399_v22  ;;  %v7408_v32 = vrot.slane %v7406_v21, 4  ;;  %v7407_v3 = vsel %vm14154_vm14, %v11953_v14, %v7406_v21  ;;  %v11957_v5 = vrot.slane %v7288_v12, 9  ;;  %v13306_v14 = vld [vmem:[#allocation3 + $0xa8] sm:$0xff]  }
 0x421   : > { %12511 = vmatprep.subr.bf16.mxu1 %v13301_v10  ;;  %v11968_v55 = vcombine.low %v7400_v25, %v7403_v43  ;;  %v13296_v10 = vld [vmem:[#allocation3 + $0x6c] sm:$0xff]   ;;  %v7441_v21 = vrot.slane %v7292_v31, 5  ;;  %v13310_v31 = vld [vmem:[#allocation3 + $0xc0] sm:$0xff]  }
 0x424   : > { %12512 = vmatpush3.bf16.msra.mxu1 %v13303_v57  ;;  %v7410_v57 = vsel %vm14154_vm14, %v7408_v32, %v7409_v45 }
 0x425   : > { %12513 = vmatprep.subr.bf16.mxu1 %v13305_v26  ;;  %v7413_v26 = vrot.slane %v7280_v4, 5  ;;  %v11969_v58 = vcombine.low %v7407_v3, %v7410_v57  ;;  %v7293_v4 = vld [vmem:[#allocation3 + $0xa4] sm:$0x1]  ;;  %v7443_v57 = vrot.slane %v7441_v21, 4  ;;  %v7295_v3 = vld [vmem:[#allocation3 + $0xac] sm:$0xf] }
 0x427   : > { %10368 = vmatmul.mubr.bf16.gmra.mrb[104].mxu1 %v11964_v19  ;;  %v7279_v19 = vld [vmem:[#allocation3 + $0x6c] sm:$0xe] }
 0x428   : > { %10375 = vmatprep.mubr.bf16.mxu1 %v13288_v1  ;;  %12514 = vmatpush3.bf16.msra.mxu1 %v13307_v17  ;;  %v7415_v17 = vrot.slane %v7413_v26, 4  ;;  %v11954_v1 = vrot.slane %v7279_v19, 9  ;;  %v7448_v19 = vrot.slane %v7295_v3, 5  ;;  %v7688_v3 = vld [vmem:[#allocation3 + $0x18] sm:$0xf] }
 0x429   : > { %12515 = vmatprep.subr.bf16.mxu1 %v13309_v11  ;;  %v7416_v11 = vrot.slane %v7281_v62, 5 }
 0x42a   : > { %v7414_v29 = vsel %vm14154_vm14, %v11954_v1, %v7413_v26  ;;  %v7291_v26 = vld [vmem:[#allocation3 + $0x9c] sm:$0xe] }
 0x42b   : > { %v7417_v8 = vsel %vm14154_vm14, %v7415_v17, %v7416_v11 }
 0x42c   : > { %12516 = vmatpush3.bf16.msra.mxu1 %v13311_v36  ;;  %v11970_v46 = vcombine.low %v7414_v29, %v7417_v8  ;;  %v7284_v36 = vld [vmem:[#allocation3 + $0x80] sm:$0x1] }
 0x42d   : > { %12613 = vmatprep.subr.bf16.mxu1 %v13312_v38  ;;  %v13300_v38 = vld [vmem:[#allocation3 + $0x84] sm:$0xff]   ;;  %v7423_v13 = vrot.slane %v7284_v36, 5 }
 0x42f   : > { %10376 = vmatmul.mubr.bf16.gmra.mrb[108].mxu1 %v11965_v37  ;;  %v11955_v37 = vrot.slane %v7282_v47, 9  ;;  %v7424_v27 = vsel %vm14154_vm14, %v7422_v24, %v7423_v13  ;;  %v7294_v24 = vld [vmem:[#allocation3 + $0xa8] sm:$0xe]  ;;  %v7450_v47 = vrot.slane %v7448_v19, 4  ;;  %v8198_v13 = vld [vmem:[#allocation3 + $0x10] sm:$0xf] }
 0x430   : > { %10383 = vmatprep.mubr.bf16.mxu1 %v13290_v35  ;;  %v7427_v35 = vrot.slane %v7286_v0, 5  ;;  %v7298_v0 = vld [vmem:[#allocation3 + $0xb8] sm:$0xf] }
 0x431   : > { %v7421_v42 = vsel %vm14154_vm14, %v11955_v37, %v7420_v7  ;;  %v7686_v37 = vld [vmem:[#allocation3 + $0x10] sm:$0xf] }
 0x432   : > { %v11971_v49 = vcombine.low %v7421_v42, %v7424_v27  ;;  %v7429_v40 = vrot.slane %v7427_v35, 4  ;;  %v7428_v53 = vsel %vm14154_vm14, %v11956_v48, %v7427_v35  ;;  %v7685_v35 = vld [vmem:[#allocation3 + $0xc] sm:$0xf]  ;;  %v11959_v42 = vrot.slane %v7294_v24, 9  ;;  %v8202_v24 = vld [vmem:[#allocation3 + $0x20] sm:$0x1] }
 0x433   : > { %v7743_v39 = vshll.u32 %v7686_v37, 16  ;;  %v7747_v33 = vshrl.u32 %v7686_v37, 16  ;;  %v7737_v48 = vshll.u32 %v7685_v35, 16 }
 0x437   : > { %10384 = vmatmul.mubr.bf16.gmra.mrb[112].mxu1 %v11966_v56 }
 0x438   : > { %10391 = vmatprep.mubr.bf16.mxu1 %v13292_v34  ;;  %v7431_v34 = vsel %vm14154_vm14, %v7429_v40, %v7430_v50  ;;  %v8295_v40 = vrot.slane %v8198_v13, 5 }
 0x439   : > { %v11972_v22 = vcombine.low %v7428_v53, %v7431_v34  ;;  %v7299_v53 = vld [vmem:[#allocation3 + $0xbc] sm:$0x1] }
 0x43f   : > { %10392 = vmatmul.mubr.bf16.gmra.mrb[116].mxu1 %v11967_v23 }
 0x440   : > { %10399 = vmatprep.mubr.bf16.mxu1 %v13294_v20  ;;  %v7436_v20 = vrot.slane %v7434_v9, 4 }
 0x442   : > { %v7438_v43 = vsel %vm14154_vm14, %v7436_v20, %v7437_v18  ;;  %v8199_v20 = vld [vmem:[#allocation3 + $0x14] sm:$0x1]  ;;  %v8297_v18 = vrot.slane %v8295_v40, 4 }
 0x447   : > { %10400 = vmatmul.mubr.bf16.gmra.mrb[120].mxu1 %v11968_v55 }
 0x448   : > { %10407 = vmatprep.mubr.bf16.mxu1 %v13296_v10  ;;  %v7435_v10 = vsel %vm14154_vm14, %v11957_v5, %v7434_v9  ;;  %v7749_v5 = vrot.slane %v7747_v33, 4  ;;  %v8305_v33 = vrot.slane %v8202_v24, 5  ;;  %v7693_v24 = vld [vmem:[#allocation3 + $0x2c] sm:$0x1] }
 0x449   : > { %v11973_v52 = vcombine.low %v7435_v10, %v7438_v43  ;;  %v8201_v43 = vld [vmem:[#allocation3 + $0x1c] sm:$0xf] }
 0x44a   : > { %v7689_v10 = vld [vmem:[#allocation3 + $0x1c] sm:$0xf] }
 0x44f   : > { %10408 = vmatmul.mubr.bf16.gmra.mrb[124].mxu1 %v11969_v58  ;;  %v7444_v58 = vrot.slane %v7293_v4, 5 }
 0x450   : > { %10415 = vmatprep.mubr.bf16.mxu1 %v13298_v6  ;;  %v11958_v6 = vrot.slane %v7291_v26, 9  ;;  %v8302_v26 = vrot.slane %v8201_v43, 5 }
 0x451   : > { %v7445_v17 = vsel %vm14154_vm14, %v7443_v57, %v7444_v58 }
 0x452   : > { %v7442_v8 = vsel %vm14154_vm14, %v11958_v6, %v7441_v21  ;;  %v7458_v21 = vrot.slane %v7299_v53, 5 }
 0x453   : > { %v11974_v29 = vcombine.low %v7442_v8, %v7445_v17  ;;  %v7767_v17 = vshll.u32 %v7689_v10, 16 }
 0x457   : > { %10416 = vmatmul.mubr.bf16.gmra.mrb[128].mxu1 %v11970_v46  ;;  %v7296_v46 = vld [vmem:[#allocation3 + $0xb0] sm:$0x1] }
 0x458   : > { %10423 = vmatprep.mubr.bf16.mxu1 %v13300_v38  ;;  %v13308_v38 = vld [vmem:[#allocation3 + $0xb4] sm:$0xff]   ;;  %v7451_v27 = vrot.slane %v7296_v46, 5 }
 0x45f   : > { %10424 = vmatmul.mubr.bf16.gmra.mrb[132].mxu1 %v11971_v49  ;;  %v7455_v49 = vrot.slane %v7298_v0, 5  ;;  %v7761_v0 = vshll.u32 %v7688_v3, 16 }
 0x460   : > { %10431 = vmatprep.mubr.bf16.mxu1 %v13302_v15  ;;  %v7452_v15 = vsel %vm14154_vm14, %v7450_v47, %v7451_v27  ;;  %v7758_v47 = vshrl.u32 %v7688_v3, 16 }
 0x461   : > { %v7457_v16 = vrot.slane %v7455_v49, 4 }
 0x462   : > { %v12293_v56 = vpop.f32.mrb[28].mxu1 }
 0x463   : > { %v12294_v2 = vpop.f32.mrb[29].mxu1 }
 0x464   : > { %v15955_v59 = vadd.f32 %v12294_v2, %v12293_v56  ;;  %v12296_v30 = vpop.f32.mrb[30].mxu1  ;;  %v7734_v56 = vshrl.u32 %v7685_v35, 16  ;;  %v7449_v2 = vsel %vm14154_vm14, %v11959_v42, %v7448_v19  ;;  %v7771_v19 = vshrl.u32 %v7689_v10, 16 }
 0x465   : > { %v12297_v61 = vpop.f32.mrb[31].mxu1  ;;  %v8304_v35 = vrot.slane %v8302_v26, 4 }
 0x466   : > { %v15959_v23 = vadd.f32 %v12297_v61, %v12296_v30  ;;  %v7297_v30 = vld [vmem:[#allocation3 + $0xb4] sm:$0xe] }
 0x467   : > { %10432 = vmatmul.mubr.bf16.gmra.mrb[136].mxu1 %v11972_v22  ;;  %v11975_v22 = vcombine.low %v7449_v2, %v7452_v15  ;;  %v11960_v4 = vrot.slane %v7297_v30, 9  ;;  %v8200_v15 = vld [vmem:[#allocation3 + $0x18] sm:$0xe]  ;;  %v7760_v2 = vrot.slane %v7758_v47, 4  ;;  %v7763_v30 = vrot.slane %v7761_v0, 5 }
 0x468   : > { %10439 = vmatprep.mubr.bf16.mxu1 %v13304_v41  ;;  %v8197_v41 = vld [vmem:[#allocation3 + $0xc] sm:$0xe]  ;;  %v12010_v53 = vrot.slane %v8200_v15, 9  ;;  %v7694_v47 = vld [vmem:[#allocation3 + $0x30] sm:$0xf] }
 0x469   : > { %v12009_v57 = vrot.slane %v8197_v41, 9 }
 0x46a   : > { %v12299_v28 = vpop.f32.mrb[32].mxu1 }
 0x46b   : > { %v12300_v25 = vpop.f32.mrb[33].mxu1  ;;  %v8296_v8 = vsel %vm14154_vm14, %v12009_v57, %v8295_v40 }
 0x46c   : > { %v15963_v55 = vadd.f32 %v12300_v25, %v12299_v28  ;;  %v12302_v60 = vpop.f32.mrb[34].mxu1  ;;  %v15985_v28 = vrot.slane %v7743_v39, 5  ;;  %v7736_v25 = vrot.slane %v7734_v56, 4  ;;  %v7773_v39 = vrot.slane %v7771_v19, 4  ;;  %v7692_v56 = vld [vmem:[#allocation3 + $0x28] sm:$0xf] }
 0x46d   : > { %v12303_v32 = vpop.f32.mrb[35].mxu1 }
 0x46e   : > { %v15967_v45 = vadd.f32 %v12303_v32, %v12302_v60  ;;  %v7739_v60 = vrot.slane %v7737_v48, 5  ;;  %v8298_v32 = vrot.slane %v8199_v20, 5  ;;  %v7750_v6 = vor.u32 %v7749_v5, %v15985_v28 }
 0x46f   : > { %10440 = vmatmul.mubr.bf16.gmra.mrb[140].mxu1 %v11973_v52  ;;  %v7687_v52 = vld [vmem:[#allocation3 + $0x14] sm:$0x1] }
 0x470   : > { %10447 = vmatprep.mubr.bf16.mxu1 %v13306_v14  ;;  %v7459_v14 = vsel %vm14154_vm14, %v7457_v16, %v7458_v21  ;;  %v8303_v21 = vsel %vm14154_vm14, %v12010_v53, %v8302_v26  ;;  %v16020_v26 = vld [vmem:[#allocation3 + $0x34] sm:$0xf]  ;;  %v7806_v53 = vshrl.u32 %v7694_v47, 16 }
 0x471   : > { %v8316_v15 = vrot.slane %v16020_v26, 5 }
 0x472   : > { %v12305_v62 = vpop.f32.mrb[36].mxu1 }
 0x473   : > { %v12306_v54 = vpop.f32.mrb[37].mxu1 }
 0x474   : > { %v15971_v11 = vadd.f32 %v12306_v54, %v12305_v62  ;;  %v12308_v1 = vpop.f32.mrb[38].mxu1  ;;  %v8299_v62 = vsel %vm14154_vm14, %v8297_v18, %v8298_v32  ;;  %v7795_v18 = vshrl.u32 %v7692_v56, 16 }
 0x475   : > { %v12309_v7 = vpop.f32.mrb[39].mxu1  ;;  %v12025_v27 = vcombine.low %v8296_v8, %v8299_v62 }
 0x476   : > { %v15975_v36 = vadd.f32 %v12309_v7, %v12308_v1  ;;  %v7456_v1 = vsel %vm14154_vm14, %v11960_v4, %v7455_v49  ;;  %v7740_v7 = vor.u32 %v7739_v60, %v7736_v25  ;;  %v16000_v49 = vrot.slane %v7767_v17, 5  ;;  %v7695_v17 = vld [vmem:[#allocation3 + $0x34] sm:$0xf] }
 0x477   : > { %10448 = vmatmul.mubr.bf16.gmra.mrb[144].mxu1 %v11974_v29  ;;  %v11976_v37 = vcombine.low %v7456_v1, %v7459_v14  ;;  %v7764_v4 = vor.u32 %v7763_v30, %v7760_v2  ;;  %v8203_v14 = vld [vmem:[#allocation3 + $0x24] sm:$0xe]  ;;  %v8205_v1 = vld [vmem:[#allocation3 + $0x2c] sm:$0x1] }
 0x478   : > { %10455 = vmatprep.mubr.bf16.mxu1 %v13308_v38  ;;  %v7753_v38 = vshll.u32 %v7687_v52, 16  ;;  %v7741_v40 = vrot.slane %v7740_v7, 4  ;;  %v7774_v20 = vor.u32 %v7773_v39, %v16000_v49  ;;  %v13313_v52 = vld [vmem:[%s16966_s2 + $0x180] sm:$0xff]   ;;  %v7797_v7 = vrot.slane %v7795_v18, 4 }
 0x479   : > { %v7765_v0 = vrot.slane %v7764_v4, 4  ;;  %v7815_v39 = vshll.u32 %v7695_v17, 16  ;;  %v8206_v18 = vld [vmem:[#allocation3 + $0x30] sm:$0xe] }
 0x47a   : > { %v12311_v44 = vpop.f32.mrb[40].mxu1  ;;  %v7755_v48 = vrot.slane %v7753_v38, 5  ;;  %v7746_v43 = vsel %vm13522_vm9, %v7741_v40, %v15985_v28  ;;  %v13314_v28 = vld [vmem:[%s16966_s2 + $0x1c8] sm:$0xff]   ;;  %v7819_v40 = vshrl.u32 %v7695_v17, 16  ;;  %v7698_v17 = vld [vmem:[#allocation3 + $0x40] sm:$0xf] }
 0x47b   : > { %v12312_v50 = vpop.f32.mrb[41].mxu1 }
 0x47c   : > { %v15979_v34 = vadd.f32 %v12312_v50, %v12311_v44  ;;  %v12314_v9 = vpop.f32.mrb[42].mxu1  ;;  %v7751_v44 = vrot.slane %v7750_v6, 4  ;;  %v8204_v50 = vld [vmem:[#allocation3 + $0x28] sm:$0xf] }
 0x47d   : > { %v12315_v61 = vpop.f32.mrb[43].mxu1  ;;  %v8309_v60 = vrot.slane %v8204_v50, 5 }
 0x47e   : > { %v15983_v12 = vadd.f32 %v12315_v61, %v12314_v9  ;;  %v7690_v9 = vld [vmem:[#allocation3 + $0x20] sm:$0x1]  ;;  %v8306_v61 = vsel %vm14154_vm14, %v8304_v35, %v8305_v33  ;;  %v7756_v41 = vsel %vm13522_vm9, %v7751_v44, %v7755_v48  ;;  %v13315_v35 = vld [vmem:[%s16966_s2 + $0x188] sm:$0xff]   ;;  %v8312_v44 = vrot.slane %v8205_v1, 5 }
 0x47f   : > { %10456 = vmatmul.mubr.bf16.gmra.mrb[148].mxu1 %v11975_v22  ;;  %v7691_v22 = vld [vmem:[#allocation3 + $0x24] sm:$0xf]  ;;  %v7777_v25 = vshll.u32 %v7690_v9, 16  ;;  %v11993_v62 = vcombine.low %v7746_v43, %v7756_v41  ;;  %v12026_v6 = vcombine.low %v8303_v21, %v8306_v61  ;;  %v8311_v38 = vrot.slane %v8309_v60, 4 }
 0x480   : > { %10463 = vmatprep.mubr.bf16.mxu1 %v13310_v31  ;;  %v7791_v31 = vshll.u32 %v7692_v56, 16  ;;  %v7782_v57 = vshrl.u32 %v7691_v22, 16  ;;  %v7785_v3 = vshll.u32 %v7691_v22, 16  ;;  %v13316_v33 = vld [vmem:[%s16966_s2 + $0x1d0] sm:$0xff]   ;;  %v7809_v61 = vshll.u32 %v7694_v47, 16 }
 0x481   : > { %v8313_v30 = vsel %vm14154_vm14, %v8311_v38, %v8312_v44  ;;  %v7770_v41 = vsel %vm13522_vm9, %v7765_v0, %v16000_v49  ;;  %v13317_v43 = vld [vmem:[%s16966_s2 + $0x190] sm:$0xff]   ;;  %v13318_v49 = vld [vmem:[%s16966_s2 + $0x1d8] sm:$0xff]   ;;  %v12012_v38 = vrot.slane %v8206_v18, 9  ;;  %v13320_v0 = vld [vmem:[%s16966_s2 + $0x1e0] sm:$0xff]   ;;  %v7843_v44 = vshrl.u32 %v7698_v17, 16 }
 0x482   : > { %v12317_v58 = vpop.f32.mrb[44].mxu1  ;;  %v16024_v8 = vrot.slane %v7791_v31, 5  ;;  %v7801_v31 = vshll.u32 %v7693_v24, 16  ;;  %v8211_v18 = vld [vmem:[#allocation3 + $0x44] sm:$0x1] }
 0x483   : > { %v12318_v54 = vpop.f32.mrb[45].mxu1 }
 0x484   : > { %v15996_v29 = vadd.f32 %v12318_v54, %v12317_v58  ;;  %v12320_v46 = vpop.f32.mrb[46].mxu1  ;;  %v7775_v54 = vrot.slane %v7774_v20, 4  ;;  %v7798_v48 = vor.u32 %v7797_v7, %v16024_v8  ;;  %v7803_v1 = vrot.slane %v7801_v31, 5  ;;  %v7697_v7 = vld [vmem:[#allocation3 + $0x3c] sm:$0xf] }
 0x485   : > { %v12321_v13 = vpop.f32.mrb[47].mxu1 }
 0x486   : > { %v15998_v42 = vadd.f32 %v12321_v13, %v12320_v46  ;;  %v12011_v46 = vrot.slane %v8203_v14, 9  ;;  %v7779_v13 = vrot.slane %v7777_v25, 5 }
 0x487   : > { %10464 = vmatmul.mubr.bf16.gmra.mrb[152].mxu1 %v11976_v37  ;;  %v7784_v37 = vrot.slane %v7782_v57, 4  ;;  %v7799_v57 = vrot.slane %v7798_v48, 4 }
 0x488   : > { %10504 = vmatprep.mubr.bf16.mxu1 %v12025_v27  ;;  %v7787_v27 = vrot.slane %v7785_v3, 5  ;;  %v7780_v56 = vsel %vm13522_vm9, %v7775_v54, %v7779_v13  ;;  %v8310_v2 = vsel %vm14154_vm14, %v12011_v46, %v8309_v60  ;;  %v8318_v60 = vrot.slane %v8316_v15, 4  ;;  %v7696_v3 = vld [vmem:[#allocation3 + $0x38] sm:$0x1]  ;;  %v13319_v46 = vld [vmem:[%s16966_s2 + $0x198] sm:$0xff]  }
 0x489   : > { %v11994_v25 = vcombine.low %v7770_v41, %v7780_v56  ;;  %v12027_v14 = vcombine.low %v8310_v2, %v8313_v30  ;;  %v7833_v56 = vshll.u32 %v7697_v7, 16  ;;  %v8317_v30 = vsel %vm14154_vm14, %v12012_v38, %v8316_v15 }
 0x48a   : > { %v12323_v16 = vpop.f32.mrb[48].mxu1  ;;  %v7788_v20 = vor.u32 %v7787_v27, %v7784_v37  ;;  %v7804_v37 = vsel %vm13522_vm9, %v7799_v57, %v7803_v1  ;;  %v8326_v57 = vrot.slane %v8211_v18, 5 }
 0x48b   : > { %v12324_v5 = vpop.f32.mrb[49].mxu1 }
 0x48c   : > { %v16012_v10 = vadd.f32 %v12324_v5, %v12323_v16  ;;  %v12326_v32 = vpop.f32.mrb[50].mxu1  ;;  %v8208_v5 = vld [vmem:[#allocation3 + $0x38] sm:$0x1]  ;;  %v7789_v54 = vrot.slane %v7788_v20, 4 }
 0x48d   : > { %v12327_v58 = vpop.f32.mrb[51].mxu1 }
 0x48e   : > { %v16022_v19 = vadd.f32 %v12327_v58, %v12326_v32  ;;  %v16050_v32 = vrot.slane %v7815_v39, 5  ;;  %v16057_v58 = vld [vmem:[#allocation3 + $0x40] sm:$0xf]  ;;  %v7794_v2 = vsel %vm13522_vm9, %v7789_v54, %v16024_v8  ;;  %v13322_v8 = vld [vmem:[%s16966_s2 + $0x1e8] sm:$0xff]  }
 0x48f   : > { %10505 = vmatmul.mubr.bf16.vlgmr.msra.gmra.mrb[156].mxu1 %v11993_v62  ;;  %v8319_v62 = vrot.slane %v8208_v5, 5  ;;  %v8323_v27 = vrot.slane %v16057_v58, 5  ;;  %v11995_v41 = vcombine.low %v7794_v2, %v7804_v37  ;;  %v13323_v58 = vld [vmem:[%s16966_s2 + $0x1a8] sm:$0xff]   ;;  %v13324_v54 = vld [vmem:[%s16966_s2 + $0x1f0] sm:$0xff]  }
 0x490   : > { %10512 = vmatprep.mubr.bf16.mxu1 %v12026_v6  ;;  %12614 = vmatpush3.bf16.msra.mxu1 %v13313_v52  ;;  %v7821_v52 = vrot.slane %v7819_v40, 4  ;;  %v7808_v6 = vrot.slane %v7806_v53, 4  ;;  %v8209_v53 = vld [vmem:[#allocation3 + $0x3c] sm:$0xe] }
 0x491   : > { %12615 = vmatprep.subr.bf16.mxu1 %v13314_v28  ;;  %v7811_v28 = vrot.slane %v7809_v61, 5  ;;  %v8320_v24 = vsel %vm14154_vm14, %v8318_v60, %v8319_v62  ;;  %v13321_v61 = vld [vmem:[%s16966_s2 + $0x1a0] sm:$0xff]   ;;  %v8325_v5 = vrot.slane %v8323_v27, 4 }
 0x492   : > { %v12329_v50 = vpop.f32.mrb[52].mxu1  ;;  %v7822_v47 = vor.u32 %v7821_v52, %v16050_v32  ;;  %v12028_v20 = vcombine.low %v8317_v30, %v8320_v24 }
 0x493   : > { %v12330_v9 = vpop.f32.mrb[53].mxu1  ;;  %v7812_v40 = vor.u32 %v7811_v28, %v7808_v6  ;;  %v12013_v6 = vrot.slane %v8209_v53, 9 }
 0x494   : > { %v16040_v22 = vadd.f32 %v12330_v9, %v12329_v50  ;;  %v12332_v16 = vpop.f32.mrb[54].mxu1  ;;  %12616 = vmatpush3.bf16.msra.mxu1 %v13315_v35  ;;  %v7839_v35 = vshll.u32 %v7698_v17, 16  ;;  %v7830_v50 = vshrl.u32 %v7697_v7, 16  ;;  %v7823_v31 = vrot.slane %v7822_v47, 4  ;;  %v7700_v17 = vld [vmem:[#allocation3 + $0x48] sm:$0xf] }
 0x495   : > { %v12333_v21 = vpop.f32.mrb[55].mxu1  ;;  %12617 = vmatprep.subr.bf16.mxu1 %v13316_v33  ;;  %v7825_v33 = vshll.u32 %v7696_v3, 16  ;;  %v7699_v3 = vld [vmem:[#allocation3 + $0x44] sm:$0x1]  ;;  %v8327_v7 = vsel %vm14154_vm14, %v8325_v5, %v8326_v57  ;;  %v7704_v5 = vld [vmem:[#allocation3 + $0x58] sm:$0xf] }
 0x496   : > { %v16055_v4 = vadd.f32 %v12333_v21, %v12332_v16  ;;  %v16088_v15 = vrot.slane %v7839_v35, 5  ;;  %v16090_v21 = vld [vmem:[#allocation3 + $0x4c] sm:$0xf]  ;;  %v7832_v52 = vrot.slane %v7830_v50, 4  ;;  %v8214_v35 = vld [vmem:[#allocation3 + $0x50] sm:$0x1] }
 0x497   : > { %10513 = vmatmul.mubr.bf16.gmra.mrb[160].mxu1 %v11994_v25  ;;  %v7813_v25 = vrot.slane %v7812_v40, 4  ;;  %v7827_v60 = vrot.slane %v7825_v33, 5  ;;  %v8330_v28 = vrot.slane %v16090_v21, 5  ;;  %v7849_v40 = vshll.u32 %v7699_v3, 16  ;;  %v7703_v57 = vld [vmem:[#allocation3 + $0x54] sm:$0xf] }
 0x498   : > { %10520 = vmatprep.mubr.bf16.mxu1 %v12027_v14  ;;  %12618 = vmatpush3.bf16.msra.mxu1 %v13317_v43  ;;  %v7845_v43 = vrot.slane %v7843_v44, 4  ;;  %v7701_v14 = vld [vmem:[#allocation3 + $0x4c] sm:$0xf]  ;;  %v7854_v33 = vshrl.u32 %v7700_v17, 16  ;;  %v7857_v50 = vshll.u32 %v7700_v17, 16  ;;  %v8333_v18 = vrot.slane %v8214_v35, 5 }
 0x499   : > { %12619 = vmatprep.subr.bf16.mxu1 %v13318_v49  ;;  %v7835_v49 = vrot.slane %v7833_v56, 5  ;;  %v7828_v62 = vsel %vm13522_vm9, %v7823_v31, %v7827_v60  ;;  %v7863_v38 = vshll.u32 %v7701_v14, 16  ;;  %v7867_v24 = vshrl.u32 %v7701_v14, 16  ;;  %v13325_v56 = vld [vmem:[%s16966_s2 + $0x1b0] sm:$0xff]   ;;  %v8216_v60 = vld [vmem:[#allocation3 + $0x58] sm:$0xf] }
 0x49a   : > { %v12335_v13 = vpop.f32.mrb[56].mxu1  ;;  %v7856_v21 = vrot.slane %v7854_v33, 4  ;;  %v16129_v3 = vld [vmem:[%s16966_s2 + $0x200] sm:$0xff]   ;;  %v7887_v17 = vshll.u32 %v7704_v5, 16  ;;  %v7878_v35 = vshrl.u32 %v7703_v57, 16 }
 0x49b   : > { %v12336_v39 = vpop.f32.mrb[57].mxu1  ;;  %v7836_v37 = vor.u32 %v7835_v49, %v7832_v52  ;;  %v13327_v52 = vld [vmem:[%s16966_s2 + $0x1b8] sm:$0xff]  }
 0x49c   : > { %v16071_v48 = vadd.f32 %v12336_v39, %v12335_v13  ;;  %v12338_v9 = vpop.f32.mrb[58].mxu1  ;;  %12620 = vmatpush3.bf16.msra.mxu1 %v13319_v46  ;;  %v7846_v46 = vor.u32 %v7845_v43, %v16088_v15  ;;  %v8324_v13 = vsel %vm14154_vm14, %v12013_v6, %v8323_v27  ;;  %v13326_v27 = vld [vmem:[%s16966_s2 + $0x1f8] sm:$0xff]   ;;  %v7851_v43 = vrot.slane %v7849_v40, 5 }
 0x49d   : > { %v12339_v16 = vpop.f32.mrb[59].mxu1  ;;  %12621 = vmatprep.subr.bf16.mxu1 %v13320_v0  ;;  %v7818_v0 = vsel %vm13522_vm9, %v7813_v25, %v16050_v32  ;;  %v12029_v30 = vcombine.low %v8324_v13, %v8327_v7  ;;  %v8332_v32 = vrot.slane %v8330_v28, 4  ;;  %v7837_v31 = vrot.slane %v7836_v37, 4  ;;  %v8215_v37 = vld [vmem:[#allocation3 + $0x54] sm:$0xe] }
 0x49e   : > { %v16086_v26 = vadd.f32 %v12339_v16, %v12338_v9  ;;  %v11996_v2 = vcombine.low %v7818_v0, %v7828_v62  ;;  %v8212_v16 = vld [vmem:[#allocation3 + $0x48] sm:$0xe]  ;;  %v7859_v25 = vrot.slane %v7857_v50, 5 }
 0x49f   : > { %10521 = vmatmul.mubr.bf16.gmra.mrb[164].mxu1 %v11995_v41  ;;  %v16119_v41 = vrot.slane %v7863_v38, 5  ;;  %v12014_v49 = vrot.slane %v8212_v16, 9  ;;  %v8334_v14 = vsel %vm14154_vm14, %v8332_v32, %v8333_v18  ;;  %v7842_v7 = vsel %vm13522_vm9, %v7837_v31, %v16088_v15  ;;  %v7707_v32 = vld [vmem:[#allocation3 + $0x64] sm:$0xf] }
 0x4a0   : > { %10528 = vmatprep.mubr.bf16.mxu1 %v12028_v20  ;;  %12622 = vmatpush3.bf16.msra.mxu1 %v13321_v61  ;;  %v7847_v61 = vrot.slane %v7846_v46, 4  ;;  %v7869_v20 = vrot.slane %v7867_v24, 4  ;;  %v8337_v24 = vrot.slane %v8216_v60, 5  ;;  %v7860_v13 = vor.u32 %v7859_v25, %v7856_v21 }
 0x4a1   : > { %12623 = vmatprep.subr.bf16.mxu1 %v13322_v8  ;;  %v7702_v8 = vld [vmem:[#allocation3 + $0x50] sm:$0x1]  ;;  %v8331_v46 = vsel %vm14154_vm14, %v12014_v49, %v8330_v28  ;;  %v7880_v31 = vrot.slane %v7878_v35, 4  ;;  %v7911_v25 = vshll.u32 %v7707_v32, 16  ;;  %v7915_v60 = vshrl.u32 %v7707_v32, 16 }
 0x4a2   : > { %v12341_v1 = vpop.f32.mrb[60].mxu1  ;;  %v7852_v62 = vsel %vm13522_vm9, %v7847_v61, %v7851_v43  ;;  %v7870_v6 = vor.u32 %v7869_v20, %v16119_v41  ;;  %v7873_v38 = vshll.u32 %v7702_v8, 16  ;;  %v12030_v50 = vcombine.low %v8331_v46, %v8334_v14  ;;  %v7706_v8 = vld [vmem:[#allocation3 + $0x60] sm:$0xf]  ;;  %v7705_v43 = vld [vmem:[#allocation3 + $0x5c] sm:$0x1] }
 0x4a3   : > { %v12342_v47 = vpop.f32.mrb[61].mxu1  ;;  %v11997_v33 = vcombine.low %v7842_v7, %v7852_v62  ;;  %v8339_v61 = vrot.slane %v8337_v24, 4  ;;  %v7861_v16 = vrot.slane %v7860_v13, 4 }
 0x4a4   : > { %v16109_v44 = vadd.f32 %v12342_v47, %v12341_v1  ;;  %v12344_v39 = vpop.f32.mrb[62].mxu1  ;;  %12624 = vmatpush3.bf16.msra.mxu1 %v13323_v58  ;;  %v7871_v28 = vrot.slane %v7870_v6, 4  ;;  %v7875_v20 = vrot.slane %v7873_v38, 5  ;;  %v7902_v6 = vshrl.u32 %v7706_v8, 16 }
 0x4a5   : > { %v12345_v9 = vpop.f32.mrb[63].mxu1  ;;  %12625 = vmatprep.subr.bf16.mxu1 %v13324_v54  ;;  %v7891_v54 = vshrl.u32 %v7704_v5, 16  ;;  %v7866_v7 = vsel %vm13522_vm9, %v7861_v16, %v16119_v41  ;;  %v7897_v38 = vshll.u32 %v7705_v43, 16  ;;  %v7710_v41 = vld [vmem:[#allocation3 + $0x70] sm:$0xf] }
 0x4a6   : > { %v16117_v53 = vadd.f32 %v12345_v9, %v12344_v39  ;;  %v7881_v39 = vshll.u32 %v7703_v57, 16  ;;  %v16141_v9 = vld [vmem:[#allocation3 + $0x64] sm:$0xf]  ;;  %v7876_v49 = vsel %vm13522_vm9, %v7871_v28, %v7875_v20  ;;  %v7708_v16 = vld [vmem:[#allocation3 + $0x68] sm:$0x1] }
 0x4a7   : > { %10529 = vmatmul.mubr.bf16.gmra.mrb[168].mxu1 %v11996_v2  ;;  %v16146_v2 = vrot.slane %v7887_v17, 5  ;;  %v8344_v21 = vrot.slane %v16141_v9, 5  ;;  %v7905_v17 = vshll.u32 %v7706_v8, 16  ;;  %v8222_v9 = vld [vmem:[#allocation3 + $0x70] sm:$0xf] }
 0x4a8   : > { %10536 = vmatprep.mubr.bf16.mxu1 %v12029_v30  ;;  %12626 = vmatpush3.bf16.msra.mxu1 %v13325_v56  ;;  %v8217_v56 = vld [vmem:[#allocation3 + $0x5c] sm:$0x1]  ;;  %v7893_v30 = vrot.slane %v7891_v54, 4  ;;  %v7883_v18 = vrot.slane %v7881_v39, 5  ;;  %v16161_v39 = vrot.slane %v7911_v25, 5  ;;  %v8351_v25 = vrot.slane %v8222_v9, 5 }
 0x4a9   : > { %12627 = vmatprep.subr.bf16.mxu1 %v13326_v27  ;;  %v12015_v27 = vrot.slane %v8215_v37, 9  ;;  %v8340_v5 = vrot.slane %v8217_v56, 5  ;;  %v11998_v37 = vcombine.low %v7866_v7, %v7876_v49  ;;  %v8346_v35 = vrot.slane %v8344_v21, 4  ;;  %v8218_v56 = vld [vmem:[#allocation3 + $0x60] sm:$0xe] }
 0x4aa   : > { %v12347_v58 = vpop.f32.mrb[64].mxu1  ;;  %v7894_v14 = vor.u32 %v7893_v30, %v16146_v2  ;;  %v7884_v46 = vor.u32 %v7883_v18, %v7880_v31  ;;  %v7904_v30 = vrot.slane %v7902_v6, 4  ;;  %v7907_v32 = vrot.slane %v7905_v17, 5  ;;  %v7709_v20 = vld [vmem:[#allocation3 + $0x6c] sm:$0xf] }
 0x4ab   : > { %v12348_v1 = vpop.f32.mrb[65].mxu1  ;;  %v8341_v62 = vsel %vm14154_vm14, %v8339_v61, %v8340_v5  ;;  %v7899_v61 = vrot.slane %v7897_v38, 5  ;;  %v12016_v31 = vrot.slane %v8218_v56, 9  ;;  %v8225_v9 = vld [vmem:[#allocation3 + $0x7c] sm:$0xf] }
 0x4ac   : > { %v16139_v47 = vadd.f32 %v12348_v1, %v12347_v58  ;;  %v12350_v0 = vpop.f32.mrb[66].mxu1  ;;  %12628 = vmatpush3.bf16.msra.mxu1 %v13327_v52  ;;  %v8338_v58 = vsel %vm14154_vm14, %v12015_v27, %v8337_v24  ;;  %v7917_v24 = vrot.slane %v7915_v60, 4  ;;  %v7885_v27 = vrot.slane %v7884_v46, 4 }
 0x4ad   : > { %v12351_v40 = vpop.f32.mrb[67].mxu1  ;;  %12801 = vmatprep.subr.bf16.mxu1 %v16129_v3  ;;  %v7935_v60 = vshll.u32 %v7710_v41, 16  ;;  %v8345_v7 = vsel %vm14154_vm14, %v12016_v31, %v8344_v21  ;;  %v7712_v31 = vld [vmem:[#allocation3 + $0x78] sm:$0xf] }
 0x4ae   : > { %v16144_v15 = vadd.f32 %v12351_v40, %v12350_v0  ;;  %v8220_v0 = vld [vmem:[#allocation3 + $0x68] sm:$0x1]  ;;  %v7918_v8 = vor.u32 %v7917_v24, %v16161_v39 }
 0x4af   : > { %10537 = vmatmul.mubr.bf16.gmra.mrb[172].mxu1 %v11997_v33  ;;  %v12031_v33 = vcombine.low %v8338_v58, %v8341_v62  ;;  %v8347_v28 = vrot.slane %v8220_v0, 5  ;;  %v7926_v58 = vshrl.u32 %v7709_v20, 16  ;;  %v7929_v62 = vshll.u32 %v7709_v20, 16 }
 0x4b0   : > { %10544 = vmatprep.mubr.bf16.mxu1 %v12030_v50  ;;  %v7895_v50 = vrot.slane %v7894_v14, 4  ;;  %v7908_v14 = vor.u32 %v7907_v32, %v7904_v30  ;;  %v8358_v20 = vrot.slane %v8225_v9, 5 }
 0x4b1   : > { %v8348_v18 = vsel %vm14154_vm14, %v8346_v35, %v8347_v28  ;;  %v8223_v35 = vld [vmem:[#allocation3 + $0x74] sm:$0x1]  ;;  %v7931_v32 = vrot.slane %v7929_v62, 5 }
 0x4b2   : > { %v12353_v52 = vpop.f32.mrb[68].mxu1  ;;  %v7900_v43 = vsel %vm13522_vm9, %v7895_v50, %v7899_v61  ;;  %v12032_v0 = vcombine.low %v8345_v7, %v8348_v18  ;;  %v16179_v50 = vrot.slane %v7935_v60, 5  ;;  %v7909_v28 = vrot.slane %v7908_v14, 4 }
 0x4b3   : > { %v12354_v57 = vpop.f32.mrb[69].mxu1  ;;  %v8354_v21 = vrot.slane %v8223_v35, 5  ;;  %v7950_v7 = vshrl.u32 %v7712_v31, 16 }
 0x4b4   : > { %v16156_v54 = vadd.f32 %v12354_v57, %v12353_v52  ;;  %v12356_v1 = vpop.f32.mrb[70].mxu1  ;;  %v7939_v52 = vshrl.u32 %v7710_v41, 16  ;;  %v7921_v57 = vshll.u32 %v7708_v16, 16  ;;  %v7713_v41 = vld [vmem:[#allocation3 + $0x7c] sm:$0xf] }
 0x4b5   : > { %v12357_v13 = vpop.f32.mrb[71].mxu1  ;;  %v7711_v16 = vld [vmem:[#allocation3 + $0x74] sm:$0x1]  ;;  %v7963_v60 = vshrl.u32 %v7713_v41, 16 }
 0x4b6   : > { %v16163_v40 = vadd.f32 %v12357_v13, %v12356_v1  ;;  %v7890_v1 = vsel %vm13522_vm9, %v7885_v27, %v16146_v2  ;;  %v7919_v13 = vrot.slane %v7918_v8, 4  ;;  %v7941_v56 = vrot.slane %v7939_v52, 4 }
 0x4b7   : > { %10545 = vmatmul.mubr.bf16.gmra.mrb[176].mxu1 %v11998_v37  ;;  %v11999_v38 = vcombine.low %v7890_v1, %v7900_v43  ;;  %v8221_v37 = vld [vmem:[#allocation3 + $0x6c] sm:$0xe]  ;;  %v7923_v30 = vrot.slane %v7921_v57, 5  ;;  %v7928_v2 = vrot.slane %v7926_v58, 4  ;;  %v7959_v43 = vshll.u32 %v7713_v41, 16 }
 0x4b8   : > { %10552 = vmatprep.mubr.bf16.mxu1 %v12031_v33  ;;  %v8353_v33 = vrot.slane %v8351_v25, 4  ;;  %v12017_v61 = vrot.slane %v8221_v37, 9  ;;  %v8226_v1 = vld [vmem:[#allocation3 + $0x80] sm:$0x1]  ;;  %v8360_v37 = vrot.slane %v8358_v20, 4  ;;  %v7965_v9 = vrot.slane %v7963_v60, 4 }
 0x4b9   : > { %v7924_v27 = vsel %vm13522_vm9, %v7919_v13, %v7923_v30  ;;  %v7932_v57 = vor.u32 %v7931_v32, %v7928_v2  ;;  %v7714_v30 = vld [vmem:[#allocation3 + $0x80] sm:$0x1]  ;;  %v7716_v2 = vld [vmem:[#allocation3 + $0x88] sm:$0xf]  ;;  %v7952_v41 = vrot.slane %v7950_v7, 4 }
 0x4ba   : > { %v12359_v5 = vpop.f32.mrb[72].mxu1  ;;  %v8355_v8 = vsel %vm14154_vm14, %v8353_v33, %v8354_v21  ;;  %v8352_v14 = vsel %vm14154_vm14, %v12017_v61, %v8351_v25  ;;  %v8228_v61 = vld [vmem:[#allocation3 + $0x88] sm:$0xf]  ;;  %v7987_v60 = vshrl.u32 %v7716_v2, 16 }
 0x4bb   : > { %v12360_v49 = vpop.f32.mrb[73].mxu1  ;;  %v12033_v13 = vcombine.low %v8352_v14, %v8355_v8  ;;  %v7933_v25 = vrot.slane %v7932_v57, 4  ;;  %v7969_v57 = vshll.u32 %v7714_v30, 16  ;;  %v7719_v30 = vld [vmem:[#allocation3 + $0x94] sm:$0xf] }
 0x4bc   : > { %v16170_v6 = vadd.f32 %v12360_v49, %v12359_v5  ;;  %v12362_v17 = vpop.f32.mrb[74].mxu1  ;;  %v7942_v5 = vor.u32 %v7941_v56, %v16179_v50  ;;  %v7914_v49 = vsel %vm13522_vm9, %v7909_v28, %v16161_v39  ;;  %v8224_v56 = vld [vmem:[#allocation3 + $0x78] sm:$0xe]  ;;  %v16195_v39 = vrot.slane %v7959_v43, 5 }
 0x4bd   : > { %v12363_v46 = vpop.f32.mrb[75].mxu1  ;;  %v8361_v28 = vrot.slane %v8226_v1, 5  ;;  %v7983_v43 = vshll.u32 %v7716_v2, 16 }
 0x4be   : > { %v16177_v24 = vadd.f32 %v12363_v46, %v12362_v17  ;;  %v7945_v17 = vshll.u32 %v7711_v16, 16  ;;  %v7953_v46 = vshll.u32 %v7712_v31, 16  ;;  %v7943_v33 = vrot.slane %v7942_v5, 4  ;;  %v7715_v31 = vld [vmem:[#allocation3 + $0x84] sm:$0xf] }
 0x4bf   : > { %10553 = vmatmul.mubr.bf16.gmra.mrb[180].mxu1 %v11999_v38  ;;  %v8362_v16 = vsel %vm14154_vm14, %v8360_v37, %v8361_v28  ;;  %v7966_v5 = vor.u32 %v7965_v9, %v16195_v39  ;;  %v16209_v9 = vld [vmem:[#allocation3 + $0x94] sm:$0xf] }
 0x4c0   : > { %10560 = vmatprep.mubr.bf16.mxu1 %v12032_v0  ;;  %v12000_v0 = vcombine.low %v7914_v49, %v7924_v27  ;;  %v7947_v32 = vrot.slane %v7945_v17, 5  ;;  %v7955_v21 = vrot.slane %v7953_v46, 5  ;;  %v12018_v27 = vrot.slane %v8224_v56, 9  ;;  %v8227_v46 = vld [vmem:[#allocation3 + $0x84] sm:$0xe] }
 0x4c1   : > { %v7938_v49 = vsel %vm13522_vm9, %v7933_v25, %v16179_v50  ;;  %v8229_v56 = vld [vmem:[#allocation3 + $0x8c] sm:$0x1]  ;;  %v7967_v50 = vrot.slane %v7966_v5, 4  ;;  %v16213_v25 = vrot.slane %v7983_v43, 5  ;;  %v12019_v2 = vrot.slane %v8227_v46, 9 }
 0x4c2   : > { %v12365_v18 = vpop.f32.mrb[76].mxu1  ;;  %v7948_v8 = vsel %vm13522_vm9, %v7943_v33, %v7947_v32  ;;  %v8359_v14 = vsel %vm14154_vm14, %v12018_v27, %v8358_v20  ;;  %v7956_v7 = vor.u32 %v7955_v21, %v7952_v41  ;;  %v7989_v20 = vrot.slane %v7987_v60, 4 }
 0x4c3   : > { %v12366_v52 = vpop.f32.mrb[77].mxu1  ;;  %v12001_v37 = vcombine.low %v7938_v49, %v7948_v8  ;;  %v12034_v33 = vcombine.low %v8359_v14, %v8362_v16  ;;  %v7971_v21 = vrot.slane %v7969_v57, 5  ;;  %v8368_v16 = vrot.slane %v8229_v56, 5  ;;  %v8232_v56 = vld [vmem:[#allocation3 + $0x98] sm:$0x1] }
 0x4c4   : > { %v16191_v58 = vadd.f32 %v12366_v52, %v12365_v18  ;;  %v12368_v62 = vpop.f32.mrb[78].mxu1  ;;  %v7957_v41 = vrot.slane %v7956_v7, 4  ;;  %v8372_v8 = vrot.slane %v16209_v9, 5  ;;  %v8011_v49 = vshrl.u32 %v7719_v30, 16 }
 0x4c5   : > { %v12369_v38 = vpop.f32.mrb[79].mxu1  ;;  %v7972_v43 = vsel %vm13522_vm9, %v7967_v50, %v7971_v21  ;;  %v7990_v60 = vor.u32 %v7989_v20, %v16213_v25  ;;  %v8230_v20 = vld [vmem:[#allocation3 + $0x90] sm:$0xe] }
 0x4c6   : > { %v16193_v35 = vadd.f32 %v12369_v38, %v12368_v62  ;;  %v8365_v62 = vrot.slane %v8228_v61, 5  ;;  %v7974_v38 = vshrl.u32 %v7715_v31, 16 }
 0x4c7   : > { %10561 = vmatmul.mubr.bf16.gmra.mrb[184].mxu1 %v12000_v0  ;;  %v7977_v0 = vshll.u32 %v7715_v31, 16  ;;  %v7718_v31 = vld [vmem:[#allocation3 + $0x90] sm:$0xf] }
 0x4c8   : > { %10568 = vmatprep.mubr.bf16.mxu1 %v12033_v13  ;;  %v8367_v32 = vrot.slane %v8365_v62, 4  ;;  %v7976_v61 = vrot.slane %v7974_v38, 4  ;;  %v7998_v7 = vshrl.u32 %v7718_v31, 16  ;;  %v8001_v46 = vshll.u32 %v7718_v31, 16 }
 0x4c9   : > { %v7979_v27 = vrot.slane %v7977_v0, 5  ;;  %v7991_v31 = vrot.slane %v7990_v60, 4 }
 0x4ca   : > { %v12371_v18 = vpop.f32.mrb[80].mxu1  ;;  %v8369_v57 = vsel %vm14154_vm14, %v8367_v32, %v8368_v16  ;;  %v16232_v16 = vld [vmem:[#allocation3 + $0xa0] sm:$0xf] }
 0x4cb   : > { %v12372_v52 = vpop.f32.mrb[81].mxu1 }
 0x4cc   : > { %v16207_v17 = vadd.f32 %v12372_v52, %v12371_v18  ;;  %v12374_v1 = vpop.f32.mrb[82].mxu1  ;;  %v7717_v18 = vld [vmem:[#allocation3 + $0x8c] sm:$0x1]  ;;  %v8007_v52 = vshll.u32 %v7719_v30, 16  ;;  %v8374_v30 = vrot.slane %v8372_v8, 4 }
 0x4cd   : > { %v12375_v13 = vpop.f32.mrb[83].mxu1 }
 0x4ce   : > { %v16211_v28 = vadd.f32 %v12375_v13, %v12374_v1  ;;  %v8366_v1 = vsel %vm14154_vm14, %v12019_v2, %v8365_v62  ;;  %v7962_v13 = vsel %vm13522_vm9, %v7957_v41, %v16195_v39  ;;  %v16228_v62 = vrot.slane %v8007_v52, 5 }
 0x4cf   : > { %10569 = vmatmul.mubr.bf16.gmra.mrb[188].mxu1 %v12001_v37  ;;  %v7980_v37 = vor.u32 %v7979_v27, %v7976_v61  ;;  %v12002_v50 = vcombine.low %v7962_v13, %v7972_v43  ;;  %v8013_v2 = vrot.slane %v8011_v49, 4  ;;  %v12035_v21 = vcombine.low %v8366_v1, %v8369_v57  ;;  %v7721_v61 = vld [vmem:[#allocation3 + $0x9c] sm:$0xf]  ;;  %v7720_v13 = vld [vmem:[#allocation3 + $0x98] sm:$0x1] }
 0x4d0   : > { %10576 = vmatprep.mubr.bf16.mxu1 %v12034_v33  ;;  %v7993_v33 = vshll.u32 %v7717_v18, 16  ;;  %v8000_v39 = vrot.slane %v7998_v7, 4  ;;  %v8003_v41 = vrot.slane %v8001_v46, 5  ;;  %v12020_v43 = vrot.slane %v8230_v20, 9 }
 0x4d1   : > { %v7981_v27 = vrot.slane %v7980_v37, 4  ;;  %v8014_v49 = vor.u32 %v8013_v2, %v16228_v62  ;;  %v8379_v7 = vrot.slane %v16232_v16, 5  ;;  %v8022_v46 = vshrl.u32 %v7721_v61, 16 }
 0x4d2   : > { %v12377_v5 = vpop.f32.mrb[84].mxu1  ;;  %v7995_v18 = vrot.slane %v7993_v33, 5  ;;  %v8373_v37 = vsel %vm14154_vm14, %v12020_v43, %v8372_v8  ;;  %v8004_v33 = vor.u32 %v8003_v41, %v8000_v39 }
 0x4d3   : > { %v12378_v14 = vpop.f32.mrb[85].mxu1  ;;  %v7986_v2 = vsel %vm13522_vm9, %v7981_v27, %v16213_v25  ;;  %v8015_v16 = vrot.slane %v8014_v49, 4  ;;  %v8381_v39 = vrot.slane %v8379_v7, 4  ;;  %v8024_v41 = vrot.slane %v8022_v46, 4  ;;  %v16251_v25 = vld [vmem:[#allocation3 + $0xac] sm:$0xf] }
 0x4d4   : > { %v16223_v38 = vadd.f32 %v12378_v14, %v12377_v5  ;;  %v12380_v0 = vpop.f32.mrb[86].mxu1  ;;  %v7722_v5 = vld [vmem:[#allocation3 + $0xa0] sm:$0xf]  ;;  %v8375_v14 = vrot.slane %v8232_v56, 5  ;;  %v8025_v56 = vshll.u32 %v7721_v61, 16 }
 0x4d5   : > { %v12381_v9 = vpop.f32.mrb[87].mxu1  ;;  %v8031_v1 = vshll.u32 %v7722_v5, 16  ;;  %v8035_v60 = vshrl.u32 %v7722_v5, 16  ;;  %v7725_v5 = vld [vmem:[#allocation3 + $0xac] sm:$0xf] }
 0x4d6   : > { %16997 = vst [vmem:[#allocation6_spill] sm:$0xff] %v16223_v38  ;;  %v16230_v32 = vadd.f32 %v12381_v9, %v12380_v0  ;;  %v8376_v52 = vsel %vm14154_vm14, %v8374_v30, %v8375_v14  ;;  %v7996_v0 = vsel %vm13522_vm9, %v7991_v31, %v7995_v18  ;;  %v8233_v18 = vld [vmem:[#allocation3 + $0x9c] sm:$0xe]  ;;  %v8235_v61 = vld [vmem:[#allocation3 + $0xa4] sm:$0x1]  ;;  %v8027_v43 = vrot.slane %v8025_v56, 5 }
 0x4d7   : > { %10577 = vmatmul.mubr.bf16.gmra.mrb[192].mxu1 %v12002_v50  ;;  %v8017_v50 = vshll.u32 %v7720_v13, 16  ;;  %v12003_v14 = vcombine.low %v7986_v2, %v7996_v0  ;;  %v8037_v38 = vrot.slane %v8035_v60, 4  ;;  %v7724_v13 = vld [vmem:[#allocation3 + $0xa8] sm:$0xf]  ;;  %v8055_v27 = vshll.u32 %v7725_v5, 16 }
 0x4d8   : > { %16998 = vst [vmem:[#allocation7_spill] sm:$0xff] %v16230_v32  ;;  %10584 = vmatprep.mubr.bf16.mxu1 %v12035_v21  ;;  %v12036_v21 = vcombine.low %v8373_v37, %v8376_v52  ;;  %v16247_v32 = vrot.slane %v8031_v1, 5  ;;  %v8059_v52 = vshrl.u32 %v7725_v5, 16  ;;  %v8382_v49 = vrot.slane %v8235_v61, 5  ;;  %v7723_v0 = vld [vmem:[#allocation3 + $0xa4] sm:$0x1] }
 0x4d9   : > { %v8046_v37 = vshrl.u32 %v7724_v13, 16  ;;  %v12021_v56 = vrot.slane %v8233_v18, 9  ;;  %v8386_v2 = vrot.slane %v16251_v25, 5  ;;  %v8041_v5 = vshll.u32 %v7723_v0, 16  ;;  %v7728_v0 = vld [vmem:[#allocation3 + $0xb8] sm:$0xf] }
 0x4da   : > { %v12383_v57 = vpop.f32.mrb[88].mxu1  ;;  %v8038_v60 = vor.u32 %v8037_v38, %v16247_v32 }
 0x4db   : > { %v12384_v9 = vpop.f32.mrb[89].mxu1  ;;  %v8380_v18 = vsel %vm14154_vm14, %v12021_v56, %v8379_v7 }
 0x4dc   : > { %v16242_v20 = vadd.f32 %v12384_v9, %v12383_v57  ;;  %v12386_v30 = vpop.f32.mrb[90].mxu1  ;;  %v8005_v57 = vrot.slane %v8004_v33, 4  ;;  %v8019_v9 = vrot.slane %v8017_v50, 5  ;;  %v8383_v33 = vsel %vm14154_vm14, %v8381_v39, %v8382_v49  ;;  %v16266_v39 = vld [vmem:[#allocation3 + $0xb8] sm:$0xf] }
 0x4dd   : > { %v12387_v31 = vpop.f32.mrb[91].mxu1  ;;  %v8028_v50 = vor.u32 %v8027_v43, %v8024_v41  ;;  %v12037_v43 = vcombine.low %v8380_v18, %v8383_v33  ;;  %v8039_v25 = vrot.slane %v8038_v60, 4  ;;  %v7726_v49 = vld [vmem:[#allocation3 + $0xb0] sm:$0x1]  ;;  %v8393_v56 = vrot.slane %v16266_v39, 5 }
 0x4de   : > { %16999 = vst [vmem:[#allocation8_spill] sm:$0xff] %v16242_v20  ;;  %v16249_v8 = vadd.f32 %v12387_v31, %v12386_v30  ;;  %v8020_v1 = vsel %vm13522_vm9, %v8015_v16, %v8019_v9  ;;  %v8049_v30 = vshll.u32 %v7724_v13, 16  ;;  %v8061_v16 = vrot.slane %v8059_v52, 4  ;;  %v8238_v9 = vld [vmem:[#allocation3 + $0xb0] sm:$0x1] }
 0x4df   : > { %10585 = vmatmul.mubr.bf16.gmra.mrb[196].mxu1 %v12003_v14  ;;  %v16262_v14 = vrot.slane %v8055_v27, 5  ;;  %v8029_v27 = vrot.slane %v8028_v50, 4  ;;  %v8388_v52 = vrot.slane %v8386_v2, 4  ;;  %v8389_v60 = vrot.slane %v8238_v9, 5 }
 0x4e0   : > { %17000 = vst [vmem:[#allocation9_spill] sm:$0xff] %v16249_v8  ;;  %10592 = vmatprep.mubr.bf16.mxu1 %v12036_v21  ;;  %v8010_v21 = vsel %vm13522_vm9, %v8005_v57, %v16228_v62  ;;  %v8048_v8 = vrot.slane %v8046_v37, 4  ;;  %v8051_v20 = vrot.slane %v8049_v30, 5  ;;  %v8065_v37 = vshll.u32 %v7726_v49, 16  ;;  %v7727_v30 = vld [vmem:[#allocation3 + $0xb4] sm:$0xf] }
 0x4e1   : > { %v12004_v13 = vcombine.low %v8010_v21, %v8020_v1  ;;  %v8043_v1 = vrot.slane %v8041_v5, 5  ;;  %v8062_v7 = vor.u32 %v8061_v16, %v16262_v14  ;;  %v8083_v21 = vshrl.u32 %v7728_v0, 16 }
 0x4e2   : > { %v12405_v46 = vpop.f32.mrb[92].mxu1  ;;  %v8052_v50 = vor.u32 %v8051_v20, %v8048_v8  ;;  %v8034_v5 = vsel %vm13522_vm9, %v8029_v27, %v16247_v32  ;;  %v8395_v39 = vrot.slane %v8393_v56, 4  ;;  %v7731_v32 = vld [vmem:[#allocation3 + $0xc4] sm:$0xf] }
 0x4e3   : > { %v12406_v31 = vpop.f32.mrb[93].mxu1  ;;  %v8063_v9 = vrot.slane %v8062_v7, 4 }
 0x4e4   : > { %v12407_v38 = vadd.f32 %v12406_v31, %v12405_v46  ;;  %v12408_v61 = vpop.f32.mrb[94].mxu1  ;;  %v8236_v46 = vld [vmem:[#allocation3 + $0xa8] sm:$0xe]  ;;  %v8079_v31 = vshll.u32 %v7728_v0, 16  ;;  %v7729_v0 = vld [vmem:[#allocation3 + $0xbc] sm:$0x1] }
 0x4e5   : > { %v12409_v41 = vpop.f32.mrb[95].mxu1  ;;  %v12022_v16 = vrot.slane %v8236_v46, 9 }
 0x4e6   : > { %v16269_v62 = vadd.f32 %v12407_v38, %v15955_v59  ;;  %v12410_v57 = vadd.f32 %v12409_v41, %v12408_v61  ;;  %v8044_v59 = vsel %vm13522_vm9, %v8039_v25, %v8043_v1  ;;  %v8239_v61 = vld [vmem:[#allocation3 + $0xb4] sm:$0xe]  ;;  %v8070_v41 = vshrl.u32 %v7727_v30, 16 }
 0x4e7   : > { %10593 = vmatmul.mubr.bf16.gmra.mrb[200].mxu1 %v12004_v13  ;;  %v8241_v13 = vld [vmem:[#allocation3 + $0xbc] sm:$0x1]  ;;  %v12005_v8 = vcombine.low %v8034_v5, %v8044_v59  ;;  %v8387_v49 = vsel %vm14154_vm14, %v12022_v16, %v8386_v2  ;;  %v8053_v1 = vrot.slane %v8052_v50, 4  ;;  %v7730_v5 = vld [vmem:[#allocation3 + $0xc0] sm:$0xf]  ;;  %v8107_v16 = vshrl.u32 %v7731_v32, 16 }
 0x4e8   : > { %v16274_v33 = vadd.f32 %v12410_v57, %v15959_v23  ;;  %10600 = vmatprep.mubr.bf16.mxu1 %v12037_v43  ;;  %v8390_v23 = vsel %vm14154_vm14, %v8388_v52, %v8389_v60  ;;  %v8073_v43 = vshll.u32 %v7727_v30, 16  ;;  %v8067_v57 = vrot.slane %v8065_v37, 5 }
 0x4e9   : > { %v8396_v46 = vrot.slane %v8241_v13, 5  ;;  %v16285_v52 = vrot.slane %v8079_v31, 5  ;;  %v8085_v60 = vrot.slane %v8083_v21, 4  ;;  %v12038_v30 = vcombine.low %v8387_v49, %v8390_v23  ;;  %v8631_v23 = vld [vmem:[#allocation3 + $0x1c] sm:$0xf] }
 0x4ea   : > { %17001 = vst [vmem:[#allocation10_spill] sm:$0xff] %v16274_v33  ;;  %v12411_v38 = vpop.f32.mrb[96].mxu1  ;;  %v8068_v2 = vsel %vm13522_vm9, %v8063_v9, %v8067_v57  ;;  %v8072_v59 = vrot.slane %v8070_v41, 4  ;;  %v8075_v50 = vrot.slane %v8073_v43, 5  ;;  %v8103_v21 = vshll.u32 %v7731_v32, 16 }
 0x4eb   : > { %v12412_v18 = vpop.f32.mrb[97].mxu1  ;;  %v8397_v37 = vsel %vm14154_vm14, %v8395_v39, %v8396_v46  ;;  %v8086_v13 = vor.u32 %v8085_v60, %v16285_v52  ;;  %v8094_v43 = vshrl.u32 %v7730_v5, 16  ;;  %v8242_v57 = vld [vmem:[#allocation3 + $0xc0] sm:$0xe]  ;;  %v8692_v32 = vshrl.u32 %v8631_v23, 16 }
 0x4ec   : > { %v12413_v25 = vadd.f32 %v12412_v18, %v12411_v38  ;;  %v12414_v20 = vpop.f32.mrb[98].mxu1  ;;  %v12023_v38 = vrot.slane %v8239_v61, 9  ;;  %v8243_v18 = vld [vmem:[#allocation3 + $0xc4] sm:$0xf]  ;;  %v8058_v61 = vsel %vm13522_vm9, %v8053_v1, %v16262_v14  ;;  %v8076_v49 = vor.u32 %v8075_v50, %v8072_v59  ;;  %v8244_v1 = vld [vmem:[#allocation3 + $0xc8] sm:$0x1] }
 0x4ed   : > { %v12415_v27 = vpop.f32.mrb[99].mxu1  ;;  %v8400_v9 = vrot.slane %v8243_v18, 5  ;;  %v12006_v39 = vcombine.low %v8058_v61, %v8068_v2  ;;  %v16303_v60 = vrot.slane %v8103_v21, 5  ;;  %v8087_v2 = vrot.slane %v8086_v13, 4 }
 0x4ee   : > { %v16288_v7 = vadd.f32 %v12413_v25, %v15963_v55  ;;  %v12416_v33 = vadd.f32 %v12415_v27, %v12414_v20  ;;  %v8089_v55 = vshll.u32 %v7729_v0, 16  ;;  %v8394_v41 = vsel %vm14154_vm14, %v12023_v38, %v8393_v56 }
 0x4ef   : > { %10601 = vmatmul.mubr.bf16.gmra.mrb[204].mxu1 %v12005_v8  ;;  %v12039_v8 = vcombine.low %v8394_v41, %v8397_v37  ;;  %v8688_v0 = vshll.u32 %v8631_v23, 16  ;;  %v8402_v61 = vrot.slane %v8400_v9, 4  ;;  %v8096_v59 = vrot.slane %v8094_v43, 4  ;;  %v7732_v41 = vld [vmem:[#allocation3 + $0xc8] sm:$0x1] }
 0x4f0   : > { %v16295_v31 = vadd.f32 %v12416_v33, %v15967_v45  ;;  %10608 = vmatprep.mubr.bf16.mxu1 %v12038_v30  ;;  %v8097_v45 = vshll.u32 %v7730_v5, 16  ;;  %v8630_v33 = vld [vmem:[#allocation3 + $0x18] sm:$0xf]  ;;  %v8091_v14 = vrot.slane %v8089_v55, 5  ;;  %v8109_v30 = vrot.slane %v8107_v16, 4 }
 0x4f1   : > { %v8679_v56 = vshrl.u32 %v8630_v33, 16  ;;  %v8682_v38 = vshll.u32 %v8630_v33, 16  ;;  %v8077_v23 = vrot.slane %v8076_v49, 4  ;;  %v16308_v55 = vrot.slane %v8688_v0, 5 }
 0x4f2   : > { %v12417_v25 = vpop.f32.mrb[100].mxu1  ;;  %v8099_v50 = vrot.slane %v8097_v45, 5  ;;  %v8694_v21 = vrot.slane %v8692_v32, 4  ;;  %v12024_v13 = vrot.slane %v8242_v57, 9  ;;  %v8110_v33 = vor.u32 %v8109_v30, %v16303_v60 }
 0x4f3   : > { %v12418_v20 = vpop.f32.mrb[101].mxu1  ;;  %v8681_v43 = vrot.slane %v8679_v56, 4  ;;  %v8684_v45 = vrot.slane %v8682_v38, 5 }
 0x4f4   : > { %v12419_v27 = vadd.f32 %v12418_v20, %v12417_v25  ;;  %v12420_v46 = vpop.f32.mrb[102].mxu1  ;;  %v8403_v25 = vrot.slane %v8244_v1, 5  ;;  %v8634_v20 = vld [vmem:[#allocation3 + $0x28] sm:$0xf]  ;;  %v8401_v0 = vsel %vm14154_vm14, %v12024_v13, %v8400_v9  ;;  %v8100_v32 = vor.u32 %v8099_v50, %v8096_v59 }
 0x4f5   : > { %v12421_v18 = vpop.f32.mrb[103].mxu1  ;;  %v8712_v1 = vshll.u32 %v8634_v20, 16  ;;  %v8716_v30 = vshrl.u32 %v8634_v20, 16  ;;  %v8111_v38 = vrot.slane %v8110_v33, 4  ;;  %v8685_v9 = vor.u32 %v8684_v45, %v8681_v43 }
 0x4f6   : > { %v16306_v5 = vadd.f32 %v12419_v27, %v15971_v11  ;;  %v12422_v37 = vadd.f32 %v12421_v18, %v12420_v46  ;;  %v8092_v11 = vsel %vm13522_vm9, %v8087_v2, %v8091_v14  ;;  %v8632_v27 = vld [vmem:[#allocation3 + $0x20] sm:$0x1]  ;;  %v8082_v46 = vsel %vm13522_vm9, %v8077_v23, %v16285_v52 }
 0x4f7   : > { %10609 = vmatmul.mubr.bf16.gmra.mrb[208].mxu1 %v12006_v39  ;;  %v8404_v39 = vsel %vm14154_vm14, %v8402_v61, %v8403_v25  ;;  %v8695_v14 = vor.u32 %v8694_v21, %v16308_v55  ;;  %v12007_v61 = vcombine.low %v8082_v46, %v8092_v11  ;;  %v8698_v59 = vshll.u32 %v8632_v27, 16  ;;  %v8636_v27 = vld [vmem:[#allocation3 + $0x30] sm:$0xf] }
 0x4f8   : > { %v16311_v16 = vadd.f32 %v12422_v37, %v15975_v36  ;;  %10616 = vmatprep.mubr.bf16.mxu1 %v12039_v8  ;;  %v8113_v36 = vshll.u32 %v7732_v41, 16  ;;  %v8633_v8 = vld [vmem:[#allocation3 + $0x24] sm:$0xf]  ;;  %v12040_v56 = vcombine.low %v8401_v0, %v8404_v39  ;;  %v8101_v63 = vrot.slane %v8100_v32, 4  ;;  %v8637_v39 = vld [vmem:[#allocation3 + $0x34] sm:$0xf] }
 0x4f9   : > { %v8703_v50 = vshrl.u32 %v8633_v8, 16  ;;  %v8706_v25 = vshll.u32 %v8633_v8, 16  ;;  %v8696_v23 = vrot.slane %v8695_v14, 4  ;;  %v16327_v21 = vrot.slane %v8712_v1, 5 }
 0x4fa   : > { %v12423_v49 = vpop.f32.mrb[104].mxu1  ;;  %v8115_v52 = vrot.slane %v8113_v36, 5  ;;  %v8718_v20 = vrot.slane %v8716_v30, 4  ;;  %v8686_v43 = vrot.slane %v8685_v9, 4  ;;  %v8700_v45 = vrot.slane %v8698_v59, 5 }
 0x4fb   : > { %v12424_v57 = vpop.f32.mrb[105].mxu1  ;;  %v8708_v0 = vrot.slane %v8706_v25, 5  ;;  %v8106_v36 = vsel %vm13522_vm9, %v8101_v63, %v16303_v60  ;;  %v8736_v46 = vshll.u32 %v8637_v39, 16  ;;  %v8740_v14 = vshrl.u32 %v8637_v39, 16 }
 0x4fc   : > { %v12425_v18 = vadd.f32 %v12424_v57, %v12423_v49  ;;  %v12426_v2 = vpop.f32.mrb[106].mxu1  ;;  %v8116_v33 = vsel %vm13522_vm9, %v8111_v38, %v8115_v52  ;;  %v8705_v49 = vrot.slane %v8703_v50, 4  ;;  %v8719_v57 = vor.u32 %v8718_v20, %v16327_v21 }
 0x4fd   : > { %v12427_v37 = vpop.f32.mrb[107].mxu1  ;;  %v8727_v63 = vshrl.u32 %v8636_v27, 16  ;;  %v8730_v60 = vshll.u32 %v8636_v27, 16  ;;  %v16346_v25 = vrot.slane %v8736_v46, 5 }
 0x4fe   : > { %v16325_v41 = vadd.f32 %v12425_v18, %v15979_v34  ;;  %v12428_v13 = vadd.f32 %v12427_v37, %v12426_v2  ;;  %v8635_v34 = vld [vmem:[#allocation3 + $0x2c] sm:$0x1]  ;;  %v12008_v18 = vcombine.low %v8106_v36, %v8116_v33  ;;  %v8709_v38 = vor.u32 %v8708_v0, %v8705_v49  ;;  %v8638_v33 = vld [vmem:[#allocation3 + $0x38] sm:$0x1] }
 0x4ff   : > { %10617 = vmatmul.mubr.bf16.gmra.mrb[212].mxu1 %v12007_v61  ;;  %v8722_v2 = vshll.u32 %v8635_v34, 16  ;;  %v8720_v50 = vrot.slane %v8719_v57, 4  ;;  %v8729_v39 = vrot.slane %v8727_v63, 4  ;;  %v13328_v57 = vld [vmem:[#allocation3 + $0x18] sm:$0xff]  }
 0x500   : > { %v16330_v11 = vadd.f32 %v12428_v13, %v15983_v12  ;;  %10624 = vmatprep.mubr.bf16.mxu1 %v12040_v56  ;;  %v8701_v12 = vsel %vm13522_vm9, %v8696_v23, %v8700_v45  ;;  %v8691_v56 = vsel %vm13522_vm9, %v8686_v43, %v16308_v55  ;;  %v8742_v13 = vrot.slane %v8740_v14, 4  ;;  %v8640_v23 = vld [vmem:[#allocation3 + $0x40] sm:$0xf] }
 0x501   : > { %v12057_v59 = vcombine.low %v8691_v56, %v8701_v12  ;;  %v8710_v20 = vrot.slane %v8709_v38, 4  ;;  %v8724_v55 = vrot.slane %v8722_v2, 5  ;;  %v8732_v43 = vrot.slane %v8730_v60, 5 }
 0x502   : > { %v12429_v32 = vpop.f32.mrb[108].mxu1  ;;  %v8743_v0 = vor.u32 %v8742_v13, %v16346_v25  ;;  %v8764_v36 = vshrl.u32 %v8640_v23, 16 }
 0x503   : > { %v12430_v8 = vpop.f32.mrb[109].mxu1  ;;  %v8725_v49 = vsel %vm13522_vm9, %v8720_v50, %v8724_v55  ;;  %v8715_v46 = vsel %vm13522_vm9, %v8710_v20, %v16327_v21  ;;  %v8733_v14 = vor.u32 %v8732_v43, %v8729_v39  ;;  %v8641_v21 = vld [vmem:[#allocation3 + $0x44] sm:$0x1] }
 0x504   : > { %v12431_v1 = vadd.f32 %v12430_v8, %v12429_v32  ;;  %v12432_v30 = vpop.f32.mrb[110].mxu1  ;;  %v8760_v32 = vshll.u32 %v8640_v23, 16  ;;  %v8746_v8 = vshll.u32 %v8638_v33, 16  ;;  %v12058_v56 = vcombine.low %v8715_v46, %v8725_v49  ;;  %v13335_v20 = vld [vmem:[%s16966_s2 + $0x210] sm:$0xff]   ;;  %v8642_v33 = vld [vmem:[#allocation3 + $0x48] sm:$0xf] }
 0x505   : > { %v12433_v61 = vpop.f32.mrb[111].mxu1  ;;  %v8744_v38 = vrot.slane %v8743_v0, 4  ;;  %v8766_v60 = vrot.slane %v8764_v36, 4  ;;  %v8734_v50 = vrot.slane %v8733_v14, 4  ;;  %v8770_v49 = vshll.u32 %v8641_v21, 16 }
 0x506   : > { %v16344_v37 = vadd.f32 %v12431_v1, %v15996_v29  ;;  %v12434_v9 = vadd.f32 %v12433_v61, %v12432_v30  ;;  %v8639_v29 = vld [vmem:[#allocation3 + $0x3c] sm:$0xf]  ;;  %v16363_v63 = vrot.slane %v8760_v32, 5  ;;  %v8748_v13 = vrot.slane %v8746_v8, 5  ;;  %v13330_v32 = vld [vmem:[#allocation3 + $0x24] sm:$0xff]  }
 0x507   : > { %10625 = vmatmul.mubr.bf16.gmra.mrb[216].mxu1 %v12008_v18  ;;  %v13332_v1 = vld [vmem:[%s16966_s2 + $0x208] sm:$0xff]   ;;  %v8751_v30 = vshrl.u32 %v8639_v29, 16  ;;  %v8754_v18 = vshll.u32 %v8639_v29, 16  ;;  %v8739_v36 = vsel %vm13522_vm9, %v8734_v50, %v16346_v25  ;;  %v8778_v8 = vshll.u32 %v8642_v33, 16 }
 0x508   : > { %v16349_v52 = vadd.f32 %v12434_v9, %v15998_v42  ;;  %10665 = vmatprep.mubr.bf16.mxu1 %v12057_v59  ;;  %v8643_v59 = vld [vmem:[#allocation3 + $0x4c] sm:$0xf]  ;;  %v8767_v43 = vor.u32 %v8766_v60, %v16363_v63  ;;  %v8772_v60 = vrot.slane %v8770_v49, 5 }
 0x509   : > { %v8756_v23 = vrot.slane %v8754_v18, 5 }
 0x50a   : > { %v12435_v45 = vpop.f32.mrb[112].mxu1 }
 0x50b   : > { %v12436_v34 = vpop.f32.mrb[113].mxu1 }
 0x50c   : > { %v12437_v27 = vadd.f32 %v12436_v34, %v12435_v45  ;;  %v12438_v42 = vpop.f32.mrb[114].mxu1  ;;  %v8788_v45 = vshrl.u32 %v8643_v59, 16 }
 0x50d   : > { %v12439_v12 = vpop.f32.mrb[115].mxu1 }
 0x50e   : > { %v16361_v2 = vadd.f32 %v12437_v27, %v16012_v10  ;;  %v12440_v61 = vadd.f32 %v12439_v12, %v12438_v42  ;;  %v8753_v10 = vrot.slane %v8751_v30, 4  ;;  %v8775_v42 = vshrl.u32 %v8642_v33, 16  ;;  %v13338_v12 = vld [vmem:[%s16966_s2 + $0x218] sm:$0xff]  }
 0x50f   : > { %10666 = vmatmul.mubr.bf16.vlgmr.msra.gmra.mrb[220].mxu1 %v13328_v57  ;;  %v8790_v18 = vrot.slane %v8788_v45, 4 }
 0x510   : > { %v16366_v9 = vadd.f32 %v12440_v61, %v16022_v19  ;;  %10673 = vmatprep.mubr.bf16.mxu1 %v12058_v56  ;;  %12802 = vmatpush3.bf16.msra.mxu1 %v16129_v3  ;;  %v8749_v19 = vsel %vm13522_vm9, %v8744_v38, %v8748_v13  ;;  %v8784_v3 = vshll.u32 %v8643_v59, 16  ;;  %v8757_v27 = vor.u32 %v8756_v23, %v8753_v10  ;;  %v8644_v61 = vld [vmem:[#allocation3 + $0x50] sm:$0x1]  ;;  %v8646_v56 = vld [vmem:[#allocation3 + $0x58] sm:$0xf] }
 0x511   : > { %12803 = vmatprep.subr.bf16.mxu1 %v13332_v1  ;;  %v12059_v14 = vcombine.low %v8739_v36, %v8749_v19  ;;  %v8777_v21 = vrot.slane %v8775_v42, 4  ;;  %v8780_v59 = vrot.slane %v8778_v8, 5  ;;  %v8645_v13 = vld [vmem:[#allocation3 + $0x54] sm:$0xf]  ;;  %v8812_v33 = vshrl.u32 %v8646_v56, 16 }
 0x512   : > { %v12441_v55 = vpop.f32.mrb[116].mxu1  ;;  %v16384_v30 = vrot.slane %v8784_v3, 5  ;;  %v8758_v38 = vrot.slane %v8757_v27, 4  ;;  %v8794_v19 = vshll.u32 %v8644_v61, 16  ;;  %v13331_v3 = vld [vmem:[#allocation3 + $0x30] sm:$0xff]   ;;  %v8802_v49 = vshll.u32 %v8645_v13, 16 }
 0x513   : > { %v12442_v39 = vpop.f32.mrb[117].mxu1 }
 0x514   : > { %v12443_v29 = vadd.f32 %v12442_v39, %v12441_v55  ;;  %v12444_v34 = vpop.f32.mrb[118].mxu1  ;;  %12804 = vmatpush3.bf16.msra.mxu1 %v13332_v1  ;;  %v8768_v1 = vrot.slane %v8767_v43, 4  ;;  %v8791_v23 = vor.u32 %v8790_v18, %v16384_v30  ;;  %v8808_v55 = vshll.u32 %v8646_v56, 16 }
 0x515   : > { %v12445_v0 = vpop.f32.mrb[119].mxu1  ;;  %12805 = vmatprep.subr.bf16.mxu1 %v13335_v20  ;;  %v8763_v45 = vsel %vm13522_vm9, %v8758_v38, %v16363_v63  ;;  %v8796_v18 = vrot.slane %v8794_v19, 5  ;;  %v8804_v56 = vrot.slane %v8802_v49, 5 }
 0x516   : > { %v16382_v57 = vadd.f32 %v12443_v29, %v16040_v22  ;;  %v12446_v46 = vadd.f32 %v12445_v0, %v12444_v34  ;;  %v13341_v22 = vld [vmem:[%s16966_s2 + $0x220] sm:$0xff]   ;;  %v8781_v29 = vor.u32 %v8780_v59, %v8777_v21  ;;  %v8799_v34 = vshrl.u32 %v8645_v13, 16  ;;  %v13344_v0 = vld [vmem:[%s16966_s2 + $0x228] sm:$0xff]  }
 0x517   : > { %10674 = vmatmul.mubr.bf16.gmra.mrb[224].mxu1 %v13330_v32  ;;  %v8792_v42 = vrot.slane %v8791_v23, 4  ;;  %v16404_v8 = vrot.slane %v8808_v55, 5 }
 0x518   : > { %v16387_v25 = vadd.f32 %v12446_v46, %v16055_v4  ;;  %10681 = vmatprep.mubr.bf16.mxu1 %v12059_v14  ;;  %12806 = vmatpush3.bf16.msra.mxu1 %v13335_v20  ;;  %v8773_v4 = vsel %vm13522_vm9, %v8768_v1, %v8772_v60  ;;  %v8648_v46 = vld [vmem:[#allocation3 + $0x60] sm:$0xf]  ;;  %v8649_v14 = vld [vmem:[#allocation3 + $0x64] sm:$0xf]  ;;  %v8782_v1 = vrot.slane %v8781_v29, 4  ;;  %v8801_v61 = vrot.slane %v8799_v34, 4 }
 0x519   : > { %12807 = vmatprep.subr.bf16.mxu1 %v13338_v12  ;;  %v12060_v27 = vcombine.low %v8763_v45, %v8773_v4  ;;  %v8647_v60 = vld [vmem:[#allocation3 + $0x5c] sm:$0x1]  ;;  %v8836_v13 = vshrl.u32 %v8649_v14, 16  ;;  %v8823_v4 = vshrl.u32 %v8648_v46, 16  ;;  %v8826_v23 = vshll.u32 %v8648_v46, 16 }
 0x51a   : > { %v12447_v50 = vpop.f32.mrb[120].mxu1  ;;  %v8818_v19 = vshll.u32 %v8647_v60, 16 }
 0x51b   : > { %v12448_v10 = vpop.f32.mrb[121].mxu1 }
 0x51c   : > { %v12449_v20 = vadd.f32 %v12448_v10, %v12447_v50  ;;  %v12450_v39 = vpop.f32.mrb[122].mxu1  ;;  %12808 = vmatpush3.bf16.msra.mxu1 %v13338_v12  ;;  %v8814_v12 = vrot.slane %v8812_v33, 4  ;;  %v8832_v50 = vshll.u32 %v8649_v14, 16  ;;  %v13333_v33 = vld [vmem:[#allocation3 + $0x3c] sm:$0xff]   ;;  %v8820_v46 = vrot.slane %v8818_v19, 5 }
 0x51d   : > { %v12451_v43 = vpop.f32.mrb[123].mxu1  ;;  %12809 = vmatprep.subr.bf16.mxu1 %v13341_v22  ;;  %v8650_v14 = vld [vmem:[#allocation3 + $0x68] sm:$0x1] }
 0x51e   : > { %v16402_v32 = vadd.f32 %v12449_v20, %v16071_v48  ;;  %v12452_v36 = vadd.f32 %v12451_v43, %v12450_v39  ;;  %v13347_v48 = vld [vmem:[%s16966_s2 + $0x230] sm:$0xff]   ;;  %v8815_v59 = vor.u32 %v8814_v12, %v16404_v8  ;;  %v8787_v20 = vsel %vm13522_vm9, %v8782_v1, %v16384_v30  ;;  %v13350_v43 = vld [vmem:[%s16966_s2 + $0x238] sm:$0xff]  }
 0x51f   : > { %10682 = vmatmul.mubr.bf16.gmra.mrb[228].mxu1 %v13331_v3  ;;  %v8805_v39 = vor.u32 %v8804_v56, %v8801_v61  ;;  %v16424_v49 = vrot.slane %v8832_v50, 5  ;;  %v8825_v30 = vrot.slane %v8823_v4, 4  ;;  %v8651_v1 = vld [vmem:[#allocation3 + $0x6c] sm:$0xf] }
 0x520   : > { %v16407_v63 = vadd.f32 %v12452_v36, %v16086_v26  ;;  %10689 = vmatprep.mubr.bf16.mxu1 %v12060_v27  ;;  %12810 = vmatpush3.bf16.msra.mxu1 %v13341_v22  ;;  %v8797_v26 = vsel %vm13522_vm9, %v8792_v42, %v8796_v18  ;;  %v8816_v34 = vrot.slane %v8815_v59, 4  ;;  %v8828_v27 = vrot.slane %v8826_v23, 5  ;;  %v8652_v42 = vld [vmem:[#allocation3 + $0x70] sm:$0xf] }
 0x521   : > { %12811 = vmatprep.subr.bf16.mxu1 %v13344_v0  ;;  %v12061_v29 = vcombine.low %v8787_v20, %v8797_v26  ;;  %v8806_v12 = vrot.slane %v8805_v39, 4 }
 0x522   : > { %v12453_v38 = vpop.f32.mrb[124].mxu1  ;;  %v8821_v61 = vsel %vm13522_vm9, %v8816_v34, %v8820_v46  ;;  %v8829_v26 = vor.u32 %v8828_v27, %v8825_v30  ;;  %v8653_v30 = vld [vmem:[#allocation3 + $0x74] sm:$0x1]  ;;  %v8654_v27 = vld [vmem:[#allocation3 + $0x78] sm:$0xf] }
 0x523   : > { %v12454_v21 = vpop.f32.mrb[125].mxu1  ;;  %v8811_v50 = vsel %vm13522_vm9, %v8806_v12, %v16404_v8 }
 0x524   : > { %v12455_v22 = vadd.f32 %v12454_v21, %v12453_v38  ;;  %v12456_v10 = vpop.f32.mrb[126].mxu1  ;;  %12812 = vmatpush3.bf16.msra.mxu1 %v13344_v0  ;;  %v8838_v0 = vrot.slane %v8836_v13, 4  ;;  %v8856_v38 = vshll.u32 %v8652_v42, 16  ;;  %v8842_v13 = vshll.u32 %v8650_v14, 16 }
 0x525   : > { %v12457_v55 = vpop.f32.mrb[127].mxu1  ;;  %12813 = vmatprep.subr.bf16.mxu1 %v13347_v48 }
 0x526   : > { %v16422_v3 = vadd.f32 %v12455_v22, %v16109_v44  ;;  %v12458_v45 = vadd.f32 %v12457_v55, %v12456_v10  ;;  %v8839_v56 = vor.u32 %v8838_v0, %v16424_v49  ;;  %v8847_v22 = vshrl.u32 %v8651_v1, 16 }
 0x527   : > { %10690 = vmatmul.mubr.bf16.gmra.mrb[232].mxu1 %v13333_v33  ;;  %v8850_v10 = vshll.u32 %v8651_v1, 16  ;;  %v12062_v55 = vcombine.low %v8811_v50, %v8821_v61  ;;  %v8858_v20 = vrot.slane %v8856_v38, 5  ;;  %v13336_v61 = vld [vmem:[#allocation3 + $0x54] sm:$0xff]   ;;  %v8866_v38 = vshll.u32 %v8653_v30, 16 }
 0x528   : > { %v16427_v36 = vadd.f32 %v12458_v45, %v16117_v53  ;;  %10697 = vmatprep.mubr.bf16.mxu1 %v12061_v29  ;;  %12814 = vmatpush3.bf16.msra.mxu1 %v13347_v48  ;;  %v8860_v53 = vshrl.u32 %v8652_v42, 16  ;;  %v13334_v48 = vld [vmem:[#allocation3 + $0x48] sm:$0xff]   ;;  %v8840_v33 = vrot.slane %v8839_v56, 4  ;;  %v8655_v45 = vld [vmem:[#allocation3 + $0x7c] sm:$0xf]  ;;  %v8844_v29 = vrot.slane %v8842_v13, 5 }
 0x529   : > { %12815 = vmatprep.subr.bf16.mxu1 %v13350_v43  ;;  %v8849_v8 = vrot.slane %v8847_v22, 4  ;;  %v8852_v34 = vrot.slane %v8850_v10, 5  ;;  %v8880_v46 = vshll.u32 %v8655_v45, 16 }
 0x52a   : > { %v12459_v44 = vpop.f32.mrb[128].mxu1  ;;  %v8862_v39 = vrot.slane %v8860_v53, 4  ;;  %v8845_v42 = vsel %vm13522_vm9, %v8840_v33, %v8844_v29  ;;  %v8871_v53 = vshrl.u32 %v8654_v27, 16 }
 0x52b   : > { %v12460_v18 = vpop.f32.mrb[129].mxu1  ;;  %v8853_v56 = vor.u32 %v8852_v34, %v8849_v8  ;;  %v8882_v50 = vrot.slane %v8880_v46, 5 }
 0x52c   : > { %v12461_v60 = vadd.f32 %v12460_v18, %v12459_v44  ;;  %v12462_v21 = vpop.f32.mrb[130].mxu1  ;;  %12816 = vmatpush3.bf16.msra.mxu1 %v13350_v43  ;;  %v8830_v43 = vrot.slane %v8829_v26, 4  ;;  %v8863_v12 = vor.u32 %v8862_v39, %v8858_v20  ;;  %v8884_v44 = vshrl.u32 %v8655_v45, 16  ;;  %v8657_v45 = vld [vmem:[#allocation3 + $0x84] sm:$0xf] }
 0x52d   : > { %v12463_v59 = vpop.f32.mrb[131].mxu1  ;;  %v8854_v10 = vrot.slane %v8853_v56, 4  ;;  %v8873_v33 = vrot.slane %v8871_v53, 4 }
 0x52e   : > { %v16436_v4 = vadd.f32 %v12461_v60, %v16139_v47  ;;  %v12464_v23 = vadd.f32 %v12463_v59, %v12462_v21  ;;  %v8874_v60 = vshll.u32 %v8654_v27, 16  ;;  %v8886_v13 = vrot.slane %v8884_v44, 4 }
 0x52f   : > { %10698 = vmatmul.mubr.bf16.gmra.mrb[236].mxu1 %v13334_v48  ;;  %v8864_v48 = vrot.slane %v8863_v12, 4  ;;  %v8859_v12 = vsel %vm13522_vm9, %v8854_v10, %v8858_v20  ;;  %v8895_v44 = vshrl.u32 %v8657_v45, 16  ;;  %v8659_v20 = vld [vmem:[#allocation3 + $0x8c] sm:$0x1]  ;;  %v8660_v10 = vld [vmem:[#allocation3 + $0x90] sm:$0xf] }
 0x530   : > { %v16439_v19 = vadd.f32 %v12464_v23, %v16144_v15  ;;  %10705 = vmatprep.mubr.bf16.mxu1 %v12062_v55  ;;  %v8835_v15 = vsel %vm13522_vm9, %v8830_v43, %v16424_v49  ;;  %v8658_v49 = vld [vmem:[#allocation3 + $0x88] sm:$0xf]  ;;  %v8868_v23 = vrot.slane %v8866_v38, 5  ;;  %v8656_v55 = vld [vmem:[#allocation3 + $0x80] sm:$0x1]  ;;  %v8876_v39 = vrot.slane %v8874_v60, 5 }
 0x531   : > { %v12063_v59 = vcombine.low %v8835_v15, %v8845_v42  ;;  %v8887_v8 = vor.u32 %v8886_v13, %v8882_v50  ;;  %v8904_v34 = vshll.u32 %v8658_v49, 16  ;;  %v13337_v42 = vld [vmem:[#allocation3 + $0x60] sm:$0xff]   ;;  %v8661_v60 = vld [vmem:[#allocation3 + $0x94] sm:$0xf] }
 0x532   : > { %v12465_v0 = vpop.f32.mrb[132].mxu1  ;;  %v8869_v29 = vsel %vm13522_vm9, %v8864_v48, %v8868_v23  ;;  %v8877_v46 = vor.u32 %v8876_v39, %v8873_v33  ;;  %v8897_v48 = vrot.slane %v8895_v44, 4  ;;  %v8928_v33 = vshll.u32 %v8661_v60, 16 }
 0x533   : > { %v12466_v47 = vpop.f32.mrb[133].mxu1  ;;  %v8906_v56 = vrot.slane %v8904_v34, 5  ;;  %v8932_v39 = vshrl.u32 %v8661_v60, 16 }
 0x534   : > { %v12467_v14 = vadd.f32 %v12466_v47, %v12465_v0  ;;  %v12468_v1 = vpop.f32.mrb[134].mxu1  ;;  %v8908_v0 = vshrl.u32 %v8658_v49, 16 }
 0x535   : > { %v12469_v18 = vpop.f32.mrb[135].mxu1 }
 0x536   : > { %v16447_v21 = vadd.f32 %v12467_v14, %v16156_v54  ;;  %v12470_v26 = vadd.f32 %v12469_v18, %v12468_v1  ;;  %v8898_v14 = vshll.u32 %v8657_v45, 16  ;;  %v12064_v18 = vcombine.low %v8859_v12, %v8869_v29  ;;  %v13339_v29 = vld [vmem:[#allocation3 + $0x6c] sm:$0xff]  }
 0x537   : > { %10706 = vmatmul.mubr.bf16.gmra.mrb[240].mxu1 %v13336_v61  ;;  %v8888_v61 = vrot.slane %v8887_v8, 4  ;;  %v8910_v38 = vrot.slane %v8908_v0, 4  ;;  %v8919_v0 = vshrl.u32 %v8660_v10, 16  ;;  %v8930_v12 = vrot.slane %v8928_v33, 5 }
 0x538   : > { %v16450_v22 = vadd.f32 %v12470_v26, %v16163_v40  ;;  %10713 = vmatprep.mubr.bf16.mxu1 %v12063_v59  ;;  %v8890_v40 = vshll.u32 %v8656_v55, 16  ;;  %v8878_v26 = vrot.slane %v8877_v46, 4  ;;  %v8900_v13 = vrot.slane %v8898_v14, 5  ;;  %v8664_v14 = vld [vmem:[#allocation3 + $0xa0] sm:$0xf] }
 0x539   : > { %v8911_v55 = vor.u32 %v8910_v38, %v8906_v56  ;;  %v8934_v46 = vrot.slane %v8932_v39, 4 }
 0x53a   : > { %v12471_v43 = vpop.f32.mrb[136].mxu1  ;;  %v8892_v59 = vrot.slane %v8890_v40, 5  ;;  %v8883_v8 = vsel %vm13522_vm9, %v8878_v26, %v8882_v50  ;;  %v8901_v34 = vor.u32 %v8900_v13, %v8897_v48  ;;  %v8662_v50 = vld [vmem:[#allocation3 + $0x98] sm:$0x1]  ;;  %v8663_v26 = vld [vmem:[#allocation3 + $0x9c] sm:$0xf] }
 0x53b   : > { %v12472_v54 = vpop.f32.mrb[137].mxu1  ;;  %v8952_v48 = vshll.u32 %v8664_v14, 16  ;;  %v8956_v13 = vshrl.u32 %v8664_v14, 16  ;;  %v8943_v39 = vshrl.u32 %v8663_v26, 16 }
 0x53c   : > { %v12473_v30 = vadd.f32 %v12472_v54, %v12471_v43  ;;  %v12474_v27 = vpop.f32.mrb[138].mxu1  ;;  %v8893_v23 = vsel %vm13522_vm9, %v8888_v61, %v8892_v59  ;;  %v8921_v61 = vrot.slane %v8919_v0, 4 }
 0x53d   : > { %v12475_v47 = vpop.f32.mrb[139].mxu1 }
 0x53e   : > { %v16457_v1 = vadd.f32 %v12473_v30, %v16170_v6  ;;  %v12476_v15 = vadd.f32 %v12475_v47, %v12474_v27  ;;  %v8922_v30 = vshll.u32 %v8660_v10, 16  ;;  %v12065_v47 = vcombine.low %v8883_v8, %v8893_v23  ;;  %v13340_v23 = vld [vmem:[#allocation3 + $0x78] sm:$0xff]  }
 0x53f   : > { %10714 = vmatmul.mubr.bf16.gmra.mrb[244].mxu1 %v13337_v42  ;;  %v8912_v42 = vrot.slane %v8911_v55, 4  ;;  %v8954_v8 = vrot.slane %v8952_v48, 5 }
 0x540   : > { %v16460_v53 = vadd.f32 %v12476_v15, %v16177_v24  ;;  %10721 = vmatprep.mubr.bf16.mxu1 %v12064_v18  ;;  %v8914_v24 = vshll.u32 %v8659_v20, 16  ;;  %v8902_v15 = vrot.slane %v8901_v34, 4  ;;  %v8924_v38 = vrot.slane %v8922_v30, 5  ;;  %v8667_v30 = vld [vmem:[#allocation3 + $0xac] sm:$0xf] }
 0x541   : > { %v8935_v20 = vor.u32 %v8934_v46, %v8930_v12  ;;  %v8958_v34 = vrot.slane %v8956_v13, 4 }
 0x542   : > { %v12477_v49 = vpop.f32.mrb[140].mxu1  ;;  %v8916_v18 = vrot.slane %v8914_v24, 5  ;;  %v8907_v55 = vsel %vm13522_vm9, %v8902_v15, %v8906_v56  ;;  %v8925_v33 = vor.u32 %v8924_v38, %v8921_v61  ;;  %v8665_v56 = vld [vmem:[#allocation3 + $0xa4] sm:$0x1]  ;;  %v8666_v15 = vld [vmem:[#allocation3 + $0xa8] sm:$0xf] }
 0x543   : > { %v12478_v6 = vpop.f32.mrb[141].mxu1  ;;  %v8976_v61 = vshll.u32 %v8667_v30, 16  ;;  %v8980_v38 = vshrl.u32 %v8667_v30, 16  ;;  %v8967_v13 = vshrl.u32 %v8666_v15, 16 }
 0x544   : > { %v12479_v43 = vadd.f32 %v12478_v6, %v12477_v49  ;;  %v12480_v45 = vpop.f32.mrb[142].mxu1  ;;  %v8917_v59 = vsel %vm13522_vm9, %v8912_v42, %v8916_v18  ;;  %v8945_v42 = vrot.slane %v8943_v39, 4 }
 0x545   : > { %v12481_v54 = vpop.f32.mrb[143].mxu1  ;;  %v8982_v39 = vrot.slane %v8980_v38, 4 }
 0x546   : > { %v16467_v27 = vadd.f32 %v12479_v43, %v16191_v58  ;;  %v12482_v40 = vadd.f32 %v12481_v54, %v12480_v45  ;;  %v8946_v43 = vshll.u32 %v8663_v26, 16  ;;  %v12066_v54 = vcombine.low %v8907_v55, %v8917_v59  ;;  %v13342_v59 = vld [vmem:[#allocation3 + $0x84] sm:$0xff]  }
 0x547   : > { %10722 = vmatmul.mubr.bf16.gmra.mrb[248].mxu1 %v13339_v29  ;;  %v8936_v29 = vrot.slane %v8935_v20, 4 }
 0x548   : > { %v16470_v44 = vadd.f32 %v12482_v40, %v16193_v35  ;;  %10729 = vmatprep.mubr.bf16.mxu1 %v12065_v47  ;;  %v8938_v35 = vshll.u32 %v8662_v50, 16  ;;  %v8926_v40 = vrot.slane %v8925_v33, 4  ;;  %v8948_v46 = vrot.slane %v8946_v43, 5  ;;  %v17003_v43 = vld [vmem:[#allocation7_spill] sm:$0xff] }
 0x549   : > { %v8959_v50 = vor.u32 %v8958_v34, %v8954_v8  ;;  %v8978_v33 = vrot.slane %v8976_v61, 5 }
 0x54a   : > { %v12483_v60 = vpop.f32.mrb[144].mxu1  ;;  %v8940_v47 = vrot.slane %v8938_v35, 5  ;;  %v8931_v20 = vsel %vm13522_vm9, %v8926_v40, %v8930_v12  ;;  %v8949_v48 = vor.u32 %v8948_v46, %v8945_v42  ;;  %v8969_v12 = vrot.slane %v8967_v13, 4  ;;  %v8669_v40 = vld [vmem:[#allocation3 + $0xb4] sm:$0xf] }
 0x54b   : > { %v12484_v58 = vpop.f32.mrb[145].mxu1  ;;  %v8960_v55 = vrot.slane %v8959_v50, 4  ;;  %v8991_v61 = vshrl.u32 %v8669_v40, 16  ;;  %v8994_v38 = vshll.u32 %v8669_v40, 16 }
 0x54c   : > { %v12485_v49 = vadd.f32 %v12484_v58, %v12483_v60  ;;  %v12486_v10 = vpop.f32.mrb[146].mxu1  ;;  %v8941_v18 = vsel %vm13522_vm9, %v8936_v29, %v8940_v47  ;;  %v8950_v29 = vrot.slane %v8949_v48, 4 }
 0x54d   : > { %v12487_v6 = vpop.f32.mrb[147].mxu1 }
 0x54e   : > { %v16477_v45 = vadd.f32 %v12485_v49, %v16207_v17  ;;  %v12488_v24 = vadd.f32 %v12487_v6, %v12486_v10  ;;  %v8970_v49 = vshll.u32 %v8666_v15, 16  ;;  %v17002_v10 = vld [vmem:[#allocation6_spill] sm:$0xff] }
 0x54f   : > { %10730 = vmatmul.mubr.bf16.gmra.mrb[252].mxu1 %v13340_v23  ;;  %v12067_v23 = vcombine.low %v8931_v20, %v8941_v18  ;;  %v17004_v20 = vld [vmem:[#allocation8_spill] sm:$0xff] }
 0x550   : > { %v16480_v0 = vadd.f32 %v12488_v24, %v16211_v28  ;;  %10737 = vmatprep.mubr.bf16.mxu1 %v12066_v54  ;;  %v8962_v28 = vshll.u32 %v8665_v56, 16  ;;  %v8670_v54 = vld [vmem:[#allocation3 + $0xb8] sm:$0xf]  ;;  %v8972_v30 = vrot.slane %v8970_v49, 5  ;;  %v8668_v56 = vld [vmem:[#allocation3 + $0xb0] sm:$0x1] }
 0x551   : > { %v9000_v15 = vshll.u32 %v8670_v54, 16 }
 0x552   : > { %v12489_v14 = vpop.f32.mrb[148].mxu1  ;;  %v8964_v34 = vrot.slane %v8962_v28, 5  ;;  %v8955_v28 = vsel %vm13522_vm9, %v8950_v29, %v8954_v8  ;;  %v8673_v8 = vld [vmem:[#allocation3 + $0xc4] sm:$0xf] }
 0x553   : > { %v12490_v17 = vpop.f32.mrb[149].mxu1 }
 0x554   : > { %v12491_v60 = vadd.f32 %v12490_v17, %v12489_v14  ;;  %v12492_v26 = vpop.f32.mrb[150].mxu1  ;;  %v8965_v46 = vsel %vm13522_vm9, %v8960_v55, %v8964_v34  ;;  %v8983_v14 = vor.u32 %v8982_v39, %v8978_v33  ;;  %v9004_v17 = vshrl.u32 %v8670_v54, 16  ;;  %v17005_v39 = vld [vmem:[#allocation9_spill] sm:$0xff] }
 0x555   : > { %v12493_v58 = vpop.f32.mrb[151].mxu1  ;;  %v12068_v49 = vcombine.low %v8955_v28, %v8965_v46  ;;  %v8993_v54 = vrot.slane %v8991_v61, 4  ;;  %v8996_v34 = vrot.slane %v8994_v38, 5 }
 0x556   : > { %v16487_v35 = vadd.f32 %v12491_v60, %v17002_v10  ;;  %v12494_v6 = vadd.f32 %v12493_v58, %v12492_v26  ;;  %v13343_v26 = vld [vmem:[#allocation3 + $0x90] sm:$0xff]   ;;  %v8973_v58 = vor.u32 %v8972_v30, %v8969_v12  ;;  %v8984_v10 = vrot.slane %v8983_v14, 4  ;;  %v8672_v30 = vld [vmem:[#allocation3 + $0xc0] sm:$0xf] }
 0x557   : > { %10738 = vmatmul.mubr.bf16.gmra.mrb[0].mxu1 %v13342_v59  ;;  %v8986_v59 = vshll.u32 %v8668_v56, 16  ;;  %v9006_v55 = vrot.slane %v9004_v17, 4  ;;  %v9024_v14 = vshll.u32 %v8673_v8, 16  ;;  %v9018_v61 = vshll.u32 %v8672_v30, 16 }
 0x558   : > { %v16490_v24 = vadd.f32 %v12494_v6, %v17003_v43  ;;  %10745 = vmatprep.mubr.bf16.mxu1 %v12067_v23  ;;  %v8671_v6 = vld [vmem:[#allocation3 + $0xbc] sm:$0x1]  ;;  %v16499_v23 = vrot.slane %v9000_v15, 5  ;;  %v8974_v29 = vrot.slane %v8973_v58, 4  ;;  %v9028_v15 = vshrl.u32 %v8673_v8, 16 }
 0x559   : > { %v8988_v12 = vrot.slane %v8986_v59, 5 }
 0x55a   : > { %v12495_v47 = vpop.f32.mrb[152].mxu1  ;;  %v9007_v46 = vor.u32 %v9006_v55, %v16499_v23  ;;  %v8979_v28 = vsel %vm13522_vm9, %v8974_v29, %v8978_v33  ;;  %v9026_v55 = vrot.slane %v9024_v14, 5  ;;  %v8674_v33 = vld [vmem:[#allocation3 + $0xc8] sm:$0x1] }
 0x55b   : > { %v12496_v42 = vpop.f32.mrb[153].mxu1 }
 0x55c   : > { %v12497_v18 = vadd.f32 %v12496_v42, %v12495_v47  ;;  %v12498_v50 = vpop.f32.mrb[154].mxu1  ;;  %v9010_v47 = vshll.u32 %v8671_v6, 16  ;;  %v8989_v42 = vsel %vm13522_vm9, %v8984_v10, %v8988_v12  ;;  %v9008_v10 = vrot.slane %v9007_v46, 4 }
 0x55d   : > { %v12499_v60 = vpop.f32.mrb[155].mxu1 }
 0x55e   : > { %v16497_v48 = vadd.f32 %v12497_v18, %v17004_v20  ;;  %v12500_v13 = vadd.f32 %v12499_v60, %v12498_v50  ;;  %v8997_v50 = vor.u32 %v8996_v34, %v8993_v54  ;;  %v9015_v60 = vshrl.u32 %v8672_v30, 16  ;;  %v17006_v54 = vld [vmem:[#allocation10_spill] sm:$0xff] }
 0x55f   : > { %10746 = vmatmul.mubr.bf16.gmra.mrb[4].mxu1 %v13343_v26  ;;  %v13345_v26 = vld [vmem:[#allocation3 + $0x9c] sm:$0xff]   ;;  %v12069_v20 = vcombine.low %v8979_v28, %v8989_v42  ;;  %v9012_v6 = vrot.slane %v9010_v47, 5  ;;  %v9020_v30 = vrot.slane %v9018_v61, 5 }
 0x560   : > { %v16502_v43 = vadd.f32 %v12500_v13, %v17005_v39  ;;  %10753 = vmatprep.mubr.bf16.mxu1 %v12068_v49  ;;  %v8675_v13 = vld [vmem:[#allocation3 + $0xcc] sm:$0xf]  ;;  %v8676_v49 = vld [vmem:[#allocation3 + $0xd0] sm:$0xf]  ;;  %v9030_v39 = vrot.slane %v9028_v15, 4  ;;  %v8998_v8 = vrot.slane %v8997_v50, 4 }
 0x561   : > { %v9017_v12 = vrot.slane %v9015_v60, 4  ;;  %v9039_v29 = vshrl.u32 %v8675_v13, 16  ;;  %v9013_v46 = vsel %vm13522_vm9, %v9008_v10, %v9012_v6  ;;  %v9034_v60 = vshll.u32 %v8674_v33, 16  ;;  %v8677_v6 = vld [vmem:[#allocation3 + $0xd4] sm:$0x1] }
 0x562   : > { %v12517_v40 = vpop.f32.mrb[156].mxu1  ;;  %v9031_v47 = vor.u32 %v9030_v39, %v9026_v55  ;;  %v9058_v33 = vshll.u32 %v8677_v6, 16 }
 0x563   : > { %v12518_v56 = vpop.f32.mrb[157].mxu1  ;;  %v9021_v50 = vor.u32 %v9020_v30, %v9017_v12 }
 0x564   : > { %v12519_v17 = vadd.f32 %v12518_v56, %v12517_v40  ;;  %v12520_v18 = vpop.f32.mrb[158].mxu1  ;;  %v9048_v40 = vshll.u32 %v8676_v49, 16  ;;  %v9052_v56 = vshrl.u32 %v8676_v49, 16  ;;  %v9032_v39 = vrot.slane %v9031_v47, 4 }
 0x565   : > { %v12521_v38 = vpop.f32.mrb[159].mxu1 }
 0x566   : > { %v16510_v58 = vadd.f32 %v12519_v17, %v16269_v62  ;;  %v12522_v59 = vadd.f32 %v12521_v38, %v12520_v18  ;;  %v9042_v62 = vshll.u32 %v8675_v13, 16  ;;  %v9003_v18 = vsel %vm13522_vm9, %v8998_v8, %v16499_v23  ;;  %v13346_v38 = vld [vmem:[#allocation3 + $0xa8] sm:$0xff]  }
 0x567   : > { %10754 = vmatmul.mubr.bf16.gmra.mrb[8].mxu1 %v13345_v26  ;;  %v9041_v26 = vrot.slane %v9039_v29, 4  ;;  %v12070_v10 = vcombine.low %v9003_v18, %v9013_v46  ;;  %v9022_v23 = vrot.slane %v9021_v50, 4  ;;  %v9036_v8 = vrot.slane %v9034_v60, 5 }
 0x568   : > { %v16513_v34 = vadd.f32 %v12522_v59, %v17006_v54  ;;  %10761 = vmatprep.mubr.bf16.mxu1 %v12069_v20  ;;  %v9044_v28 = vrot.slane %v9042_v62, 5  ;;  %v9050_v59 = vrot.slane %v9048_v40, 5  ;;  %v9054_v20 = vrot.slane %v9052_v56, 4 }
 0x569   : > { %v9027_v46 = vsel %vm13522_vm9, %v9022_v23, %v9026_v55 }
 0x56a   : > { %v12523_v42 = vpop.f32.mrb[160].mxu1  ;;  %v9045_v12 = vor.u32 %v9044_v28, %v9041_v26  ;;  %v9055_v30 = vor.u32 %v9054_v20, %v9050_v59 }
 0x56b   : > { %v12524_v17 = vpop.f32.mrb[161].mxu1 }
 0x56c   : > { %v12525_v14 = vadd.f32 %v12524_v17, %v12523_v42  ;;  %v12526_v15 = vpop.f32.mrb[162].mxu1  ;;  %v13348_v17 = vld [vmem:[#allocation3 + $0xb4] sm:$0xff]   ;;  %v9056_v47 = vrot.slane %v9055_v30, 4  ;;  %v9146_v30 = vld [vmem:[#allocation3 + $0x28] sm:$0xf] }
 0x56d   : > { %v12527_v61 = vpop.f32.mrb[163].mxu1 }
 0x56e   : > { %v16521_v13 = vadd.f32 %v12525_v14, %v16288_v7  ;;  %v12528_v49 = vadd.f32 %v12527_v61, %v12526_v15  ;;  %v9037_v7 = vsel %vm13522_vm9, %v9032_v39, %v9036_v8  ;;  %v9060_v14 = vrot.slane %v9058_v33, 5  ;;  %v9143_v61 = vld [vmem:[#allocation3 + $0x1c] sm:$0xf]  ;;  %v13349_v39 = vld [vmem:[#allocation3 + $0xc0] sm:$0xff]   ;;  %v9149_v33 = vld [vmem:[#allocation3 + $0x34] sm:$0xf] }
 0x56f   : > { %10762 = vmatmul.mubr.bf16.gmra.mrb[12].mxu1 %v13346_v38  ;;  %v12071_v50 = vcombine.low %v9027_v46, %v9037_v7  ;;  %v9240_v20 = vrot.slane %v9143_v61, 5  ;;  %v9144_v8 = vld [vmem:[#allocation3 + $0x20] sm:$0x1]  ;;  %v9247_v7 = vrot.slane %v9146_v30, 5  ;;  %v9254_v46 = vrot.slane %v9149_v33, 5 }
 0x570   : > { %v16524_v54 = vadd.f32 %v12528_v49, %v16295_v31  ;;  %10769 = vmatprep.mubr.bf16.mxu1 %v12070_v10  ;;  %v9046_v31 = vrot.slane %v9045_v12, 4  ;;  %v9061_v55 = vsel %vm13522_vm9, %v9056_v47, %v9060_v14 }
 0x571   : > { %v9242_v12 = vrot.slane %v9240_v20, 4 }
 0x572   : > { %v12529_v29 = vpop.f32.mrb[164].mxu1  ;;  %v9051_v38 = vsel %vm13522_vm9, %v9046_v31, %v9050_v59 }
 0x573   : > { %v12530_v62 = vpop.f32.mrb[165].mxu1  ;;  %v12072_v10 = vcombine.low %v9051_v38, %v9061_v55  ;;  %v9249_v55 = vrot.slane %v9247_v7, 4 }
 0x574   : > { %v12531_v40 = vadd.f32 %v12530_v62, %v12529_v29  ;;  %v12532_v56 = vpop.f32.mrb[166].mxu1  ;;  %v9243_v29 = vrot.slane %v9144_v8, 5 }
 0x575   : > { %v12533_v42 = vpop.f32.mrb[167].mxu1 }
 0x576   : > { %v16531_v15 = vadd.f32 %v12531_v40, %v16306_v5  ;;  %v12534_v18 = vadd.f32 %v12533_v42, %v12532_v56  ;;  %v13351_v56 = vld [vmem:[#allocation3 + $0xcc] sm:$0xff]   ;;  %v12073_v42 = vrot.slane %v9142_v51, 9 }
 0x577   : > { %10770 = vmatmul.mubr.bf16.gmra.mrb[16].mxu1 %v13348_v17 }
 0x578   : > { %v16534_v60 = vadd.f32 %v12534_v18, %v16311_v16  ;;  %10777 = vmatprep.mubr.bf16.mxu1 %v12071_v50  ;;  %v9147_v18 = vld [vmem:[#allocation3 + $0x2c] sm:$0x1] }
 0x57a   : > { %v12535_v26 = vpop.f32.mrb[168].mxu1 }
 0x57b   : > { %v12536_v28 = vpop.f32.mrb[169].mxu1 }
 0x57c   : > { %v12537_v49 = vadd.f32 %v12536_v28, %v12535_v26  ;;  %v12538_v5 = vpop.f32.mrb[170].mxu1  ;;  %v9150_v26 = vld [vmem:[#allocation3 + $0x38] sm:$0x1]  ;;  %v9145_v28 = vld [vmem:[#allocation3 + $0x24] sm:$0xe] }
 0x57d   : > { %v12539_v6 = vpop.f32.mrb[171].mxu1 }
 0x57e   : > { %v16541_v23 = vadd.f32 %v12537_v49, %v16325_v41  ;;  %v12540_v16 = vadd.f32 %v12539_v6, %v12538_v5  ;;  %v9244_v41 = vsel %vm14154_vm14, %v9242_v12, %v9243_v29  ;;  %v9256_v49 = vrot.slane %v9254_v46, 4  ;;  %v9152_v5 = vld [vmem:[#allocation3 + $0x40] sm:$0xf] }
 0x57f   : > { %10778 = vmatmul.mubr.bf16.gmra.mrb[20].mxu1 %v13349_v39  ;;  %v9250_v6 = vrot.slane %v9147_v18, 5  ;;  %v9148_v39 = vld [vmem:[#allocation3 + $0x30] sm:$0xe]  ;;  %v12074_v12 = vrot.slane %v9145_v28, 9  ;;  %v9261_v30 = vrot.slane %v9152_v5, 5 }
 0x580   : > { %v16544_v59 = vadd.f32 %v12540_v16, %v16330_v11  ;;  %10785 = vmatprep.mubr.bf16.mxu1 %v12072_v10  ;;  %v9241_v11 = vsel %vm14154_vm14, %v12073_v42, %v9240_v20  ;;  %v9155_v16 = vld [vmem:[#allocation3 + $0x4c] sm:$0xf]  ;;  %v9257_v20 = vrot.slane %v9150_v26, 5  ;;  %v12075_v33 = vrot.slane %v9148_v39, 9  ;;  %v9158_v28 = vld [vmem:[#allocation3 + $0x58] sm:$0xf] }
 0x581   : > { %v12089_v38 = vcombine.low %v9241_v11, %v9244_v41  ;;  %v9154_v5 = vld [vmem:[#allocation3 + $0x48] sm:$0xe] }
 0x582   : > { %v12541_v62 = vpop.f32.mrb[172].mxu1  ;;  %v9258_v29 = vsel %vm14154_vm14, %v9256_v49, %v9257_v20  ;;  %v9275_v20 = vrot.slane %v9158_v28, 5  ;;  %v9160_v28 = vld [vmem:[#allocation3 + $0x60] sm:$0xe] }
 0x583   : > { %v12542_v40 = vpop.f32.mrb[173].mxu1 }
 0x584   : > { %v12543_v31 = vadd.f32 %v12542_v40, %v12541_v62  ;;  %v12544_v47 = vpop.f32.mrb[174].mxu1  ;;  %v9268_v62 = vrot.slane %v9155_v16, 5 }
 0x585   : > { %v12545_v14 = vpop.f32.mrb[175].mxu1 }
 0x586   : > { %v16551_v50 = vadd.f32 %v12543_v31, %v16344_v37  ;;  %v12546_v61 = vadd.f32 %v12545_v14, %v12544_v47  ;;  %v9251_v37 = vsel %vm14154_vm14, %v9249_v55, %v9250_v6  ;;  %v9255_v31 = vsel %vm14154_vm14, %v12075_v33, %v9254_v46  ;;  %v9153_v47 = vld [vmem:[#allocation3 + $0x44] sm:$0x1]  ;;  %v9151_v55 = vld [vmem:[#allocation3 + $0x3c] sm:$0xe] }
 0x587   : > { %10786 = vmatmul.mubr.bf16.gmra.mrb[24].mxu1 %v13351_v56  ;;  %v9248_v56 = vsel %vm14154_vm14, %v12074_v12, %v9247_v7  ;;  %v12091_v18 = vcombine.low %v9255_v31, %v9258_v29  ;;  %v9270_v26 = vrot.slane %v9268_v62, 4  ;;  %v9264_v7 = vrot.slane %v9153_v47, 5  ;;  %v9161_v6 = vld [vmem:[#allocation3 + $0x64] sm:$0xf] }
 0x588   : > { %v16554_v10 = vadd.f32 %v12546_v61, %v16349_v52  ;;  %12817 = vmatprep.mubr.bf16.mxu1 %v12089_v38  ;;  %v12090_v41 = vcombine.low %v9248_v56, %v9251_v37  ;;  %v9263_v61 = vrot.slane %v9261_v30, 4  ;;  %v9156_v38 = vld [vmem:[#allocation3 + $0x50] sm:$0x1]  ;;  %v12076_v16 = vrot.slane %v9151_v55, 9 }
 0x589   : > { %v9271_v46 = vrot.slane %v9156_v38, 5  ;;  %v12077_v12 = vrot.slane %v9154_v5, 9  ;;  %v9164_v55 = vld [vmem:[#allocation3 + $0x70] sm:$0xf] }
 0x58a   : > { %v12547_v8 = vpop.f32.mrb[176].mxu1  ;;  %v9262_v29 = vsel %vm14154_vm14, %v12076_v16, %v9261_v30  ;;  %v12079_v16 = vrot.slane %v9160_v28, 9 }
 0x58b   : > { %v12548_v51 = vpop.f32.mrb[177].mxu1  ;;  %v9272_v37 = vsel %vm14154_vm14, %v9270_v26, %v9271_v46  ;;  %v9269_v56 = vsel %vm14154_vm14, %v12077_v12, %v9268_v62  ;;  %v9289_v46 = vrot.slane %v9164_v55, 5  ;;  %v9166_v55 = vld [vmem:[#allocation3 + $0x78] sm:$0xe] }
 0x58c   : > { %v12549_v40 = vadd.f32 %v12548_v51, %v12547_v8  ;;  %v12550_v52 = vpop.f32.mrb[178].mxu1  ;;  %v9282_v51 = vrot.slane %v9161_v6, 5  ;;  %v12093_v47 = vcombine.low %v9269_v56, %v9272_v37 }
 0x58d   : > { %v12551_v42 = vpop.f32.mrb[179].mxu1 }
 0x58e   : > { %v16565_v14 = vadd.f32 %v12549_v40, %v16361_v2  ;;  %v12552_v11 = vadd.f32 %v12551_v42, %v12550_v52  ;;  %v9265_v2 = vsel %vm14154_vm14, %v9263_v61, %v9264_v7  ;;  %v9159_v42 = vld [vmem:[#allocation3 + $0x5c] sm:$0x1]  ;;  %v9157_v61 = vld [vmem:[#allocation3 + $0x54] sm:$0xe]  ;;  %v9284_v38 = vrot.slane %v9282_v51, 4 }
 0x58f   : > { %12818 = vmatmul.mubr.bf16.vlgmr.msra.gmra.mrb[28].mxu1 %v12090_v41  ;;  %v12092_v52 = vcombine.low %v9262_v29, %v9265_v2  ;;  %v9278_v30 = vrot.slane %v9159_v42, 5  ;;  %v9167_v7 = vld [vmem:[#allocation3 + $0x7c] sm:$0xf]  ;;  %v12078_v6 = vrot.slane %v9157_v61, 9  ;;  %v9283_v29 = vsel %vm14154_vm14, %v12079_v16, %v9282_v51  ;;  %v9170_v61 = vld [vmem:[#allocation3 + $0x88] sm:$0xf] }
 0x590   : > { %v16568_v49 = vadd.f32 %v12552_v11, %v16366_v9  ;;  %12821 = vmatprep.mubr.bf16.mxu1 %v12091_v18  ;;  %v9277_v11 = vrot.slane %v9275_v20, 4  ;;  %v9162_v18 = vld [vmem:[#allocation3 + $0x68] sm:$0x1] }
 0x591   : > { %v9285_v62 = vrot.slane %v9162_v18, 5  ;;  %v9276_v37 = vsel %vm14154_vm14, %v12078_v6, %v9275_v20  ;;  %v12081_v6 = vrot.slane %v9166_v55, 9 }
 0x592   : > { %v12553_v39 = vpop.f32.mrb[180].mxu1 }
 0x593   : > { %v12554_v8 = vpop.f32.mrb[181].mxu1  ;;  %v9286_v2 = vsel %vm14154_vm14, %v9284_v38, %v9285_v62  ;;  %v9303_v62 = vrot.slane %v9170_v61, 5  ;;  %v9172_v61 = vld [vmem:[#allocation3 + $0x90] sm:$0xe] }
 0x594   : > { %v12555_v33 = vadd.f32 %v12554_v8, %v12553_v39  ;;  %v12556_v9 = vpop.f32.mrb[182].mxu1  ;;  %v9296_v8 = vrot.slane %v9167_v7, 5  ;;  %v12095_v42 = vcombine.low %v9283_v29, %v9286_v2 }
 0x595   : > { %v12557_v40 = vpop.f32.mrb[183].mxu1 }
 0x596   : > { %v16579_v41 = vadd.f32 %v12555_v33, %v16382_v57  ;;  %v12558_v31 = vadd.f32 %v12557_v40, %v12556_v9  ;;  %v9279_v57 = vsel %vm14154_vm14, %v9277_v11, %v9278_v30  ;;  %v9165_v40 = vld [vmem:[#allocation3 + $0x74] sm:$0x1]  ;;  %v9163_v11 = vld [vmem:[#allocation3 + $0x6c] sm:$0xe]  ;;  %v9298_v18 = vrot.slane %v9296_v8, 4 }
 0x597   : > { %12822 = vmatmul.mubr.bf16.gmra.mrb[32].mxu1 %v12092_v52  ;;  %v12094_v9 = vcombine.low %v9276_v37, %v9279_v57  ;;  %v9292_v20 = vrot.slane %v9165_v40, 5  ;;  %v9173_v30 = vld [vmem:[#allocation3 + $0x94] sm:$0xf]  ;;  %v12080_v7 = vrot.slane %v9163_v11, 9  ;;  %v9297_v37 = vsel %vm14154_vm14, %v12081_v6, %v9296_v8  ;;  %v9176_v11 = vld [vmem:[#allocation3 + $0xa0] sm:$0xf] }
 0x598   : > { %v16582_v26 = vadd.f32 %v12558_v31, %v16387_v25  ;;  %12825 = vmatprep.mubr.bf16.mxu1 %v12093_v47  ;;  %v9291_v31 = vrot.slane %v9289_v46, 4  ;;  %v9168_v47 = vld [vmem:[#allocation3 + $0x80] sm:$0x1] }
 0x599   : > { %v9299_v51 = vrot.slane %v9168_v47, 5  ;;  %v9290_v2 = vsel %vm14154_vm14, %v12080_v7, %v9289_v46  ;;  %v12083_v7 = vrot.slane %v9172_v61, 9 }
 0x59a   : > { %v12559_v5 = vpop.f32.mrb[184].mxu1 }
 0x59b   : > { %v12560_v39 = vpop.f32.mrb[185].mxu1  ;;  %v9300_v57 = vsel %vm14154_vm14, %v9298_v18, %v9299_v51  ;;  %v9317_v51 = vrot.slane %v9176_v11, 5  ;;  %v9178_v11 = vld [vmem:[#allocation3 + $0xa8] sm:$0xe] }
 0x59c   : > { %v12561_v12 = vadd.f32 %v12560_v39, %v12559_v5  ;;  %v12562_v25 = vpop.f32.mrb[186].mxu1  ;;  %v9310_v39 = vrot.slane %v9173_v30, 5  ;;  %v12097_v40 = vcombine.low %v9297_v37, %v9300_v57 }
 0x59d   : > { %v12563_v33 = vpop.f32.mrb[187].mxu1 }
 0x59e   : > { %v16593_v52 = vadd.f32 %v12561_v12, %v16402_v32  ;;  %v12564_v56 = vadd.f32 %v12563_v33, %v12562_v25  ;;  %v9293_v32 = vsel %vm14154_vm14, %v9291_v31, %v9292_v20  ;;  %v9171_v33 = vld [vmem:[#allocation3 + $0x8c] sm:$0x1]  ;;  %v9169_v31 = vld [vmem:[#allocation3 + $0x84] sm:$0xe]  ;;  %v9312_v47 = vrot.slane %v9310_v39, 4 }
 0x59f   : > { %12826 = vmatmul.mubr.bf16.gmra.mrb[36].mxu1 %v12094_v9  ;;  %v12096_v25 = vcombine.low %v9290_v2, %v9293_v32  ;;  %v9306_v46 = vrot.slane %v9171_v33, 5  ;;  %v9179_v20 = vld [vmem:[#allocation3 + $0xac] sm:$0xf]  ;;  %v12082_v30 = vrot.slane %v9169_v31, 9  ;;  %v9311_v2 = vsel %vm14154_vm14, %v12083_v7, %v9310_v39  ;;  %v9182_v31 = vld [vmem:[#allocation3 + $0xb8] sm:$0xf] }
 0x5a0   : > { %v16596_v38 = vadd.f32 %v12564_v56, %v16407_v63  ;;  %12829 = vmatprep.mubr.bf16.mxu1 %v12095_v42  ;;  %v9305_v56 = vrot.slane %v9303_v62, 4  ;;  %v9174_v42 = vld [vmem:[#allocation3 + $0x98] sm:$0x1] }
 0x5a1   : > { %v9313_v8 = vrot.slane %v9174_v42, 5  ;;  %v9304_v57 = vsel %vm14154_vm14, %v12082_v30, %v9303_v62  ;;  %v12085_v30 = vrot.slane %v9178_v11, 9 }
 0x5a2   : > { %v12565_v28 = vpop.f32.mrb[188].mxu1 }
 0x5a3   : > { %v12566_v5 = vpop.f32.mrb[189].mxu1  ;;  %v9314_v32 = vsel %vm14154_vm14, %v9312_v47, %v9313_v8  ;;  %v9331_v8 = vrot.slane %v9182_v31, 5  ;;  %v9184_v31 = vld [vmem:[#allocation3 + $0xc0] sm:$0xe] }
 0x5a4   : > { %v12567_v16 = vadd.f32 %v12566_v5, %v12565_v28  ;;  %v12568_v63 = vpop.f32.mrb[190].mxu1  ;;  %v9324_v5 = vrot.slane %v9179_v20, 5  ;;  %v12099_v33 = vcombine.low %v9311_v2, %v9314_v32 }
 0x5a5   : > { %v12569_v12 = vpop.f32.mrb[191].mxu1 }
 0x5a6   : > { %v16607_v9 = vadd.f32 %v12567_v16, %v16422_v3  ;;  %v12570_v29 = vadd.f32 %v12569_v12, %v12568_v63  ;;  %v9307_v3 = vsel %vm14154_vm14, %v9305_v56, %v9306_v46  ;;  %v9177_v12 = vld [vmem:[#allocation3 + $0xa4] sm:$0x1]  ;;  %v9175_v56 = vld [vmem:[#allocation3 + $0x9c] sm:$0xe]  ;;  %v9326_v42 = vrot.slane %v9324_v5, 4 }
 0x5a7   : > { %12830 = vmatmul.mubr.bf16.gmra.mrb[40].mxu1 %v12096_v25  ;;  %v12098_v63 = vcombine.low %v9304_v57, %v9307_v3  ;;  %v9320_v62 = vrot.slane %v9177_v12, 5  ;;  %v9185_v46 = vld [vmem:[#allocation3 + $0xc4] sm:$0xf]  ;;  %v12084_v20 = vrot.slane %v9175_v56, 9  ;;  %v9325_v57 = vsel %vm14154_vm14, %v12085_v30, %v9324_v5 }
 0x5a8   : > { %v16610_v18 = vadd.f32 %v12570_v29, %v16427_v36  ;;  %12833 = vmatprep.mubr.bf16.mxu1 %v12097_v40  ;;  %v9319_v29 = vrot.slane %v9317_v51, 4  ;;  %v9180_v40 = vld [vmem:[#allocation3 + $0xb0] sm:$0x1] }
 0x5a9   : > { %v9327_v39 = vrot.slane %v9180_v40, 5  ;;  %v9318_v32 = vsel %vm14154_vm14, %v12084_v20, %v9317_v51  ;;  %v9186_v40 = vld [vmem:[#allocation3 + $0xc8] sm:$0x1] }
 0x5aa   : > { %v12571_v55 = vpop.f32.mrb[192].mxu1  ;;  %v9341_v11 = vrot.slane %v9186_v40, 5 }
 0x5ab   : > { %v12572_v28 = vpop.f32.mrb[193].mxu1  ;;  %v9328_v3 = vsel %vm14154_vm14, %v9326_v42, %v9327_v39  ;;  %v9189_v39 = vld [vmem:[#allocation3 + $0xd4] sm:$0x1] }
 0x5ac   : > { %v12573_v6 = vadd.f32 %v12572_v28, %v12571_v55  ;;  %v12574_v36 = vpop.f32.mrb[194].mxu1  ;;  %v9338_v28 = vrot.slane %v9185_v46, 5  ;;  %v9187_v46 = vld [vmem:[#allocation3 + $0xcc] sm:$0xe] }
 0x5ad   : > { %v12575_v16 = vpop.f32.mrb[195].mxu1 }
 0x5ae   : > { %v16621_v25 = vadd.f32 %v12573_v6, %v16436_v4  ;;  %v12576_v37 = vadd.f32 %v12575_v16, %v12574_v36  ;;  %v9321_v4 = vsel %vm14154_vm14, %v9319_v29, %v9320_v62  ;;  %v9183_v16 = vld [vmem:[#allocation3 + $0xbc] sm:$0x1]  ;;  %v9333_v29 = vrot.slane %v9331_v8, 4 }
 0x5af   : > { %12834 = vmatmul.mubr.bf16.gmra.mrb[44].mxu1 %v12098_v63  ;;  %v12100_v36 = vcombine.low %v9318_v32, %v9321_v4  ;;  %v9188_v63 = vld [vmem:[#allocation3 + $0xd0] sm:$0xf]  ;;  %v9340_v56 = vrot.slane %v9338_v28, 4  ;;  %v9334_v51 = vrot.slane %v9183_v16, 5  ;;  %v9348_v32 = vrot.slane %v9189_v39, 5 }
 0x5b0   : > { %v16624_v47 = vadd.f32 %v12576_v37, %v16439_v19  ;;  %12837 = vmatprep.mubr.bf16.mxu1 %v12099_v33  ;;  %v12101_v37 = vcombine.low %v9325_v57, %v9328_v3  ;;  %v9181_v33 = vld [vmem:[#allocation3 + $0xb4] sm:$0xe]  ;;  %v9345_v62 = vrot.slane %v9188_v63, 5 }
 0x5b1   : > { %v12086_v5 = vrot.slane %v9181_v33, 9 }
 0x5b2   : > { %v12577_v61 = vpop.f32.mrb[196].mxu1 }
 0x5b3   : > { %v12578_v55 = vpop.f32.mrb[197].mxu1  ;;  %v9332_v4 = vsel %vm14154_vm14, %v12086_v5, %v9331_v8 }
 0x5b4   : > { %v12579_v7 = vadd.f32 %v12578_v55, %v12577_v61  ;;  %v12580_v19 = vpop.f32.mrb[198].mxu1  ;;  %v9335_v61 = vsel %vm14154_vm14, %v9333_v29, %v9334_v51  ;;  %v12087_v55 = vrot.slane %v9184_v31, 9 }
 0x5b5   : > { %v12581_v6 = vpop.f32.mrb[199].mxu1 }
 0x5b6   : > { %v16635_v2 = vadd.f32 %v12579_v7, %v16447_v21  ;;  %v12582_v12 = vadd.f32 %v12581_v6, %v12580_v19  ;;  %v12088_v7 = vrot.slane %v9187_v46, 9  ;;  %v9347_v19 = vrot.slane %v9345_v62, 4 }
 0x5b7   : > { %12838 = vmatmul.mubr.bf16.gmra.mrb[48].mxu1 %v12100_v36  ;;  %v12102_v36 = vcombine.low %v9332_v4, %v9335_v61  ;;  %v9339_v57 = vsel %vm14154_vm14, %v12087_v55, %v9338_v28 }
 0x5b8   : > { %v16638_v42 = vadd.f32 %v12582_v12, %v16450_v22  ;;  %12841 = vmatprep.mubr.bf16.mxu1 %v12101_v37  ;;  %v9342_v22 = vsel %vm14154_vm14, %v9340_v56, %v9341_v11  ;;  %v9346_v37 = vsel %vm14154_vm14, %v12088_v7, %v9345_v62  ;;  %v9349_v33 = vsel %vm14154_vm14, %v9347_v19, %v9348_v32 }
 0x5b9   : > { %v12103_v12 = vcombine.low %v9339_v57, %v9342_v22  ;;  %v12104_v56 = vcombine.low %v9346_v37, %v9349_v33 }
 0x5ba   : > { %v12583_v21 = vpop.f32.mrb[200].mxu1 }
 0x5bb   : > { %v12584_v20 = vpop.f32.mrb[201].mxu1 }
 0x5bc   : > { %v12585_v30 = vadd.f32 %v12584_v20, %v12583_v21  ;;  %v12586_v3 = vpop.f32.mrb[202].mxu1 }
 0x5bd   : > { %v12587_v6 = vpop.f32.mrb[203].mxu1 }
 0x5be   : > { %v16649_v16 = vadd.f32 %v12585_v30, %v16457_v1  ;;  %v12588_v63 = vadd.f32 %v12587_v6, %v12586_v3 }
 0x5bf   : > { %12842 = vmatmul.mubr.bf16.gmra.mrb[52].mxu1 %v12102_v36 }
 0x5c0   : > { %v16652_v8 = vadd.f32 %v12588_v63, %v16460_v53  ;;  %12845 = vmatprep.mubr.bf16.mxu1 %v12103_v12 }
 0x5c2   : > { %v12589_v29 = vpop.f32.mrb[204].mxu1 }
 0x5c3   : > { %v12590_v40 = vpop.f32.mrb[205].mxu1 }
 0x5c4   : > { %v12591_v28 = vadd.f32 %v12590_v40, %v12589_v29  ;;  %v12592_v51 = vpop.f32.mrb[206].mxu1 }
 0x5c5   : > { %v12593_v1 = vpop.f32.mrb[207].mxu1 }
 0x5c6   : > { %v16659_v31 = vadd.f32 %v12591_v28, %v16467_v27  ;;  %v12594_v5 = vadd.f32 %v12593_v1, %v12592_v51 }
 0x5c7   : > { %12846 = vmatmul.mubr.bf16.gmra.mrb[56].mxu1 %v12104_v56 }
 0x5c8   : > { %v16662_v53 = vadd.f32 %v12594_v5, %v16470_v44 }
 0x5ca   : > { %v12595_v11 = vpop.f32.mrb[208].mxu1 }
 0x5cb   : > { %v12596_v46 = vpop.f32.mrb[209].mxu1 }
 0x5cc   : > { %v12597_v62 = vadd.f32 %v12596_v46, %v12595_v11  ;;  %v12598_v39 = vpop.f32.mrb[210].mxu1 }
 0x5cd   : > { %v12599_v17 = vpop.f32.mrb[211].mxu1 }
 0x5ce   : > { %v16665_v21 = vadd.f32 %v12597_v62, %v16477_v45  ;;  %v12600_v61 = vadd.f32 %v12599_v17, %v12598_v39 }
 0x5d0   : > { %v16668_v20 = vadd.f32 %v12600_v61, %v16480_v0 }
 0x5d2   : > { %v12601_v4 = vpop.f32.mrb[212].mxu1 }
 0x5d3   : > { %v12602_v27 = vpop.f32.mrb[213].mxu1 }
 0x5d4   : > { %v12603_v55 = vadd.f32 %v12602_v27, %v12601_v4  ;;  %v12604_v22 = vpop.f32.mrb[214].mxu1 }
 0x5d5   : > { %v12605_v30 = vpop.f32.mrb[215].mxu1 }
 0x5d6   : > { %v16671_v44 = vadd.f32 %v12603_v55, %v16487_v35  ;;  %v12606_v3 = vadd.f32 %v12605_v30, %v12604_v22 }
 0x5d8   : > { %v16674_v7 = vadd.f32 %v12606_v3, %v16490_v24 }
 0x5da   : > { %v12607_v19 = vpop.f32.mrb[216].mxu1 }
 0x5db   : > { %v12608_v32 = vpop.f32.mrb[217].mxu1 }
 0x5dc   : > { %v12609_v45 = vadd.f32 %v12608_v32, %v12607_v19  ;;  %v12610_v6 = vpop.f32.mrb[218].mxu1 }
 0x5dd   : > { %v12611_v36 = vpop.f32.mrb[219].mxu1 }
 0x5de   : > { %v16677_v0 = vadd.f32 %v12609_v45, %v16497_v48  ;;  %v12612_v57 = vadd.f32 %v12611_v36, %v12610_v6 }
 0x5e0   : > { %v16680_v63 = vadd.f32 %v12612_v57, %v16502_v43 }
 0x5e2   : > { %v12629_v12 = vpop.f32.mrb[220].mxu1 }
 0x5e3   : > { %v12630_v37 = vpop.f32.mrb[221].mxu1 }
 0x5e4   : > { %v12631_v35 = vadd.f32 %v12630_v37, %v12629_v12  ;;  %v12632_v33 = vpop.f32.mrb[222].mxu1 }
 0x5e5   : > { %v12633_v29 = vpop.f32.mrb[223].mxu1 }
 0x5e6   : > { %v12634_v40 = vadd.f32 %v12633_v29, %v12632_v33  ;;  %v16683_v5 = vadd.f32 %v12631_v35, %v16510_v58 }
 0x5e8   : > { %v16689_v43 = vadd.f32 %v12634_v40, %v16513_v34 }
 0x5ea   : > { %v12635_v24 = vpop.f32.mrb[224].mxu1 }
 0x5eb   : > { %v12636_v56 = vpop.f32.mrb[225].mxu1 }
 0x5ec   : > { %v12637_v28 = vadd.f32 %v12636_v56, %v12635_v24  ;;  %v12638_v51 = vpop.f32.mrb[226].mxu1 }
 0x5ed   : > { %v12639_v1 = vpop.f32.mrb[227].mxu1 }
 0x5ee   : > { %v12640_v48 = vadd.f32 %v12639_v1, %v12638_v51  ;;  %v16686_v11 = vadd.f32 %v12637_v28, %v16521_v13 }
 0x5f0   : > { %v16692_v46 = vadd.f32 %v12640_v48, %v16524_v54 }
 0x5f2   : > { %v12641_v62 = vpop.f32.mrb[228].mxu1 }
 0x5f3   : > { %v12642_v39 = vpop.f32.mrb[229].mxu1 }
 0x5f4   : > { %v12643_v17 = vadd.f32 %v12642_v39, %v12641_v62  ;;  %v12644_v61 = vpop.f32.mrb[230].mxu1 }
 0x5f5   : > { %v12645_v4 = vpop.f32.mrb[231].mxu1 }
 0x5f6   : > { %v12646_v27 = vadd.f32 %v12645_v4, %v12644_v61  ;;  %v16695_v55 = vadd.f32 %v12643_v17, %v16531_v15 }
 0x5f8   : > { %v16698_v58 = vadd.f32 %v12646_v27, %v16534_v60 }
 0x5fa   : > { %v12647_v13 = vpop.f32.mrb[232].mxu1 }
 0x5fb   : > { %v12648_v22 = vpop.f32.mrb[233].mxu1 }
 0x5fc   : > { %v12649_v30 = vadd.f32 %v12648_v22, %v12647_v13  ;;  %v12650_v34 = vpop.f32.mrb[234].mxu1 }
 0x5fd   : > { %v12651_v3 = vpop.f32.mrb[235].mxu1 }
 0x5fe   : > { %v12652_v19 = vadd.f32 %v12651_v3, %v12650_v34  ;;  %v16701_v54 = vadd.f32 %v12649_v30, %v16541_v23 }
 0x600   : > { %v16704_v32 = vadd.f32 %v12652_v19, %v16544_v59 }
 0x602   : > { %v12653_v45 = vpop.f32.mrb[236].mxu1 }
 0x603   : > { %v12654_v6 = vpop.f32.mrb[237].mxu1 }
 0x604   : > { %v12655_v36 = vadd.f32 %v12654_v6, %v12653_v45  ;;  %v12656_v15 = vpop.f32.mrb[238].mxu1 }
 0x605   : > { %v12657_v57 = vpop.f32.mrb[239].mxu1 }
 0x606   : > { %v12658_v12 = vadd.f32 %v12657_v57, %v12656_v15  ;;  %v16707_v60 = vadd.f32 %v12655_v36, %v16551_v50 }
 0x608   : > { %v16710_v37 = vadd.f32 %v12658_v12, %v16554_v10 }
 0x60a   : > { %v12659_v35 = vpop.f32.mrb[240].mxu1 }
 0x60b   : > { %v12660_v33 = vpop.f32.mrb[241].mxu1 }
 0x60c   : > { %v12661_v29 = vadd.f32 %v12660_v33, %v12659_v35  ;;  %v12662_v23 = vpop.f32.mrb[242].mxu1 }
 0x60d   : > { %v12663_v40 = vpop.f32.mrb[243].mxu1 }
 0x60e   : > { %v12664_v24 = vadd.f32 %v12663_v40, %v12662_v23  ;;  %v16713_v59 = vadd.f32 %v12661_v29, %v16565_v14 }
 0x610   : > { %v16716_v56 = vadd.f32 %v12664_v24, %v16568_v49 }
 0x612   : > { %v12665_v28 = vpop.f32.mrb[244].mxu1 }
 0x613   : > { %v12666_v51 = vpop.f32.mrb[245].mxu1 }
 0x614   : > { %v12667_v1 = vadd.f32 %v12666_v51, %v12665_v28  ;;  %v12668_v50 = vpop.f32.mrb[246].mxu1 }
 0x615   : > { %v12669_v48 = vpop.f32.mrb[247].mxu1 }
 0x616   : > { %v12670_v62 = vadd.f32 %v12669_v48, %v12668_v50  ;;  %v16719_v10 = vadd.f32 %v12667_v1, %v16579_v41 }
 0x618   : > { %v16722_v39 = vadd.f32 %v12670_v62, %v16582_v26 }
 0x61a   : > { %v12671_v17 = vpop.f32.mrb[248].mxu1 }
 0x61b   : > { %v12672_v61 = vpop.f32.mrb[249].mxu1 }
 0x61c   : > { %v12673_v4 = vadd.f32 %v12672_v61, %v12671_v17  ;;  %v12674_v14 = vpop.f32.mrb[250].mxu1 }
 0x61d   : > { %v12675_v27 = vpop.f32.mrb[251].mxu1 }
 0x61e   : > { %v12676_v13 = vadd.f32 %v12675_v27, %v12674_v14  ;;  %v16725_v49 = vadd.f32 %v12673_v4, %v16593_v52 }
 0x620   : > { %v16728_v22 = vadd.f32 %v12676_v13, %v16596_v38 }
 0x622   : > { %v12677_v30 = vpop.f32.mrb[252].mxu1 }
 0x623   : > { %v12678_v34 = vpop.f32.mrb[253].mxu1 }
 0x624   : > { %v12679_v3 = vadd.f32 %v12678_v34, %v12677_v30  ;;  %v12680_v41 = vpop.f32.mrb[254].mxu1 }
 0x625   : > { %v12681_v19 = vpop.f32.mrb[255].mxu1 }
 0x626   : > { %v12682_v45 = vadd.f32 %v12681_v19, %v12680_v41  ;;  %v16731_v26 = vadd.f32 %v12679_v3, %v16607_v9 }
 0x628   : > { %v16734_v6 = vadd.f32 %v12682_v45, %v16610_v18 }
 0x62a   : > { %v12683_v36 = vpop.f32.mrb[0].mxu1 }
 0x62b   : > { %v12684_v15 = vpop.f32.mrb[1].mxu1 }
 0x62c   : > { %v12685_v57 = vadd.f32 %v12684_v15, %v12683_v36  ;;  %v12686_v52 = vpop.f32.mrb[2].mxu1 }
 0x62d   : > { %v12687_v12 = vpop.f32.mrb[3].mxu1 }
 0x62e   : > { %v12688_v35 = vadd.f32 %v12687_v12, %v12686_v52  ;;  %v16737_v38 = vadd.f32 %v12685_v57, %v16621_v25 }
 0x630   : > { %v16740_v33 = vadd.f32 %v12688_v35, %v16624_v47 }
 0x632   : > { %v12689_v29 = vpop.f32.mrb[4].mxu1 }
 0x633   : > { %v12690_v23 = vpop.f32.mrb[5].mxu1 }
 0x634   : > { %v12691_v40 = vadd.f32 %v12690_v23, %v12689_v29  ;;  %v12692_v9 = vpop.f32.mrb[6].mxu1 }
 0x635   : > { %v12693_v24 = vpop.f32.mrb[7].mxu1 }
 0x636   : > { %v12694_v28 = vadd.f32 %v12693_v24, %v12692_v9  ;;  %v16743_v18 = vadd.f32 %v12691_v40, %v16635_v2 }
 0x638   : > { %v16746_v51 = vadd.f32 %v12694_v28, %v16638_v42 }
 0x63a   : > { %v12695_v1 = vpop.f32.mrb[8].mxu1 }
 0x63b   : > { %v12696_v50 = vpop.f32.mrb[9].mxu1 }
 0x63c   : > { %v12697_v48 = vadd.f32 %v12696_v50, %v12695_v1  ;;  %v12698_v25 = vpop.f32.mrb[10].mxu1 }
 0x63d   : > { %v12699_v62 = vpop.f32.mrb[11].mxu1 }
 0x63e   : > { %v12700_v17 = vadd.f32 %v12699_v62, %v12698_v25  ;;  %v16749_v47 = vadd.f32 %v12697_v48, %v16649_v16  ;;  %v16787_v62 = vld [vmem:[%s16967_s3 + $0x3] ss:$0 sm:$0xff] }
 0x640   : > { %v16752_v61 = vadd.f32 %v12700_v17, %v16652_v8 }
 0x642   : > { %v12701_v4 = vpop.f32.mrb[12].mxu1 }
 0x643   : > { %v12702_v14 = vpop.f32.mrb[13].mxu1 }
 0x644   : > { %v12703_v27 = vadd.f32 %v12702_v14, %v12701_v4  ;;  %v12704_v2 = vpop.f32.mrb[14].mxu1 }
 0x645   : > { %v12705_v13 = vpop.f32.mrb[15].mxu1 }
 0x646   : > { %v12706_v30 = vadd.f32 %v12705_v13, %v12704_v2  ;;  %v16755_v42 = vadd.f32 %v12703_v27, %v16659_v31  ;;  %v10959_v27 = vld [vmem:[%s13492_s8 + $0x10] sm:$0xff] }
 0x648   : > { %v16758_v34 = vadd.f32 %v12706_v30, %v16662_v53  ;;  %v10957_v30 = vld [vmem:[%s13492_s8] sm:$0xff] }
 0x64a   : > { %v12707_v3 = vpop.f32.mrb[16].mxu1 }
 0x64b   : > { %v12708_v41 = vpop.f32.mrb[17].mxu1 }
 0x64c   : > { %v12709_v19 = vadd.f32 %v12708_v41, %v12707_v3  ;;  %v12710_v16 = vpop.f32.mrb[18].mxu1  ;;  %v10960_v41 = vld [vmem:[%s13492_s8 + $0x18] sm:$0xff] }
 0x64d   : > { %v12711_v45 = vpop.f32.mrb[19].mxu1 }
 0x64e   : > { %v12712_v36 = vadd.f32 %v12711_v45, %v12710_v16  ;;  %v16761_v8 = vadd.f32 %v12709_v19, %v16665_v21 }
 0x650   : > { %v16764_v15 = vadd.f32 %v12712_v36, %v16668_v20 }
 0x652   : > { %v12713_v57 = vpop.f32.mrb[20].mxu1 }
 0x653   : > { %v12714_v52 = vpop.f32.mrb[21].mxu1 }
 0x654   : > { %v12715_v12 = vadd.f32 %v12714_v52, %v12713_v57  ;;  %v12716_v31 = vpop.f32.mrb[22].mxu1 }
 0x655   : > { %v12717_v35 = vpop.f32.mrb[23].mxu1 }
 0x656   : > { %v12718_v29 = vadd.f32 %v12717_v35, %v12716_v31  ;;  %v16767_v53 = vadd.f32 %v12715_v12, %v16671_v44  ;;  %v16781_v44 = vld [vmem:[%s16967_s3 + $0x2] ss:$0 sm:$0xff] }
 0x658   : > { %v16770_v23 = vadd.f32 %v12718_v29, %v16674_v7 }
 0x65a   : > { %v12719_v40 = vpop.f32.mrb[24].mxu1 }
 0x65b   : > { %v12720_v9 = vpop.f32.mrb[25].mxu1 }
 0x65c   : > { %v12721_v24 = vadd.f32 %v12720_v9, %v12719_v40  ;;  %v12722_v21 = vpop.f32.mrb[26].mxu1 }
 0x65d   : > { %v12723_v28 = vpop.f32.mrb[27].mxu1 }
 0x65e   : > { %v12724_v20 = vadd.f32 %v12723_v28, %v12722_v21  ;;  %v16773_v1 = vadd.f32 %v12721_v24, %v16677_v0 }
 0x660   : > { %v16776_v50 = vadd.f32 %v12724_v20, %v16680_v63 }
 0x662   : > { %v12819_v48 = vpop.f32.mrb[28].mxu1 }
 0x663   : > { %v10837_v7 = vadd.f32 %v12819_v48, %v16686_v11  ;;  %v10828_v25 = vpop.f32.mrb[29].mxu1 }
 0x664   : > { %v10829_v0 = vadd.f32 %v10828_v25, %v16683_v5  ;;  %v12820_v63 = vpop.f32.mrb[30].mxu1 }
 0x665   : > { %v10996_v17 = vmul.f32 %v16781_v44, %v10837_v7  ;;  %v10840_v4 = vadd.f32 %v12820_v63, %v16692_v46  ;;  %v10831_v14 = vpop.f32.mrb[31].mxu1  ;;  %v10958_v46 = vld [vmem:[%s13492_s8 + $0x8] sm:$0xff]  ;;  %v10963_v7 = vld [vmem:[%s13492_s8 + $0x30] sm:$0xff]  ;;  %v10961_v63 = vld [vmem:[%s13492_s8 + $0x20] sm:$0xff] }
 0x666   : > { %v10994_v2 = vmul.f32 %v16781_v44, %v10829_v0  ;;  %v10832_v11 = vadd.f32 %v10831_v14, %v16689_v43  ;;  %v10964_v14 = vld [vmem:[%s13492_s8 + $0x38] sm:$0xff] }
 0x667   : > { %v11033_v13 = vadd.f32 %v16787_v62, %v10996_v17  ;;  %v10997_v3 = vmul.f32 %v16781_v44, %v10840_v4 }
 0x668   : > { %v11031_v5 = vadd.f32 %v16787_v62, %v10994_v2  ;;  %v10995_v19 = vmul.f32 %v16781_v44, %v10832_v11  ;;  %v10962_v11 = vld [vmem:[%s13492_s8 + $0x28] sm:$0xff] }
 0x669   : > { %v11065_v16 = vadd.f32 %v11033_v13, %v10959_v27  ;;  %v11034_v45 = vadd.f32 %v16787_v62, %v10997_v3 }
 0x66a   : > { %v11063_v43 = vadd.f32 %v11031_v5, %v10957_v30  ;;  %v11032_v36 = vadd.f32 %v16787_v62, %v10995_v19  ;;  %v12823_v57 = vpop.f32.mrb[32].mxu1 }
 0x66b   : > { %v11097_v52 = vmax.f32 %v11065_v16, 0.0  ;;  %v11066_v12 = vadd.f32 %v11034_v45, %v10960_v41  ;;  %v10853_v31 = vadd.f32 %v12823_v57, %v16701_v54  ;;  %v10844_v35 = vpop.f32.mrb[33].mxu1 }
 0x66c   : > { %v11095_v29 = vmax.f32 %v11063_v43, 0.0  ;;  %v11064_v40 = vadd.f32 %v11032_v36, %v10958_v46  ;;  %v10845_v9 = vadd.f32 %v10844_v35, %v16695_v55  ;;  %v12824_v24 = vpop.f32.mrb[34].mxu1 }
 0x66d   : > { %11129 = vst [vmem:[%s16808_s19 + $0x10] sm:$0xff] %v11097_v52  ;;  %v11098_v21 = vmax.f32 %v11066_v12, 0.0  ;;  %v11000_v28 = vmul.f32 %v16781_v44, %v10853_v31  ;;  %v10856_v20 = vadd.f32 %v12824_v24, %v16704_v32  ;;  %v10847_v48 = vpop.f32.mrb[35].mxu1  ;;  %v10967_v31 = vld [vmem:[%s13492_s8 + $0x50] sm:$0xff] }
 0x66e   : > { %11127 = vst [vmem:[%s16808_s19] sm:$0xff] %v11095_v29  ;;  %v11096_v54 = vmax.f32 %v11064_v40, 0.0  ;;  %v10998_v25 = vmul.f32 %v16781_v44, %v10845_v9  ;;  %v10848_v0 = vadd.f32 %v10847_v48, %v16698_v58  ;;  %v10965_v40 = vld [vmem:[%s13492_s8 + $0x40] sm:$0xff]  ;;  %v10966_v48 = vld [vmem:[%s13492_s8 + $0x48] sm:$0xff] }
 0x66f   : > { %11130 = vst [vmem:[%s16808_s19 + $0x18] sm:$0xff] %v11098_v21  ;;  %v11037_v55 = vadd.f32 %v16787_v62, %v11000_v28  ;;  %v11001_v17 = vmul.f32 %v16781_v44, %v10856_v20  ;;  %v10968_v21 = vld [vmem:[%s13492_s8 + $0x58] sm:$0xff] }
 0x670   : > { %11128 = vst [vmem:[%s16808_s19 + $0x8] sm:$0xff] %v11096_v54  ;;  %v11035_v4 = vadd.f32 %v16787_v62, %v10998_v25  ;;  %v10999_v32 = vmul.f32 %v16781_v44, %v10848_v0 }
 0x671   : > { %v11069_v27 = vadd.f32 %v11037_v55, %v10963_v7  ;;  %v11038_v2 = vadd.f32 %v16787_v62, %v11001_v17 }
 0x672   : > { %v11067_v13 = vadd.f32 %v11035_v4, %v10961_v63  ;;  %v11036_v58 = vadd.f32 %v16787_v62, %v10999_v32  ;;  %v12827_v30 = vpop.f32.mrb[36].mxu1 }
 0x673   : > { %v11101_v3 = vmax.f32 %v11069_v27, 0.0  ;;  %v11070_v5 = vadd.f32 %v11038_v2, %v10964_v14  ;;  %v10869_v41 = vadd.f32 %v12827_v30, %v16713_v59  ;;  %v10860_v19 = vpop.f32.mrb[37].mxu1 }
 0x674   : > { %v11099_v16 = vmax.f32 %v11067_v13, 0.0  ;;  %v11068_v45 = vadd.f32 %v11036_v58, %v10962_v11  ;;  %v10861_v46 = vadd.f32 %v10860_v19, %v16707_v60  ;;  %v12828_v43 = vpop.f32.mrb[38].mxu1  ;;  %v10971_v58 = vld [vmem:[%s13492_s8 + $0x70] sm:$0xff] }
 0x675   : > { %11133 = vst [vmem:[%s16808_s19 + $0x30] sm:$0xff] %v11101_v3  ;;  %v11102_v36 = vmax.f32 %v11070_v5, 0.0  ;;  %v11004_v57 = vmul.f32 %v16781_v44, %v10869_v41  ;;  %v10872_v52 = vadd.f32 %v12828_v43, %v16716_v56  ;;  %v10863_v12 = vpop.f32.mrb[39].mxu1  ;;  %v10969_v5 = vld [vmem:[%s13492_s8 + $0x60] sm:$0xff]  ;;  %v10970_v43 = vld [vmem:[%s13492_s8 + $0x68] sm:$0xff] }
 0x676   : > { %11131 = vst [vmem:[%s16808_s19 + $0x20] sm:$0xff] %v11099_v16  ;;  %v11100_v59 = vmax.f32 %v11068_v45, 0.0  ;;  %v11002_v35 = vmul.f32 %v16781_v44, %v10861_v46  ;;  %v10864_v29 = vadd.f32 %v10863_v12, %v16710_v37  ;;  %v10972_v16 = vld [vmem:[%s13492_s8 + $0x78] sm:$0xff] }
 0x677   : > { %11134 = vst [vmem:[%s16808_s19 + $0x38] sm:$0xff] %v11102_v36  ;;  %v11041_v60 = vadd.f32 %v16787_v62, %v11004_v57  ;;  %v11005_v9 = vmul.f32 %v16781_v44, %v10872_v52 }
 0x678   : > { %11132 = vst [vmem:[%s16808_s19 + $0x28] sm:$0xff] %v11100_v59  ;;  %v11039_v24 = vadd.f32 %v16787_v62, %v11002_v35  ;;  %v11003_v56 = vmul.f32 %v16781_v44, %v10864_v29 }
 0x679   : > { %v11073_v28 = vadd.f32 %v11041_v60, %v10967_v31  ;;  %v11042_v20 = vadd.f32 %v16787_v62, %v11005_v9 }
 0x67a   : > { %v11071_v54 = vadd.f32 %v11039_v24, %v10965_v40  ;;  %v11040_v37 = vadd.f32 %v16787_v62, %v11003_v56  ;;  %v12831_v7 = vpop.f32.mrb[40].mxu1 }
 0x67b   : > { %v11105_v25 = vmax.f32 %v11073_v28, 0.0  ;;  %v11074_v0 = vadd.f32 %v11042_v20, %v10968_v21  ;;  %v10885_v55 = vadd.f32 %v12831_v7, %v16725_v49  ;;  %v10876_v63 = vpop.f32.mrb[41].mxu1  ;;  %v10975_v28 = vld [vmem:[%s13492_s8 + $0x90] sm:$0xff] }
 0x67c   : > { %v11103_v17 = vmax.f32 %v11071_v54, 0.0  ;;  %v11072_v4 = vadd.f32 %v11040_v37, %v10966_v48  ;;  %v10877_v14 = vadd.f32 %v10876_v63, %v16719_v10  ;;  %v12832_v32 = vpop.f32.mrb[42].mxu1  ;;  %v10973_v54 = vld [vmem:[%s13492_s8 + $0x80] sm:$0xff]  ;;  %v10974_v63 = vld [vmem:[%s13492_s8 + $0x88] sm:$0xff] }
 0x67d   : > { %11137 = vst [vmem:[%s16808_s19 + $0x50] sm:$0xff] %v11105_v25  ;;  %v11106_v27 = vmax.f32 %v11074_v0, 0.0  ;;  %v11008_v2 = vmul.f32 %v16781_v44, %v10885_v55  ;;  %v10888_v11 = vadd.f32 %v12832_v32, %v16728_v22  ;;  %v10879_v13 = vpop.f32.mrb[43].mxu1  ;;  %v10976_v25 = vld [vmem:[%s13492_s8 + $0x98] sm:$0xff] }
 0x67e   : > { %11135 = vst [vmem:[%s16808_s19 + $0x40] sm:$0xff] %v11103_v17  ;;  %v11104_v49 = vmax.f32 %v11072_v4, 0.0  ;;  %v11006_v30 = vmul.f32 %v16781_v44, %v10877_v14  ;;  %v10880_v3 = vadd.f32 %v10879_v13, %v16722_v39 }
 0x67f   : > { %11138 = vst [vmem:[%s16808_s19 + $0x58] sm:$0xff] %v11106_v27  ;;  %v11045_v10 = vadd.f32 %v16787_v62, %v11008_v2  ;;  %v11009_v41 = vmul.f32 %v16781_v44, %v10888_v11 }
 0x680   : > { %11136 = vst [vmem:[%s16808_s19 + $0x48] sm:$0xff] %v11104_v49  ;;  %v11043_v19 = vadd.f32 %v16787_v62, %v11006_v30  ;;  %v11007_v22 = vmul.f32 %v16781_v44, %v10880_v3 }
 0x681   : > { %v11077_v45 = vadd.f32 %v11045_v10, %v10971_v58  ;;  %v11046_v46 = vadd.f32 %v16787_v62, %v11009_v41  ;;  %v10979_v41 = vld [vmem:[%s13492_s8 + $0xb0] sm:$0xff] }
 0x682   : > { %v11075_v36 = vadd.f32 %v11043_v19, %v10969_v5  ;;  %v11044_v39 = vadd.f32 %v16787_v62, %v11007_v22  ;;  %v12835_v57 = vpop.f32.mrb[44].mxu1  ;;  %v10977_v22 = vld [vmem:[%s13492_s8 + $0xa0] sm:$0xff] }
 0x683   : > { %v11109_v52 = vmax.f32 %v11077_v45, 0.0  ;;  %v11078_v12 = vadd.f32 %v11046_v46, %v10972_v16  ;;  %v10901_v59 = vadd.f32 %v12835_v57, %v16737_v38  ;;  %v10892_v31 = vpop.f32.mrb[45].mxu1  ;;  %v10978_v57 = vld [vmem:[%s13492_s8 + $0xa8] sm:$0xff] }
 0x684   : > { %v11107_v35 = vmax.f32 %v11075_v36, 0.0  ;;  %v11076_v29 = vadd.f32 %v11044_v39, %v10970_v43  ;;  %v10893_v60 = vadd.f32 %v10892_v31, %v16731_v26  ;;  %v12836_v40 = vpop.f32.mrb[46].mxu1  ;;  %v10980_v43 = vld [vmem:[%s13492_s8 + $0xb8] sm:$0xff] }
 0x685   : > { %11141 = vst [vmem:[%s16808_s19 + $0x70] sm:$0xff] %v11109_v52  ;;  %v11110_v9 = vmax.f32 %v11078_v12, 0.0  ;;  %v11012_v24 = vmul.f32 %v16781_v44, %v10901_v59  ;;  %v10904_v21 = vadd.f32 %v12836_v40, %v16740_v33  ;;  %v10895_v56 = vpop.f32.mrb[47].mxu1 }
 0x686   : > { %11139 = vst [vmem:[%s16808_s19 + $0x60] sm:$0xff] %v11107_v35  ;;  %v11108_v38 = vmax.f32 %v11076_v29, 0.0  ;;  %v11010_v20 = vmul.f32 %v16781_v44, %v10893_v60  ;;  %v10896_v48 = vadd.f32 %v10895_v56, %v16734_v6 }
 0x687   : > { %11142 = vst [vmem:[%s16808_s19 + $0x78] sm:$0xff] %v11110_v9  ;;  %v11049_v26 = vadd.f32 %v16787_v62, %v11012_v24  ;;  %v11013_v37 = vmul.f32 %v16781_v44, %v10904_v21 }
 0x688   : > { %11140 = vst [vmem:[%s16808_s19 + $0x68] sm:$0xff] %v11108_v38  ;;  %v11047_v7 = vadd.f32 %v16787_v62, %v11010_v20  ;;  %v11011_v33 = vmul.f32 %v16781_v44, %v10896_v48  ;;  %v10983_v20 = vld [vmem:[%s13492_s8 + $0xd0] sm:$0xff] }
 0x689   : > { %v11081_v0 = vadd.f32 %v11049_v26, %v10975_v28  ;;  %v11050_v55 = vadd.f32 %v16787_v62, %v11013_v37 }
 0x68a   : > { %v11079_v17 = vadd.f32 %v11047_v7, %v10973_v54  ;;  %v11048_v6 = vadd.f32 %v16787_v62, %v11011_v33  ;;  %v12839_v4 = vpop.f32.mrb[48].mxu1  ;;  %v10981_v54 = vld [vmem:[%s13492_s8 + $0xc0] sm:$0xff] }
 0x68b   : > { %v11113_v14 = vmax.f32 %v11081_v0, 0.0  ;;  %v11082_v32 = vadd.f32 %v11050_v55, %v10976_v25  ;;  %v10917_v27 = vadd.f32 %v12839_v4, %v16749_v47  ;;  %v10908_v2 = vpop.f32.mrb[49].mxu1  ;;  %v10984_v25 = vld [vmem:[%s13492_s8 + $0xd8] sm:$0xff]  ;;  %v10982_v55 = vld [vmem:[%s13492_s8 + $0xc8] sm:$0xff] }
 0x68c   : > { %v11111_v11 = vmax.f32 %v11079_v17, 0.0  ;;  %v11080_v13 = vadd.f32 %v11048_v6, %v10974_v63  ;;  %v10909_v49 = vadd.f32 %v10908_v2, %v16743_v18  ;;  %v12840_v58 = vpop.f32.mrb[50].mxu1 }
 0x68d   : > { %11145 = vst [vmem:[%s16808_s19 + $0x90] sm:$0xff] %v11113_v14  ;;  %v11114_v30 = vmax.f32 %v11082_v32, 0.0  ;;  %v11016_v3 = vmul.f32 %v16781_v44, %v10917_v27  ;;  %v10920_v10 = vadd.f32 %v12840_v58, %v16752_v61  ;;  %v10911_v5 = vpop.f32.mrb[51].mxu1 }
 0x68e   : > { %11143 = vst [vmem:[%s16808_s19 + $0x80] sm:$0xff] %v11111_v11  ;;  %v11112_v47 = vmax.f32 %v11080_v13, 0.0  ;;  %v11014_v19 = vmul.f32 %v16781_v44, %v10909_v49  ;;  %v10912_v16 = vadd.f32 %v10911_v5, %v16746_v51 }
 0x68f   : > { %11146 = vst [vmem:[%s16808_s19 + $0x98] sm:$0xff] %v11114_v30  ;;  %v11053_v18 = vadd.f32 %v16787_v62, %v11016_v3  ;;  %v11017_v45 = vmul.f32 %v16781_v44, %v10920_v10  ;;  %v10987_v10 = vld [vmem:[%s13492_s8 + $0xf0] sm:$0xff] }
 0x690   : > { %11144 = vst [vmem:[%s16808_s19 + $0x88] sm:$0xff] %v11112_v47  ;;  %v11051_v46 = vadd.f32 %v16787_v62, %v11014_v19  ;;  %v11015_v61 = vmul.f32 %v16781_v44, %v10912_v16  ;;  %v10988_v16 = vld [vmem:[%s13492_s8 + $0xf8] sm:$0xff] }
 0x691   : > { %v11085_v36 = vadd.f32 %v11053_v18, %v10979_v41  ;;  %v11054_v39 = vadd.f32 %v16787_v62, %v11017_v45  ;;  %v10985_v41 = vld [vmem:[%s13492_s8 + $0xe0] sm:$0xff] }
 0x692   : > { %v11083_v52 = vadd.f32 %v11051_v46, %v10977_v22  ;;  %v11052_v51 = vadd.f32 %v16787_v62, %v11015_v61  ;;  %v12843_v12 = vpop.f32.mrb[52].mxu1 }
 0x693   : > { %v11117_v59 = vmax.f32 %v11085_v36, 0.0  ;;  %v11086_v31 = vadd.f32 %v11054_v39, %v10980_v43  ;;  %v10933_v35 = vadd.f32 %v12843_v12, %v16761_v8  ;;  %v10924_v29 = vpop.f32.mrb[53].mxu1 }
 0x694   : > { %v11115_v60 = vmax.f32 %v11083_v52, 0.0  ;;  %v11084_v40 = vadd.f32 %v11052_v51, %v10978_v57  ;;  %v10925_v9 = vadd.f32 %v10924_v29, %v16755_v42  ;;  %v12844_v24 = vpop.f32.mrb[54].mxu1 }
 0x695   : > { %11149 = vst [vmem:[%s16808_s19 + $0xb0] sm:$0xff] %v11117_v59  ;;  %v11118_v21 = vmax.f32 %v11086_v31, 0.0  ;;  %v11020_v56 = vmul.f32 %v16781_v44, %v10933_v35  ;;  %v10936_v38 = vadd.f32 %v12844_v24, %v16764_v15  ;;  %v10927_v28 = vpop.f32.mrb[55].mxu1 }
 0x696   : > { %11147 = vst [vmem:[%s16808_s19 + $0xa0] sm:$0xff] %v11115_v60  ;;  %v11116_v8 = vmax.f32 %v11084_v40, 0.0  ;;  %v11018_v48 = vmul.f32 %v16781_v44, %v10925_v9  ;;  %v10928_v26 = vadd.f32 %v10927_v28, %v16758_v34 }
 0x697   : > { %11150 = vst [vmem:[%s16808_s19 + $0xb8] sm:$0xff] %v11118_v21  ;;  %v11057_v42 = vadd.f32 %v16787_v62, %v11020_v56  ;;  %v11021_v37 = vmul.f32 %v16781_v44, %v10936_v38 }
 0x698   : > { %11148 = vst [vmem:[%s16808_s19 + $0xa8] sm:$0xff] %v11116_v8  ;;  %v11055_v7 = vadd.f32 %v16787_v62, %v11018_v48  ;;  %v11019_v15 = vmul.f32 %v16781_v44, %v10928_v26 }
 0x699   : > { %v11089_v33 = vadd.f32 %v11057_v42, %v10983_v20  ;;  %v11058_v0 = vadd.f32 %v16787_v62, %v11021_v37 }
 0x69a   : > { %v11087_v63 = vadd.f32 %v11055_v7, %v10981_v54  ;;  %v11056_v34 = vadd.f32 %v16787_v62, %v11019_v15  ;;  %v12847_v17 = vpop.f32.mrb[56].mxu1 }
 0x69b   : > { %v11121_v6 = vmax.f32 %v11089_v33, 0.0  ;;  %v11090_v4 = vadd.f32 %v11058_v0, %v10984_v25  ;;  %v10949_v14 = vadd.f32 %v12847_v17, %v16773_v1  ;;  %v10940_v32 = vpop.f32.mrb[57].mxu1 }
 0x69c   : > { %v11119_v27 = vmax.f32 %v11087_v63, 0.0  ;;  %v11088_v2 = vadd.f32 %v11056_v34, %v10982_v55  ;;  %v10941_v11 = vadd.f32 %v10940_v32, %v16767_v53  ;;  %v12848_v13 = vpop.f32.mrb[58].mxu1 }
 0x69d   : > { %11153 = vst [vmem:[%s16808_s19 + $0xd0] sm:$0xff] %v11121_v6  ;;  %v11122_v49 = vmax.f32 %v11090_v4, 0.0  ;;  %v11024_v58 = vmul.f32 %v16781_v44, %v10949_v14  ;;  %v10952_v30 = vadd.f32 %v12848_v13, %v16776_v50  ;;  %v10943_v3 = vpop.f32.mrb[59].mxu1 }
 0x69e   : > { %11151 = vst [vmem:[%s16808_s19 + $0xc0] sm:$0xff] %v11119_v27  ;;  %v11120_v1 = vmax.f32 %v11088_v2, 0.0  ;;  %v11022_v5 = vmul.f32 %v16781_v44, %v10941_v11  ;;  %v10944_v47 = vadd.f32 %v10943_v3, %v16770_v23  ;;  %v10986_v23 = vld [vmem:[%s13492_s8 + $0xe8] sm:$0xff] }
 0x69f   : > { %11154 = vst [vmem:[%s16808_s19 + $0xd8] sm:$0xff] %v11122_v49  ;;  %v11061_v53 = vadd.f32 %v16787_v62, %v11024_v58  ;;  %v11025_v19 = vmul.f32 %v16781_v44, %v10952_v30 }
 0x6a0   : > { %11152 = vst [vmem:[%s16808_s19 + $0xc8] sm:$0xff] %v11120_v1  ;;  %v11059_v50 = vadd.f32 %v16787_v62, %v11022_v5  ;;  %v11023_v18 = vmul.f32 %v16781_v44, %v10944_v47 }
 0x6a1   : > { %v11093_v22 = vadd.f32 %v11061_v53, %v10987_v10  ;;  %v11062_v45 = vadd.f32 %v16787_v62, %v11025_v19 }
 0x6a2   : > { %v11091_v46 = vadd.f32 %v11059_v50, %v10985_v41  ;;  %v11060_v43 = vadd.f32 %v16787_v62, %v11023_v18 }
 0x6a3   : > { %v11125_v61 = vmax.f32 %v11093_v22, 0.0  ;;  %v11094_v36 = vadd.f32 %v11062_v45, %v10988_v16 }
 0x6a4   : > { %v11123_v39 = vmax.f32 %v11091_v46, 0.0  ;;  %v11092_v57 = vadd.f32 %v11060_v43, %v10986_v23 }
 0x6a5   : > { %11157 = vst [vmem:[%s16808_s19 + $0xf0] sm:$0xff] %v11125_v61  ;;  %v11126_v52 = vmax.f32 %v11094_v36, 0.0 }
 0x6a6   : > { %11155 = vst [vmem:[%s16808_s19 + $0xe0] sm:$0xff] %v11123_v39  ;;  %v11124_v51 = vmax.f32 %v11092_v57, 0.0 }
 0x6a7   : > { %11158 = vst [vmem:[%s16808_s19 + $0xf8] sm:$0xff] %v11126_v52 }
 0x6a8   : > { %11156 = vst [vmem:[%s16808_s19 + $0xe8] sm:$0xff] %v11124_v51 }
 0x6a9 PF: > { %s14_s17 = sadd.s32 1, %s13384_s17   ;;  %s17008_s15 = smov %s13380_s16 }
 0x6aa   : > { %p11_p5 = scmp.ge.s32.totalorder %s14_s17, 4   ;;  %s17009_s16 = smov %s17011_s18 }
 0x6ac   :  { %13 = sbr.rel (!%p11_p5) target bundleno = 2 (0x2), region = 83 }

</bundles_post_ra>
